<compile_context>
chip_gen: v6e
topology: v6e:2x2x1
jax: 0.10.0
libtpu: 0.0.40
codegen_flags: <defaults>
</compile_context>

<pallas_src>
import functools

import jax
import jax.numpy as jnp
import numpy as np
from jax.experimental import pallas as pl
from jax.experimental.pallas import tpu as pltpu

VGG_MEAN = (0.485, 0.456, 0.406)
VGG_STD = (0.229, 0.224, 0.225)
RGB_RANGE = 1.0
_IM2COL_K = 32  # 3x3x3 = 27 patch channels, padded to 32 lanes


# ----------------------------------------------------------------------------
# Row-tile selection helpers
# ----------------------------------------------------------------------------
def _tile_ok(th, H, W, itemsize, pool):
    """Row-tile th is usable: divides H, even if pooling, blocks tile-aligned."""
    if th <= 0 or H % th or (pool and th % 2):
        return False
    if th == H:                       # whole-image block: always expressible
        return True
    sub = max(8, 32 // itemsize)      # conservative second-minor granularity
    tp = th * W
    if tp % sub or W % sub:           # main block + 1-row halo blocks
        return False
    if pool and (tp // 4) % sub:      # pooled output block
        return False
    return True


def _pick_row_tile(H, W, Cin, Cout, itemsize, pool):
    """Largest valid row tile whose per-tile working set stays ~<= 20 MiB."""
    budget = 20 << 20
    per_row = W * (8 * Cin * itemsize + Cout * (4 + itemsize)
                   + (2 * Cout if pool else 0))
    cand = [d for d in range(H, 0, -1) if _tile_ok(d, H, W, itemsize, pool)]
    for th in cand:
        if th * per_row <= budget:
            return th
    return cand[-1] if cand else H


def _vmem_limit(est_bytes):
    # Honest estimate, floored at the 32 MiB default and capped below v7x's
    # 64 MiB physical VMEM (tiles are picked so this cap is sufficient).
    return int(min(max(est_bytes, 32 << 20), 48 << 20))


# ----------------------------------------------------------------------------
# Kernel 1: grouped 3x3 SAME conv + bias + ReLU (+ optional fused 2x2/2 pool)
# ----------------------------------------------------------------------------
def _conv3x3_kernel(*refs, W, Th, pool, has_halo):
    # refs: x_ref (1,Tp,Cin) [, up_ref (1,W,Cin), dn_ref (1,W,Cin)],
    #       w_ref (3, 3*Cin, Cout), b_ref (1,Cout) f32, o_ref (1,Tpo,Cout)
    #       [, scr (Th/2, W, Cout) f32]
    it = iter(refs)
    x_ref = next(it)
    up_ref = next(it) if has_halo else None
    dn_ref = next(it) if has_halo else None
    w_ref = next(it)
    b_ref = next(it)
    o_ref = next(it)
    scr = next(it) if pool else None

    Tp = Th * W
    Cout = o_ref.shape[-1]
    x = x_ref[0]                                            # (Tp, Cin) compute dtype

    pid = jax.lax.broadcasted_iota(jnp.int32, (Tp, 1), 0)   # tile-local pixel index
    col = pid % W                                           # column within image

    # ---- row-shifted input planes (dy = -1, 0, +1), zeroed outside image ----
    if has_halo:
        t = pl.program_id(1)
        n_t = pl.num_programs(1)
        up_row = up_ref[0]                                  # row above tile
        dn_row = dn_ref[0]                                  # row below tile
        x_up = jnp.concatenate([up_row, x[:Tp - W]], axis=0)  # x_up[p] = img[p - W]
        x_dn = jnp.concatenate([x[W:], dn_row], axis=0)       # x_dn[p] = img[p + W]
        x_up = jnp.where((pid >= W) | (t > 0), x_up, 0)        # image top border
        x_dn = jnp.where((pid < Tp - W) | (t < n_t - 1), x_dn, 0)  # bottom border
    else:
        x_up = jnp.where(pid >= W, pltpu.roll(x, shift=W, axis=0), 0)
        x_dn = jnp.where(pid < Tp - W, pltpu.roll(x, shift=Tp - W, axis=0), 0)

    # ---- per-ky group: concat 3 kx-shifted inputs -> one K=3*Cin MXU matmul --
    def kx_group(xr):
        xl = jnp.where(col >= 1, pltpu.roll(xr, shift=1, axis=0), 0)          # dx=-1
        xr1 = jnp.where(col < W - 1, pltpu.roll(xr, shift=Tp - 1, axis=0), 0)  # dx=+1
        return jnp.concatenate([xl, xr, xr1], axis=1)        # (Tp, 3*Cin), kx order

    acc = jnp.zeros((Tp, Cout), jnp.float32)
    for ky, plane in enumerate((x_up, x, x_dn)):             # ky = 0, 1, 2
        acc = acc + jnp.dot(kx_group(plane), w_ref[ky],
                            preferred_element_type=jnp.float32)

    y = jnp.maximum(acc + b_ref[0], 0.0)                     # bias + ReLU in f32

    if not pool:
        o_ref[0] = y.astype(o_ref.dtype)
    else:
        Hh, Wo = Th // 2, W // 2
        r = y.reshape(Hh, 2, W, Cout)                        # cheap major-dim split
        scr[...] = jnp.maximum(r[:, 0], r[:, 1])             # vertical pair max
        left = scr[:, pl.ds(0, Wo, stride=2), :]             # stride-2 sublane read
        right = scr[:, pl.ds(1, Wo, stride=2), :]
        o_ref[0] = jnp.maximum(left, right).reshape(Hh * Wo, Cout).astype(o_ref.dtype)


def conv3x3_relu(x_flat, w3, b2, *, H, W, pool, out_dtype, row_tile=None):
    """(N, H*W, Cin) -> (N, Ho*Wo, Cout): 3x3 SAME conv + bias + ReLU (+pool)."""
    N, P, Cin = x_flat.shape
    assert P == H * W
    Cout = w3.shape[-1]
    if pool:
        assert H % 2 == 0 and W % 2 == 0
    itm = jnp.dtype(x_flat.dtype).itemsize

    Th = int(row_tile) if row_tile is not None else _pick_row_tile(
        H, W, Cin, Cout, itm, pool)
    Th = max(1, min(Th, H))
    if not _tile_ok(Th, H, W, itm, pool):
        Th = H                                               # safe fallback
    nt = H // Th
    has_halo = nt > 1
    Tp = Th * W
    Ho, Wo = ((H // 2, W // 2) if pool else (H, W))
    Tpo = Tp // 4 if pool else Tp
    Po = Ho * Wo

    in_specs = [pl.BlockSpec((1, Tp, Cin), lambda n, t: (n, t, 0))]
    inputs = [x_flat]
    if has_halo:
        # 1-row halo blocks (block size W along the P axis -> block idx == row).
        in_specs.append(pl.BlockSpec(
            (1, W, Cin), lambda n, t: (n, jnp.maximum(t * Th - 1, 0), 0)))
        in_specs.append(pl.BlockSpec(
            (1, W, Cin), lambda n, t: (n, jnp.minimum(t * Th + Th, H - 1), 0)))
        inputs += [x_flat, x_flat]
    # Weights/bias: constant index_map -> stay VMEM-resident across the grid.
    in_specs += [pl.BlockSpec((3, 3 * Cin, Cout), lambda n, t: (0, 0, 0)),
                 pl.BlockSpec((1, Cout), lambda n, t: (0, 0))]
    inputs += [w3, b2]

    scratch_shapes = ([pltpu.VMEM((Th // 2, W, Cout), jnp.float32)] if pool else [])

    est = (2 * Tp * Cin * itm                                  # input block (x2)
           + (4 * W * Cin * itm if has_halo else 0)            # halo blocks (x2 each)
           + 9 * Cin * Cout * itm + 4 * Cout                   # weights + bias
           + 2 * Tpo * Cout * jnp.dtype(out_dtype).itemsize    # output block (x2)
           + Tp * Cout * 4                                     # f32 accumulator
           + 6 * Tp * Cin * itm                                # shifted planes/concat
           + ((Th // 2) * W * Cout * 4 if pool else 0))        # pool scratch

    return pl.pallas_call(
        functools.partial(_conv3x3_kernel, W=W, Th=Th, pool=pool,
                          has_halo=has_halo),
        out_shape=jax.ShapeDtypeStruct((N, Po, Cout), out_dtype),
        grid=(N, nt),
        in_specs=in_specs,
        out_specs=pl.BlockSpec((1, Tpo, Cout), lambda n, t: (n, t, 0)),
        scratch_shapes=scratch_shapes,
        compiler_params=pltpu.CompilerParams(
            dimension_semantics=("parallel", "parallel"),
            vmem_limit_bytes=_vmem_limit(est)),
    )(*inputs)


# ----------------------------------------------------------------------------
# Kernel 2: im2col matmul + bias + ReLU (conv1_1)
# ----------------------------------------------------------------------------
def _mm_bias_relu_kernel(x_ref, w_ref, b_ref, o_ref):
    y = jnp.dot(x_ref[0], w_ref[...], preferred_element_type=jnp.float32)
    o_ref[0] = jnp.maximum(y + b_ref[0], 0.0).astype(o_ref.dtype)


def matmul_bias_relu(x_flat, w, b2, *, H, W, out_dtype, row_tile=None):
    """(N, H*W, K) @ (K, Cout) + bias, ReLU — used for the im2col'd conv1_1."""
    N, P, K = x_flat.shape
    assert P == H * W
    Cout = w.shape[-1]
    itm = jnp.dtype(x_flat.dtype).itemsize

    Th = int(row_tile) if row_tile is not None else _pick_row_tile(
        H, W, K, Cout, itm, False)
    Th = max(1, min(Th, H))
    if not _tile_ok(Th, H, W, itm, False):
        Th = H
    nt = H // Th
    Tp = Th * W

    est = (2 * Tp * K * itm + K * Cout * itm + 4 * Cout
           + 2 * Tp * Cout * jnp.dtype(out_dtype).itemsize + Tp * Cout * 4)

    return pl.pallas_call(
        _mm_bias_relu_kernel,
        out_shape=jax.ShapeDtypeStruct((N, P, Cout), out_dtype),
        grid=(N, nt),
        in_specs=[pl.BlockSpec((1, Tp, K), lambda n, t: (n, t, 0)),
                  pl.BlockSpec((K, Cout), lambda n, t: (0, 0)),
                  pl.BlockSpec((1, Cout), lambda n, t: (0, 0))],
        out_specs=pl.BlockSpec((1, Tp, Cout), lambda n, t: (n, t, 0)),
        compiler_params=pltpu.CompilerParams(
            dimension_semantics=("parallel", "parallel"),
            vmem_limit_bytes=_vmem_limit(est)),
    )(x_flat, w, b2)


# ----------------------------------------------------------------------------
# Parameter prep (hoisted out of jit) and im2col helper
# ----------------------------------------------------------------------------
def prepare_params(params, compute_dtype):
    """One-time layout/dtype prep so weights arrive exactly as the kernels want."""
    w, b = params["conv1_1"]
    cin, cout = w.shape[2], w.shape[3]
    w_cols = w.reshape(9 * cin, cout)                        # (ky,kx,ci) order
    w_cols = jnp.pad(w_cols, ((0, _IM2COL_K - 9 * cin), (0, 0)))
    prepped = {"conv1_1": (w_cols.astype(compute_dtype),
                           b.reshape(1, cout).astype(jnp.float32))}
    for name in ("conv1_2", "conv2_1", "conv2_2", "conv3_1"):
        w, b = params[name]
        _, _, cin, cout = w.shape
        prepped[name] = (w.reshape(3, 3 * cin, cout).astype(compute_dtype),
                         b.reshape(1, cout).astype(jnp.float32))
    return prepped


def _im2col3x3(x_nhwc, k_pad=_IM2COL_K):
    """(N,H,W,C) -> (N, H*W, max(9C, k_pad)) patch matrix (tiny, 3 channels)."""
    N, H, W, C = x_nhwc.shape
    xp = jnp.pad(x_nhwc, ((0, 0), (1, 1), (1, 1), (0, 0)))
    cols = jnp.concatenate(
        [xp[:, ky:ky + H, kx:kx + W, :] for ky in range(3) for kx in range(3)],
        axis=-1)
    k = 9 * C
    if k_pad > k:
        cols = jnp.pad(cols, ((0, 0), (0, 0), (0, 0), (0, k_pad - k)))
    return cols.reshape(N, H * W, max(k, k_pad))


def init_params(key):
    def conv_init(k, cin, cout):
        kw_, kb = jax.random.split(k)
        w = jax.random.normal(kw_, (3, 3, cin, cout), jnp.float32)
        w = w * (1.0 / np.sqrt(9.0 * cin))
        b = jax.random.normal(kb, (cout,), jnp.float32) * 0.01
        return w, b

    ks = jax.random.split(key, 5)
    return {
        "conv1_1": conv_init(ks[0], 3, 64),
        "conv1_2": conv_init(ks[1], 64, 64),
        "conv2_1": conv_init(ks[2], 64, 128),
        "conv2_2": conv_init(ks[3], 128, 128),
        "conv3_1": conv_init(ks[4], 128, 256),
    }


# ----------------------------------------------------------------------------
# Full forward (matches the PyTorch FE.forward)
# ----------------------------------------------------------------------------
def fe_forward(x_nchw, prepped, *, compute_dtype=jnp.bfloat16, row_tile=None):
    N, C, H, W = x_nchw.shape
    x = jnp.transpose(x_nchw, (0, 2, 3, 1)).astype(jnp.float32)       # NCHW -> NHWC
    std = jnp.asarray(VGG_STD, jnp.float32) * RGB_RANGE
    mean = jnp.asarray(VGG_MEAN, jnp.float32)
    x = x / std - RGB_RANGE * mean / std                              # MeanShift
    cols = _im2col3x3(x.astype(compute_dtype))                        # (N, P, 32)

    # slice1: conv1_1 + ReLU (single im2col matmul)
    w, b = prepped["conv1_1"]
    lv1 = matmul_bias_relu(cols, w, b, H=H, W=W, out_dtype=compute_dtype,
                           row_tile=row_tile)

    # slice2: conv1_2 + ReLU + maxpool (fused), conv2_1 + ReLU
    w, b = prepped["conv1_2"]
    y = conv3x3_relu(lv1, w, b, H=H, W=W, pool=True, out_dtype=compute_dtype,
                     row_tile=row_tile)
    H2, W2 = H // 2, W // 2
    w, b = prepped["conv2_1"]
    lv2 = conv3x3_relu(y, w, b, H=H2, W=W2, pool=False, out_dtype=compute_dtype,
                       row_tile=row_tile)

    # slice3: conv2_2 + ReLU + maxpool (fused), conv3_1 + ReLU
    w, b = prepped["conv2_2"]
    y = conv3x3_relu(lv2, w, b, H=H2, W=W2, pool=True, out_dtype=compute_dtype,
                     row_tile=row_tile)
    H4, W4 = H2 // 2, W2 // 2
    w, b = prepped["conv3_1"]
    lv3 = conv3x3_relu(y, w, b, H=H4, W=W4, pool=False, out_dtype=compute_dtype,
                       row_tile=row_tile)

    def to_nchw(t, h, w_):
        return jnp.transpose(t.reshape(N, h, w_, -1), (0, 3, 1, 2)).astype(
            jnp.float32)

    return to_nchw(lv1, H, W), to_nchw(lv2, H2, W2), to_nchw(lv3, H4, W4)


# ----------------------------------------------------------------------------
# Pure-JAX reference (module semantics, f32) for validation
# ----------------------------------------------------------------------------
def _conv_ref(x, w, b):
    y = jax.lax.conv_general_dilated(
        x, w, window_strides=(1, 1), padding="SAME",
        dimension_numbers=("NHWC", "HWIO", "NHWC"))
    return jnp.maximum(y + b, 0.0)


def _pool_ref(x):
    return jnp.maximum(
        jnp.maximum(x[:, 0::2, 0::2, :], x[:, 0::2, 1::2, :]),
        jnp.maximum(x[:, 1::2, 0::2, :], x[:, 1::2, 1::2, :]))


def fe_forward_ref(x_nchw, params):
    x = jnp.transpose(x_nchw, (0, 2, 3, 1)).astype(jnp.float32)
    std = jnp.array(VGG_STD, jnp.float32) * RGB_RANGE
    mean = jnp.array(VGG_MEAN, jnp.float32)
    x = x / std - RGB_RANGE * mean / std
    x = _conv_ref(x, *params["conv1_1"]); lv1 = x
    x = _conv_ref(x, *params["conv1_2"]); x = _pool_ref(x)
    x = _conv_ref(x, *params["conv2_1"]); lv2 = x
    x = _conv_ref(x, *params["conv2_2"]); x = _pool_ref(x)
    x = _conv_ref(x, *params["conv3_1"]); lv3 = x
    to_nchw = lambda t: jnp.transpose(t, (0, 3, 1, 2))
    return to_nchw(lv1), to_nchw(lv2), to_nchw(lv3)


if __name__ == "__main__":
    key = jax.random.PRNGKey(0)
    kx, kp = jax.random.split(key)
    x = jax.random.uniform(kx, (2, 3, 16, 16), jnp.float32)   # NCHW like torch
    params = init_params(kp)

    r1, r2, r3 = fe_forward_ref(x, params)

    # 1) f32 path, auto tiles (whole image): exact-precision validation.
    prep32 = prepare_params(params, jnp.float32)
    fwd32 = jax.jit(functools.partial(fe_forward, compute_dtype=jnp.float32))
    lv1, lv2, lv3 = fwd32(x, prep32)
    jax.block_until_ready((lv1, lv2, lv3))
    assert lv1.shape == (2, 64, 16, 16)
    assert lv2.shape == (2, 128, 8, 8)
    assert lv3.shape == (2, 256, 4, 4)
    np.testing.assert_allclose(np.asarray(lv1), np.asarray(r1), rtol=2e-3, atol=2e-3)
    np.testing.assert_allclose(np.asarray(lv2), np.asarray(r2), rtol=2e-3, atol=2e-3)
    np.testing.assert_allclose(np.asarray(lv3), np.asarray(r3), rtol=2e-3, atol=2e-3)

    # 2) f32 path with forced 4-row tiles: validates the halo / H-tiling path.
    fwd32t = jax.jit(functools.partial(fe_forward, compute_dtype=jnp.float32,
                                       row_tile=4))
    t1, t2, t3 = fwd32t(x, prep32)
    jax.block_until_ready((t1, t2, t3))
    np.testing.assert_allclose(np.asarray(t1), np.asarray(r1), rtol=2e-3, atol=2e-3)
    np.testing.assert_allclose(np.asarray(t2), np.asarray(r2), rtol=2e-3, atol=2e-3)
    np.testing.assert_allclose(np.asarray(t3), np.asarray(r3), rtol=2e-3, atol=2e-3)

    # 3) bf16 MXU / bf16 activations (perf configuration): loose check.
    prep16 = prepare_params(params, jnp.bfloat16)
    fwd16 = jax.jit(functools.partial(fe_forward, compute_dtype=jnp.bfloat16))
    b1, b2_, b3 = fwd16(x, prep16)
    jax.block_until_ready((b1, b2_, b3))
    np.testing.assert_allclose(np.asarray(b1), np.asarray(r1), rtol=0.25, atol=0.25)
    np.testing.assert_allclose(np.asarray(b2_), np.asarray(r2), rtol=0.25, atol=0.25)
    np.testing.assert_allclose(np.asarray(b3), np.asarray(r3), rtol=0.25, atol=0.25)

    print("KERNEL_OK")
</pallas_src>

<mosaic_0001>
module attributes {stable_mosaic.version = 11 : i64} {
  func.func @_mm_bias_relu_kernel(%arg0: i32, %arg1: i32, %arg2: memref<1x256x32xf32, #tpu.memory_space<vmem>>, %arg3: memref<32x64xf32, #tpu.memory_space<vmem>>, %arg4: memref<1x64xf32, #tpu.memory_space<vmem>>, %arg5: memref<1x256x64xf32, #tpu.memory_space<vmem>>) attributes {dimension_semantics = [#tpu.dimension_semantics<parallel>, #tpu.dimension_semantics<parallel>], iteration_bounds = array<i64: 2, 1>, scalar_prefetch = 0 : i64, scratch_operands = 0 : i64, tpu.core_type = #tpu.core_type<tc>, window_params = [{transform_indices = @transform_0, window_bounds = array<i64: 1, 256, 32>}, {pipeline_mode = #tpu.pipeline_mode<synchronous>, transform_indices = @transform_1, window_bounds = array<i64: 32, 64>}, {pipeline_mode = #tpu.pipeline_mode<synchronous>, transform_indices = @transform_2, window_bounds = array<i64: 1, 64>}, {transform_indices = @transform_3, window_bounds = array<i64: 1, 256, 64>}]} {
    %c0 = arith.constant 0 : index
    %c0_0 = arith.constant 0 : index
    %c0_1 = arith.constant 0 : index
    %0 = vector.load %arg2[%c0, %c0_0, %c0_1] : memref<1x256x32xf32, #tpu.memory_space<vmem>>, vector<1x256x32xf32>
    %1 = vector.shape_cast %0 : vector<1x256x32xf32> to vector<256x32xf32>
    %c0_2 = arith.constant 0 : index
    %c0_3 = arith.constant 0 : index
    %2 = vector.load %arg3[%c0_2, %c0_3] : memref<32x64xf32, #tpu.memory_space<vmem>>, vector<32x64xf32>
    %cst = arith.constant dense<0.000000e+00> : vector<256x64xf32>
    %3 = tpu.matmul %1, %2, %cst {dimension_numbers = #tpu.dot_dimension_numbers<[1], [0], [0], [1], [0, 0, 1, 1], [], []>} : vector<256x32xf32>, vector<32x64xf32>, vector<256x64xf32> -> vector<256x64xf32>
    %c0_4 = arith.constant 0 : index
    %c0_5 = arith.constant 0 : index
    %4 = vector.load %arg4[%c0_4, %c0_5] : memref<1x64xf32, #tpu.memory_space<vmem>>, vector<1x64xf32>
    %5 = vector.shape_cast %4 : vector<1x64xf32> to vector<64xf32>
    %6 = vector.shape_cast %5 : vector<64xf32> to vector<1x64xf32>
    %7 = vector.broadcast %6 : vector<1x64xf32> to vector<256x64xf32>
    %8 = arith.addf %3, %7 : vector<256x64xf32>
    %cst_6 = arith.constant 0.000000e+00 : f32
    %9 = vector.broadcast %cst_6 : f32 to vector<256x64xf32>
    %10 = arith.maximumf %8, %9 : vector<256x64xf32>
    %c0_7 = arith.constant 0 : index
    %c0_8 = arith.constant 0 : index
    %c0_9 = arith.constant 0 : index
    %11 = vector.load %arg5[%c0_7, %c0_8, %c0_9] : memref<1x256x64xf32, #tpu.memory_space<vmem>>, vector<1x256x64xf32>
    %12 = vector.shape_cast %11 : vector<1x256x64xf32> to vector<256x64xf32>
    %13 = vector.shape_cast %10 : vector<256x64xf32> to vector<1x256x64xf32>
    tpu.vector_store %arg5[%c0_7, %c0_8, %c0_9], %13 {strides = array<i32>} : memref<1x256x64xf32, #tpu.memory_space<vmem>>, vector<1x256x64xf32>,
    return
  }
  func.func @transform_0(%arg0: i32, %arg1: i32) -> (i32, i32, i32) {
    %c0_i32 = arith.constant 0 : i32
    %c0_i32_0 = arith.constant 0 : i32
    return %arg0, %arg1, %c0_i32 : i32, i32, i32
  }
  func.func @transform_1(%arg0: i32, %arg1: i32) -> (i32, i32) {
    %c0_i32 = arith.constant 0 : i32
    %c0_i32_0 = arith.constant 0 : i32
    %c0_i32_1 = arith.constant 0 : i32
    return %c0_i32, %c0_i32_0 : i32, i32
  }
  func.func @transform_2(%arg0: i32, %arg1: i32) -> (i32, i32) {
    %c0_i32 = arith.constant 0 : i32
    %c0_i32_0 = arith.constant 0 : i32
    %c0_i32_1 = arith.constant 0 : i32
    return %c0_i32, %c0_i32_0 : i32, i32
  }
  func.func @transform_3(%arg0: i32, %arg1: i32) -> (i32, i32, i32) {
    %c0_i32 = arith.constant 0 : i32
    %c0_i32_0 = arith.constant 0 : i32
    return %arg0, %arg1, %c0_i32 : i32, i32, i32
  }
}

module attributes {stable_mosaic.version = 11 : i64} {
  func.func @_conv3x3_kernel(%arg0: i32, %arg1: i32, %arg2: memref<1x256x64xf32, #tpu.memory_space<vmem>>, %arg3: memref<3x192x64xf32, #tpu.memory_space<vmem>>, %arg4: memref<1x64xf32, #tpu.memory_space<vmem>>, %arg5: memref<1x64x64xf32, #tpu.memory_space<vmem>>, %arg6: memref<8x16x64xf32, #tpu.memory_space<vmem>>) attributes {dimension_semantics = [#tpu.dimension_semantics<parallel>, #tpu.dimension_semantics<parallel>], iteration_bounds = array<i64: 2, 1>, scalar_prefetch = 0 : i64, scratch_operands = 1 : i64, tpu.core_type = #tpu.core_type<tc>, window_params = [{transform_indices = @transform_0, window_bounds = array<i64: 1, 256, 64>}, {pipeline_mode = #tpu.pipeline_mode<synchronous>, transform_indices = @transform_1, window_bounds = array<i64: 3, 192, 64>}, {pipeline_mode = #tpu.pipeline_mode<synchronous>, transform_indices = @transform_2, window_bounds = array<i64: 1, 64>}, {transform_indices = @transform_3, window_bounds = array<i64: 1, 64, 64>}]} {
    %c0 = arith.constant 0 : index
    %c0_0 = arith.constant 0 : index
    %c0_1 = arith.constant 0 : index
    %0 = vector.load %arg2[%c0, %c0_0, %c0_1] : memref<1x256x64xf32, #tpu.memory_space<vmem>>, vector<1x256x64xf32>
    %1 = vector.shape_cast %0 : vector<1x256x64xf32> to vector<256x64xf32>
    %2 = tpu.iota {dimensions = array<i32: 0>} : vector<256x1xi32>
    %c16_i32 = arith.constant 16 : i32
    %c0_i32 = arith.constant 0 : i32
    %3 = arith.cmpi eq, %c16_i32, %c0_i32 : i32
    %c1_i32 = arith.constant 1 : i32
    %4 = arith.select %3, %c1_i32, %c16_i32 : i32
    %5 = vector.broadcast %4 : i32 to vector<256x1xi32>
    %6 = arith.remsi %2, %5 : vector<256x1xi32>
    %c0_i32_2 = arith.constant 0 : i32
    %7 = vector.broadcast %c0_i32_2 : i32 to vector<256x1xi32>
    %8 = arith.cmpi ne, %6, %7 : vector<256x1xi32>
    %c0_i32_3 = arith.constant 0 : i32
    %9 = vector.broadcast %c0_i32_3 : i32 to vector<256x1xi32>
    %10 = arith.cmpi slt, %6, %9 : vector<256x1xi32>
    %c0_i32_4 = arith.constant 0 : i32
    %11 = arith.cmpi slt, %4, %c0_i32_4 : i32
    %12 = vector.broadcast %11 : i1 to vector<256x1xi1>
    %13 = vector.broadcast %12 : vector<256x1xi1> to vector<256x1xi1>
    %14 = arith.xori %10, %13 : vector<256x1xi1>
    %15 = arith.andi %14, %8 : vector<256x1xi1>
    %16 = vector.broadcast %4 : i32 to vector<256x1xi32>
    %17 = arith.addi %6, %16 : vector<256x1xi32>
    %18 = arith.select %15, %17, %6 : vector<256x1xi1>, vector<256x1xi32>
    %c16_i32_5 = arith.constant 16 : i32
    %19 = vector.broadcast %c16_i32_5 : i32 to vector<256x1xi32>
    %20 = arith.cmpi sge, %2, %19 : vector<256x1xi32>
    %c16_i32_6 = arith.constant 16 : i32
    %21 = tpu.dynamic_rotate %1 by %c16_i32_6 dim 0 : vector<256x64xf32>, i32 -> vector<256x64xf32>
    %c0_i32_7 = arith.constant 0 : i32
    %22 = arith.sitofp %c0_i32_7 : i32 to f32
    %23 = vector.shape_cast %20 : vector<256x1xi1> to vector<256x1xi1>
    %24 = vector.broadcast %23 : vector<256x1xi1> to vector<256x64xi1>
    %25 = vector.broadcast %22 : f32 to vector<256x64xf32>
    %26 = arith.select %24, %21, %25 : vector<256x64xi1>, vector<256x64xf32>
    %c240_i32 = arith.constant 240 : i32
    %27 = vector.broadcast %c240_i32 : i32 to vector<256x1xi32>
    %28 = arith.cmpi slt, %2, %27 : vector<256x1xi32>
    %c240_i32_8 = arith.constant 240 : i32
    %29 = tpu.dynamic_rotate %1 by %c240_i32_8 dim 0 : vector<256x64xf32>, i32 -> vector<256x64xf32>
    %c0_i32_9 = arith.constant 0 : i32
    %30 = arith.sitofp %c0_i32_9 : i32 to f32
    %31 = vector.shape_cast %28 : vector<256x1xi1> to vector<256x1xi1>
    %32 = vector.broadcast %31 : vector<256x1xi1> to vector<256x64xi1>
    %33 = vector.broadcast %30 : f32 to vector<256x64xf32>
    %34 = arith.select %32, %29, %33 : vector<256x64xi1>, vector<256x64xf32>
    %cst = arith.constant 0.000000e+00 : f32
    %35 = vector.broadcast %cst : f32 to vector<256x64xf32>
    %c1_i32_10 = arith.constant 1 : i32
    %36 = vector.broadcast %c1_i32_10 : i32 to vector<256x1xi32>
    %37 = arith.cmpi sge, %18, %36 : vector<256x1xi32>
    %c1_i32_11 = arith.constant 1 : i32
    %38 = tpu.dynamic_rotate %26 by %c1_i32_11 dim 0 : vector<256x64xf32>, i32 -> vector<256x64xf32>
    %c0_i32_12 = arith.constant 0 : i32
    %39 = arith.sitofp %c0_i32_12 : i32 to f32
    %40 = vector.shape_cast %37 : vector<256x1xi1> to vector<256x1xi1>
    %41 = vector.broadcast %40 : vector<256x1xi1> to vector<256x64xi1>
    %42 = vector.broadcast %39 : f32 to vector<256x64xf32>
    %43 = arith.select %41, %38, %42 : vector<256x64xi1>, vector<256x64xf32>
    %c15_i32 = arith.constant 15 : i32
    %44 = vector.broadcast %c15_i32 : i32 to vector<256x1xi32>
    %45 = arith.cmpi slt, %18, %44 : vector<256x1xi32>
    %c255_i32 = arith.constant 255 : i32
    %46 = tpu.dynamic_rotate %26 by %c255_i32 dim 0 : vector<256x64xf32>, i32 -> vector<256x64xf32>
    %c0_i32_13 = arith.constant 0 : i32
    %47 = arith.sitofp %c0_i32_13 : i32 to f32
    %48 = vector.shape_cast %45 : vector<256x1xi1> to vector<256x1xi1>
    %49 = vector.broadcast %48 : vector<256x1xi1> to vector<256x64xi1>
    %50 = vector.broadcast %47 : f32 to vector<256x64xf32>
    %51 = arith.select %49, %46, %50 : vector<256x64xi1>, vector<256x64xf32>
    %52 = tpu.concatenate %43, %26, %51 in 1 : vector<256x64xf32>, vector<256x64xf32>, vector<256x64xf32> -> vector<256x192xf32>
    %c0_14 = arith.constant 0 : index
    %c0_15 = arith.constant 0 : index
    %c0_16 = arith.constant 0 : index
    %53 = vector.load %arg3[%c0_14, %c0_15, %c0_16] : memref<3x192x64xf32, #tpu.memory_space<vmem>>, vector<1x192x64xf32>
    %54 = vector.shape_cast %53 : vector<1x192x64xf32> to vector<192x64xf32>
    %cst_17 = arith.constant dense<0.000000e+00> : vector<256x64xf32>
    %55 = tpu.matmul %52, %54, %cst_17 {dimension_numbers = #tpu.dot_dimension_numbers<[1], [0], [0], [1], [0, 0, 1, 1], [], []>} : vector<256x192xf32>, vector<192x64xf32>, vector<256x64xf32> -> vector<256x64xf32>
    %56 = arith.addf %35, %55 : vector<256x64xf32>
    %c1_i32_18 = arith.constant 1 : i32
    %57 = vector.broadcast %c1_i32_18 : i32 to vector<256x1xi32>
    %58 = arith.cmpi sge, %18, %57 : vector<256x1xi32>
    %c1_i32_19 = arith.constant 1 : i32
    %59 = tpu.dynamic_rotate %1 by %c1_i32_19 dim 0 : vector<256x64xf32>, i32 -> vector<256x64xf32>
    %c0_i32_20 = arith.constant 0 : i32
    %60 = arith.sitofp %c0_i32_20 : i32 to f32
    %61 = vector.shape_cast %58 : vector<256x1xi1> to vector<256x1xi1>
    %62 = vector.broadcast %61 : vector<256x1xi1> to vector<256x64xi1>
    %63 = vector.broadcast %60 : f32 to vector<256x64xf32>
    %64 = arith.select %62, %59, %63 : vector<256x64xi1>, vector<256x64xf32>
    %c15_i32_21 = arith.constant 15 : i32
    %65 = vector.broadcast %c15_i32_21 : i32 to vector<256x1xi32>
    %66 = arith.cmpi slt, %18, %65 : vector<256x1xi32>
    %c255_i32_22 = arith.constant 255 : i32
    %67 = tpu.dynamic_rotate %1 by %c255_i32_22 dim 0 : vector<256x64xf32>, i32 -> vector<256x64xf32>
    %c0_i32_23 = arith.constant 0 : i32
    %68 = arith.sitofp %c0_i32_23 : i32 to f32
    %69 = vector.shape_cast %66 : vector<256x1xi1> to vector<256x1xi1>
    %70 = vector.broadcast %69 : vector<256x1xi1> to vector<256x64xi1>
    %71 = vector.broadcast %68 : f32 to vector<256x64xf32>
    %72 = arith.select %70, %67, %71 : vector<256x64xi1>, vector<256x64xf32>
    %73 = tpu.concatenate %64, %1, %72 in 1 : vector<256x64xf32>, vector<256x64xf32>, vector<256x64xf32> -> vector<256x192xf32>
    %c1 = arith.constant 1 : index
    %c0_24 = arith.constant 0 : index
    %c0_25 = arith.constant 0 : index
    %74 = vector.load %arg3[%c1, %c0_24, %c0_25] : memref<3x192x64xf32, #tpu.memory_space<vmem>>, vector<1x192x64xf32>
    %75 = vector.shape_cast %74 : vector<1x192x64xf32> to vector<192x64xf32>
    %cst_26 = arith.constant dense<0.000000e+00> : vector<256x64xf32>
    %76 = tpu.matmul %73, %75, %cst_26 {dimension_numbers = #tpu.dot_dimension_numbers<[1], [0], [0], [1], [0, 0, 1, 1], [], []>} : vector<256x192xf32>, vector<192x64xf32>, vector<256x64xf32> -> vector<256x64xf32>
    %77 = arith.addf %56, %76 : vector<256x64xf32>
    %c1_i32_27 = arith.constant 1 : i32
    %78 = vector.broadcast %c1_i32_27 : i32 to vector<256x1xi32>
    %79 = arith.cmpi sge, %18, %78 : vector<256x1xi32>
    %c1_i32_28 = arith.constant 1 : i32
    %80 = tpu.dynamic_rotate %34 by %c1_i32_28 dim 0 : vector<256x64xf32>, i32 -> vector<256x64xf32>
    %c0_i32_29 = arith.constant 0 : i32
    %81 = arith.sitofp %c0_i32_29 : i32 to f32
    %82 = vector.shape_cast %79 : vector<256x1xi1> to vector<256x1xi1>
    %83 = vector.broadcast %82 : vector<256x1xi1> to vector<256x64xi1>
    %84 = vector.broadcast %81 : f32 to vector<256x64xf32>
    %85 = arith.select %83, %80, %84 : vector<256x64xi1>, vector<256x64xf32>
    %c15_i32_30 = arith.constant 15 : i32
    %86 = vector.broadcast %c15_i32_30 : i32 to vector<256x1xi32>
    %87 = arith.cmpi slt, %18, %86 : vector<256x1xi32>
    %c255_i32_31 = arith.constant 255 : i32
    %88 = tpu.dynamic_rotate %34 by %c255_i32_31 dim 0 : vector<256x64xf32>, i32 -> vector<256x64xf32>
    %c0_i32_32 = arith.constant 0 : i32
    %89 = arith.sitofp %c0_i32_32 : i32 to f32
    %90 = vector.shape_cast %87 : vector<256x1xi1> to vector<256x1xi1>
    %91 = vector.broadcast %90 : vector<256x1xi1> to vector<256x64xi1>
    %92 = vector.broadcast %89 : f32 to vector<256x64xf32>
    %93 = arith.select %91, %88, %92 : vector<256x64xi1>, vector<256x64xf32>
    %94 = tpu.concatenate %85, %34, %93 in 1 : vector<256x64xf32>, vector<256x64xf32>, vector<256x64xf32> -> vector<256x192xf32>
    %c2 = arith.constant 2 : index
    %c0_33 = arith.constant 0 : index
    %c0_34 = arith.constant 0 : index
    %95 = vector.load %arg3[%c2, %c0_33, %c0_34] : memref<3x192x64xf32, #tpu.memory_space<vmem>>, vector<1x192x64xf32>
    %96 = vector.shape_cast %95 : vector<1x192x64xf32> to vector<192x64xf32>
    %cst_35 = arith.constant dense<0.000000e+00> : vector<256x64xf32>
    %97 = tpu.matmul %94, %96, %cst_35 {dimension_numbers = #tpu.dot_dimension_numbers<[1], [0], [0], [1], [0, 0, 1, 1], [], []>} : vector<256x192xf32>, vector<192x64xf32>, vector<256x64xf32> -> vector<256x64xf32>
    %98 = arith.addf %77, %97 : vector<256x64xf32>
    %c0_36 = arith.constant 0 : index
    %c0_37 = arith.constant 0 : index
    %99 = vector.load %arg4[%c0_36, %c0_37] : memref<1x64xf32, #tpu.memory_space<vmem>>, vector<1x64xf32>
    %100 = vector.shape_cast %99 : vector<1x64xf32> to vector<64xf32>
    %101 = vector.shape_cast %100 : vector<64xf32> to vector<1x64xf32>
    %102 = vector.broadcast %101 : vector<1x64xf32> to vector<256x64xf32>
    %103 = arith.addf %98, %102 : vector<256x64xf32>
    %cst_38 = arith.constant 0.000000e+00 : f32
    %104 = vector.broadcast %cst_38 : f32 to vector<256x64xf32>
    %105 = arith.maximumf %103, %104 : vector<256x64xf32>
    %106 = vector.shape_cast %105 : vector<256x64xf32> to vector<8x2x16x64xf32>
    %107 = vector.extract_strided_slice %106 {offsets = [0, 0, 0, 0], sizes = [8, 1, 16, 64], strides = [1, 1, 1, 1]} : vector<8x2x16x64xf32> to vector<8x1x16x64xf32>
    %108 = vector.shape_cast %107 : vector<8x1x16x64xf32> to vector<8x16x64xf32>
    %109 = vector.extract_strided_slice %106 {offsets = [0, 1, 0, 0], sizes = [8, 1, 16, 64], strides = [1, 1, 1, 1]} : vector<8x2x16x64xf32> to vector<8x1x16x64xf32>
    %110 = vector.shape_cast %109 : vector<8x1x16x64xf32> to vector<8x16x64xf32>
    %111 = arith.maximumf %108, %110 : vector<8x16x64xf32>
    %c0_39 = arith.constant 0 : index
    %c0_40 = arith.constant 0 : index
    %c0_41 = arith.constant 0 : index
    %112 = vector.load %arg6[%c0_39, %c0_40, %c0_41] : memref<8x16x64xf32, #tpu.memory_space<vmem>>, vector<8x16x64xf32>
    tpu.vector_store %arg6[%c0_39, %c0_40, %c0_41], %111 {strides = array<i32>} : memref<8x16x64xf32, #tpu.memory_space<vmem>>, vector<8x16x64xf32>,
    %c0_42 = arith.constant 0 : index
    %c0_43 = arith.constant 0 : index
    %c0_44 = arith.constant 0 : index
    %113 = tpu.strided_load %arg6[%c0_42, %c0_43, %c0_44] {strides = array<i32: 1, 2, 1>} : memref<8x16x64xf32, #tpu.memory_space<vmem>>, vector<8x8x64xf32>
    %c0_45 = arith.constant 0 : index
    %c1_46 = arith.constant 1 : index
    %c0_47 = arith.constant 0 : index
    %114 = tpu.strided_load %arg6[%c0_45, %c1_46, %c0_47] {strides = array<i32: 1, 2, 1>} : memref<8x16x64xf32, #tpu.memory_space<vmem>>, vector<8x8x64xf32>
    %115 = arith.maximumf %113, %114 : vector<8x8x64xf32>
    %116 = vector.shape_cast %115 : vector<8x8x64xf32> to vector<64x64xf32>
    %c0_48 = arith.constant 0 : index
    %c0_49 = arith.constant 0 : index
    %c0_50 = arith.constant 0 : index
    %117 = vector.load %arg5[%c0_48, %c0_49, %c0_50] : memref<1x64x64xf32, #tpu.memory_space<vmem>>, vector<1x64x64xf32>
    %118 = vector.shape_cast %117 : vector<1x64x64xf32> to vector<64x64xf32>
    %119 = vector.shape_cast %116 : vector<64x64xf32> to vector<1x64x64xf32>
    tpu.vector_store %arg5[%c0_48, %c0_49, %c0_50], %119 {strides = array<i32>} : memref<1x64x64xf32, #tpu.memory_space<vmem>>, vector<1x64x64xf32>,
    return
  }
  func.func @transform_0(%arg0: i32, %arg1: i32) -> (i32, i32, i32) {
    %c0_i32 = arith.constant 0 : i32
    %c0_i32_0 = arith.constant 0 : i32
    return %arg0, %arg1, %c0_i32 : i32, i32, i32
  }
  func.func @transform_1(%arg0: i32, %arg1: i32) -> (i32, i32, i32) {
    %c0_i32 = arith.constant 0 : i32
    %c0_i32_0 = arith.constant 0 : i32
    %c0_i32_1 = arith.constant 0 : i32
    %c0_i32_2 = arith.constant 0 : i32
    return %c0_i32, %c0_i32_0, %c0_i32_1 : i32, i32, i32
  }
  func.func @transform_2(%arg0: i32, %arg1: i32) -> (i32, i32) {
    %c0_i32 = arith.constant 0 : i32
    %c0_i32_0 = arith.constant 0 : i32
    %c0_i32_1 = arith.constant 0 : i32
    return %c0_i32, %c0_i32_0 : i32, i32
  }
  func.func @transform_3(%arg0: i32, %arg1: i32) -> (i32, i32, i32) {
    %c0_i32 = arith.constant 0 : i32
    %c0_i32_0 = arith.constant 0 : i32
    return %arg0, %arg1, %c0_i32 : i32, i32, i32
  }
}

module attributes {stable_mosaic.version = 11 : i64} {
  func.func @_conv3x3_kernel(%arg0: i32, %arg1: i32, %arg2: memref<1x64x64xf32, #tpu.memory_space<vmem>>, %arg3: memref<3x192x128xf32, #tpu.memory_space<vmem>>, %arg4: memref<1x128xf32, #tpu.memory_space<vmem>>, %arg5: memref<1x64x128xf32, #tpu.memory_space<vmem>>) attributes {dimension_semantics = [#tpu.dimension_semantics<parallel>, #tpu.dimension_semantics<parallel>], iteration_bounds = array<i64: 2, 1>, scalar_prefetch = 0 : i64, scratch_operands = 0 : i64, tpu.core_type = #tpu.core_type<tc>, window_params = [{transform_indices = @transform_0, window_bounds = array<i64: 1, 64, 64>}, {pipeline_mode = #tpu.pipeline_mode<synchronous>, transform_indices = @transform_1, window_bounds = array<i64: 3, 192, 128>}, {pipeline_mode = #tpu.pipeline_mode<synchronous>, transform_indices = @transform_2, window_bounds = array<i64: 1, 128>}, {transform_indices = @transform_3, window_bounds = array<i64: 1, 64, 128>}]} {
    %c0 = arith.constant 0 : index
    %c0_0 = arith.constant 0 : index
    %c0_1 = arith.constant 0 : index
    %0 = vector.load %arg2[%c0, %c0_0, %c0_1] : memref<1x64x64xf32, #tpu.memory_space<vmem>>, vector<1x64x64xf32>
    %1 = vector.shape_cast %0 : vector<1x64x64xf32> to vector<64x64xf32>
    %2 = tpu.iota {dimensions = array<i32: 0>} : vector<64x1xi32>
    %c8_i32 = arith.constant 8 : i32
    %c0_i32 = arith.constant 0 : i32
    %3 = arith.cmpi eq, %c8_i32, %c0_i32 : i32
    %c1_i32 = arith.constant 1 : i32
    %4 = arith.select %3, %c1_i32, %c8_i32 : i32
    %5 = vector.broadcast %4 : i32 to vector<64x1xi32>
    %6 = arith.remsi %2, %5 : vector<64x1xi32>
    %c0_i32_2 = arith.constant 0 : i32
    %7 = vector.broadcast %c0_i32_2 : i32 to vector<64x1xi32>
    %8 = arith.cmpi ne, %6, %7 : vector<64x1xi32>
    %c0_i32_3 = arith.constant 0 : i32
    %9 = vector.broadcast %c0_i32_3 : i32 to vector<64x1xi32>
    %10 = arith.cmpi slt, %6, %9 : vector<64x1xi32>
    %c0_i32_4 = arith.constant 0 : i32
    %11 = arith.cmpi slt, %4, %c0_i32_4 : i32
    %12 = vector.broadcast %11 : i1 to vector<64x1xi1>
    %13 = vector.broadcast %12 : vector<64x1xi1> to vector<64x1xi1>
    %14 = arith.xori %10, %13 : vector<64x1xi1>
    %15 = arith.andi %14, %8 : vector<64x1xi1>
    %16 = vector.broadcast %4 : i32 to vector<64x1xi32>
    %17 = arith.addi %6, %16 : vector<64x1xi32>
    %18 = arith.select %15, %17, %6 : vector<64x1xi1>, vector<64x1xi32>
    %c8_i32_5 = arith.constant 8 : i32
    %19 = vector.broadcast %c8_i32_5 : i32 to vector<64x1xi32>
    %20 = arith.cmpi sge, %2, %19 : vector<64x1xi32>
    %c8_i32_6 = arith.constant 8 : i32
    %21 = tpu.dynamic_rotate %1 by %c8_i32_6 dim 0 : vector<64x64xf32>, i32 -> vector<64x64xf32>
    %c0_i32_7 = arith.constant 0 : i32
    %22 = arith.sitofp %c0_i32_7 : i32 to f32
    %23 = vector.shape_cast %20 : vector<64x1xi1> to vector<64x1xi1>
    %24 = vector.broadcast %23 : vector<64x1xi1> to vector<64x64xi1>
    %25 = vector.broadcast %22 : f32 to vector<64x64xf32>
    %26 = arith.select %24, %21, %25 : vector<64x64xi1>, vector<64x64xf32>
    %c56_i32 = arith.constant 56 : i32
    %27 = vector.broadcast %c56_i32 : i32 to vector<64x1xi32>
    %28 = arith.cmpi slt, %2, %27 : vector<64x1xi32>
    %c56_i32_8 = arith.constant 56 : i32
    %29 = tpu.dynamic_rotate %1 by %c56_i32_8 dim 0 : vector<64x64xf32>, i32 -> vector<64x64xf32>
    %c0_i32_9 = arith.constant 0 : i32
    %30 = arith.sitofp %c0_i32_9 : i32 to f32
    %31 = vector.shape_cast %28 : vector<64x1xi1> to vector<64x1xi1>
    %32 = vector.broadcast %31 : vector<64x1xi1> to vector<64x64xi1>
    %33 = vector.broadcast %30 : f32 to vector<64x64xf32>
    %34 = arith.select %32, %29, %33 : vector<64x64xi1>, vector<64x64xf32>
    %cst = arith.constant 0.000000e+00 : f32
    %35 = vector.broadcast %cst : f32 to vector<64x128xf32>
    %c1_i32_10 = arith.constant 1 : i32
    %36 = vector.broadcast %c1_i32_10 : i32 to vector<64x1xi32>
    %37 = arith.cmpi sge, %18, %36 : vector<64x1xi32>
    %c1_i32_11 = arith.constant 1 : i32
    %38 = tpu.dynamic_rotate %26 by %c1_i32_11 dim 0 : vector<64x64xf32>, i32 -> vector<64x64xf32>
    %c0_i32_12 = arith.constant 0 : i32
    %39 = arith.sitofp %c0_i32_12 : i32 to f32
    %40 = vector.shape_cast %37 : vector<64x1xi1> to vector<64x1xi1>
    %41 = vector.broadcast %40 : vector<64x1xi1> to vector<64x64xi1>
    %42 = vector.broadcast %39 : f32 to vector<64x64xf32>
    %43 = arith.select %41, %38, %42 : vector<64x64xi1>, vector<64x64xf32>
    %c7_i32 = arith.constant 7 : i32
    %44 = vector.broadcast %c7_i32 : i32 to vector<64x1xi32>
    %45 = arith.cmpi slt, %18, %44 : vector<64x1xi32>
    %c63_i32 = arith.constant 63 : i32
    %46 = tpu.dynamic_rotate %26 by %c63_i32 dim 0 : vector<64x64xf32>, i32 -> vector<64x64xf32>
    %c0_i32_13 = arith.constant 0 : i32
    %47 = arith.sitofp %c0_i32_13 : i32 to f32
    %48 = vector.shape_cast %45 : vector<64x1xi1> to vector<64x1xi1>
    %49 = vector.broadcast %48 : vector<64x1xi1> to vector<64x64xi1>
    %50 = vector.broadcast %47 : f32 to vector<64x64xf32>
    %51 = arith.select %49, %46, %50 : vector<64x64xi1>, vector<64x64xf32>
    %52 = tpu.concatenate %43, %26, %51 in 1 : vector<64x64xf32>, vector<64x64xf32>, vector<64x64xf32> -> vector<64x192xf32>
    %c0_14 = arith.constant 0 : index
    %c0_15 = arith.constant 0 : index
    %c0_16 = arith.constant 0 : index
    %53 = vector.load %arg3[%c0_14, %c0_15, %c0_16] : memref<3x192x128xf32, #tpu.memory_space<vmem>>, vector<1x192x128xf32>
    %54 = vector.shape_cast %53 : vector<1x192x128xf32> to vector<192x128xf32>
    %cst_17 = arith.constant dense<0.000000e+00> : vector<64x128xf32>
    %55 = tpu.matmul %52, %54, %cst_17 {dimension_numbers = #tpu.dot_dimension_numbers<[1], [0], [0], [1], [0, 0, 1, 1], [], []>} : vector<64x192xf32>, vector<192x128xf32>, vector<64x128xf32> -> vector<64x128xf32>
    %56 = arith.addf %35, %55 : vector<64x128xf32>
    %c1_i32_18 = arith.constant 1 : i32
    %57 = vector.broadcast %c1_i32_18 : i32 to vector<64x1xi32>
    %58 = arith.cmpi sge, %18, %57 : vector<64x1xi32>
    %c1_i32_19 = arith.constant 1 : i32
    %59 = tpu.dynamic_rotate %1 by %c1_i32_19 dim 0 : vector<64x64xf32>, i32 -> vector<64x64xf32>
    %c0_i32_20 = arith.constant 0 : i32
    %60 = arith.sitofp %c0_i32_20 : i32 to f32
    %61 = vector.shape_cast %58 : vector<64x1xi1> to vector<64x1xi1>
    %62 = vector.broadcast %61 : vector<64x1xi1> to vector<64x64xi1>
    %63 = vector.broadcast %60 : f32 to vector<64x64xf32>
    %64 = arith.select %62, %59, %63 : vector<64x64xi1>, vector<64x64xf32>
    %c7_i32_21 = arith.constant 7 : i32
    %65 = vector.broadcast %c7_i32_21 : i32 to vector<64x1xi32>
    %66 = arith.cmpi slt, %18, %65 : vector<64x1xi32>
    %c63_i32_22 = arith.constant 63 : i32
    %67 = tpu.dynamic_rotate %1 by %c63_i32_22 dim 0 : vector<64x64xf32>, i32 -> vector<64x64xf32>
    %c0_i32_23 = arith.constant 0 : i32
    %68 = arith.sitofp %c0_i32_23 : i32 to f32
    %69 = vector.shape_cast %66 : vector<64x1xi1> to vector<64x1xi1>
    %70 = vector.broadcast %69 : vector<64x1xi1> to vector<64x64xi1>
    %71 = vector.broadcast %68 : f32 to vector<64x64xf32>
    %72 = arith.select %70, %67, %71 : vector<64x64xi1>, vector<64x64xf32>
    %73 = tpu.concatenate %64, %1, %72 in 1 : vector<64x64xf32>, vector<64x64xf32>, vector<64x64xf32> -> vector<64x192xf32>
    %c1 = arith.constant 1 : index
    %c0_24 = arith.constant 0 : index
    %c0_25 = arith.constant 0 : index
    %74 = vector.load %arg3[%c1, %c0_24, %c0_25] : memref<3x192x128xf32, #tpu.memory_space<vmem>>, vector<1x192x128xf32>
    %75 = vector.shape_cast %74 : vector<1x192x128xf32> to vector<192x128xf32>
    %cst_26 = arith.constant dense<0.000000e+00> : vector<64x128xf32>
    %76 = tpu.matmul %73, %75, %cst_26 {dimension_numbers = #tpu.dot_dimension_numbers<[1], [0], [0], [1], [0, 0, 1, 1], [], []>} : vector<64x192xf32>, vector<192x128xf32>, vector<64x128xf32> -> vector<64x128xf32>
    %77 = arith.addf %56, %76 : vector<64x128xf32>
    %c1_i32_27 = arith.constant 1 : i32
    %78 = vector.broadcast %c1_i32_27 : i32 to vector<64x1xi32>
    %79 = arith.cmpi sge, %18, %78 : vector<64x1xi32>
    %c1_i32_28 = arith.constant 1 : i32
    %80 = tpu.dynamic_rotate %34 by %c1_i32_28 dim 0 : vector<64x64xf32>, i32 -> vector<64x64xf32>
    %c0_i32_29 = arith.constant 0 : i32
    %81 = arith.sitofp %c0_i32_29 : i32 to f32
    %82 = vector.shape_cast %79 : vector<64x1xi1> to vector<64x1xi1>
    %83 = vector.broadcast %82 : vector<64x1xi1> to vector<64x64xi1>
    %84 = vector.broadcast %81 : f32 to vector<64x64xf32>
    %85 = arith.select %83, %80, %84 : vector<64x64xi1>, vector<64x64xf32>
    %c7_i32_30 = arith.constant 7 : i32
    %86 = vector.broadcast %c7_i32_30 : i32 to vector<64x1xi32>
    %87 = arith.cmpi slt, %18, %86 : vector<64x1xi32>
    %c63_i32_31 = arith.constant 63 : i32
    %88 = tpu.dynamic_rotate %34 by %c63_i32_31 dim 0 : vector<64x64xf32>, i32 -> vector<64x64xf32>
    %c0_i32_32 = arith.constant 0 : i32
    %89 = arith.sitofp %c0_i32_32 : i32 to f32
    %90 = vector.shape_cast %87 : vector<64x1xi1> to vector<64x1xi1>
    %91 = vector.broadcast %90 : vector<64x1xi1> to vector<64x64xi1>
    %92 = vector.broadcast %89 : f32 to vector<64x64xf32>
    %93 = arith.select %91, %88, %92 : vector<64x64xi1>, vector<64x64xf32>
    %94 = tpu.concatenate %85, %34, %93 in 1 : vector<64x64xf32>, vector<64x64xf32>, vector<64x64xf32> -> vector<64x192xf32>
    %c2 = arith.constant 2 : index
    %c0_33 = arith.constant 0 : index
    %c0_34 = arith.constant 0 : index
    %95 = vector.load %arg3[%c2, %c0_33, %c0_34] : memref<3x192x128xf32, #tpu.memory_space<vmem>>, vector<1x192x128xf32>
    %96 = vector.shape_cast %95 : vector<1x192x128xf32> to vector<192x128xf32>
    %cst_35 = arith.constant dense<0.000000e+00> : vector<64x128xf32>
    %97 = tpu.matmul %94, %96, %cst_35 {dimension_numbers = #tpu.dot_dimension_numbers<[1], [0], [0], [1], [0, 0, 1, 1], [], []>} : vector<64x192xf32>, vector<192x128xf32>, vector<64x128xf32> -> vector<64x128xf32>
    %98 = arith.addf %77, %97 : vector<64x128xf32>
    %c0_36 = arith.constant 0 : index
    %c0_37 = arith.constant 0 : index
    %99 = vector.load %arg4[%c0_36, %c0_37] : memref<1x128xf32, #tpu.memory_space<vmem>>, vector<1x128xf32>
    %100 = vector.shape_cast %99 : vector<1x128xf32> to vector<128xf32>
    %101 = vector.shape_cast %100 : vector<128xf32> to vector<1x128xf32>
    %102 = vector.broadcast %101 : vector<1x128xf32> to vector<64x128xf32>
    %103 = arith.addf %98, %102 : vector<64x128xf32>
    %cst_38 = arith.constant 0.000000e+00 : f32
    %104 = vector.broadcast %cst_38 : f32 to vector<64x128xf32>
    %105 = arith.maximumf %103, %104 : vector<64x128xf32>
    %c0_39 = arith.constant 0 : index
    %c0_40 = arith.constant 0 : index
    %c0_41 = arith.constant 0 : index
    %106 = vector.load %arg5[%c0_39, %c0_40, %c0_41] : memref<1x64x128xf32, #tpu.memory_space<vmem>>, vector<1x64x128xf32>
    %107 = vector.shape_cast %106 : vector<1x64x128xf32> to vector<64x128xf32>
    %108 = vector.shape_cast %105 : vector<64x128xf32> to vector<1x64x128xf32>
    tpu.vector_store %arg5[%c0_39, %c0_40, %c0_41], %108 {strides = array<i32>} : memref<1x64x128xf32, #tpu.memory_space<vmem>>, vector<1x64x128xf32>,
    return
  }
  func.func @transform_0(%arg0: i32, %arg1: i32) -> (i32, i32, i32) {
    %c0_i32 = arith.constant 0 : i32
    %c0_i32_0 = arith.constant 0 : i32
    return %arg0, %arg1, %c0_i32 : i32, i32, i32
  }
  func.func @transform_1(%arg0: i32, %arg1: i32) -> (i32, i32, i32) {
    %c0_i32 = arith.constant 0 : i32
    %c0_i32_0 = arith.constant 0 : i32
    %c0_i32_1 = arith.constant 0 : i32
    %c0_i32_2 = arith.constant 0 : i32
    return %c0_i32, %c0_i32_0, %c0_i32_1 : i32, i32, i32
  }
  func.func @transform_2(%arg0: i32, %arg1: i32) -> (i32, i32) {
    %c0_i32 = arith.constant 0 : i32
    %c0_i32_0 = arith.constant 0 : i32
    %c0_i32_1 = arith.constant 0 : i32
    return %c0_i32, %c0_i32_0 : i32, i32
  }
  func.func @transform_3(%arg0: i32, %arg1: i32) -> (i32, i32, i32) {
    %c0_i32 = arith.constant 0 : i32
    %c0_i32_0 = arith.constant 0 : i32
    return %arg0, %arg1, %c0_i32 : i32, i32, i32
  }
}

module attributes {stable_mosaic.version = 11 : i64} {
  func.func @_conv3x3_kernel(%arg0: i32, %arg1: i32, %arg2: memref<1x64x128xf32, #tpu.memory_space<vmem>>, %arg3: memref<3x384x128xf32, #tpu.memory_space<vmem>>, %arg4: memref<1x128xf32, #tpu.memory_space<vmem>>, %arg5: memref<1x16x128xf32, #tpu.memory_space<vmem>>, %arg6: memref<4x8x128xf32, #tpu.memory_space<vmem>>) attributes {dimension_semantics = [#tpu.dimension_semantics<parallel>, #tpu.dimension_semantics<parallel>], iteration_bounds = array<i64: 2, 1>, scalar_prefetch = 0 : i64, scratch_operands = 1 : i64, tpu.core_type = #tpu.core_type<tc>, window_params = [{transform_indices = @transform_0, window_bounds = array<i64: 1, 64, 128>}, {pipeline_mode = #tpu.pipeline_mode<synchronous>, transform_indices = @transform_1, window_bounds = array<i64: 3, 384, 128>}, {pipeline_mode = #tpu.pipeline_mode<synchronous>, transform_indices = @transform_2, window_bounds = array<i64: 1, 128>}, {transform_indices = @transform_3, window_bounds = array<i64: 1, 16, 128>}]} {
    %c0 = arith.constant 0 : index
    %c0_0 = arith.constant 0 : index
    %c0_1 = arith.constant 0 : index
    %0 = vector.load %arg2[%c0, %c0_0, %c0_1] : memref<1x64x128xf32, #tpu.memory_space<vmem>>, vector<1x64x128xf32>
    %1 = vector.shape_cast %0 : vector<1x64x128xf32> to vector<64x128xf32>
    %2 = tpu.iota {dimensions = array<i32: 0>} : vector<64x1xi32>
    %c8_i32 = arith.constant 8 : i32
    %c0_i32 = arith.constant 0 : i32
    %3 = arith.cmpi eq, %c8_i32, %c0_i32 : i32
    %c1_i32 = arith.constant 1 : i32
    %4 = arith.select %3, %c1_i32, %c8_i32 : i32
    %5 = vector.broadcast %4 : i32 to vector<64x1xi32>
    %6 = arith.remsi %2, %5 : vector<64x1xi32>
    %c0_i32_2 = arith.constant 0 : i32
    %7 = vector.broadcast %c0_i32_2 : i32 to vector<64x1xi32>
    %8 = arith.cmpi ne, %6, %7 : vector<64x1xi32>
    %c0_i32_3 = arith.constant 0 : i32
    %9 = vector.broadcast %c0_i32_3 : i32 to vector<64x1xi32>
    %10 = arith.cmpi slt, %6, %9 : vector<64x1xi32>
    %c0_i32_4 = arith.constant 0 : i32
    %11 = arith.cmpi slt, %4, %c0_i32_4 : i32
    %12 = vector.broadcast %11 : i1 to vector<64x1xi1>
    %13 = vector.broadcast %12 : vector<64x1xi1> to vector<64x1xi1>
    %14 = arith.xori %10, %13 : vector<64x1xi1>
    %15 = arith.andi %14, %8 : vector<64x1xi1>
    %16 = vector.broadcast %4 : i32 to vector<64x1xi32>
    %17 = arith.addi %6, %16 : vector<64x1xi32>
    %18 = arith.select %15, %17, %6 : vector<64x1xi1>, vector<64x1xi32>
    %c8_i32_5 = arith.constant 8 : i32
    %19 = vector.broadcast %c8_i32_5 : i32 to vector<64x1xi32>
    %20 = arith.cmpi sge, %2, %19 : vector<64x1xi32>
    %c8_i32_6 = arith.constant 8 : i32
    %21 = tpu.dynamic_rotate %1 by %c8_i32_6 dim 0 : vector<64x128xf32>, i32 -> vector<64x128xf32>
    %c0_i32_7 = arith.constant 0 : i32
    %22 = arith.sitofp %c0_i32_7 : i32 to f32
    %23 = vector.shape_cast %20 : vector<64x1xi1> to vector<64x1xi1>
    %24 = vector.broadcast %23 : vector<64x1xi1> to vector<64x128xi1>
    %25 = vector.broadcast %22 : f32 to vector<64x128xf32>
    %26 = arith.select %24, %21, %25 : vector<64x128xi1>, vector<64x128xf32>
    %c56_i32 = arith.constant 56 : i32
    %27 = vector.broadcast %c56_i32 : i32 to vector<64x1xi32>
    %28 = arith.cmpi slt, %2, %27 : vector<64x1xi32>
    %c56_i32_8 = arith.constant 56 : i32
    %29 = tpu.dynamic_rotate %1 by %c56_i32_8 dim 0 : vector<64x128xf32>, i32 -> vector<64x128xf32>
    %c0_i32_9 = arith.constant 0 : i32
    %30 = arith.sitofp %c0_i32_9 : i32 to f32
    %31 = vector.shape_cast %28 : vector<64x1xi1> to vector<64x1xi1>
    %32 = vector.broadcast %31 : vector<64x1xi1> to vector<64x128xi1>
    %33 = vector.broadcast %30 : f32 to vector<64x128xf32>
    %34 = arith.select %32, %29, %33 : vector<64x128xi1>, vector<64x128xf32>
    %cst = arith.constant 0.000000e+00 : f32
    %35 = vector.broadcast %cst : f32 to vector<64x128xf32>
    %c1_i32_10 = arith.constant 1 : i32
    %36 = vector.broadcast %c1_i32_10 : i32 to vector<64x1xi32>
    %37 = arith.cmpi sge, %18, %36 : vector<64x1xi32>
    %c1_i32_11 = arith.constant 1 : i32
    %38 = tpu.dynamic_rotate %26 by %c1_i32_11 dim 0 : vector<64x128xf32>, i32 -> vector<64x128xf32>
    %c0_i32_12 = arith.constant 0 : i32
    %39 = arith.sitofp %c0_i32_12 : i32 to f32
    %40 = vector.shape_cast %37 : vector<64x1xi1> to vector<64x1xi1>
    %41 = vector.broadcast %40 : vector<64x1xi1> to vector<64x128xi1>
    %42 = vector.broadcast %39 : f32 to vector<64x128xf32>
    %43 = arith.select %41, %38, %42 : vector<64x128xi1>, vector<64x128xf32>
    %c7_i32 = arith.constant 7 : i32
    %44 = vector.broadcast %c7_i32 : i32 to vector<64x1xi32>
    %45 = arith.cmpi slt, %18, %44 : vector<64x1xi32>
    %c63_i32 = arith.constant 63 : i32
    %46 = tpu.dynamic_rotate %26 by %c63_i32 dim 0 : vector<64x128xf32>, i32 -> vector<64x128xf32>
    %c0_i32_13 = arith.constant 0 : i32
    %47 = arith.sitofp %c0_i32_13 : i32 to f32
    %48 = vector.shape_cast %45 : vector<64x1xi1> to vector<64x1xi1>
    %49 = vector.broadcast %48 : vector<64x1xi1> to vector<64x128xi1>
    %50 = vector.broadcast %47 : f32 to vector<64x128xf32>
    %51 = arith.select %49, %46, %50 : vector<64x128xi1>, vector<64x128xf32>
    %52 = tpu.concatenate %43, %26, %51 in 1 : vector<64x128xf32>, vector<64x128xf32>, vector<64x128xf32> -> vector<64x384xf32>
    %c0_14 = arith.constant 0 : index
    %c0_15 = arith.constant 0 : index
    %c0_16 = arith.constant 0 : index
    %53 = vector.load %arg3[%c0_14, %c0_15, %c0_16] : memref<3x384x128xf32, #tpu.memory_space<vmem>>, vector<1x384x128xf32>
    %54 = vector.shape_cast %53 : vector<1x384x128xf32> to vector<384x128xf32>
    %cst_17 = arith.constant dense<0.000000e+00> : vector<64x128xf32>
    %55 = tpu.matmul %52, %54, %cst_17 {dimension_numbers = #tpu.dot_dimension_numbers<[1], [0], [0], [1], [0, 0, 1, 1], [], []>} : vector<64x384xf32>, vector<384x128xf32>, vector<64x128xf32> -> vector<64x128xf32>
    %56 = arith.addf %35, %55 : vector<64x128xf32>
    %c1_i32_18 = arith.constant 1 : i32
    %57 = vector.broadcast %c1_i32_18 : i32 to vector<64x1xi32>
    %58 = arith.cmpi sge, %18, %57 : vector<64x1xi32>
    %c1_i32_19 = arith.constant 1 : i32
    %59 = tpu.dynamic_rotate %1 by %c1_i32_19 dim 0 : vector<64x128xf32>, i32 -> vector<64x128xf32>
    %c0_i32_20 = arith.constant 0 : i32
    %60 = arith.sitofp %c0_i32_20 : i32 to f32
    %61 = vector.shape_cast %58 : vector<64x1xi1> to vector<64x1xi1>
    %62 = vector.broadcast %61 : vector<64x1xi1> to vector<64x128xi1>
    %63 = vector.broadcast %60 : f32 to vector<64x128xf32>
    %64 = arith.select %62, %59, %63 : vector<64x128xi1>, vector<64x128xf32>
    %c7_i32_21 = arith.constant 7 : i32
    %65 = vector.broadcast %c7_i32_21 : i32 to vector<64x1xi32>
    %66 = arith.cmpi slt, %18, %65 : vector<64x1xi32>
    %c63_i32_22 = arith.constant 63 : i32
    %67 = tpu.dynamic_rotate %1 by %c63_i32_22 dim 0 : vector<64x128xf32>, i32 -> vector<64x128xf32>
    %c0_i32_23 = arith.constant 0 : i32
    %68 = arith.sitofp %c0_i32_23 : i32 to f32
    %69 = vector.shape_cast %66 : vector<64x1xi1> to vector<64x1xi1>
    %70 = vector.broadcast %69 : vector<64x1xi1> to vector<64x128xi1>
    %71 = vector.broadcast %68 : f32 to vector<64x128xf32>
    %72 = arith.select %70, %67, %71 : vector<64x128xi1>, vector<64x128xf32>
    %73 = tpu.concatenate %64, %1, %72 in 1 : vector<64x128xf32>, vector<64x128xf32>, vector<64x128xf32> -> vector<64x384xf32>
    %c1 = arith.constant 1 : index
    %c0_24 = arith.constant 0 : index
    %c0_25 = arith.constant 0 : index
    %74 = vector.load %arg3[%c1, %c0_24, %c0_25] : memref<3x384x128xf32, #tpu.memory_space<vmem>>, vector<1x384x128xf32>
    %75 = vector.shape_cast %74 : vector<1x384x128xf32> to vector<384x128xf32>
    %cst_26 = arith.constant dense<0.000000e+00> : vector<64x128xf32>
    %76 = tpu.matmul %73, %75, %cst_26 {dimension_numbers = #tpu.dot_dimension_numbers<[1], [0], [0], [1], [0, 0, 1, 1], [], []>} : vector<64x384xf32>, vector<384x128xf32>, vector<64x128xf32> -> vector<64x128xf32>
    %77 = arith.addf %56, %76 : vector<64x128xf32>
    %c1_i32_27 = arith.constant 1 : i32
    %78 = vector.broadcast %c1_i32_27 : i32 to vector<64x1xi32>
    %79 = arith.cmpi sge, %18, %78 : vector<64x1xi32>
    %c1_i32_28 = arith.constant 1 : i32
    %80 = tpu.dynamic_rotate %34 by %c1_i32_28 dim 0 : vector<64x128xf32>, i32 -> vector<64x128xf32>
    %c0_i32_29 = arith.constant 0 : i32
    %81 = arith.sitofp %c0_i32_29 : i32 to f32
    %82 = vector.shape_cast %79 : vector<64x1xi1> to vector<64x1xi1>
    %83 = vector.broadcast %82 : vector<64x1xi1> to vector<64x128xi1>
    %84 = vector.broadcast %81 : f32 to vector<64x128xf32>
    %85 = arith.select %83, %80, %84 : vector<64x128xi1>, vector<64x128xf32>
    %c7_i32_30 = arith.constant 7 : i32
    %86 = vector.broadcast %c7_i32_30 : i32 to vector<64x1xi32>
    %87 = arith.cmpi slt, %18, %86 : vector<64x1xi32>
    %c63_i32_31 = arith.constant 63 : i32
    %88 = tpu.dynamic_rotate %34 by %c63_i32_31 dim 0 : vector<64x128xf32>, i32 -> vector<64x128xf32>
    %c0_i32_32 = arith.constant 0 : i32
    %89 = arith.sitofp %c0_i32_32 : i32 to f32
    %90 = vector.shape_cast %87 : vector<64x1xi1> to vector<64x1xi1>
    %91 = vector.broadcast %90 : vector<64x1xi1> to vector<64x128xi1>
    %92 = vector.broadcast %89 : f32 to vector<64x128xf32>
    %93 = arith.select %91, %88, %92 : vector<64x128xi1>, vector<64x128xf32>
    %94 = tpu.concatenate %85, %34, %93 in 1 : vector<64x128xf32>, vector<64x128xf32>, vector<64x128xf32> -> vector<64x384xf32>
    %c2 = arith.constant 2 : index
    %c0_33 = arith.constant 0 : index
    %c0_34 = arith.constant 0 : index
    %95 = vector.load %arg3[%c2, %c0_33, %c0_34] : memref<3x384x128xf32, #tpu.memory_space<vmem>>, vector<1x384x128xf32>
    %96 = vector.shape_cast %95 : vector<1x384x128xf32> to vector<384x128xf32>
    %cst_35 = arith.constant dense<0.000000e+00> : vector<64x128xf32>
    %97 = tpu.matmul %94, %96, %cst_35 {dimension_numbers = #tpu.dot_dimension_numbers<[1], [0], [0], [1], [0, 0, 1, 1], [], []>} : vector<64x384xf32>, vector<384x128xf32>, vector<64x128xf32> -> vector<64x128xf32>
    %98 = arith.addf %77, %97 : vector<64x128xf32>
    %c0_36 = arith.constant 0 : index
    %c0_37 = arith.constant 0 : index
    %99 = vector.load %arg4[%c0_36, %c0_37] : memref<1x128xf32, #tpu.memory_space<vmem>>, vector<1x128xf32>
    %100 = vector.shape_cast %99 : vector<1x128xf32> to vector<128xf32>
    %101 = vector.shape_cast %100 : vector<128xf32> to vector<1x128xf32>
    %102 = vector.broadcast %101 : vector<1x128xf32> to vector<64x128xf32>
    %103 = arith.addf %98, %102 : vector<64x128xf32>
    %cst_38 = arith.constant 0.000000e+00 : f32
    %104 = vector.broadcast %cst_38 : f32 to vector<64x128xf32>
    %105 = arith.maximumf %103, %104 : vector<64x128xf32>
    %106 = vector.shape_cast %105 : vector<64x128xf32> to vector<4x2x8x128xf32>
    %107 = vector.extract_strided_slice %106 {offsets = [0, 0, 0, 0], sizes = [4, 1, 8, 128], strides = [1, 1, 1, 1]} : vector<4x2x8x128xf32> to vector<4x1x8x128xf32>
    %108 = vector.shape_cast %107 : vector<4x1x8x128xf32> to vector<4x8x128xf32>
    %109 = vector.extract_strided_slice %106 {offsets = [0, 1, 0, 0], sizes = [4, 1, 8, 128], strides = [1, 1, 1, 1]} : vector<4x2x8x128xf32> to vector<4x1x8x128xf32>
    %110 = vector.shape_cast %109 : vector<4x1x8x128xf32> to vector<4x8x128xf32>
    %111 = arith.maximumf %108, %110 : vector<4x8x128xf32>
    %c0_39 = arith.constant 0 : index
    %c0_40 = arith.constant 0 : index
    %c0_41 = arith.constant 0 : index
    %112 = vector.load %arg6[%c0_39, %c0_40, %c0_41] : memref<4x8x128xf32, #tpu.memory_space<vmem>>, vector<4x8x128xf32>
    tpu.vector_store %arg6[%c0_39, %c0_40, %c0_41], %111 {strides = array<i32>} : memref<4x8x128xf32, #tpu.memory_space<vmem>>, vector<4x8x128xf32>,
    %c0_42 = arith.constant 0 : index
    %c0_43 = arith.constant 0 : index
    %c0_44 = arith.constant 0 : index
    %113 = tpu.strided_load %arg6[%c0_42, %c0_43, %c0_44] {strides = array<i32: 1, 2, 1>} : memref<4x8x128xf32, #tpu.memory_space<vmem>>, vector<4x4x128xf32>
    %c0_45 = arith.constant 0 : index
    %c1_46 = arith.constant 1 : index
    %c0_47 = arith.constant 0 : index
    %114 = tpu.strided_load %arg6[%c0_45, %c1_46, %c0_47] {strides = array<i32: 1, 2, 1>} : memref<4x8x128xf32, #tpu.memory_space<vmem>>, vector<4x4x128xf32>
    %115 = arith.maximumf %113, %114 : vector<4x4x128xf32>
    %116 = vector.shape_cast %115 : vector<4x4x128xf32> to vector<16x128xf32>
    %c0_48 = arith.constant 0 : index
    %c0_49 = arith.constant 0 : index
    %c0_50 = arith.constant 0 : index
    %117 = vector.load %arg5[%c0_48, %c0_49, %c0_50] : memref<1x16x128xf32, #tpu.memory_space<vmem>>, vector<1x16x128xf32>
    %118 = vector.shape_cast %117 : vector<1x16x128xf32> to vector<16x128xf32>
    %119 = vector.shape_cast %116 : vector<16x128xf32> to vector<1x16x128xf32>
    tpu.vector_store %arg5[%c0_48, %c0_49, %c0_50], %119 {strides = array<i32>} : memref<1x16x128xf32, #tpu.memory_space<vmem>>, vector<1x16x128xf32>,
    return
  }
  func.func @transform_0(%arg0: i32, %arg1: i32) -> (i32, i32, i32) {
    %c0_i32 = arith.constant 0 : i32
    %c0_i32_0 = arith.constant 0 : i32
    return %arg0, %arg1, %c0_i32 : i32, i32, i32
  }
  func.func @transform_1(%arg0: i32, %arg1: i32) -> (i32, i32, i32) {
    %c0_i32 = arith.constant 0 : i32
    %c0_i32_0 = arith.constant 0 : i32
    %c0_i32_1 = arith.constant 0 : i32
    %c0_i32_2 = arith.constant 0 : i32
    return %c0_i32, %c0_i32_0, %c0_i32_1 : i32, i32, i32
  }
  func.func @transform_2(%arg0: i32, %arg1: i32) -> (i32, i32) {
    %c0_i32 = arith.constant 0 : i32
    %c0_i32_0 = arith.constant 0 : i32
    %c0_i32_1 = arith.constant 0 : i32
    return %c0_i32, %c0_i32_0 : i32, i32
  }
  func.func @transform_3(%arg0: i32, %arg1: i32) -> (i32, i32, i32) {
    %c0_i32 = arith.constant 0 : i32
    %c0_i32_0 = arith.constant 0 : i32
    return %arg0, %arg1, %c0_i32 : i32, i32, i32
  }
}

module attributes {stable_mosaic.version = 11 : i64} {
  func.func @_conv3x3_kernel(%arg0: i32, %arg1: i32, %arg2: memref<1x16x128xf32, #tpu.memory_space<vmem>>, %arg3: memref<3x384x256xf32, #tpu.memory_space<vmem>>, %arg4: memref<1x256xf32, #tpu.memory_space<vmem>>, %arg5: memref<1x16x256xf32, #tpu.memory_space<vmem>>) attributes {dimension_semantics = [#tpu.dimension_semantics<parallel>, #tpu.dimension_semantics<parallel>], iteration_bounds = array<i64: 2, 1>, scalar_prefetch = 0 : i64, scratch_operands = 0 : i64, tpu.core_type = #tpu.core_type<tc>, window_params = [{transform_indices = @transform_0, window_bounds = array<i64: 1, 16, 128>}, {pipeline_mode = #tpu.pipeline_mode<synchronous>, transform_indices = @transform_1, window_bounds = array<i64: 3, 384, 256>}, {pipeline_mode = #tpu.pipeline_mode<synchronous>, transform_indices = @transform_2, window_bounds = array<i64: 1, 256>}, {transform_indices = @transform_3, window_bounds = array<i64: 1, 16, 256>}]} {
    %c0 = arith.constant 0 : index
    %c0_0 = arith.constant 0 : index
    %c0_1 = arith.constant 0 : index
    %0 = vector.load %arg2[%c0, %c0_0, %c0_1] : memref<1x16x128xf32, #tpu.memory_space<vmem>>, vector<1x16x128xf32>
    %1 = vector.shape_cast %0 : vector<1x16x128xf32> to vector<16x128xf32>
    %2 = tpu.iota {dimensions = array<i32: 0>} : vector<16x1xi32>
    %c4_i32 = arith.constant 4 : i32
    %c0_i32 = arith.constant 0 : i32
    %3 = arith.cmpi eq, %c4_i32, %c0_i32 : i32
    %c1_i32 = arith.constant 1 : i32
    %4 = arith.select %3, %c1_i32, %c4_i32 : i32
    %5 = vector.broadcast %4 : i32 to vector<16x1xi32>
    %6 = arith.remsi %2, %5 : vector<16x1xi32>
    %c0_i32_2 = arith.constant 0 : i32
    %7 = vector.broadcast %c0_i32_2 : i32 to vector<16x1xi32>
    %8 = arith.cmpi ne, %6, %7 : vector<16x1xi32>
    %c0_i32_3 = arith.constant 0 : i32
    %9 = vector.broadcast %c0_i32_3 : i32 to vector<16x1xi32>
    %10 = arith.cmpi slt, %6, %9 : vector<16x1xi32>
    %c0_i32_4 = arith.constant 0 : i32
    %11 = arith.cmpi slt, %4, %c0_i32_4 : i32
    %12 = vector.broadcast %11 : i1 to vector<16x1xi1>
    %13 = vector.broadcast %12 : vector<16x1xi1> to vector<16x1xi1>
    %14 = arith.xori %10, %13 : vector<16x1xi1>
    %15 = arith.andi %14, %8 : vector<16x1xi1>
    %16 = vector.broadcast %4 : i32 to vector<16x1xi32>
    %17 = arith.addi %6, %16 : vector<16x1xi32>
    %18 = arith.select %15, %17, %6 : vector<16x1xi1>, vector<16x1xi32>
    %c4_i32_5 = arith.constant 4 : i32
    %19 = vector.broadcast %c4_i32_5 : i32 to vector<16x1xi32>
    %20 = arith.cmpi sge, %2, %19 : vector<16x1xi32>
    %c4_i32_6 = arith.constant 4 : i32
    %21 = tpu.dynamic_rotate %1 by %c4_i32_6 dim 0 : vector<16x128xf32>, i32 -> vector<16x128xf32>
    %c0_i32_7 = arith.constant 0 : i32
    %22 = arith.sitofp %c0_i32_7 : i32 to f32
    %23 = vector.shape_cast %20 : vector<16x1xi1> to vector<16x1xi1>
    %24 = vector.broadcast %23 : vector<16x1xi1> to vector<16x128xi1>
    %25 = vector.broadcast %22 : f32 to vector<16x128xf32>
    %26 = arith.select %24, %21, %25 : vector<16x128xi1>, vector<16x128xf32>
    %c12_i32 = arith.constant 12 : i32
    %27 = vector.broadcast %c12_i32 : i32 to vector<16x1xi32>
    %28 = arith.cmpi slt, %2, %27 : vector<16x1xi32>
    %c12_i32_8 = arith.constant 12 : i32
    %29 = tpu.dynamic_rotate %1 by %c12_i32_8 dim 0 : vector<16x128xf32>, i32 -> vector<16x128xf32>
    %c0_i32_9 = arith.constant 0 : i32
    %30 = arith.sitofp %c0_i32_9 : i32 to f32
    %31 = vector.shape_cast %28 : vector<16x1xi1> to vector<16x1xi1>
    %32 = vector.broadcast %31 : vector<16x1xi1> to vector<16x128xi1>
    %33 = vector.broadcast %30 : f32 to vector<16x128xf32>
    %34 = arith.select %32, %29, %33 : vector<16x128xi1>, vector<16x128xf32>
    %cst = arith.constant 0.000000e+00 : f32
    %35 = vector.broadcast %cst : f32 to vector<16x256xf32>
    %c1_i32_10 = arith.constant 1 : i32
    %36 = vector.broadcast %c1_i32_10 : i32 to vector<16x1xi32>
    %37 = arith.cmpi sge, %18, %36 : vector<16x1xi32>
    %c1_i32_11 = arith.constant 1 : i32
    %38 = tpu.dynamic_rotate %26 by %c1_i32_11 dim 0 : vector<16x128xf32>, i32 -> vector<16x128xf32>
    %c0_i32_12 = arith.constant 0 : i32
    %39 = arith.sitofp %c0_i32_12 : i32 to f32
    %40 = vector.shape_cast %37 : vector<16x1xi1> to vector<16x1xi1>
    %41 = vector.broadcast %40 : vector<16x1xi1> to vector<16x128xi1>
    %42 = vector.broadcast %39 : f32 to vector<16x128xf32>
    %43 = arith.select %41, %38, %42 : vector<16x128xi1>, vector<16x128xf32>
    %c3_i32 = arith.constant 3 : i32
    %44 = vector.broadcast %c3_i32 : i32 to vector<16x1xi32>
    %45 = arith.cmpi slt, %18, %44 : vector<16x1xi32>
    %c15_i32 = arith.constant 15 : i32
    %46 = tpu.dynamic_rotate %26 by %c15_i32 dim 0 : vector<16x128xf32>, i32 -> vector<16x128xf32>
    %c0_i32_13 = arith.constant 0 : i32
    %47 = arith.sitofp %c0_i32_13 : i32 to f32
    %48 = vector.shape_cast %45 : vector<16x1xi1> to vector<16x1xi1>
    %49 = vector.broadcast %48 : vector<16x1xi1> to vector<16x128xi1>
    %50 = vector.broadcast %47 : f32 to vector<16x128xf32>
    %51 = arith.select %49, %46, %50 : vector<16x128xi1>, vector<16x128xf32>
    %52 = tpu.concatenate %43, %26, %51 in 1 : vector<16x128xf32>, vector<16x128xf32>, vector<16x128xf32> -> vector<16x384xf32>
    %c0_14 = arith.constant 0 : index
    %c0_15 = arith.constant 0 : index
    %c0_16 = arith.constant 0 : index
    %53 = vector.load %arg3[%c0_14, %c0_15, %c0_16] : memref<3x384x256xf32, #tpu.memory_space<vmem>>, vector<1x384x256xf32>
    %54 = vector.shape_cast %53 : vector<1x384x256xf32> to vector<384x256xf32>
    %cst_17 = arith.constant dense<0.000000e+00> : vector<16x256xf32>
    %55 = tpu.matmul %52, %54, %cst_17 {dimension_numbers = #tpu.dot_dimension_numbers<[1], [0], [0], [1], [0, 0, 1, 1], [], []>} : vector<16x384xf32>, vector<384x256xf32>, vector<16x256xf32> -> vector<16x256xf32>
    %56 = arith.addf %35, %55 : vector<16x256xf32>
    %c1_i32_18 = arith.constant 1 : i32
    %57 = vector.broadcast %c1_i32_18 : i32 to vector<16x1xi32>
    %58 = arith.cmpi sge, %18, %57 : vector<16x1xi32>
    %c1_i32_19 = arith.constant 1 : i32
    %59 = tpu.dynamic_rotate %1 by %c1_i32_19 dim 0 : vector<16x128xf32>, i32 -> vector<16x128xf32>
    %c0_i32_20 = arith.constant 0 : i32
    %60 = arith.sitofp %c0_i32_20 : i32 to f32
    %61 = vector.shape_cast %58 : vector<16x1xi1> to vector<16x1xi1>
    %62 = vector.broadcast %61 : vector<16x1xi1> to vector<16x128xi1>
    %63 = vector.broadcast %60 : f32 to vector<16x128xf32>
    %64 = arith.select %62, %59, %63 : vector<16x128xi1>, vector<16x128xf32>
    %c3_i32_21 = arith.constant 3 : i32
    %65 = vector.broadcast %c3_i32_21 : i32 to vector<16x1xi32>
    %66 = arith.cmpi slt, %18, %65 : vector<16x1xi32>
    %c15_i32_22 = arith.constant 15 : i32
    %67 = tpu.dynamic_rotate %1 by %c15_i32_22 dim 0 : vector<16x128xf32>, i32 -> vector<16x128xf32>
    %c0_i32_23 = arith.constant 0 : i32
    %68 = arith.sitofp %c0_i32_23 : i32 to f32
    %69 = vector.shape_cast %66 : vector<16x1xi1> to vector<16x1xi1>
    %70 = vector.broadcast %69 : vector<16x1xi1> to vector<16x128xi1>
    %71 = vector.broadcast %68 : f32 to vector<16x128xf32>
    %72 = arith.select %70, %67, %71 : vector<16x128xi1>, vector<16x128xf32>
    %73 = tpu.concatenate %64, %1, %72 in 1 : vector<16x128xf32>, vector<16x128xf32>, vector<16x128xf32> -> vector<16x384xf32>
    %c1 = arith.constant 1 : index
    %c0_24 = arith.constant 0 : index
    %c0_25 = arith.constant 0 : index
    %74 = vector.load %arg3[%c1, %c0_24, %c0_25] : memref<3x384x256xf32, #tpu.memory_space<vmem>>, vector<1x384x256xf32>
    %75 = vector.shape_cast %74 : vector<1x384x256xf32> to vector<384x256xf32>
    %cst_26 = arith.constant dense<0.000000e+00> : vector<16x256xf32>
    %76 = tpu.matmul %73, %75, %cst_26 {dimension_numbers = #tpu.dot_dimension_numbers<[1], [0], [0], [1], [0, 0, 1, 1], [], []>} : vector<16x384xf32>, vector<384x256xf32>, vector<16x256xf32> -> vector<16x256xf32>
    %77 = arith.addf %56, %76 : vector<16x256xf32>
    %c1_i32_27 = arith.constant 1 : i32
    %78 = vector.broadcast %c1_i32_27 : i32 to vector<16x1xi32>
    %79 = arith.cmpi sge, %18, %78 : vector<16x1xi32>
    %c1_i32_28 = arith.constant 1 : i32
    %80 = tpu.dynamic_rotate %34 by %c1_i32_28 dim 0 : vector<16x128xf32>, i32 -> vector<16x128xf32>
    %c0_i32_29 = arith.constant 0 : i32
    %81 = arith.sitofp %c0_i32_29 : i32 to f32
    %82 = vector.shape_cast %79 : vector<16x1xi1> to vector<16x1xi1>
    %83 = vector.broadcast %82 : vector<16x1xi1> to vector<16x128xi1>
    %84 = vector.broadcast %81 : f32 to vector<16x128xf32>
    %85 = arith.select %83, %80, %84 : vector<16x128xi1>, vector<16x128xf32>
    %c3_i32_30 = arith.constant 3 : i32
    %86 = vector.broadcast %c3_i32_30 : i32 to vector<16x1xi32>
    %87 = arith.cmpi slt, %18, %86 : vector<16x1xi32>
    %c15_i32_31 = arith.constant 15 : i32
    %88 = tpu.dynamic_rotate %34 by %c15_i32_31 dim 0 : vector<16x128xf32>, i32 -> vector<16x128xf32>
    %c0_i32_32 = arith.constant 0 : i32
    %89 = arith.sitofp %c0_i32_32 : i32 to f32
    %90 = vector.shape_cast %87 : vector<16x1xi1> to vector<16x1xi1>
    %91 = vector.broadcast %90 : vector<16x1xi1> to vector<16x128xi1>
    %92 = vector.broadcast %89 : f32 to vector<16x128xf32>
    %93 = arith.select %91, %88, %92 : vector<16x128xi1>, vector<16x128xf32>
    %94 = tpu.concatenate %85, %34, %93 in 1 : vector<16x128xf32>, vector<16x128xf32>, vector<16x128xf32> -> vector<16x384xf32>
    %c2 = arith.constant 2 : index
    %c0_33 = arith.constant 0 : index
    %c0_34 = arith.constant 0 : index
    %95 = vector.load %arg3[%c2, %c0_33, %c0_34] : memref<3x384x256xf32, #tpu.memory_space<vmem>>, vector<1x384x256xf32>
    %96 = vector.shape_cast %95 : vector<1x384x256xf32> to vector<384x256xf32>
    %cst_35 = arith.constant dense<0.000000e+00> : vector<16x256xf32>
    %97 = tpu.matmul %94, %96, %cst_35 {dimension_numbers = #tpu.dot_dimension_numbers<[1], [0], [0], [1], [0, 0, 1, 1], [], []>} : vector<16x384xf32>, vector<384x256xf32>, vector<16x256xf32> -> vector<16x256xf32>
    %98 = arith.addf %77, %97 : vector<16x256xf32>
    %c0_36 = arith.constant 0 : index
    %c0_37 = arith.constant 0 : index
    %99 = vector.load %arg4[%c0_36, %c0_37] : memref<1x256xf32, #tpu.memory_space<vmem>>, vector<1x256xf32>
    %100 = vector.shape_cast %99 : vector<1x256xf32> to vector<256xf32>
    %101 = vector.shape_cast %100 : vector<256xf32> to vector<1x256xf32>
    %102 = vector.broadcast %101 : vector<1x256xf32> to vector<16x256xf32>
    %103 = arith.addf %98, %102 : vector<16x256xf32>
    %cst_38 = arith.constant 0.000000e+00 : f32
    %104 = vector.broadcast %cst_38 : f32 to vector<16x256xf32>
    %105 = arith.maximumf %103, %104 : vector<16x256xf32>
    %c0_39 = arith.constant 0 : index
    %c0_40 = arith.constant 0 : index
    %c0_41 = arith.constant 0 : index
    %106 = vector.load %arg5[%c0_39, %c0_40, %c0_41] : memref<1x16x256xf32, #tpu.memory_space<vmem>>, vector<1x16x256xf32>
    %107 = vector.shape_cast %106 : vector<1x16x256xf32> to vector<16x256xf32>
    %108 = vector.shape_cast %105 : vector<16x256xf32> to vector<1x16x256xf32>
    tpu.vector_store %arg5[%c0_39, %c0_40, %c0_41], %108 {strides = array<i32>} : memref<1x16x256xf32, #tpu.memory_space<vmem>>, vector<1x16x256xf32>,
    return
  }
  func.func @transform_0(%arg0: i32, %arg1: i32) -> (i32, i32, i32) {
    %c0_i32 = arith.constant 0 : i32
    %c0_i32_0 = arith.constant 0 : i32
    return %arg0, %arg1, %c0_i32 : i32, i32, i32
  }
  func.func @transform_1(%arg0: i32, %arg1: i32) -> (i32, i32, i32) {
    %c0_i32 = arith.constant 0 : i32
    %c0_i32_0 = arith.constant 0 : i32
    %c0_i32_1 = arith.constant 0 : i32
    %c0_i32_2 = arith.constant 0 : i32
    return %c0_i32, %c0_i32_0, %c0_i32_1 : i32, i32, i32
  }
  func.func @transform_2(%arg0: i32, %arg1: i32) -> (i32, i32) {
    %c0_i32 = arith.constant 0 : i32
    %c0_i32_0 = arith.constant 0 : i32
    %c0_i32_1 = arith.constant 0 : i32
    return %c0_i32, %c0_i32_0 : i32, i32
  }
  func.func @transform_3(%arg0: i32, %arg1: i32) -> (i32, i32, i32) {
    %c0_i32 = arith.constant 0 : i32
    %c0_i32_0 = arith.constant 0 : i32
    return %arg0, %arg1, %c0_i32 : i32, i32, i32
  }
}

</mosaic_0001>

<bundles_post_ra>
// kernel: fe_forward.5
= control target key start
LH: loop header
LB: loop body
LE: loop exit
PB: predicated region body
PF: predicated region fallthrough
CT: control target
= control target key end

     0   :  { %s941_s12 = smov 0   ;;  %s943_s13 = smov 0   ;;  %s1162_s0 = inlined_call_operand.vmem [shape: f32[2,256,32], index: 0, kind: input, shape index: {}]   ;;  %s1163_s1 = inlined_call_operand.vmem [shape: f32[32,64], index: 1, kind: input, shape index: {}]   ;;  %s1164_s2 = inlined_call_operand.vmem [shape: f32[1,64], index: 2, kind: input, shape index: {}]   ;;  %s1165_s3 = inlined_call_operand.vmem [shape: f32[2,256,64], index: 3, kind: output, shape index: {}]  }
   0x1   :  { %s945_s14 = smov 0  }
   0x2 LB: > { %s25_s15 = sadd.s32 1, %s915_s13  ;;  %p731_p0 = scmp.ge.s32.totalorder %s919_s14, 1  ;;  %s919_s14 = sphi %s945_s14, %s13_s14   ;;  %s915_s13 = sphi %s943_s13, %s1167_s13   ;;  %s911_s12 = sphi %s941_s12, %s1166_s12  }
   0x3   : > { %p27_p1 = scmp.ge.s32.totalorder %s25_s15, 2  ;;  %p158_p2 = scmp.lt.s32.totalorder %s919_s14, 3 }
   0x5   : > { %s1169_s15 = smov (%p27_p1, %s25_s15), 0  ;;  %p159_p3 = pnand %p731_p0, %p158_p2 }
   0x6   : > { %p191_p4 = scmp.lt.s32.totalorder (!%p159_p3), %s911_s12, 1 }
   0x7   : > { %162 = sbr.rel (%p159_p3) target bundleno = 250 (0xfa), region = 32 }
   0xc   : > { %v245_v0 = vld [vmem:[%s1163_s1 + $0x18] sm:$0xff]  ;;  %v244_v1 = vld [vmem:[%s1163_s1 + $0x10] sm:$0xff]  ;;  %v243_v2 = vld [vmem:[%s1163_s1 + $0x8] sm:$0xff]  ;;  %s1171_s12 = smov (!%p191_p4, %s911_s12), 1  ;;  %vm253_vm0 = vcmask 261120   ;;  %vm607_vm1 = vcmask 523264  }
   0xd   : > { %809 = vmatprep.subr.mxu0 %v245_v0  ;;  %865 = vmatprep.subr.mxu1 %v245_v0  ;;  %v242_v3 = vld [vmem:[%s1163_s1] sm:$0xff]  ;;  %s771_s24 = sshll.u32 %s1171_s12, 8 }
   0xe   : > { %810 = vmatpush3.msra.mxu0 %v245_v0  ;;  %869 = vmatpush3.msra.mxu1 %v245_v0  ;;  %s979_s27 = scalar_lea.vmem %s1162_s0, %s771_s24  ;;  %v1048_v36 = vld [vmem:[%s1164_s2] ss:$0 sm:$0xff]  ;;  %s1057_s5 = scalar_lea.vmem %s1165_s3, %s771_s24 }
   0xf   : > { %811 = vmatprep.subr.mxu0 %v244_v1  ;;  %866 = vmatprep.subr.mxu1 %v244_v1  ;;  %v210_v4 = vld [vmem:[%s979_s27] sm:$0xff]  ;;  %v211_v6 = vld [vmem:[%s979_s27 + $0x8] sm:$0xff]  ;;  %v212_v8 = vld [vmem:[%s979_s27 + $0x10] sm:$0xff] }
  0x10   : > { %812 = vmatpush3.msra.mxu0 %v244_v1  ;;  %870 = vmatpush3.msra.mxu1 %v244_v1  ;;  %v226_v5 = vld [vmem:[%s979_s27 + $0x80] sm:$0xff]  ;;  %v227_v7 = vld [vmem:[%s979_s27 + $0x88] sm:$0xff]  ;;  %v228_v9 = vld [vmem:[%s979_s27 + $0x90] sm:$0xff] }
  0x11   : > { %813 = vmatprep.subr.mxu0 %v243_v2  ;;  %867 = vmatprep.subr.mxu1 %v243_v2  ;;  %v213_v10 = vld [vmem:[%s979_s27 + $0x18] sm:$0xff]  ;;  %v214_v12 = vld [vmem:[%s979_s27 + $0x20] sm:$0xff]  ;;  %v215_v14 = vld [vmem:[%s979_s27 + $0x28] sm:$0xff] }
  0x12   : > { %814 = vmatpush3.msra.mxu0 %v243_v2  ;;  %871 = vmatpush3.msra.mxu1 %v243_v2  ;;  %v229_v11 = vld [vmem:[%s979_s27 + $0x98] sm:$0xff]  ;;  %v230_v13 = vld [vmem:[%s979_s27 + $0xa0] sm:$0xff]  ;;  %v231_v15 = vld [vmem:[%s979_s27 + $0xa8] sm:$0xff] }
  0x13   : > { %815 = vmatprep.subr.mxu0 %v242_v3  ;;  %868 = vmatprep.subr.mxu1 %v242_v3  ;;  %v216_v16 = vld [vmem:[%s979_s27 + $0x30] sm:$0xff]  ;;  %v217_v18 = vld [vmem:[%s979_s27 + $0x38] sm:$0xff]  ;;  %v218_v20 = vld [vmem:[%s979_s27 + $0x40] sm:$0xff] }
  0x14   : > { %816 = vmatpush3.msra.mxu0 %v242_v3  ;;  %872 = vmatpush3.msra.mxu1 %v242_v3  ;;  %v232_v17 = vld [vmem:[%s979_s27 + $0xb0] sm:$0xff]  ;;  %v233_v19 = vld [vmem:[%s979_s27 + $0xb8] sm:$0xff]  ;;  %v234_v21 = vld [vmem:[%s979_s27 + $0xc0] sm:$0xff] }
  0x15   : > { %817 = vmatprep.mubr.msk.f32.mxu0 %vm253_vm0, %v210_v4  ;;  %841 = vmatprep.mubr.msk.f32.mxu1 %vm253_vm0, %v226_v5  ;;  %v219_v22 = vld [vmem:[%s979_s27 + $0x48] sm:$0xff]  ;;  %v220_v24 = vld [vmem:[%s979_s27 + $0x50] sm:$0xff]  ;;  %v221_v26 = vld [vmem:[%s979_s27 + $0x58] sm:$0xff] }
  0x16   : > { %818 = vmatmul.mubr.msk.f32.vlgmr.msra.gmra.mxu0 %vm253_vm0, %v211_v6  ;;  %842 = vmatmul.mubr.msk.f32.vlgmr.msra.gmra.mxu1 %vm253_vm0, %v227_v7  ;;  %v235_v23 = vld [vmem:[%s979_s27 + $0xc8] sm:$0xff]  ;;  %v236_v25 = vld [vmem:[%s979_s27 + $0xd0] sm:$0xff]  ;;  %v237_v27 = vld [vmem:[%s979_s27 + $0xd8] sm:$0xff] }
  0x17   : > { %820 = vmatprep.mubr.msk.f32.mxu0 %vm253_vm0, %v212_v8  ;;  %844 = vmatprep.mubr.msk.f32.mxu1 %vm253_vm0, %v228_v9  ;;  %v222_v28 = vld [vmem:[%s979_s27 + $0x60] sm:$0xff]  ;;  %v223_v30 = vld [vmem:[%s979_s27 + $0x68] sm:$0xff]  ;;  %v224_v32 = vld [vmem:[%s979_s27 + $0x70] sm:$0xff] }
  0x18   : > { %v238_v29 = vld [vmem:[%s979_s27 + $0xe0] sm:$0xff]  ;;  %v239_v31 = vld [vmem:[%s979_s27 + $0xe8] sm:$0xff]  ;;  %v240_v33 = vld [vmem:[%s979_s27 + $0xf0] sm:$0xff] }
  0x19   : > { %v225_v34 = vld [vmem:[%s979_s27 + $0x78] sm:$0xff] }
  0x1a   : > { %821 = vmatmul.mubr.msk.f32.gmra.mxu0 %vm253_vm0, %v213_v10  ;;  %845 = vmatmul.mubr.msk.f32.gmra.mxu1 %vm253_vm0, %v229_v11  ;;  %v241_v35 = vld [vmem:[%s979_s27 + $0xf8] sm:$0xff] }
  0x1b   : > { %823 = vmatprep.mubr.msk.f32.mxu0 %vm253_vm0, %v214_v12  ;;  %847 = vmatprep.mubr.msk.f32.mxu1 %vm253_vm0, %v230_v13 }
  0x1e   : > { %824 = vmatmul.mubr.msk.f32.gmra.mxu0 %vm253_vm0, %v215_v14  ;;  %848 = vmatmul.mubr.msk.f32.gmra.mxu1 %vm253_vm0, %v231_v15 }
  0x1f   : > { %826 = vmatprep.mubr.msk.f32.mxu0 %vm253_vm0, %v216_v16  ;;  %850 = vmatprep.mubr.msk.f32.mxu1 %vm253_vm0, %v232_v17 }
  0x22   : > { %827 = vmatmul.mubr.msk.f32.gmra.mxu0 %vm253_vm0, %v217_v18  ;;  %851 = vmatmul.mubr.msk.f32.gmra.mxu1 %vm253_vm0, %v233_v19 }
  0x23   : > { %829 = vmatprep.mubr.msk.f32.mxu0 %vm253_vm0, %v218_v20  ;;  %853 = vmatprep.mubr.msk.f32.mxu1 %vm253_vm0, %v234_v21 }
  0x26   : > { %830 = vmatmul.mubr.msk.f32.gmra.mxu0 %vm253_vm0, %v219_v22  ;;  %854 = vmatmul.mubr.msk.f32.gmra.mxu1 %vm253_vm0, %v235_v23 }
  0x27   : > { %832 = vmatprep.mubr.msk.f32.mxu0 %vm253_vm0, %v220_v24  ;;  %856 = vmatprep.mubr.msk.f32.mxu1 %vm253_vm0, %v236_v25 }
  0x2a   : > { %833 = vmatmul.mubr.msk.f32.gmra.mxu0 %vm253_vm0, %v221_v26  ;;  %857 = vmatmul.mubr.msk.f32.gmra.mxu1 %vm253_vm0, %v237_v27 }
  0x2b   : > { %835 = vmatprep.mubr.msk.f32.mxu0 %vm253_vm0, %v222_v28  ;;  %859 = vmatprep.mubr.msk.f32.mxu1 %vm253_vm0, %v238_v29 }
  0x2e   : > { %836 = vmatmul.mubr.msk.f32.gmra.mxu0 %vm253_vm0, %v223_v30  ;;  %860 = vmatmul.mubr.msk.f32.gmra.mxu1 %vm253_vm0, %v239_v31 }
  0x2f   : > { %838 = vmatprep.mubr.msk.f32.mxu0 %vm253_vm0, %v224_v32  ;;  %862 = vmatprep.mubr.msk.f32.mxu1 %vm253_vm0, %v240_v33 }
  0x32   : > { %839 = vmatmul.mubr.msk.f32.gmra.mxu0 %vm253_vm0, %v225_v34  ;;  %863 = vmatmul.mubr.msk.f32.gmra.mxu1 %vm253_vm0, %v241_v35 }
  0xd6   : > { %v819_v37 = vpop.f32.mrf.mxu0  ;;  %v843_v38 = vpop.f32.mrf.mxu1 }
  0xd7   : > { %v422_v39 = vadd.f32 %v819_v37, %v1048_v36  ;;  %v502_v40 = vadd.f32 %v843_v38, %v1048_v36 }
  0xd8   : > { %v416_v41 = vpop.f32.mrf.mxu0  ;;  %v496_v42 = vpop.f32.mrf.mxu1 }
  0xd9   : > { %v576_v43 = vmax.f32 %v422_v39, 0.0  ;;  %v592_v44 = vmax.f32 %v502_v40, 0.0  ;;  %v417_v45 = vadd.f32 %v1048_v36, %v416_v41  ;;  %v497_v46 = vadd.f32 %v1048_v36, %v496_v42 }
  0xda   : > { %v822_v47 = vpop.f32.mrf.mxu0  ;;  %v846_v48 = vpop.f32.mrf.mxu1 }
  0xdb   : > { %609 = vst.msk [vmem:[%s1057_s5 + $0x8] sm:$0xff] %vm607_vm1, %v576_v43  ;;  %625 = vst.msk [vmem:[%s1057_s5 + $0x88] sm:$0xff] %vm607_vm1, %v592_v44  ;;  %v575_v49 = vmax.f32 %v417_v45, 0.0  ;;  %v591_v50 = vmax.f32 %v497_v46, 0.0  ;;  %v432_v51 = vadd.f32 %v822_v47, %v1048_v36  ;;  %v512_v52 = vadd.f32 %v846_v48, %v1048_v36 }
  0xdc   : > { %v426_v53 = vpop.f32.mrf.mxu0  ;;  %v506_v54 = vpop.f32.mrf.mxu1 }
  0xdd   : > { %608 = vst.msk [vmem:[%s1057_s5] sm:$0xff] %vm607_vm1, %v575_v49  ;;  %624 = vst.msk [vmem:[%s1057_s5 + $0x80] sm:$0xff] %vm607_vm1, %v591_v50  ;;  %v578_v55 = vmax.f32 %v432_v51, 0.0  ;;  %v594_v56 = vmax.f32 %v512_v52, 0.0  ;;  %v427_v57 = vadd.f32 %v1048_v36, %v426_v53  ;;  %v507_v58 = vadd.f32 %v1048_v36, %v506_v54 }
  0xde   : > { %v825_v59 = vpop.f32.mrf.mxu0  ;;  %v849_v60 = vpop.f32.mrf.mxu1 }
  0xdf   : > { %611 = vst.msk [vmem:[%s1057_s5 + $0x18] sm:$0xff] %vm607_vm1, %v578_v55  ;;  %627 = vst.msk [vmem:[%s1057_s5 + $0x98] sm:$0xff] %vm607_vm1, %v594_v56  ;;  %v577_v61 = vmax.f32 %v427_v57, 0.0  ;;  %v593_v62 = vmax.f32 %v507_v58, 0.0  ;;  %v442_v63 = vadd.f32 %v825_v59, %v1048_v36  ;;  %v522_v0 = vadd.f32 %v849_v60, %v1048_v36 }
  0xe0   : > { %v436_v1 = vpop.f32.mrf.mxu0  ;;  %v516_v2 = vpop.f32.mrf.mxu1 }
  0xe1   : > { %610 = vst.msk [vmem:[%s1057_s5 + $0x10] sm:$0xff] %vm607_vm1, %v577_v61  ;;  %626 = vst.msk [vmem:[%s1057_s5 + $0x90] sm:$0xff] %vm607_vm1, %v593_v62  ;;  %v580_v3 = vmax.f32 %v442_v63, 0.0  ;;  %v596_v4 = vmax.f32 %v522_v0, 0.0  ;;  %v437_v5 = vadd.f32 %v1048_v36, %v436_v1  ;;  %v517_v6 = vadd.f32 %v1048_v36, %v516_v2 }
  0xe2   : > { %v828_v7 = vpop.f32.mrf.mxu0  ;;  %v852_v8 = vpop.f32.mrf.mxu1 }
  0xe3   : > { %613 = vst.msk [vmem:[%s1057_s5 + $0x28] sm:$0xff] %vm607_vm1, %v580_v3  ;;  %629 = vst.msk [vmem:[%s1057_s5 + $0xa8] sm:$0xff] %vm607_vm1, %v596_v4  ;;  %v579_v9 = vmax.f32 %v437_v5, 0.0  ;;  %v595_v10 = vmax.f32 %v517_v6, 0.0  ;;  %v452_v11 = vadd.f32 %v828_v7, %v1048_v36  ;;  %v532_v12 = vadd.f32 %v852_v8, %v1048_v36 }
  0xe4   : > { %v446_v13 = vpop.f32.mrf.mxu0  ;;  %v526_v14 = vpop.f32.mrf.mxu1 }
  0xe5   : > { %612 = vst.msk [vmem:[%s1057_s5 + $0x20] sm:$0xff] %vm607_vm1, %v579_v9  ;;  %628 = vst.msk [vmem:[%s1057_s5 + $0xa0] sm:$0xff] %vm607_vm1, %v595_v10  ;;  %v582_v15 = vmax.f32 %v452_v11, 0.0  ;;  %v598_v16 = vmax.f32 %v532_v12, 0.0  ;;  %v447_v17 = vadd.f32 %v1048_v36, %v446_v13  ;;  %v527_v18 = vadd.f32 %v1048_v36, %v526_v14 }
  0xe6   : > { %v831_v19 = vpop.f32.mrf.mxu0  ;;  %v855_v20 = vpop.f32.mrf.mxu1 }
  0xe7   : > { %615 = vst.msk [vmem:[%s1057_s5 + $0x38] sm:$0xff] %vm607_vm1, %v582_v15  ;;  %631 = vst.msk [vmem:[%s1057_s5 + $0xb8] sm:$0xff] %vm607_vm1, %v598_v16  ;;  %v581_v21 = vmax.f32 %v447_v17, 0.0  ;;  %v597_v22 = vmax.f32 %v527_v18, 0.0  ;;  %v462_v23 = vadd.f32 %v831_v19, %v1048_v36  ;;  %v542_v24 = vadd.f32 %v855_v20, %v1048_v36 }
  0xe8   : > { %v456_v25 = vpop.f32.mrf.mxu0  ;;  %v536_v26 = vpop.f32.mrf.mxu1 }
  0xe9   : > { %614 = vst.msk [vmem:[%s1057_s5 + $0x30] sm:$0xff] %vm607_vm1, %v581_v21  ;;  %630 = vst.msk [vmem:[%s1057_s5 + $0xb0] sm:$0xff] %vm607_vm1, %v597_v22  ;;  %v584_v27 = vmax.f32 %v462_v23, 0.0  ;;  %v600_v28 = vmax.f32 %v542_v24, 0.0  ;;  %v457_v29 = vadd.f32 %v1048_v36, %v456_v25  ;;  %v537_v30 = vadd.f32 %v1048_v36, %v536_v26 }
  0xea   : > { %v834_v31 = vpop.f32.mrf.mxu0  ;;  %v858_v32 = vpop.f32.mrf.mxu1 }
  0xeb   : > { %617 = vst.msk [vmem:[%s1057_s5 + $0x48] sm:$0xff] %vm607_vm1, %v584_v27  ;;  %633 = vst.msk [vmem:[%s1057_s5 + $0xc8] sm:$0xff] %vm607_vm1, %v600_v28  ;;  %v583_v33 = vmax.f32 %v457_v29, 0.0  ;;  %v599_v34 = vmax.f32 %v537_v30, 0.0  ;;  %v472_v35 = vadd.f32 %v834_v31, %v1048_v36  ;;  %v552_v37 = vadd.f32 %v858_v32, %v1048_v36 }
  0xec   : > { %v466_v38 = vpop.f32.mrf.mxu0  ;;  %v546_v39 = vpop.f32.mrf.mxu1 }
  0xed   : > { %616 = vst.msk [vmem:[%s1057_s5 + $0x40] sm:$0xff] %vm607_vm1, %v583_v33  ;;  %632 = vst.msk [vmem:[%s1057_s5 + $0xc0] sm:$0xff] %vm607_vm1, %v599_v34  ;;  %v586_v40 = vmax.f32 %v472_v35, 0.0  ;;  %v602_v41 = vmax.f32 %v552_v37, 0.0  ;;  %v467_v42 = vadd.f32 %v1048_v36, %v466_v38  ;;  %v547_v43 = vadd.f32 %v1048_v36, %v546_v39 }
  0xee   : > { %v837_v44 = vpop.f32.mrf.mxu0  ;;  %v861_v45 = vpop.f32.mrf.mxu1 }
  0xef   : > { %619 = vst.msk [vmem:[%s1057_s5 + $0x58] sm:$0xff] %vm607_vm1, %v586_v40  ;;  %635 = vst.msk [vmem:[%s1057_s5 + $0xd8] sm:$0xff] %vm607_vm1, %v602_v41  ;;  %v585_v46 = vmax.f32 %v467_v42, 0.0  ;;  %v601_v47 = vmax.f32 %v547_v43, 0.0  ;;  %v482_v48 = vadd.f32 %v837_v44, %v1048_v36  ;;  %v562_v49 = vadd.f32 %v861_v45, %v1048_v36 }
  0xf0   : > { %v476_v50 = vpop.f32.mrf.mxu0  ;;  %v556_v51 = vpop.f32.mrf.mxu1 }
  0xf1   : > { %618 = vst.msk [vmem:[%s1057_s5 + $0x50] sm:$0xff] %vm607_vm1, %v585_v46  ;;  %634 = vst.msk [vmem:[%s1057_s5 + $0xd0] sm:$0xff] %vm607_vm1, %v601_v47  ;;  %v588_v52 = vmax.f32 %v482_v48, 0.0  ;;  %v604_v53 = vmax.f32 %v562_v49, 0.0  ;;  %v477_v54 = vadd.f32 %v1048_v36, %v476_v50  ;;  %v557_v55 = vadd.f32 %v1048_v36, %v556_v51 }
  0xf2   : > { %v840_v56 = vpop.f32.mrf.mxu0  ;;  %v864_v57 = vpop.f32.mrf.mxu1 }
  0xf3   : > { %621 = vst.msk [vmem:[%s1057_s5 + $0x68] sm:$0xff] %vm607_vm1, %v588_v52  ;;  %637 = vst.msk [vmem:[%s1057_s5 + $0xe8] sm:$0xff] %vm607_vm1, %v604_v53  ;;  %v587_v58 = vmax.f32 %v477_v54, 0.0  ;;  %v603_v59 = vmax.f32 %v557_v55, 0.0  ;;  %v492_v60 = vadd.f32 %v840_v56, %v1048_v36  ;;  %v572_v61 = vadd.f32 %v864_v57, %v1048_v36 }
  0xf4   : > { %v486_v62 = vpop.f32.mrf.mxu0  ;;  %v566_v63 = vpop.f32.mrf.mxu1 }
  0xf5   : > { %620 = vst.msk [vmem:[%s1057_s5 + $0x60] sm:$0xff] %vm607_vm1, %v587_v58  ;;  %636 = vst.msk [vmem:[%s1057_s5 + $0xe0] sm:$0xff] %vm607_vm1, %v603_v59  ;;  %v590_v0 = vmax.f32 %v492_v60, 0.0  ;;  %v606_v1 = vmax.f32 %v572_v61, 0.0  ;;  %v487_v2 = vadd.f32 %v1048_v36, %v486_v62  ;;  %v567_v3 = vadd.f32 %v1048_v36, %v566_v63 }
  0xf7   : > { %623 = vst.msk [vmem:[%s1057_s5 + $0x78] sm:$0xff] %vm607_vm1, %v590_v0  ;;  %639 = vst.msk [vmem:[%s1057_s5 + $0xf8] sm:$0xff] %vm607_vm1, %v606_v1  ;;  %v589_v4 = vmax.f32 %v487_v2, 0.0  ;;  %v605_v5 = vmax.f32 %v567_v3, 0.0 }
  0xf9   : > { %622 = vst.msk [vmem:[%s1057_s5 + $0x70] sm:$0xff] %vm607_vm1, %v589_v4  ;;  %638 = vst.msk [vmem:[%s1057_s5 + $0xf0] sm:$0xff] %vm607_vm1, %v605_v5 }
  0xfa PF: > { %s13_s14 = sadd.s32 1, %s919_s14   ;;  %s1166_s12 = smov %s915_s13 }
  0xfb   : > { %p10_p5 = scmp.ge.s32.totalorder %s13_s14, 4   ;;  %s1167_s13 = smov %s1169_s15 }
  0xfd   :  { %12 = sbr.rel (!%p10_p5) target bundleno = 2 (0x2), region = 62 }

// kernel: fe_forward.7
= control target key start
LH: loop header
LB: loop body
LE: loop exit
PB: predicated region body
PF: predicated region fallthrough
CT: control target
= control target key end

     0   :  { %s1555_s12 = smov 0   ;;  %s1557_s13 = smov 0   ;;  %s2587_s0 = inlined_call_operand.vmem [shape: f32[2,64,64], index: 0, kind: input, shape index: {}]   ;;  %s2588_s1 = inlined_call_operand.vmem [shape: f32[3,192,128], index: 1, kind: input, shape index: {}]   ;;  %s2589_s2 = inlined_call_operand.vmem [shape: f32[1,128], index: 2, kind: input, shape index: {}]   ;;  %s2590_s3 = inlined_call_operand.vmem [shape: f32[2,64,128], index: 3, kind: output, shape index: {}]  }
   0x1   :  { %s1559_s14 = smov 0  }
   0x2 LB: > { %s25_s15 = sadd.s32 1, %s1527_s13  ;;  %p1293_p0 = scmp.ge.s32.totalorder %s1531_s14, 1  ;;  %s1531_s14 = sphi %s1559_s14, %s13_s14   ;;  %s1527_s13 = sphi %s1557_s13, %s2720_s13   ;;  %s1523_s12 = sphi %s1555_s12, %s2719_s12  }
   0x3   : > { %p27_p1 = scmp.ge.s32.totalorder %s25_s15, 2  ;;  %p158_p2 = scmp.lt.s32.totalorder %s1531_s14, 3 }
   0x5   : > { %s2722_s15 = smov (%p27_p1, %s25_s15), 0  ;;  %p159_p3 = pnand %p1293_p0, %p158_p2 }
   0x6   : > { %p191_p4 = scmp.lt.s32.totalorder (!%p159_p3), %s1523_s12, 1  ;;  %s1534_s11 = smov (!%p159_p3), 64  }
   0x7   : > { %162 = sbr.rel (%p159_p3) target bundleno = 413 (0x19d), region = 32 }
   0xc   : > { %v1313_v0 = vld [vmem:[%s2588_s1 + $0x138] sm:$0xff]  ;;  %v218_v2 = vlaneseq  ;;  %v1533_v3 = vmov 0.0   ;;  %v1312_v4 = vld [vmem:[%s2588_s1 + $0x130] sm:$0xff]  ;;  %s2724_s12 = smov (!%p191_p4, %s1523_s12), 1  ;;  %v1311_v7 = vld [vmem:[%s2588_s1 + $0x128] sm:$0xff]  ;;  %v2609_v33 = vmov 0 }
   0xd   : > { %v541_v1 = vld [vmem:[%s2588_s1 + $0x78] sm:$0xff]  ;;  %687 = vmatprep.subr.mxu0 %v1533_v3  ;;  %816 = vmatprep.subr.mxu1 %v1533_v3  ;;  %v540_v5 = vld [vmem:[%s2588_s1 + $0x70] sm:$0xff]  ;;  %v539_v8 = vld [vmem:[%s2588_s1 + $0x68] sm:$0xff]  ;;  %s1373_s28 = sshll.u32 %s2724_s12, 6  ;;  %v1668_v30 = vrot.slane %v1533_v3, 7 }
   0xe   : > { %688 = vmatpush1.msra.mxu0 %v1313_v0  ;;  %817 = vmatpush1.msra.mxu1 %v541_v1  ;;  %v1589_v6 = vshrl.u32 %v218_v2, 7  ;;  %s1608_s4 = scalar_lea.vmem %s2587_s0, %s1373_s28  ;;  %v1310_v10 = vld [vmem:[%s2588_s1 + $0x120] sm:$0xff]  ;;  %v1309_v20 = vld [vmem:[%s2588_s1 + $0x118] sm:$0xff]  ;;  %v1308_v32 = vld [vmem:[%s2588_s1 + $0x110] sm:$0xff]  ;;  %s2568_s10 = scalar_lea.vmem %s2590_s3, %s1373_s28 }
   0xf   : > { %689 = vmatprep.subr.mxu0 %v1533_v3  ;;  %818 = vmatprep.subr.mxu1 %v1533_v3  ;;  %v210_v11 = vld [vmem:[%s1608_s4] sm:$0xff]  ;;  %v1617_v12 = vld [vmem:[%s1608_s4 + $0x8] sm:$0xff]  ;;  %v1620_v13 = vld [vmem:[%s1608_s4 + $0x10] sm:$0xff] }
  0x10   : > { %690 = vmatpush1.msra.mxu0 %v1312_v4  ;;  %819 = vmatpush1.msra.mxu1 %v540_v5  ;;  %v1601_v9 = vadd.s32 8, %v1589_v6  ;;  %v1449_v15 = vpack.i.bf16 %v210_v11, %v1533_v3  ;;  %v1459_v16 = vpack.i.bf16 %v1620_v13, %v1617_v12  ;;  %v1627_v17 = vld [vmem:[%s1608_s4 + $0x18] sm:$0xff]  ;;  %v538_v18 = vld [vmem:[%s2588_s1 + $0x60] sm:$0xff]  ;;  %v231_v19 = vand.u32 7, %v1589_v6  ;;  %v1653_v26 = vld [vmem:[%s1608_s4 + $0x28] sm:$0xff] }
  0x11   : > { %691 = vmatprep.subr.mxu0 %v1533_v3  ;;  %820 = vmatprep.subr.mxu1 %v1533_v3  ;;  %v1638_v21 = vrot.slane %v210_v11, 1  ;;  %v1454_v22 = vpack.i.bf16 %v1617_v12, %v210_v11  ;;  %v1464_v23 = vpack.i.bf16 %v1627_v17, %v1620_v13  ;;  %v1646_v24 = vld [vmem:[%s1608_s4 + $0x20] sm:$0xff]  ;;  %v537_v25 = vld [vmem:[%s2588_s1 + $0x58] sm:$0xff]  ;;  %vm2594_vm0 = vcmp.lt.s32.totalorder %v1589_v6, 7  ;;  %v1671_v31 = vld [vmem:[%s1608_s4 + $0x30] sm:$0xff] }
  0x12   : > { %692 = vmatpush1.msra.mxu0 %v1311_v7  ;;  %821 = vmatpush1.msra.mxu1 %v539_v8  ;;  %v238_v14 = vand.u32 7, %v1601_v9  ;;  %v1656_v27 = vld [vmem:[%s1608_s4 + $0x38] sm:$0xff]  ;;  %v1664_v29 = vrot.slane %v1617_v12, 1  ;;  %vm2591_vm2 = vcmp.lt.s32.totalorder %v1589_v6, 1  ;;  %vm1679_vm3 = vcmp.ge.s32.totalorder %v231_v19, 1  ;;  %v536_v37 = vld [vmem:[%s2588_s1 + $0x50] sm:$0xff] }
  0x13   : > { %693 = vmatprep.subr.mxu0 %v1533_v3  ;;  %822 = vmatprep.subr.mxu1 %v1533_v3  ;;  %v2610_v33 = vsel %vm1679_vm3, 4294967295, %v2609_v33  ;;  %v396_v34 = vrot.slane %v210_v11, 7  ;;  %v1684_v35 = vrot.slane %v1656_v27, 7  ;;  %v1469_v36 = vpack.i.bf16 %v1646_v24, %v1627_v17  ;;  %v1307_v42 = vld [vmem:[%s2588_s1 + $0x108] sm:$0xff]  ;;  %v1306_v54 = vld [vmem:[%s2588_s1 + $0x100] sm:$0xff]  ;;  %v1305_v0 = vld [vmem:[%s2588_s1 + $0xf8] sm:$0xff] }
  0x14   : > { %694 = vmatpush1.msra.mxu0 %v1310_v10  ;;  %1450 = vrot.lane.b32.xlu0 %v1449_v15, %s1534_s11  ;;  %vm1659_vm1 = vcmp.lt.s32.totalorder %v238_v14, 7  ;;  %v1696_v38 = vsel %vm2594_vm0, %v1638_v21, %v1664_v29  ;;  %v1699_v39 = vrot.slane %v1671_v31, 7  ;;  %v447_v40 = vrot.slane %v1620_v13, 1  ;;  %v535_v49 = vld [vmem:[%s2588_s1 + $0x48] sm:$0xff]  ;;  %v534_v60 = vld [vmem:[%s2588_s1 + $0x40] sm:$0xff]  ;;  %v533_v5 = vld [vmem:[%s2588_s1 + $0x38] sm:$0xff] }
  0x15   : > { %1460 = vrot.lane.b32.xlu1 %v1459_v16, %s1534_s11  ;;  %823 = vmatpush1.msra.mxu1 %v538_v18  ;;  %v1474_v41 = vpack.i.bf16 %v1653_v26, %v1646_v24  ;;  %v478_v43 = vsel %vm1659_vm1, %v1696_v38, 0.0  ;;  %v1715_v44 = vsel %vm2591_vm2, %v1684_v35, %v396_v34  ;;  %v1718_v45 = vrot.slane %v1617_v12, 7  ;;  %v1304_v9 = vld [vmem:[%s2588_s1 + $0xf0] sm:$0xff] }
  0x16   : > { %695 = vmatprep.subr.mxu0 %v1533_v3  ;;  %824 = vmatprep.subr.mxu1 %v1533_v3  ;;  %v566_v46 = vsel %vm1679_vm3, %v1715_v44, 0.0  ;;  %v1728_v47 = vsel %vm2591_vm2, %v1699_v39, %v1668_v30  ;;  %v1733_v48 = vsel %vm2594_vm0, %v1664_v29, %v447_v40  ;;  %vm1745_vm4 = vcmp.ge.s32.totalorder %v238_v14, 1  ;;  %v532_v18 = vld [vmem:[%s2588_s1 + $0x30] sm:$0xff]  ;;  %v1351_v44 = vld [vmem:[%s2588_s1 + $0x1e8] sm:$0xff] }
  0x17   : > { %696 = vmatpush1.msra.mxu0 %v1309_v20  ;;  %825 = vmatpush1.msra.mxu1 %v537_v25  ;;  %v428_v50 = vsel %vm1679_vm3, %v1728_v47, 0.0  ;;  %v591_v51 = vsel %vm1659_vm1, %v1733_v48, 0.0  ;;  %v1752_v53 = vsel %vm2591_vm2, %v396_v34, %v1718_v45  ;;  %v1764_v56 = vsel %vm2591_vm2, %v1668_v30, %v396_v34  ;;  %v1303_v20 = vld [vmem:[%s2588_s1 + $0xe8] sm:$0xff]  ;;  %v1349_v47 = vld [vmem:[%s2588_s1 + $0x1d8] sm:$0xff] }
  0x18   : > { %697 = vmatprep.subr.mxu0 %v1533_v3  ;;  %1455 = vrot.lane.b32.xlu0 %v1454_v22, %s1534_s11  ;;  %v567_v55 = vsel %vm1745_vm4, %v1752_v53, 0.0  ;;  %v221_v57 = vadd.s32 16, %v1589_v6  ;;  %v1479_v58 = vpack.i.bf16 %v1671_v31, %v1653_v26  ;;  %v1484_v59 = vpack.i.bf16 %v1656_v27, %v1671_v31  ;;  %v531_v34 = vld [vmem:[%s2588_s1 + $0x28] sm:$0xff] }
  0x19   : > { %1465 = vrot.lane.b32.xlu1 %v1464_v23, %s1534_s11  ;;  %826 = vmatprep.subr.mxu1 %v1533_v3  ;;  %v429_v61 = vsel %vm1745_vm4, %v1764_v56, 0.0  ;;  %v448_v63 = vrot.slane %v1627_v17, 1  ;;  %v398_v1 = vrot.slane %v1620_v13, 7  ;;  %v1489_v2 = vpack.i.bf16 %v1653_v26, %v1617_v12  ;;  %v1344_v56 = vld [vmem:[%s2588_s1 + $0x1b0] sm:$0xff] }
  0x1a   : > { %698 = vmatpush1.msra.mxu0 %v1308_v32  ;;  %827 = vmatpush1.msra.mxu1 %v536_v37  ;;  %v245_v62 = vand.u32 7, %v221_v57  ;;  %v1494_v4 = vpack.i.bf16 %v1671_v31, %v1620_v13  ;;  %v222_v16 = vadd.s32 24, %v1589_v6  ;;  %v449_v23 = vrot.slane %v1646_v24, 1  ;;  %v530_v57 = vld [vmem:[%s2588_s1 + $0x20] sm:$0xff] }
  0x1b   : > { %699 = vmatprep.subr.mxu0 %v1533_v3  ;;  %828 = vmatprep.subr.mxu1 %v1533_v3  ;;  %v1800_v8 = vsel %vm2594_vm0, %v447_v40, %v448_v63  ;;  %v1820_v13 = vsel %vm2591_vm2, %v1718_v45, %v398_v1  ;;  %v1499_v25 = vpack.i.bf16 %v1656_v27, %v1627_v17  ;;  %v2617_v37 = vmov 0 }
  0x1c   : > { %700 = vmatpush1.msra.mxu0 %v1307_v42  ;;  %1470 = vrot.lane.b32.xlu0 %v1469_v36, %s1534_s11  ;;  %vm1794_vm5 = vcmp.lt.s32.totalorder %v245_v62, 7  ;;  %vm1813_vm6 = vcmp.ge.s32.totalorder %v245_v62, 1  ;;  %v252_v22 = vand.u32 7, %v222_v16  ;;  %v1504_v32 = vpack.i.bf16 %v1533_v3, %v1646_v24  ;;  %v1301_v62 = vld [vmem:[%s2588_s1 + $0xd8] sm:$0xff] }
  0x1d   : > { %1475 = vrot.lane.b32.xlu1 %v1474_v41, %s1534_s11  ;;  %829 = vmatpush1.msra.mxu1 %v535_v49  ;;  %v592_v10 = vsel %vm1794_vm5, %v1800_v8, 0.0  ;;  %v479_v11 = vsel %vm1794_vm5, %v1733_v48, 0.0  ;;  %v568_v14 = vsel %vm1813_vm6, %v1820_v13, 0.0  ;;  %v430_v15 = vsel %vm1813_vm6, %v1752_v53, 0.0  ;;  %v1302_v41 = vld [vmem:[%s2588_s1 + $0xe0] sm:$0xff] }
  0x1e   : > { %701 = vmatprep.subr.mxu0 %v1533_v3  ;;  %830 = vmatprep.subr.mxu1 %v1533_v3  ;;  %v399_v36 = vrot.slane %v1627_v17, 7  ;;  %vm1850_vm7 = vcmp.lt.s32.totalorder %v252_v22, 7  ;;  %v1856_v40 = vsel %vm2594_vm0, %v448_v63, %v449_v23  ;;  %vm1868_vm8 = vcmp.ge.s32.totalorder %v252_v22, 1  ;;  %v529_v63 = vld [vmem:[%s2588_s1 + $0x18] sm:$0xff]  ;;  %v1342_v53 = vld [vmem:[%s2588_s1 + $0x1a0] sm:$0xff] }
  0x1f   : > { %702 = vmatpush1.msra.mxu0 %v1306_v54  ;;  %831 = vmatpush1.msra.mxu1 %v534_v60  ;;  %v2618_v37 = vsel %vm1850_vm7, 4294967295, %v2617_v37  ;;  %v2619_v49 = vmov 0  ;;  %v223_v60 = vadd.s32 32, %v1589_v6  ;;  %vm2075_vm15 = vcmp.lt.s32.totalorder %v231_v19, 7 }
  0x20   : > { %703 = vmatprep.subr.mxu0 %v1533_v3  ;;  %1480 = vrot.lane.b32.xlu0 %v1479_v58, %s1534_s11  ;;  %v2620_v49 = vsel %vm1868_vm8, 4294967295, %v2619_v49  ;;  %v1874_v54 = vsel %vm2591_vm2, %v398_v1, %v399_v36  ;;  %v450_v1 = vrot.slane %v1653_v26, 1  ;;  %vm2597_vm7 = vcmask 523264  }
  0x21   : > { %1485 = vrot.lane.b32.xlu1 %v1484_v59, %s1534_s11  ;;  %832 = vmatprep.subr.mxu1 %v1533_v3  ;;  %v569_v58 = vsel %vm1868_vm8, %v1874_v54, 0.0  ;;  %v431_v59 = vsel %vm1868_vm8, %v1820_v13, 0.0  ;;  %v2694_v22 = vsel %vm1659_vm1, %v1800_v8, 0.0 }
  0x22   : > { %704 = vmatpush1.msra.mxu0 %v1305_v0  ;;  %833 = vmatpush1.msra.mxu1 %v533_v5  ;;  %v259_v0 = vand.u32 7, %v223_v60  ;;  %v528_v5 = vld [vmem:[%s2588_s1 + $0x10] sm:$0xff]  ;;  %v1912_v16 = vsel %vm2594_vm0, %v449_v23, %v450_v1 }
  0x23   : > { %705 = vmatprep.subr.mxu0 %v1533_v3  ;;  %834 = vmatprep.subr.mxu1 %v1533_v3 }
  0x24   : > { %706 = vmatpush1.msra.mxu0 %v1304_v9  ;;  %1490 = vrot.lane.b32.xlu0 %v1489_v2, %s1534_s11  ;;  %v1300_v2 = vld [vmem:[%s2588_s1 + $0xd0] sm:$0xff]  ;;  %vm1906_vm9 = vcmp.lt.s32.totalorder %v259_v0, 7  ;;  %vm1924_vm10 = vcmp.ge.s32.totalorder %v259_v0, 1  ;;  %v401_v0 = vrot.slane %v1653_v26, 7 }
  0x25   : > { %1495 = vrot.lane.b32.xlu1 %v1494_v4, %s1534_s11  ;;  %835 = vmatpush1.msra.mxu1 %v532_v18  ;;  %v400_v4 = vrot.slane %v1646_v24, 7  ;;  %v1299_v24 = vld [vmem:[%s2588_s1 + $0xc8] sm:$0xff]  ;;  %v1320_v26 = vld [vmem:[%s2588_s1 + $0x170] sm:$0xff]  ;;  %v444_v18 = vrot.slane %v1533_v3, 1 }
  0x26   : > { %707 = vmatprep.subr.mxu0 %v1533_v3  ;;  %836 = vmatprep.subr.mxu1 %v1533_v3 }
  0x27   : > { %708 = vmatpush1.msra.mxu0 %v1303_v20  ;;  %837 = vmatpush1.msra.mxu1 %v531_v34  ;;  %v1930_v23 = vsel %vm2591_vm2, %v399_v36, %v400_v4  ;;  %v1298_v36 = vld [vmem:[%s2588_s1 + $0xc0] sm:$0xff] }
  0x28   : > { %709 = vmatprep.subr.mxu0 %v1533_v3  ;;  %1500 = vrot.lane.b32.xlu0 %v1499_v25, %s1534_s11  ;;  %v527_v25 = vld [vmem:[%s2588_s1 + $0x8] sm:$0xff] }
  0x29   : > { %1505 = vrot.lane.b32.xlu1 %v1504_v32, %s1534_s11  ;;  %838 = vmatprep.subr.mxu1 %v1533_v3  ;;  %v1314_v32 = vld [vmem:[%s2588_s1 + $0x140] sm:$0xff] }
  0x2a   : > { %710 = vmatpush1.msra.mxu0 %v1302_v41  ;;  %839 = vmatpush1.msra.mxu1 %v530_v57  ;;  %v224_v41 = vadd.s32 40, %v1589_v6  ;;  %v526_v57 = vld [vmem:[%s2588_s1] sm:$0xff] }
  0x2b   : > { %711 = vmatprep.subr.mxu0 %v1533_v3  ;;  %840 = vmatprep.subr.mxu1 %v1533_v3 }
  0x2c   : > { %712 = vmatpush1.msra.mxu0 %v1301_v62  ;;  %841 = vmatpush1.msra.mxu1 %v529_v63  ;;  %v266_v60 = vand.u32 7, %v224_v41  ;;  %v1952_v62 = vrot.slane %v1671_v31, 1  ;;  %v1321_v63 = vld [vmem:[%s2588_s1 + $0x178] sm:$0xff] }
  0x2d   : > { %713 = vmatprep.subr.mxu0 %v1533_v3  ;;  %842 = vmatprep.subr.mxu1 %v1533_v3 }
  0x2e   : > { %714 = vmatpush1.msra.mxu0 %v1300_v2  ;;  %843 = vmatpush1.msra.mxu1 %v528_v5  ;;  %v549_v2 = vld [vmem:[%s2588_s1 + $0xb8] sm:$0xff]  ;;  %vm1963_vm11 = vcmp.lt.s32.totalorder %v266_v60, 7  ;;  %v1970_v31 = vsel %vm2594_vm0, %v450_v1, %v1952_v62  ;;  %vm1982_vm12 = vcmp.ge.s32.totalorder %v266_v60, 1  ;;  %v1988_v1 = vsel %vm2591_vm2, %v400_v4, %v401_v0  ;;  %v1319_v4 = vld [vmem:[%s2588_s1 + $0x168] sm:$0xff] }
  0x2f   : > { %715 = vmatprep.subr.mxu0 %v1533_v3  ;;  %844 = vmatprep.subr.mxu1 %v1533_v3  ;;  %v2629_v60 = vmov 0  ;;  %v2702_v5 = vsel %vm1794_vm5, %v1856_v40, 0.0 }
  0x30   : > { %716 = vmatpush1.msra.mxu0 %v1299_v24  ;;  %845 = vmatpush1.msra.mxu1 %v527_v25  ;;  %v225_v25 = vadd.s32 48, %v1589_v6 }
  0x31   : > { %717 = vmatprep.subr.mxu0 %v1533_v3  ;;  %846 = vmatprep.subr.mxu1 %v1533_v3 }
  0x32   : > { %718 = vmatpush1.msra.mxu0 %v1298_v36  ;;  %847 = vmatpush1.msra.mxu1 %v526_v57  ;;  %v548_v36 = vld [vmem:[%s2588_s1 + $0xb0] sm:$0xff]  ;;  %v273_v24 = vand.u32 7, %v225_v25  ;;  %v2010_v57 = vrot.slane %v1656_v27, 1  ;;  %v1317_v25 = vld [vmem:[%s2588_s1 + $0x158] sm:$0xff] }
  0x33   : > { %735 = vmatprep.subr.mxu0 %v1533_v3  ;;  %864 = vmatprep.subr.mxu1 %v1533_v3 }
  0x34   : > { %736 = vmatpush2.msra.mxu0 %v1321_v63  ;;  %865 = vmatpush2.msra.mxu1 %v549_v2  ;;  %v547_v63 = vld [vmem:[%s2588_s1 + $0xa8] sm:$0xff]  ;;  %v1318_v2 = vld [vmem:[%s2588_s1 + $0x160] sm:$0xff]  ;;  %vm2020_vm13 = vcmp.lt.s32.totalorder %v273_v24, 7  ;;  %v2028_v27 = vsel %vm2594_vm0, %v1952_v62, %v2010_v57  ;;  %vm2040_vm14 = vcmp.ge.s32.totalorder %v273_v24, 1  ;;  %v544_v24 = vld [vmem:[%s2588_s1 + $0x90] sm:$0xff]  ;;  %v2094_v19 = vsel %vm2594_vm0, %v2010_v57, %v1638_v21 }
  0x35   : > { %737 = vmatprep.subr.mxu0 %v1533_v3  ;;  %866 = vmatprep.subr.mxu1 %v1533_v3  ;;  %v2630_v60 = vsel %vm2020_vm13, 4294967295, %v2629_v60  ;;  %vm2643_vm13 = vcmp.lt.s32.totalorder %v1589_v6, 1 }
  0x36   : > { %738 = vmatpush2.msra.mxu0 %v1320_v26  ;;  %867 = vmatpush2.msra.mxu1 %v548_v36  ;;  %v546_v26 = vld [vmem:[%s2588_s1 + $0xa0] sm:$0xff]  ;;  %v545_v36 = vld [vmem:[%s2588_s1 + $0x98] sm:$0xff] }
  0x37   : > { %739 = vmatprep.subr.mxu0 %v1533_v3  ;;  %868 = vmatprep.subr.mxu1 %v1533_v3 }
  0x38   : > { %740 = vmatpush2.msra.mxu0 %v1319_v4  ;;  %869 = vmatpush2.msra.mxu1 %v547_v63  ;;  %v2047_v63 = vsel %vm2591_vm2, %v401_v0, %v1699_v39  ;;  %v226_v0 = vadd.s32 56, %v1589_v6  ;;  %v2633_v4 = vmov 0 }
  0x39   : > { %741 = vmatprep.subr.mxu0 %v1533_v3  ;;  %870 = vmatprep.subr.mxu1 %v1533_v3  ;;  %v2634_v4 = vsel %vm2075_vm15, 4294967295, %v2633_v4  ;;  %v2700_v28 = vsel %vm1982_vm12, %v2047_v63, 0.0 }
  0x3a   : > { %742 = vmatpush2.msra.mxu0 %v1318_v2  ;;  %871 = vmatpush2.msra.mxu1 %v546_v26  ;;  %v1316_v2 = vld [vmem:[%s2588_s1 + $0x150] sm:$0xff]  ;;  %v280_v34 = vand.u32 7, %v226_v0  ;;  %v1315_v26 = vld [vmem:[%s2588_s1 + $0x148] sm:$0xff]  ;;  %v2635_v0 = vmov 0 }
  0x3b   : > { %743 = vmatprep.subr.mxu0 %v1533_v3  ;;  %872 = vmatprep.subr.mxu1 %v1533_v3 }
  0x3c   : > { %744 = vmatpush2.msra.mxu0 %v1317_v25  ;;  %873 = vmatpush2.msra.mxu1 %v545_v36  ;;  %v543_v25 = vld [vmem:[%s2588_s1 + $0x88] sm:$0xff]  ;;  %v459_v36 = vsel %vm2594_vm0, %v444_v18, %v1638_v21  ;;  %vm2086_vm2 = vcmp.lt.s32.totalorder %v280_v34, 7  ;;  %vm2111_vm8 = vcmp.ge.s32.totalorder %v280_v34, 1  ;;  %v590_v34 = vsel %vm2075_vm15, %v1696_v38, 0.0 }
  0x3d   : > { %745 = vmatprep.subr.mxu0 %v1533_v3  ;;  %874 = vmatprep.subr.mxu1 %v1533_v3  ;;  %v2636_v0 = vsel %vm2086_vm2, 4294967295, %v2635_v0  ;;  %v597_v42 = vsel %vm2086_vm2, %v2094_v19, 0.0  ;;  %v1343_v38 = vld [vmem:[%s2588_s1 + $0x1a8] sm:$0xff] }
  0x3e   : > { %746 = vmatpush2.msra.mxu0 %v1316_v2  ;;  %v2099_v2 = vsel %vm2594_vm0, %v1952_v62, %v444_v18  ;;  %875 = vmatpush2.msra.mxu1 %v544_v24  ;;  %vm2639_vm0 = vcmp.lt.s32.totalorder %v1589_v6, 1  ;;  %v542_v24 = vld [vmem:[%s2588_s1 + $0x80] sm:$0xff] }
  0x3f   : > { %747 = vmatprep.subr.mxu0 %v1533_v3  ;;  %v2119_v62 = vsel %vm2639_vm0, %v1699_v39, %v1684_v35  ;;  %876 = vmatprep.subr.mxu1 %v1533_v3  ;;  %v435_v39 = vsel %vm2111_vm8, %v2047_v63, 0.0 }
  0x40   : > { %748 = vmatpush2.msra.mxu0 %v1315_v26  ;;  %v573_v21 = vsel %vm2111_vm8, %v2119_v62, 0.0  ;;  %877 = vmatpush2.msra.mxu1 %v543_v25  ;;  %v477_v26 = vsel %vm2075_vm15, %v459_v36, 0.0  ;;  %v2149_v36 = vsel %vm2639_vm0, %v1668_v30, %v1718_v45  ;;  %vm2640_vm0 = vcmp.lt.s32.totalorder %v1589_v6, 7  ;;  %v1353_v45 = vld [vmem:[%s2588_s1 + $0x1f8] sm:$0xff] }
  0x41   : > { %749 = vmatprep.subr.mxu0 %v1533_v3  ;;  %878 = vmatprep.subr.mxu1 %v1533_v3  ;;  %v2708_v7 = vsel %vm2040_vm14, %v2119_v62, 0.0 }
  0x42   : > { %750 = vmatpush2.msra.mxu0 %v1314_v32  ;;  %879 = vmatpush2.msra.mxu1 %v542_v24  ;;  %v2204_v32 = vsel %vm2643_vm13, %v1684_v35, %v1668_v30  ;;  %vm2644_vm13 = vcmask 523264   ;;  %v1352_v35 = vld [vmem:[%s2588_s1 + $0x1f0] sm:$0xff] }
  0x43   : > { %1322 = vmatprep.mubr.msk.f32.mxu0 %vm2597_vm7, %v590_v34  ;;  %1330 = vmatprep.mubr.msk.f32.mxu1 %vm2597_vm7, %v477_v26  ;;  %v2178_v26 = vsel %vm2640_vm0, %v2010_v57, %v444_v18  ;;  %vm2641_vm7 = vnez %v2618_v37  ;;  %v2195_v57 = vsel %vm2640_vm0, %v444_v18, %v1664_v29  ;;  %v944_v34 = vsel %vm2111_vm8, %v2204_v32, 0.0  ;;  %vm2645_vm0 = vmmov %vm2644_vm13 }
  0x44   : > { %1058 = vmatprep.subr.mxu0 %v1533_v3  ;;  %1375 = vmatprep.subr.mxu1 %v1533_v3  ;;  %v968_v25 = vsel %vm2086_vm2, %v2195_v57, 0.0  ;;  %vm2647_vm3 = vmmov %vm2645_vm0 }
  0x45   : > { %vm2648_vm2 = vmmov %vm2645_vm0 }
  0x46   : > { %vm2678_vm15 = vmmov %vm2645_vm0 }
  0x86   : > { %v1451_v29 = vpop.permute.xlu0 %1450 }
  0x87   : > { %v1453_v18 = vunpack.i.h.bf16 %v1451_v29  ;;  %v1452_v24 = vunpack.i.l.bf16 %v1451_v29 }
  0x89   : > { %v630_v6 = vsel %vm2644_vm13, %v566_v46, %v1453_v18  ;;  %v518_v30 = vsel %vm2645_vm0, %v428_v50, %v1452_v24  ;;  %v1350_v46 = vld [vmem:[%s2588_s1 + $0x1e0] sm:$0xff]  ;;  %v1348_v50 = vld [vmem:[%s2588_s1 + $0x1d0] sm:$0xff]  ;;  %vm2646_vm13 = vmmov %vm2645_vm0 }
  0x8a   : > { %752 = vmatmul.mubr.f32.vlgmr.msra.gmra.mxu0 %v630_v6  ;;  %881 = vmatmul.mubr.f32.vlgmr.msra.gmra.mxu1 %v518_v30  ;;  %v1456_v24 = vpop.permute.xlu0 %1455  ;;  %v1346_v6 = vld [vmem:[%s2588_s1 + $0x1c0] sm:$0xff]  ;;  %v1345_v30 = vld [vmem:[%s2588_s1 + $0x1b8] sm:$0xff] }
  0x8b   : > { %1059 = vmatpush1.msra.mxu0 %v1353_v45  ;;  %1399 = vmatpush1.msra.mxu1 %v1353_v45  ;;  %v1347_v45 = vld [vmem:[%s2588_s1 + $0x1c8] sm:$0xff]  ;;  %v1458_v29 = vunpack.i.h.bf16 %v1456_v24  ;;  %v1457_v18 = vunpack.i.l.bf16 %v1456_v24 }
  0x8c   : > { %1060 = vmatprep.subr.mxu0 %v1533_v3  ;;  %1376 = vmatprep.subr.mxu1 %v1533_v3 }
  0x8d   : > { %1061 = vmatpush1.msra.mxu0 %v1352_v35  ;;  %1400 = vmatpush1.msra.mxu1 %v1352_v35  ;;  %v1461_v35 = vpop.permute.xlu1 %1460 }
  0x8e   : > { %1062 = vmatprep.subr.mxu0 %v1533_v3  ;;  %1377 = vmatprep.subr.mxu1 %v1533_v3 }
  0x8f   : > { %1063 = vmatpush1.msra.mxu0 %v1351_v44  ;;  %1401 = vmatpush1.msra.mxu1 %v1351_v44  ;;  %v631_v44 = vsel %vm2646_vm13, %v567_v55, %v1458_v29  ;;  %v1463_v55 = vunpack.i.h.bf16 %v1461_v35  ;;  %vm2651_vm13 = vmmov %vm2645_vm0  ;;  %v2656_v29 = vsel %vm2641_vm7, %v1800_v8, 0.0 }
  0x90   : > { %1064 = vmatprep.subr.mxu0 %v1533_v3  ;;  %1378 = vmatprep.subr.mxu1 %v1533_v3 }
  0x91   : > { %1065 = vmatpush1.msra.mxu0 %v1350_v46  ;;  %1402 = vmatpush1.msra.mxu1 %v1350_v46  ;;  %v519_v46 = vsel %vm2645_vm0, %v429_v61, %v1457_v18 }
  0x92   : > { %1066 = vmatprep.subr.mxu0 %v1533_v3  ;;  %1379 = vmatprep.subr.mxu1 %v1533_v3 }
  0x93   : > { %1067 = vmatpush1.msra.mxu0 %v1349_v47  ;;  %1403 = vmatpush1.msra.mxu1 %v1349_v47  ;;  %v1462_v47 = vunpack.i.l.bf16 %v1461_v35  ;;  %v2657_v35 = vsel %vm1924_vm10, %v1930_v23, 0.0 }
  0x94   : > { %1068 = vmatprep.subr.mxu0 %v1533_v3  ;;  %1380 = vmatprep.subr.mxu1 %v1533_v3 }
  0x95   : > { %1069 = vmatpush1.msra.mxu0 %v1348_v50  ;;  %1404 = vmatpush1.msra.mxu1 %v1348_v50 }
  0x96   : > { %1070 = vmatprep.subr.mxu0 %v1533_v3  ;;  %1381 = vmatprep.subr.mxu1 %v1533_v3 }
  0x97   : > { %1071 = vmatpush1.msra.mxu0 %v1347_v45  ;;  %1405 = vmatpush1.msra.mxu1 %v1347_v45  ;;  %v2654_v45 = vsel %vm2641_vm7, %v1856_v40, 0.0  ;;  %vm2683_vm7 = vmmov %vm2645_vm0 }
  0x98   : > { %1072 = vmatprep.subr.mxu0 %v1533_v3  ;;  %1382 = vmatprep.subr.mxu1 %v1533_v3 }
  0x99   : > { %1073 = vmatpush1.msra.mxu0 %v1346_v6  ;;  %1406 = vmatpush1.msra.mxu1 %v1346_v6  ;;  %v1339_v6 = vld [vmem:[%s2588_s1 + $0x188] sm:$0xff] }
  0x9a   : > { %1074 = vmatprep.subr.mxu0 %v1533_v3  ;;  %1383 = vmatprep.subr.mxu1 %v1533_v3 }
  0x9b   : > { %1323 = vmatprep.mubr.msk.f32.mxu0 %vm2647_vm3, %v591_v51  ;;  %1331 = vmatprep.mubr.msk.f32.mxu1 %vm2648_vm2, %v478_v43  ;;  %v1466_v43 = vpop.permute.xlu1 %1465  ;;  %vm2649_vm2 = vmmov %vm2645_vm0 }
  0x9c   : > { %1075 = vmatpush1.msra.mxu0 %v1345_v30  ;;  %1407 = vmatpush1.msra.mxu1 %v1345_v30  ;;  %v632_v51 = vsel %vm2649_vm2, %v568_v14, %v1463_v55  ;;  %vm2650_vm3 = vmmov %vm2645_vm0  ;;  %v1468_v14 = vunpack.i.h.bf16 %v1466_v43  ;;  %v1467_v50 = vunpack.i.l.bf16 %v1466_v43 }
  0x9d   : > { %757 = vmatmul.mubr.f32.gmra.mxu0 %v631_v44  ;;  %886 = vmatmul.mubr.f32.gmra.mxu1 %v519_v46  ;;  %v520_v61 = vsel %vm2650_vm3, %v430_v15, %v1462_v47  ;;  %vm2652_vm2 = vmmov %vm2645_vm0  ;;  %v2659_v46 = vsel %vm1924_vm10, %v1874_v54, 0.0  ;;  %v2661_v47 = vsel %vm1906_vm9, %v1912_v16, 0.0 }
  0x9e   : > { %1076 = vmatprep.subr.mxu0 %v1533_v3  ;;  %1384 = vmatprep.subr.mxu1 %v1533_v3  ;;  %v633_v15 = vsel %vm2652_vm2, %v569_v58, %v1468_v14  ;;  %vm2653_vm3 = vmmov %vm2645_vm0 }
  0x9f   : > { %1077 = vmatpush1.msra.mxu0 %v1344_v56  ;;  %1408 = vmatpush1.msra.mxu1 %v1344_v56  ;;  %v521_v24 = vsel %vm2653_vm3, %v431_v59, %v1467_v50  ;;  %v1340_v59 = vld [vmem:[%s2588_s1 + $0x190] sm:$0xff]  ;;  %v1476_v30 = vpop.permute.xlu1 %1475  ;;  %vm2658_vm2 = vmmov %vm2645_vm0  ;;  %v2663_v56 = vsel %vm1906_vm9, %v1856_v40, 0.0  ;;  %v2664_v50 = vsel %vm1982_vm12, %v1988_v1, 0.0 }
  0xa0   : > { %1078 = vmatprep.subr.mxu0 %v1533_v3  ;;  %1385 = vmatprep.subr.mxu1 %v1533_v3  ;;  %vm2660_vm3 = vmmov %vm2645_vm0  ;;  %v1477_v43 = vunpack.i.l.bf16 %v1476_v30 }
  0xa1   : > { %1324 = vmatprep.mubr.msk.f32.mxu0 %vm2651_vm13, %v592_v10  ;;  %1332 = vmatprep.mubr.msk.f32.mxu1 %vm2645_vm0, %v479_v11  ;;  %v1341_v10 = vld [vmem:[%s2588_s1 + $0x198] sm:$0xff]  ;;  %v1471_v11 = vpop.permute.xlu0 %1470  ;;  %vm2655_vm13 = vmmov %vm2645_vm0 }
  0xa2   : > { %1079 = vmatpush1.msra.mxu0 %v1343_v38  ;;  %1409 = vmatpush1.msra.mxu1 %v1343_v38  ;;  %v1473_v58 = vunpack.i.h.bf16 %v1471_v11  ;;  %v1472_v18 = vunpack.i.l.bf16 %v1471_v11  ;;  %v1478_v38 = vunpack.i.h.bf16 %v1476_v30 }
  0xa3   : > { %762 = vmatmul.mubr.f32.gmra.mxu0 %v632_v51  ;;  %891 = vmatmul.mubr.f32.gmra.mxu1 %v520_v61  ;;  %v1338_v51 = vld [vmem:[%s2588_s1 + $0x180] sm:$0xff]  ;;  %v1361_v61 = vld [vmem:[%s2588_s1 + $0x238] sm:$0xff] }
  0xa4   : > { %1080 = vmatprep.subr.mxu0 %v1533_v3  ;;  %1386 = vmatprep.subr.mxu1 %v1533_v3  ;;  %v634_v44 = vsel %vm2658_vm2, %v2657_v35, %v1473_v58  ;;  %v522_v55 = vsel %vm2660_vm3, %v2659_v46, %v1472_v18  ;;  %vm2665_vm2 = vmmov %vm2645_vm0  ;;  %v1360_v58 = vld [vmem:[%s2588_s1 + $0x230] sm:$0xff]  ;;  %v1359_v18 = vld [vmem:[%s2588_s1 + $0x228] sm:$0xff]  ;;  %v2673_v35 = vsel %vm2040_vm14, %v1988_v1, 0.0 }
  0xa5   : > { %1081 = vmatpush1.msra.mxu0 %v1342_v53  ;;  %1410 = vmatpush1.msra.mxu1 %v1342_v53  ;;  %v1481_v14 = vpop.permute.xlu0 %1480  ;;  %v635_v53 = vsel %vm2665_vm2, %v2664_v50, %v1478_v38  ;;  %vm2667_vm3 = vmmov %vm2645_vm0  ;;  %v1358_v38 = vld [vmem:[%s2588_s1 + $0x220] sm:$0xff] }
  0xa6   : > { %1082 = vmatprep.subr.mxu0 %v1533_v3  ;;  %1387 = vmatprep.subr.mxu1 %v1533_v3  ;;  %vm2672_vm2 = vmmov %vm2645_vm0 }
  0xa7   : > { %1325 = vmatprep.mubr.msk.f32.mxu0 %vm2655_vm13, %v2654_v45  ;;  %1333 = vmatprep.mubr.msk.f32.mxu1 %vm2645_vm0, %v2656_v29  ;;  %vm2662_vm13 = vmmov %vm2645_vm0  ;;  %v1483_v45 = vunpack.i.h.bf16 %v1481_v14  ;;  %v1482_v29 = vunpack.i.l.bf16 %v1481_v14 }
  0xa8   : > { %1083 = vmatpush1.msra.mxu0 %v1341_v10  ;;  %1411 = vmatpush1.msra.mxu1 %v1341_v10  ;;  %v2666_v10 = vsel %vm1982_vm12, %v1930_v23, 0.0  ;;  %vm2710_vm12 = vnez %v2618_v37 }
  0xa9   : > { %767 = vmatmul.mubr.f32.gmra.mxu0 %v633_v15  ;;  %896 = vmatmul.mubr.f32.gmra.mxu1 %v521_v24  ;;  %v523_v11 = vsel %vm2667_vm3, %v2666_v10, %v1477_v43  ;;  %v2668_v15 = vsel %vm1963_vm11, %v1970_v31, 0.0  ;;  %v2670_v24 = vsel %vm1963_vm11, %v1912_v16, 0.0  ;;  %vm2674_vm3 = vmmov %vm2645_vm0  ;;  %v1357_v43 = vld [vmem:[%s2588_s1 + $0x218] sm:$0xff]  ;;  %v1491_v50 = vpop.permute.xlu0 %1490 }
  0xaa   : > { %1084 = vmatprep.subr.mxu0 %v1533_v3  ;;  %1388 = vmatprep.subr.mxu1 %v1533_v3  ;;  %v1492_v19 = vunpack.i.l.bf16 %v1491_v50 }
  0xab   : > { %1085 = vmatpush1.msra.mxu0 %v1340_v59  ;;  %1412 = vmatpush1.msra.mxu1 %v1340_v59  ;;  %v1486_v59 = vpop.permute.xlu1 %1485 }
  0xac   : > { %1086 = vmatprep.subr.mxu0 %v1533_v3  ;;  %1389 = vmatprep.subr.mxu1 %v1533_v3 }
  0xad   : > { %1326 = vmatprep.mubr.msk.f32.mxu0 %vm2662_vm13, %v2661_v47  ;;  %1334 = vmatprep.mubr.msk.f32.mxu1 %vm2645_vm0, %v2663_v56  ;;  %vm2669_vm13 = vmmov %vm2645_vm0  ;;  %v1488_v47 = vunpack.i.h.bf16 %v1486_v59  ;;  %v1487_v56 = vunpack.i.l.bf16 %v1486_v59 }
  0xae   : > { %1087 = vmatpush1.msra.mxu0 %v1339_v6  ;;  %1413 = vmatpush1.msra.mxu1 %v1339_v6  ;;  %v2671_v6 = vsel %vm2040_vm14, %v2047_v63, 0.0 }
  0xaf   : > { %772 = vmatmul.mubr.f32.gmra.mxu0 %v634_v44  ;;  %901 = vmatmul.mubr.f32.gmra.mxu1 %v522_v55  ;;  %v636_v30 = vsel %vm2672_vm2, %v2671_v6, %v1483_v45  ;;  %v524_v44 = vsel %vm2674_vm3, %v2673_v35, %v1482_v29  ;;  %vm2680_vm2 = vmmov %vm2645_vm0  ;;  %vm2681_vm3 = vnez %v2636_v0  ;;  %v2687_v45 = vsel %vm1924_vm10, %v1988_v1, 0.0 }
  0xb0   : > { %1088 = vmatprep.subr.mxu0 %v1533_v3  ;;  %1390 = vmatprep.subr.mxu1 %v1533_v3  ;;  %v2682_v14 = vsel %vm2681_vm3, %v2099_v2, 0.0  ;;  %v1355_v2 = vld [vmem:[%s2588_s1 + $0x208] sm:$0xff] }
  0xb1   : > { %1089 = vmatpush1.msra.mxu0 %v1338_v51  ;;  %1414 = vmatpush1.msra.mxu1 %v1338_v51 }
  0xb2   : > { %1106 = vmatprep.subr.mxu0 %v1533_v3  ;;  %1391 = vmatprep.subr.mxu1 %v1533_v3 }
  0xb3   : > { %1327 = vmatprep.mubr.msk.f32.mxu0 %vm2669_vm13, %v2668_v15  ;;  %1335 = vmatprep.mubr.msk.f32.mxu1 %vm2645_vm0, %v2670_v24  ;;  %vm2675_vm13 = vnez %v2630_v60  ;;  %v2711_v60 = vsel %vm2710_vm12, %v1912_v16, 0.0 }
  0xb4   : > { %1107 = vmatpush2.msra.mxu0 %v1361_v61  ;;  %1415 = vmatpush2.msra.mxu1 %v1361_v61  ;;  %v2676_v46 = vsel %vm2675_vm13, %v2028_v27, 0.0  ;;  %v2677_v55 = vsel %vm2675_vm13, %v1970_v31, 0.0  ;;  %v525_v61 = vsel %vm2680_vm2, %v435_v39, %v1487_v56  ;;  %v1496_v39 = vpop.permute.xlu1 %1495  ;;  %vm2688_vm2 = vmmov %vm2645_vm0  ;;  %v2704_v52 = vsel %vm2675_vm13, %v2178_v26, 0.0 }
  0xb5   : > { %777 = vmatmul.mubr.f32.gmra.mxu0 %v635_v53  ;;  %906 = vmatmul.mubr.f32.gmra.mxu1 %v523_v11  ;;  %v1354_v53 = vld [vmem:[%s2588_s1 + $0x200] sm:$0xff]  ;;  %v1498_v10 = vunpack.i.h.bf16 %v1496_v39  ;;  %v1497_v11 = vunpack.i.l.bf16 %v1496_v39  ;;  %vm2691_vm8 = vmmov %vm2688_vm2 }
  0xb6   : > { %1108 = vmatprep.subr.mxu0 %v1533_v3  ;;  %1392 = vmatprep.subr.mxu1 %v1533_v3  ;;  %vm2695_vm10 = vmmov %vm2688_vm2 }
  0xb7   : > { %1109 = vmatpush2.msra.mxu0 %v1360_v58  ;;  %1416 = vmatpush2.msra.mxu1 %v1360_v58  ;;  %v1501_v58 = vpop.permute.xlu0 %1500  ;;  %vm2701_vm1 = vmmov %vm2688_vm2 }
  0xb8   : > { %1110 = vmatprep.subr.mxu0 %v1533_v3  ;;  %1393 = vmatprep.subr.mxu1 %v1533_v3  ;;  %v1503_v1 = vunpack.i.h.bf16 %v1501_v58  ;;  %v1502_v9 = vunpack.i.l.bf16 %v1501_v58  ;;  %v1006_v8 = vsel %vm2701_vm1, %v2700_v28, %v1498_v10  ;;  %vm2709_vm5 = vmmov %vm2701_vm1 }
  0xb9   : > { %1328 = vmatprep.mubr.msk.f32.mxu0 %vm2645_vm0, %v2676_v46  ;;  %1336 = vmatprep.mubr.msk.f32.mxu1 %vm2678_vm15, %v2677_v55  ;;  %vm2679_vm15 = vmmov %vm2645_vm0 }
  0xba   : > { %1111 = vmatpush2.msra.mxu0 %v1359_v18  ;;  %1417 = vmatpush2.msra.mxu1 %v1359_v18  ;;  %v637_v51 = vsel %vm2679_vm15, %v573_v21, %v1488_v47  ;;  %v1356_v21 = vld [vmem:[%s2588_s1 + $0x210] sm:$0xff]  ;;  %vm2686_vm15 = vmmov %vm2645_vm0  ;;  %v1007_v40 = vsel %vm2709_vm5, %v2708_v7, %v1503_v1 }
  0xbb   : > { %782 = vmatmul.mubr.f32.gmra.mxu0 %v636_v30  ;;  %911 = vmatmul.mubr.f32.gmra.mxu1 %v524_v44  ;;  %vm2712_vm13 = vmmov %vm2701_vm1 }
  0xbc   : > { %1112 = vmatprep.subr.mxu0 %v1533_v3  ;;  %1394 = vmatprep.subr.mxu1 %v1533_v3  ;;  %vm2716_vm14 = vmmov %vm2701_vm1 }
  0xbd   : > { %1113 = vmatpush2.msra.mxu0 %v1358_v38  ;;  %1418 = vmatpush2.msra.mxu1 %v1358_v38 }
  0xbe   : > { %1114 = vmatprep.subr.mxu0 %v1533_v3  ;;  %1395 = vmatprep.subr.mxu1 %v1533_v3 }
  0xbf   : > { %1329 = vmatprep.mubr.msk.f32.mxu0 %vm2645_vm0, %v597_v42  ;;  %1337 = vmatprep.mubr.msk.f32.mxu1 %vm2683_vm7, %v2682_v14  ;;  %v1493_v42 = vunpack.i.h.bf16 %v1491_v50  ;;  %vm2684_vm7 = vnez %v2610_v33  ;;  %vm2689_vm0 = vnez %v2634_v4  ;;  %v2692_v33 = vsel %vm1906_vm9, %v1970_v31, 0.0  ;;  %vm2703_vm9 = vmmov %vm2701_vm1 }
  0xc0   : > { %1115 = vmatpush2.msra.mxu0 %v1357_v43  ;;  %1419 = vmatpush2.msra.mxu1 %v1357_v43  ;;  %v2685_v15 = vsel %vm2684_vm7, %v2149_v36, 0.0  ;;  %vm2693_vm7 = vmmov %vm2688_vm2  ;;  %v2698_v31 = vsel %vm1745_vm4, %v1820_v13, 0.0  ;;  %v1506_v36 = vpop.permute.xlu1 %1505 }
  0xc1   : > { %787 = vmatmul.mubr.f32.gmra.mxu0 %v637_v51  ;;  %916 = vmatmul.mubr.f32.gmra.mxu1 %v525_v61  ;;  %v1001_v24 = vsel %vm2686_vm15, %v2685_v15, %v1492_v19  ;;  %v1005_v29 = vsel %vm2688_vm2, %v2687_v45, %v1493_v42  ;;  %vm2697_vm15 = vmmov %vm2688_vm2  ;;  %v1508_v13 = vunpack.i.h.bf16 %v1506_v36  ;;  %v1507_v41 = vunpack.i.l.bf16 %v1506_v36 }
  0xc2   : > { %1116 = vmatprep.subr.mxu0 %v1533_v3  ;;  %1396 = vmatprep.subr.mxu1 %v1533_v3  ;;  %vm2705_vm4 = vmmov %vm2701_vm1 }
  0xc3   : > { %1117 = vmatpush2.msra.mxu0 %v1356_v21  ;;  %1420 = vmatpush2.msra.mxu1 %v1356_v21 }
  0xc4   : > { %1118 = vmatprep.subr.mxu0 %v1533_v3  ;;  %1397 = vmatprep.subr.mxu1 %v1533_v3 }
  0xc5   : > { %1119 = vmatpush2.msra.mxu0 %v1355_v2  ;;  %1421 = vmatpush2.msra.mxu1 %v1355_v2 }
  0xc6   : > { %1120 = vmatprep.subr.mxu0 %v1533_v3  ;;  %1398 = vmatprep.subr.mxu1 %v1533_v3  ;;  %v2690_v3 = vsel %vm2689_vm0, %v1733_v48, 0.0  ;;  %v2696_v48 = vsel %vm1963_vm11, %v2028_v27, 0.0  ;;  %v2706_v27 = vsel %vm1813_vm6, %v1874_v54, 0.0  ;;  %vm2707_vm11 = vmmov %vm2701_vm1 }
  0xc7   : > { %1121 = vmatpush2.msra.mxu0 %v1354_v53  ;;  %1422 = vmatpush2.msra.mxu1 %v1354_v53  ;;  %v1003_v63 = vsel %vm2707_vm11, %v2706_v27, %v1502_v9  ;;  %vm2713_vm6 = vmmov %vm2701_vm1 }
  0xc8   : > { %1362 = vmatprep.mubr.msk.f32.mxu0 %vm2691_vm8, %v2690_v3  ;;  %1366 = vmatprep.mubr.msk.f32.mxu1 %vm2693_vm7, %v2692_v33  ;;  %vm2699_vm8 = vmmov %vm2688_vm2  ;;  %vm2714_vm2 = vnez %v2620_v49 }
  0xc9   : > { %1123 = vmatmul.mubr.f32.vlgmr.msra.gmra.mxu0 %v1001_v24  ;;  %1143 = vmatmul.mubr.f32.vlgmr.msra.gmra.mxu1 %v1005_v29  ;;  %v1002_v4 = vsel %vm2699_vm8, %v2698_v31, %v1497_v11  ;;  %v2715_v12 = vsel %vm2714_vm2, %v1930_v23, 0.0  ;;  %vm2718_vm7 = vmmov %vm2701_vm1  ;;  %v1370_v11 = vld [vmem:[%s2589_s2] ss:$0 sm:$0xff] }
  0xca   : > { %1363 = vmatprep.mubr.msk.f32.mxu0 %vm2695_vm10, %v2694_v22  ;;  %1367 = vmatprep.mubr.msk.f32.mxu1 %vm2697_vm15, %v2696_v48  ;;  %v1004_v54 = vsel %vm2716_vm14, %v2715_v12, %v1507_v41  ;;  %v1008_v37 = vsel %vm2718_vm7, %v944_v34, %v1508_v13 }
  0xcd   : > { %1128 = vmatmul.mubr.f32.gmra.mxu0 %v1002_v4  ;;  %1148 = vmatmul.mubr.f32.gmra.mxu1 %v1006_v8 }
  0xce   : > { %1364 = vmatprep.mubr.msk.f32.mxu0 %vm2703_vm9, %v2702_v5  ;;  %1368 = vmatprep.mubr.msk.f32.mxu1 %vm2705_vm4, %v2704_v52 }
  0xd1   : > { %1133 = vmatmul.mubr.f32.gmra.mxu0 %v1003_v63  ;;  %1153 = vmatmul.mubr.f32.gmra.mxu1 %v1007_v40 }
  0xd2   : > { %1365 = vmatprep.mubr.msk.f32.mxu0 %vm2712_vm13, %v2711_v60  ;;  %1369 = vmatprep.mubr.msk.f32.mxu1 %vm2713_vm6, %v968_v25 }
  0xd5   : > { %1138 = vmatmul.mubr.f32.gmra.mxu0 %v1004_v54  ;;  %1158 = vmatmul.mubr.f32.gmra.mxu1 %v1008_v37 }
 0x14a   : > { %v753_v16 = vpop.f32.mrf.mxu0  ;;  %v882_v20 = vpop.f32.mrf.mxu1 }
 0x14b   : > { %v883_v39 = vadd.f32 %v882_v20, %v753_v16 }
 0x14c   : > { %v755_v0 = vpop.f32.mrf.mxu0  ;;  %v884_v62 = vpop.f32.mrf.mxu1 }
 0x15d   : > { %v758_v26 = vpop.f32.mrf.mxu0  ;;  %v887_v25 = vpop.f32.mrf.mxu1 }
 0x15e   : > { %v888_v3 = vadd.f32 %v887_v25, %v758_v26 }
 0x15f   : > { %v760_v57 = vpop.f32.mrf.mxu0  ;;  %v889_v49 = vpop.f32.mrf.mxu1 }
 0x163   : > { %v763_v18 = vpop.f32.mrf.mxu0  ;;  %v892_v23 = vpop.f32.mrf.mxu1 }
 0x164   : > { %v893_v52 = vadd.f32 %v892_v23, %v763_v18 }
 0x165   : > { %v765_v59 = vpop.f32.mrf.mxu0  ;;  %v894_v6 = vpop.f32.mrf.mxu1 }
 0x169   : > { %v768_v30 = vpop.f32.mrf.mxu0  ;;  %v897_v17 = vpop.f32.mrf.mxu1 }
 0x16a   : > { %v898_v20 = vadd.f32 %v897_v17, %v768_v30 }
 0x16b   : > { %v770_v35 = vpop.f32.mrf.mxu0  ;;  %v899_v32 = vpop.f32.mrf.mxu1 }
 0x16f   : > { %v773_v44 = vpop.f32.mrf.mxu0  ;;  %v902_v34 = vpop.f32.mrf.mxu1 }
 0x170   : > { %v903_v53 = vadd.f32 %v902_v34, %v773_v44 }
 0x171   : > { %v775_v46 = vpop.f32.mrf.mxu0  ;;  %v904_v55 = vpop.f32.mrf.mxu1 }
 0x175   : > { %v778_v47 = vpop.f32.mrf.mxu0  ;;  %v907_v56 = vpop.f32.mrf.mxu1 }
 0x176   : > { %v908_v33 = vadd.f32 %v907_v56, %v778_v47 }
 0x177   : > { %v780_v38 = vpop.f32.mrf.mxu0  ;;  %v909_v43 = vpop.f32.mrf.mxu1 }
 0x17b   : > { %v783_v51 = vpop.f32.mrf.mxu0  ;;  %v912_v61 = vpop.f32.mrf.mxu1 }
 0x17c   : > { %v913_v13 = vadd.f32 %v912_v61, %v783_v51 }
 0x17d   : > { %v785_v14 = vpop.f32.mrf.mxu0  ;;  %v914_v50 = vpop.f32.mrf.mxu1 }
 0x181   : > { %v788_v21 = vpop.f32.mrf.mxu0  ;;  %v917_v42 = vpop.f32.mrf.mxu1 }
 0x182   : > { %v918_v0 = vadd.f32 %v917_v42, %v788_v21 }
 0x183   : > { %v790_v19 = vpop.f32.mrf.mxu0  ;;  %v919_v2 = vpop.f32.mrf.mxu1 }
 0x189   : > { %v1124_v10 = vpop.f32.mrf.mxu0  ;;  %v1144_v15 = vpop.f32.mrf.mxu1 }
 0x18a   : > { %v1163_v24 = vadd.f32 %v1124_v10, %v883_v39  ;;  %v1167_v45 = vadd.f32 %v1144_v15, %v903_v53 }
 0x18b   : > { %v1126_v29 = vpop.f32.mrf.mxu0  ;;  %v1146_v58 = vpop.f32.mrf.mxu1 }
 0x18c   : > { %v1178_v22 = vadd.f32 %v1370_v11, %v1163_v24  ;;  %v1182_v48 = vadd.f32 %v1370_v11, %v1167_v45 }
 0x18d   : > { %v1129_v1 = vpop.f32.mrf.mxu0  ;;  %v1149_v9 = vpop.f32.mrf.mxu1 }
 0x18e   : > { %v1186_v31 = vmax.f32 %v1178_v22, 0.0  ;;  %v1190_v4 = vmax.f32 %v1182_v48, 0.0  ;;  %v1164_v28 = vadd.f32 %v1129_v1, %v888_v3  ;;  %v1168_v8 = vadd.f32 %v1149_v9, %v908_v33 }
 0x18f   : > { %v1131_v36 = vpop.f32.mrf.mxu0  ;;  %v1151_v5 = vpop.f32.mrf.mxu1 }
 0x190   : > { %1194 = vst [vmem:[%s2568_s10] sm:$0xff] %v1186_v31  ;;  %1198 = vst [vmem:[%s2568_s10 + $0x20] sm:$0xff] %v1190_v4  ;;  %v1179_v41 = vadd.f32 %v1370_v11, %v1164_v28  ;;  %v1183_v27 = vadd.f32 %v1370_v11, %v1168_v8 }
 0x191   : > { %v1134_v63 = vpop.f32.mrf.mxu0  ;;  %v1154_v7 = vpop.f32.mrf.mxu1 }
 0x192   : > { %v1187_v40 = vmax.f32 %v1179_v41, 0.0  ;;  %v1191_v60 = vmax.f32 %v1183_v27, 0.0  ;;  %v1165_v12 = vadd.f32 %v1134_v63, %v893_v52  ;;  %v1169_v54 = vadd.f32 %v1154_v7, %v913_v13 }
 0x193   : > { %v1136_v37 = vpop.f32.mrf.mxu0  ;;  %v1156_v16 = vpop.f32.mrf.mxu1 }
 0x194   : > { %1195 = vst [vmem:[%s2568_s10 + $0x8] sm:$0xff] %v1187_v40  ;;  %1199 = vst [vmem:[%s2568_s10 + $0x28] sm:$0xff] %v1191_v60  ;;  %v1180_v62 = vadd.f32 %v1370_v11, %v1165_v12  ;;  %v1184_v26 = vadd.f32 %v1370_v11, %v1169_v54 }
 0x195   : > { %v1139_v25 = vpop.f32.mrf.mxu0  ;;  %v1159_v57 = vpop.f32.mrf.mxu1 }
 0x196   : > { %v1188_v49 = vmax.f32 %v1180_v62, 0.0  ;;  %v1192_v18 = vmax.f32 %v1184_v26, 0.0  ;;  %v1166_v23 = vadd.f32 %v1139_v25, %v898_v20  ;;  %v1170_v59 = vadd.f32 %v1159_v57, %v918_v0 }
 0x197   : > { %v1141_v6 = vpop.f32.mrf.mxu0  ;;  %v1161_v35 = vpop.f32.mrf.mxu1 }
 0x198   : > { %1196 = vst [vmem:[%s2568_s10 + $0x10] sm:$0xff] %v1188_v49  ;;  %1200 = vst [vmem:[%s2568_s10 + $0x30] sm:$0xff] %v1192_v18  ;;  %v1181_v32 = vadd.f32 %v1370_v11, %v1166_v23  ;;  %v1185_v44 = vadd.f32 %v1370_v11, %v1170_v59 }
 0x19a   : > { %v1189_v30 = vmax.f32 %v1181_v32, 0.0  ;;  %v1193_v17 = vmax.f32 %v1185_v44, 0.0 }
 0x19c   : > { %1197 = vst [vmem:[%s2568_s10 + $0x18] sm:$0xff] %v1189_v30  ;;  %1201 = vst [vmem:[%s2568_s10 + $0x38] sm:$0xff] %v1193_v17 }
 0x19d PF: > { %s13_s14 = sadd.s32 1, %s1531_s14   ;;  %s2719_s12 = smov %s1527_s13 }
 0x19e   : > { %p10_p5 = scmp.ge.s32.totalorder %s13_s14, 4   ;;  %s2720_s13 = smov %s2722_s15 }
 0x1a0   :  { %12 = sbr.rel (!%p10_p5) target bundleno = 2 (0x2), region = 64 }

// kernel: fe_forward.6
= control target key start
LH: loop header
LB: loop body
LE: loop exit
PB: predicated region body
PF: predicated region fallthrough
CT: control target
= control target key end

     0   :  { %s3764_s12 = smov 0   ;;  %s3766_s13 = smov 0   ;;  %s5975_s0 = inlined_call_operand.vmem [shape: f32[2,256,64], index: 0, kind: input, shape index: {}]   ;;  %s5976_s1 = inlined_call_operand.vmem [shape: f32[3,192,64], index: 1, kind: input, shape index: {}]   ;;  %s5977_s2 = inlined_call_operand.vmem [shape: f32[1,64], index: 2, kind: input, shape index: {}]   ;;  %s5978_s3 = inlined_call_operand.vmem [shape: f32[2,64,64], index: 3, kind: output, shape index: {}]  }
   0x1   :  { %s3768_s14 = smov 0  }
   0x2 LB: > { %s25_s15 = sadd.s32 1, %s3736_s13  ;;  %p3476_p0 = scmp.ge.s32.totalorder %s3740_s14, 1  ;;  %s3740_s14 = sphi %s3768_s14, %s13_s14   ;;  %s3736_s13 = sphi %s3766_s13, %s6661_s13   ;;  %s3732_s12 = sphi %s3764_s12, %s6660_s12  }
   0x3   : > { %p27_p1 = scmp.ge.s32.totalorder %s25_s15, 2  ;;  %p158_p2 = scmp.lt.s32.totalorder %s3740_s14, 3 }
   0x5   : > { %s6663_s15 = smov (%p27_p1, %s25_s15), 0  ;;  %p159_p3 = pnand %p3476_p0, %p158_p2 }
   0x7   : > { %162 = sbr.rel (%p159_p3) target bundleno = 576 (0x240), region = 32 }
   0xc   : > { %p191_p4 = scmp.lt.s32.totalorder %s3732_s12, 1  ;;  %v3496_v0 = vld [vmem:[%s5976_s1 + $0x138] sm:$0xff]  ;;  %v5981_v1 = vmov 0.0   ;;  %v3495_v2 = vld [vmem:[%s5976_s1 + $0x130] sm:$0xff]  ;;  %v3494_v3 = vld [vmem:[%s5976_s1 + $0x128] sm:$0xff]  ;;  %s3743_s28 = smov 64   ;;  %v242_v44 = vlaneseq }
   0xd   : > { %3630 = vmatprep.subr.mxu1 %v5981_v1  ;;  %1959 = vmatprep.subr.mxu0 %v5981_v1  ;;  %v3493_v6 = vld [vmem:[%s5976_s1 + $0x120] sm:$0xff]  ;;  %v3492_v9 = vld [vmem:[%s5976_s1 + $0x118] sm:$0xff]  ;;  %v3491_v10 = vld [vmem:[%s5976_s1 + $0x110] sm:$0xff]  ;;  %vm6045_vm1 = vcmask 523264  }
   0xe   : > { %s6665_s12 = smov (!%p191_p4, %s3732_s12), 1  ;;  %3654 = vmatpush1.msra.mxu1 %v3496_v0  ;;  %1960 = vmatpush1.msra.mxu0 %v3496_v0  ;;  %v3490_v13 = vld [vmem:[%s5976_s1 + $0x108] sm:$0xff]  ;;  %v3489_v16 = vld [vmem:[%s5976_s1 + $0x100] sm:$0xff]  ;;  %v3488_v17 = vld [vmem:[%s5976_s1 + $0xf8] sm:$0xff]  ;;  %v4019_v49 = vshrl.u32 %v242_v44, 7 }
   0xf   : > { %3631 = vmatprep.subr.mxu1 %v5981_v1  ;;  %1961 = vmatprep.subr.mxu0 %v5981_v1  ;;  %s3628_s22 = sshll.u32 %s6665_s12, 8  ;;  %v3487_v20 = vld [vmem:[%s5976_s1 + $0xf0] sm:$0xff]  ;;  %v3486_v23 = vld [vmem:[%s5976_s1 + $0xe8] sm:$0xff]  ;;  %v3485_v24 = vld [vmem:[%s5976_s1 + $0xe0] sm:$0xff]  ;;  %s3629_s16 = sshll.u32 %s6665_s12, 6 }
  0x10   : > { %3655 = vmatpush1.msra.mxu1 %v3495_v2  ;;  %1962 = vmatpush1.msra.mxu0 %v3495_v2  ;;  %s3801_s25 = scalar_lea.vmem %s5975_s0, %s3628_s22  ;;  %v3484_v27 = vld [vmem:[%s5976_s1 + $0xd8] sm:$0xff]  ;;  %v3483_v30 = vld [vmem:[%s5976_s1 + $0xd0] sm:$0xff]  ;;  %v3482_v31 = vld [vmem:[%s5976_s1 + $0xc8] sm:$0xff]  ;;  %vm6041_vm0 = vcmp.lt.s32.totalorder %v4019_v49, 7  ;;  %v259_v2 = vadd.s32 128, %v4019_v49  ;;  %vm6042_vm2 = vcmp.lt.s32.totalorder %v4019_v49, 1  ;;  %s5884_s19 = scalar_lea.vmem %s5978_s3, %s3629_s16 }
  0x11   : > { %3632 = vmatprep.subr.mxu1 %v5981_v1  ;;  %1963 = vmatprep.subr.mxu0 %v5981_v1  ;;  %v3806_v4 = vld [vmem:[%s3801_s25 + $0x80] sm:$0xff]  ;;  %v3809_v5 = vld [vmem:[%s3801_s25 + $0x88] sm:$0xff]  ;;  %v3839_v11 = vld [vmem:[%s3801_s25 + $0x90] sm:$0xff] }
  0x12   : > { %3656 = vmatpush1.msra.mxu1 %v3494_v3  ;;  %1964 = vmatpush1.msra.mxu0 %v3494_v3  ;;  %v3819_v7 = vld [vmem:[%s3801_s25] sm:$0xff]  ;;  %v3822_v8 = vld [vmem:[%s3801_s25 + $0x8] sm:$0xff]  ;;  %v3842_v12 = vld [vmem:[%s3801_s25 + $0x10] sm:$0xff]  ;;  %v5980_v50 = vrot.slane %v3806_v4, 1  ;;  %v1159_v51 = vrot.slane %v3809_v5, 1  ;;  %v260_v3 = vadd.s32 136, %v4019_v49 }
  0x13   : > { %1742 = vrot.lane.b32.xlu0 %v3806_v4, %s3743_s28  ;;  %1744 = vrot.lane.b32.xlu1 %v3809_v5, %s3743_s28  ;;  %v3854_v14 = vld [vmem:[%s3801_s25 + $0x98] sm:$0xff]  ;;  %v3874_v18 = vld [vmem:[%s3801_s25 + $0xa0] sm:$0xff]  ;;  %v4055_v57 = vrot.slane %v3819_v7, 1  ;;  %v1143_v58 = vrot.slane %v3822_v8, 1  ;;  %v4192_v44 = vrot.slane %v3842_v12, 1 }
  0x14   : > { %3633 = vmatprep.subr.mxu1 %v5981_v1  ;;  %1965 = vmatprep.subr.mxu0 %v5981_v1  ;;  %v3857_v15 = vld [vmem:[%s3801_s25 + $0x18] sm:$0xff]  ;;  %v3877_v19 = vld [vmem:[%s3801_s25 + $0x20] sm:$0xff]  ;;  %v3889_v21 = vld [vmem:[%s3801_s25 + $0xa8] sm:$0xff]  ;;  %v4050_v56 = vsel %vm6041_vm0, %v5980_v50, %v1159_v51 }
  0x15   : > { %3657 = vmatpush1.msra.mxu1 %v3493_v6  ;;  %1966 = vmatpush1.msra.mxu0 %v3493_v6  ;;  %v3892_v22 = vld [vmem:[%s3801_s25 + $0x28] sm:$0xff]  ;;  %v3909_v25 = vld [vmem:[%s3801_s25 + $0xb0] sm:$0xff]  ;;  %v3924_v28 = vld [vmem:[%s3801_s25 + $0xb8] sm:$0xff]  ;;  %6165 = vst [vmem:[#allocation3_spill] sm:$0xff] %v4050_v56  ;;  %v4080_v62 = vsel %vm6041_vm0, %v4055_v57, %v1143_v58  ;;  %v391_v6 = vand.u32 15, %v259_v2 }
  0x16   : > { %3634 = vmatprep.subr.mxu1 %v5981_v1  ;;  %1967 = vmatprep.subr.mxu0 %v5981_v1  ;;  %v3912_v26 = vld [vmem:[%s3801_s25 + $0x30] sm:$0xff]  ;;  %v3927_v29 = vld [vmem:[%s3801_s25 + $0x38] sm:$0xff]  ;;  %v3944_v32 = vld [vmem:[%s3801_s25 + $0xc0] sm:$0xff]  ;;  %6174 = vst [vmem:[#allocation8_spill] sm:$0xff] %v4192_v44 }
  0x17   : > { %1710 = vrot.lane.b32.xlu0 %v3819_v7, %s3743_s28  ;;  %1712 = vrot.lane.b32.xlu1 %v3822_v8, %s3743_s28  ;;  %v3947_v33 = vld [vmem:[%s3801_s25 + $0x40] sm:$0xff]  ;;  %v3959_v35 = vld [vmem:[%s3801_s25 + $0xc8] sm:$0xff]  ;;  %vm4163_vm3 = vcmp.ge.s32.totalorder %v391_v6, 1 }
  0x18   : > { %3658 = vmatpush1.msra.mxu1 %v3492_v9  ;;  %1968 = vmatpush1.msra.mxu0 %v3492_v9  ;;  %v3481_v34 = vld [vmem:[%s5976_s1 + $0xc0] sm:$0xff]  ;;  %v3962_v36 = vld [vmem:[%s3801_s25 + $0x48] sm:$0xff]  ;;  %v3504_v37 = vld [vmem:[%s5976_s1 + $0x178] sm:$0xff] }
  0x19   : > { %3635 = vmatprep.subr.mxu1 %v5981_v1  ;;  %1969 = vmatprep.subr.mxu0 %v5981_v1  ;;  %v3503_v38 = vld [vmem:[%s5976_s1 + $0x170] sm:$0xff]  ;;  %v3502_v41 = vld [vmem:[%s5976_s1 + $0x168] sm:$0xff]  ;;  %v3994_v42 = vld [vmem:[%s3801_s25 + $0xd8] sm:$0xff] }
  0x1a   : > { %3659 = vmatpush1.msra.mxu1 %v3491_v10  ;;  %1970 = vmatpush1.msra.mxu0 %v3491_v10  ;;  %v3979_v39 = vld [vmem:[%s3801_s25 + $0xd0] sm:$0xff]  ;;  %v3997_v43 = vld [vmem:[%s3801_s25 + $0x58] sm:$0xff]  ;;  %v3501_v45 = vld [vmem:[%s5976_s1 + $0x160] sm:$0xff]  ;;  %v965_v10 = vrot.slane %v3806_v4, 7 }
  0x1b   : > { %1746 = vrot.lane.b32.xlu0 %v3839_v11, %s3743_s28  ;;  %1714 = vrot.lane.b32.xlu1 %v3842_v12, %s3743_s28  ;;  %v3982_v40 = vld [vmem:[%s3801_s25 + $0x50] sm:$0xff]  ;;  %v3500_v46 = vld [vmem:[%s5976_s1 + $0x158] sm:$0xff] }
  0x1c   : > { %3636 = vmatprep.subr.mxu1 %v5981_v1  ;;  %1971 = vmatprep.subr.mxu0 %v5981_v1  ;;  %v4014_v47 = vld [vmem:[%s3801_s25 + $0xe0] sm:$0xff]  ;;  %v3499_v52 = vld [vmem:[%s5976_s1 + $0x150] sm:$0xff]  ;;  %v4034_v53 = vld [vmem:[%s3801_s25 + $0xe8] sm:$0xff] }
  0x1d   : > { %3660 = vmatpush1.msra.mxu1 %v3490_v13  ;;  %1972 = vmatpush1.msra.mxu0 %v3490_v13  ;;  %v4017_v48 = vld [vmem:[%s3801_s25 + $0x60] sm:$0xff]  ;;  %v4037_v54 = vld [vmem:[%s3801_s25 + $0x68] sm:$0xff]  ;;  %v4066_v60 = vld [vmem:[%s3801_s25 + $0xf0] sm:$0xff]  ;;  %v398_v13 = vand.u32 15, %v260_v3 }
  0x1e   : > { %3637 = vmatprep.subr.mxu1 %v5981_v1  ;;  %1973 = vmatprep.subr.mxu0 %v5981_v1  ;;  %v3498_v55 = vld [vmem:[%s5976_s1 + $0x148] sm:$0xff]  ;;  %v3497_v59 = vld [vmem:[%s5976_s1 + $0x140] sm:$0xff]  ;;  %v4069_v61 = vld [vmem:[%s3801_s25 + $0x70] sm:$0xff] }
  0x1f   : > { %1748 = vrot.lane.b32.xlu0 %v3854_v14, %s3743_s28  ;;  %1716 = vrot.lane.b32.xlu1 %v3857_v15, %s3743_s28  ;;  %v4087_v63 = vld [vmem:[%s3801_s25 + $0xf8] sm:$0xff]  ;;  %vm4174_vm4 = vcmp.lt.s32.totalorder %v398_v13, 15  ;;  %v1161_v13 = vrot.slane %v3854_v14, 1 }
  0x20   : > { %3661 = vmatpush1.msra.mxu1 %v3489_v16  ;;  %1974 = vmatpush1.msra.mxu0 %v3489_v16  ;;  %v4090_v0 = vld [vmem:[%s3801_s25 + $0x78] sm:$0xff]  ;;  %v1160_v16 = vrot.slane %v3839_v11, 1 }
  0x21   : > { %3638 = vmatprep.subr.mxu1 %v5981_v1  ;;  %1975 = vmatprep.subr.mxu0 %v5981_v1  ;;  %v5979_v9 = vrot.slane %v4090_v0, 7  ;;  %v1477_v2 = vld [vmem:[%s5976_s1 + $0x78] sm:$0xff] }
  0x22   : > { %3662 = vmatpush1.msra.mxu1 %v3488_v17  ;;  %1976 = vmatpush1.msra.mxu0 %v3488_v17  ;;  %v279_v17 = vand.u32 15, %v4019_v49 }
  0x23   : > { %1750 = vrot.lane.b32.xlu0 %v3874_v18, %s3743_s28  ;;  %1718 = vrot.lane.b32.xlu1 %v3877_v19, %s3743_s28 }
  0x24   : > { %3639 = vmatprep.subr.mxu1 %v5981_v1  ;;  %1977 = vmatprep.subr.mxu0 %v5981_v1  ;;  %vm4194_vm5 = vcmp.ge.s32.totalorder %v279_v17, 1 }
  0x25   : > { %3663 = vmatpush1.msra.mxu1 %v3487_v20  ;;  %1978 = vmatpush1.msra.mxu0 %v3487_v20  ;;  %v244_v20 = vadd.s32 8, %v4019_v49 }
  0x26   : > { %3640 = vmatprep.subr.mxu1 %v5981_v1  ;;  %1979 = vmatprep.subr.mxu0 %v5981_v1 }
  0x27   : > { %1752 = vrot.lane.b32.xlu0 %v3889_v21, %s3743_s28  ;;  %1720 = vrot.lane.b32.xlu1 %v3892_v22, %s3743_s28 }
  0x28   : > { %3664 = vmatpush1.msra.mxu1 %v3486_v23  ;;  %1980 = vmatpush1.msra.mxu0 %v3486_v23  ;;  %v261_v23 = vadd.s32 144, %v4019_v49 }
  0x29   : > { %3641 = vmatprep.subr.mxu1 %v5981_v1  ;;  %1981 = vmatprep.subr.mxu0 %v5981_v1 }
  0x2a   : > { %3665 = vmatpush1.msra.mxu1 %v3485_v24  ;;  %1982 = vmatpush1.msra.mxu0 %v3485_v24  ;;  %v4158_v24 = vrot.slane %v3819_v7, 7 }
  0x2b   : > { %1754 = vrot.lane.b32.xlu0 %v3909_v25, %s3743_s28  ;;  %1722 = vrot.lane.b32.xlu1 %v3912_v26, %s3743_s28 }
  0x2c   : > { %3642 = vmatprep.subr.mxu1 %v5981_v1  ;;  %1983 = vmatprep.subr.mxu0 %v5981_v1 }
  0x2d   : > { %3666 = vmatpush1.msra.mxu1 %v3484_v27  ;;  %1984 = vmatpush1.msra.mxu0 %v3484_v27  ;;  %v4161_v27 = vrot.slane %v4087_v63, 7 }
  0x2e   : > { %3643 = vmatprep.subr.mxu1 %v5981_v1  ;;  %1985 = vmatprep.subr.mxu0 %v5981_v1 }
  0x2f   : > { %1756 = vrot.lane.b32.xlu0 %v3924_v28, %s3743_s28  ;;  %1724 = vrot.lane.b32.xlu1 %v3927_v29, %s3743_s28 }
  0x30   : > { %3667 = vmatpush1.msra.mxu1 %v3483_v30  ;;  %1986 = vmatpush1.msra.mxu0 %v3483_v30  ;;  %v6166_v30 = vmov 0 }
  0x31   : > { %3644 = vmatprep.subr.mxu1 %v5981_v1  ;;  %1987 = vmatprep.subr.mxu0 %v5981_v1  ;;  %v6167_v30 = vsel %vm4163_vm3, 4294967295, %v6166_v30 }
  0x32   : > { %3668 = vmatpush1.msra.mxu1 %v3482_v31  ;;  %1988 = vmatpush1.msra.mxu0 %v3482_v31  ;;  %6168 = vst [vmem:[#allocation4_spill] sm:$0xff] %v6167_v30  ;;  %v4171_v31 = vsel %vm6042_vm2, %v5979_v9, %v965_v10  ;;  %v950_v9 = vrot.slane %v3822_v8, 7  ;;  %v6190_v30 = vmov 0 }
  0x33   : > { %1758 = vrot.lane.b32.xlu0 %v3944_v32, %s3743_s28  ;;  %1726 = vrot.lane.b32.xlu1 %v3947_v33, %s3743_s28  ;;  %6169 = vst [vmem:[#allocation5_spill] sm:$0xff] %v4171_v31 }
  0x34   : > { %3645 = vmatprep.subr.mxu1 %v5981_v1  ;;  %1989 = vmatprep.subr.mxu0 %v5981_v1 }
  0x35   : > { %3669 = vmatpush1.msra.mxu1 %v3481_v34  ;;  %1990 = vmatpush1.msra.mxu0 %v3481_v34  ;;  %v966_v34 = vrot.slane %v3809_v5, 7 }
  0x36   : > { %3646 = vmatprep.subr.mxu1 %v5981_v1  ;;  %2007 = vmatprep.subr.mxu0 %v5981_v1 }
  0x37   : > { %1760 = vrot.lane.b32.xlu0 %v3959_v35, %s3743_s28  ;;  %1728 = vrot.lane.b32.xlu1 %v3962_v36, %s3743_s28  ;;  %v4211_v6 = vsel %vm6042_vm2, %v965_v10, %v966_v34  ;;  %v1476_v10 = vld [vmem:[%s5976_s1 + $0x70] sm:$0xff] }
  0x38   : > { %3670 = vmatpush2.msra.mxu1 %v3504_v37  ;;  %2008 = vmatpush2.msra.mxu0 %v3504_v37  ;;  %v6170_v37 = vmov 0  ;;  %6177 = vst [vmem:[#allocation9_spill] sm:$0xff] %v4211_v6 }
  0x39   : > { %3647 = vmatprep.subr.mxu1 %v5981_v1  ;;  %2009 = vmatprep.subr.mxu0 %v5981_v1  ;;  %v6171_v37 = vsel %vm4174_vm4, 4294967295, %v6170_v37 }
  0x3a   : > { %3671 = vmatpush2.msra.mxu1 %v3503_v38  ;;  %2010 = vmatpush2.msra.mxu0 %v3503_v38  ;;  %6172 = vst [vmem:[#allocation6_spill] sm:$0xff] %v6171_v37  ;;  %v1566_v38 = vsel %vm4163_vm3, %v4171_v31, 0.0 }
  0x3b   : > { %1762 = vrot.lane.b32.xlu0 %v3979_v39, %s3743_s28  ;;  %1730 = vrot.lane.b32.xlu1 %v3982_v40, %s3743_s28 }
  0x3c   : > { %3648 = vmatprep.subr.mxu1 %v5981_v1  ;;  %2011 = vmatprep.subr.mxu0 %v5981_v1 }
  0x3d   : > { %3672 = vmatpush2.msra.mxu1 %v3502_v41  ;;  %2012 = vmatpush2.msra.mxu0 %v3502_v41  ;;  %v286_v41 = vand.u32 15, %v244_v20  ;;  %v262_v20 = vadd.s32 152, %v4019_v49 }
  0x3e   : > { %3649 = vmatprep.subr.mxu1 %v5981_v1  ;;  %2013 = vmatprep.subr.mxu0 %v5981_v1 }
  0x3f   : > { %1764 = vrot.lane.b32.xlu0 %v3994_v42, %s3743_s28  ;;  %1732 = vrot.lane.b32.xlu1 %v3997_v43, %s3743_s28  ;;  %vm4225_vm6 = vcmp.lt.s32.totalorder %v286_v41, 15  ;;  %v412_v37 = vand.u32 15, %v262_v20  ;;  %v3583_v20 = vld [vmem:[%s5976_s1 + $0x1f0] sm:$0xff] }
  0x40   : > { %3673 = vmatpush2.msra.mxu1 %v3501_v45  ;;  %2014 = vmatpush2.msra.mxu0 %v3501_v45 }
  0x41   : > { %3650 = vmatprep.subr.mxu1 %v5981_v1  ;;  %2015 = vmatprep.subr.mxu0 %v5981_v1  ;;  %vm4306_vm8 = vcmp.lt.s32.totalorder %v412_v37, 15  ;;  %v1474_v37 = vld [vmem:[%s5976_s1 + $0x60] sm:$0xff] }
  0x42   : > { %3674 = vmatpush2.msra.mxu1 %v3500_v46  ;;  %2016 = vmatpush2.msra.mxu0 %v3500_v46  ;;  %v1549_v46 = vsel %vm6042_vm2, %v4161_v27, %v4158_v24  ;;  %v6191_v30 = vsel %vm4306_vm8, 4294967295, %v6190_v30 }
  0x43   : > { %1766 = vrot.lane.b32.xlu0 %v4014_v47, %s3743_s28  ;;  %1734 = vrot.lane.b32.xlu1 %v4017_v48, %s3743_s28  ;;  %v1550_v50 = vsel %vm4194_vm5, %v1549_v46, 0.0  ;;  %6192 = vst [vmem:[#allocation17_spill] sm:$0xff] %v6191_v30  ;;  %v6200_v30 = vrot.slane %v3877_v19, 1 }
  0x44   : > { %3651 = vmatprep.subr.mxu1 %v5981_v1  ;;  %2017 = vmatprep.subr.mxu0 %v5981_v1 }
  0x45   : > { %3675 = vmatpush2.msra.mxu1 %v3499_v52  ;;  %2018 = vmatpush2.msra.mxu0 %v3499_v52  ;;  %v5983_v52 = vrot.slane %v3839_v11, 7 }
  0x46   : > { %3652 = vmatprep.subr.mxu1 %v5981_v1  ;;  %2019 = vmatprep.subr.mxu0 %v5981_v1 }
  0x47   : > { %1768 = vrot.lane.b32.xlu0 %v4034_v53, %s3743_s28  ;;  %1736 = vrot.lane.b32.xlu1 %v4037_v54, %s3743_s28  ;;  %v4247_v41 = vsel %vm6042_vm2, %v966_v34, %v5983_v52  ;;  %v3584_v34 = vld [vmem:[%s5976_s1 + $0x1f8] sm:$0xff] }
  0x48   : > { %3676 = vmatpush2.msra.mxu1 %v3498_v55  ;;  %3521 = vmatprep.mubr.msk.f32.mxu1 %vm6045_vm1, %v4050_v56  ;;  %6184 = vst [vmem:[#allocation12_spill] sm:$0xff] %v4247_v41  ;;  %v6206_v56 = vrot.slane %v3874_v18, 1 }
  0x49   : > { %3653 = vmatprep.subr.mxu1 %v5981_v1  ;;  %2020 = vmatpush2.msra.mxu0 %v3498_v55 }
  0x4a   : > { %3677 = vmatpush2.msra.mxu1 %v3497_v59  ;;  %2021 = vmatprep.subr.mxu0 %v5981_v1 }
  0x4b   : > { %1770 = vrot.lane.b32.xlu0 %v4066_v60, %s3743_s28  ;;  %1738 = vrot.lane.b32.xlu1 %v4069_v61, %s3743_s28 }
  0x4c   : > { %2280 = vmatprep.subr.mxu1 %v5981_v1  ;;  %2022 = vmatpush2.msra.mxu0 %v3497_v59 }
  0x4d   : > { %3505 = vmatprep.mubr.msk.f32.mxu0 %vm6045_vm1, %v4080_v62  ;;  %2978 = vmatprep.subr.mxu0 %v5981_v1 }
  0x4f   : > { %1772 = vrot.lane.b32.xlu0 %v4087_v63, %s3743_s28  ;;  %1740 = vrot.lane.b32.xlu1 %v4090_v0, %s3743_s28 }
  0x53   : > { %1333 = vrot.lane.b32.xlu0 %v5981_v1, %s3743_s28  ;;  %2729 = vrot.lane.b32.xlu1 %v3842_v12, %s3743_s28 }
  0x57   : > { %1335 = vrot.lane.b32.xlu0 %v5981_v1, %s3743_s28  ;;  %2731 = vrot.lane.b32.xlu1 %v3857_v15, %s3743_s28 }
  0x5b   : > { %1337 = vrot.lane.b32.xlu0 %v3819_v7, %s3743_s28  ;;  %2733 = vrot.lane.b32.xlu1 %v3877_v19, %s3743_s28  ;;  %v4182_v7 = vsel %vm6041_vm0, %v1159_v51, %v1160_v16  ;;  %v405_v51 = vand.u32 15, %v261_v23  ;;  %v245_v23 = vadd.s32 16, %v4019_v49 }
  0x5c   : > { %6173 = vst [vmem:[#allocation7_spill] sm:$0xff] %v4182_v7  ;;  %v1663_v3 = vsel %vm4174_vm4, %v4182_v7, 0.0  ;;  %v952_v7 = vrot.slane %v3857_v15, 7 }
  0x5d   : > { %vm4239_vm7 = vcmp.ge.s32.totalorder %v405_v51, 1  ;;  %v5996_v51 = vrot.slane %v3874_v18, 1 }
  0x5f   : > { %1339 = vrot.lane.b32.xlu0 %v3822_v8, %s3743_s28  ;;  %2735 = vrot.lane.b32.xlu1 %v3892_v22, %s3743_s28 }
  0x63   : > { %1341 = vrot.lane.b32.xlu0 %v3842_v12, %s3743_s28  ;;  %2737 = vrot.lane.b32.xlu1 %v3912_v26, %s3743_s28 }
  0x67   : > { %1343 = vrot.lane.b32.xlu0 %v3857_v15, %s3743_s28  ;;  %2739 = vrot.lane.b32.xlu1 %v3927_v29, %s3743_s28 }
  0x6b   : > { %1345 = vrot.lane.b32.xlu0 %v3877_v19, %s3743_s28  ;;  %2741 = vrot.lane.b32.xlu1 %v3947_v33, %s3743_s28 }
  0x6f   : > { %1347 = vrot.lane.b32.xlu0 %v3892_v22, %s3743_s28  ;;  %2743 = vrot.lane.b32.xlu1 %v3962_v36, %s3743_s28 }
  0x73   : > { %1349 = vrot.lane.b32.xlu0 %v3912_v26, %s3743_s28  ;;  %2745 = vrot.lane.b32.xlu1 %v3982_v40, %s3743_s28 }
  0x77   : > { %1351 = vrot.lane.b32.xlu0 %v3927_v29, %s3743_s28  ;;  %2747 = vrot.lane.b32.xlu1 %v3997_v43, %s3743_s28 }
  0x7b   : > { %1353 = vrot.lane.b32.xlu0 %v3947_v33, %s3743_s28  ;;  %2749 = vrot.lane.b32.xlu1 %v4017_v48, %s3743_s28 }
  0x7f   : > { %1355 = vrot.lane.b32.xlu0 %v3962_v36, %s3743_s28  ;;  %2751 = vrot.lane.b32.xlu1 %v4037_v54, %s3743_s28 }
  0x83   : > { %1357 = vrot.lane.b32.xlu0 %v3982_v40, %s3743_s28  ;;  %2753 = vrot.lane.b32.xlu1 %v4069_v61, %s3743_s28 }
  0x85   : > { %v1743_v55 = vpop.permute.xlu0 %1742  ;;  %v1745_v59 = vpop.permute.xlu1 %1744 }
  0x86   : > { %v1822_v17 = vsel %vm6045_vm1, %v1566_v38, %v1743_v55  ;;  %v4234_v38 = vsel %vm6041_vm0, %v1143_v58, %v4192_v44  ;;  %v1823_v46 = vsel %vm6045_vm1, %v4211_v6, %v1745_v59  ;;  %v6181_v55 = vmov 0 }
  0x87   : > { %2104 = vmatmul.mubr.f32.vlgmr.msra.gmra.mxu1 %v1822_v17  ;;  %1359 = vrot.lane.b32.xlu0 %v3997_v43, %s3743_s28  ;;  %6180 = vst [vmem:[#allocation10_spill] sm:$0xff] %v4234_v38  ;;  %v6182_v55 = vsel %vm4239_vm7, 4294967295, %v6181_v55  ;;  %v6185_v17 = vmov 0.0   ;;  %v4254_v59 = vsel %vm6041_vm0, %v1160_v16, %v1161_v13  ;;  %v1647_v52 = vsel %vm4225_vm6, %v4234_v38, 0.0 }
  0x88   : > { %2281 = vmatpush1.msra.mxu1 %v1477_v2  ;;  %3522 = vmatprep.mubr.msk.f32.mxu1 %vm6045_vm1, %v1663_v3  ;;  %6183 = vst [vmem:[#allocation11_spill] sm:$0xff] %v6182_v55  ;;  %6186 = vst [vmem:[#allocation13_spill] sm:$0xff] %v4254_v59  ;;  %v4258_v2 = vrot.slane %v3842_v12, 7  ;;  %v293_v6 = vand.u32 15, %v245_v23  ;;  %v4272_v12 = vsel %vm6042_vm2, %v4158_v24, %v950_v9  ;;  %v246_v16 = vadd.s32 24, %v4019_v49  ;;  %v1475_v23 = vld [vmem:[%s5976_s1 + $0x68] sm:$0xff] }
  0x89   : > { %v1711_v8 = vpop.permute.xlu0 %1710  ;;  %2282 = vmatprep.subr.mxu1 %v6185_v17  ;;  %2755 = vrot.lane.b32.xlu1 %v4090_v0, %s3743_s28  ;;  %v1713_v58 = vpop.permute.xlu1 %1712  ;;  %6187 = vst [vmem:[#allocation14_spill] sm:$0xff] %v4272_v12  ;;  %v4293_v55 = vsel %vm6041_vm0, %v1161_v13, %v5996_v51  ;;  %v6195_v51 = vrot.slane %v3839_v11, 7  ;;  %v6222_v38 = vmov 0 }
  0x8a   : > { %v1806_v3 = vsel %vm6045_vm1, %v1550_v50, %v1711_v8  ;;  %2283 = vmatpush1.msra.mxu1 %v1476_v10  ;;  %v1568_v50 = vsel %vm4239_vm7, %v4247_v41, 0.0  ;;  %v1145_v10 = vrot.slane %v3857_v15, 1  ;;  %6188 = vst [vmem:[#allocation15_spill] sm:$0xff] %v4293_v55  ;;  %v968_v41 = vrot.slane %v3854_v14, 7  ;;  %v3581_v15 = vld [vmem:[%s5976_s1 + $0x1e0] sm:$0xff] }
  0x8b   : > { %2109 = vmatmul.mubr.f32.gmra.mxu1 %v1823_v46  ;;  %1361 = vrot.lane.b32.xlu0 %v4017_v48, %s3743_s28  ;;  %v263_v46 = vadd.s32 160, %v4019_v49  ;;  %vm4310_vm9 = vcmp.ge.s32.totalorder %v293_v6, 1  ;;  %v3582_v6 = vld [vmem:[%s5976_s1 + $0x1e8] sm:$0xff] }
  0x8c   : > { %2024 = vmatmul.mubr.f32.vlgmr.msra.gmra.mxu0 %v1806_v3  ;;  %3523 = vmatprep.mubr.msk.f32.mxu1 %vm6045_vm1, %v4254_v59  ;;  %v4298_v59 = vsel %vm6042_vm2, %v950_v9, %v4258_v2  ;;  %v300_v9 = vand.u32 15, %v246_v16  ;;  %v264_v16 = vadd.s32 168, %v4019_v49 }
  0x8d   : > { %2979 = vmatpush1.msra.mxu0 %v3584_v34  ;;  %v1747_v8 = vpop.permute.xlu0 %1746  ;;  %3506 = vmatprep.mubr.msk.f32.mxu0 %vm6045_vm1, %v1647_v52  ;;  %v1715_v3 = vpop.permute.xlu1 %1714  ;;  %6189 = vst [vmem:[#allocation16_spill] sm:$0xff] %v4298_v59  ;;  %v1807_v52 = vsel %vm6045_vm1, %v4272_v12, %v1713_v58  ;;  %v4328_v58 = vsel %vm6041_vm0, %v4192_v44, %v1145_v10 }
  0x8e   : > { %2980 = vmatprep.subr.mxu0 %v6185_v17  ;;  %2284 = vmatprep.subr.mxu1 %v6185_v17  ;;  %v1824_v34 = vsel %vm6045_vm1, %v1568_v50, %v1747_v8  ;;  %v419_v50 = vand.u32 15, %v263_v46  ;;  %v1552_v8 = vsel %vm4310_vm9, %v4298_v59, 0.0  ;;  %v4341_v44 = vsel %vm6042_vm2, %v6195_v51, %v968_v41 }
  0x8f   : > { %2981 = vmatpush1.msra.mxu0 %v3583_v20  ;;  %2285 = vmatpush1.msra.mxu1 %v1475_v23  ;;  %v1665_v23 = vsel %vm4306_vm8, %v4293_v55, 0.0  ;;  %6196 = vst [vmem:[#allocation18_spill] sm:$0xff] %v4341_v44  ;;  %vm4347_vm10 = vcmp.lt.s32.totalorder %v300_v9, 15  ;;  %v4355_v51 = vsel %vm6041_vm0, %v1145_v10, %v6200_v30  ;;  %v1163_v55 = vrot.slane %v3889_v21, 1 }
  0x90   : > { %2757 = vrot.lane.b32.xlu1 %v3806_v4, %s3743_s28  ;;  %1363 = vrot.lane.b32.xlu0 %v4037_v54, %s3743_s28  ;;  %v1808_v9 = vsel %vm6045_vm1, %v1552_v8, %v1715_v3  ;;  %vm4365_vm11 = vcmp.ge.s32.totalorder %v419_v50, 1  ;;  %v6204_v30 = vrot.slane %v3874_v18, 7  ;;  %v1473_v3 = vld [vmem:[%s5976_s1 + $0x58] sm:$0xff]  ;;  %v4403_v8 = vsel %vm6042_vm2, %v4258_v2, %v952_v7 }
  0x91   : > { %2029 = vmatmul.mubr.f32.gmra.mxu0 %v1807_v52  ;;  %2114 = vmatmul.mubr.f32.gmra.mxu1 %v1824_v34  ;;  %v1749_v20 = vpop.permute.xlu0 %1748  ;;  %v1717_v46 = vpop.permute.xlu1 %1716  ;;  %v247_v52 = vadd.s32 32, %v4019_v49  ;;  %v6197_v34 = vmov 0  ;;  %v970_v59 = vrot.slane %v3889_v21, 7 }
  0x92   : > { %2286 = vmatprep.subr.mxu1 %v6185_v17  ;;  %2982 = vmatprep.subr.mxu0 %v6185_v17  ;;  %v6198_v34 = vsel %vm4347_vm10, 4294967295, %v6197_v34  ;;  %v4373_v10 = vsel %vm6042_vm2, %v968_v41, %v6204_v30  ;;  %v1649_v41 = vsel %vm4347_vm10, %v4355_v51, 0.0 }
  0x93   : > { %2287 = vmatpush1.msra.mxu1 %v1474_v37  ;;  %2983 = vmatpush1.msra.mxu0 %v3582_v6  ;;  %6199 = vst [vmem:[#allocation19_spill] sm:$0xff] %v6198_v34  ;;  %v1825_v37 = vsel %vm6045_vm1, %v4341_v44, %v1749_v20  ;;  %v6201_v6 = vmov 0  ;;  %6205 = vst [vmem:[#allocation21_spill] sm:$0xff] %v4373_v10  ;;  %v307_v30 = vand.u32 15, %v247_v52  ;;  %v1570_v31 = vsel %vm4365_vm11, %v4373_v10, 0.0 }
  0x94   : > { %3507 = vmatprep.mubr.msk.f32.mxu0 %vm6045_vm1, %v4328_v58  ;;  %3524 = vmatprep.mubr.msk.f32.mxu1 %vm6045_vm1, %v1665_v23  ;;  %v6202_v6 = vsel %vm4365_vm11, 4294967295, %v6201_v6  ;;  %v426_v23 = vand.u32 15, %v264_v16  ;;  %v4398_v16 = vsel %vm6041_vm0, %v6206_v56, %v1163_v55  ;;  %v248_v52 = vadd.s32 40, %v4019_v49  ;;  %v1472_v56 = vld [vmem:[%s5976_s1 + $0x50] sm:$0xff] }
  0x95   : > { %6203 = vst [vmem:[#allocation20_spill] sm:$0xff] %v6202_v6  ;;  %2984 = vmatprep.subr.mxu0 %v6185_v17  ;;  %2288 = vmatprep.subr.mxu1 %v6185_v17  ;;  %v1751_v50 = vpop.permute.xlu0 %1750  ;;  %v4383_v20 = vpop.permute.xlu1 %1718  ;;  %6207 = vst [vmem:[#allocation22_spill] sm:$0xff] %v4398_v16  ;;  %v1147_v6 = vrot.slane %v3892_v22, 1  ;;  %vm4438_vm13 = vcmp.ge.s32.totalorder %v307_v30, 1  ;;  %v6213_v34 = vmov 0  ;;  %v6218_v30 = vrot.slane %v3877_v19, 1 }
  0x96   : > { %2759 = vrot.lane.b32.xlu1 %v3809_v5, %s3743_s28  ;;  %1365 = vrot.lane.b32.xlu0 %v4069_v61, %s3743_s28  ;;  %vm4419_vm12 = vcmp.lt.s32.totalorder %v426_v23, 15  ;;  %v1809_v23 = vsel %vm6045_vm1, %v4403_v8, %v1717_v46  ;;  %v6214_v34 = vsel %vm4438_vm13, 4294967295, %v6213_v34 }
  0x97   : > { %2034 = vmatmul.mubr.f32.gmra.mxu0 %v1808_v9  ;;  %2119 = vmatmul.mubr.f32.gmra.mxu1 %v1825_v37  ;;  %v3580_v9 = vld [vmem:[%s5976_s1 + $0x1d8] sm:$0xff]  ;;  %v265_v37 = vadd.s32 176, %v4019_v49  ;;  %6215 = vst [vmem:[#allocation25_spill] sm:$0xff] %v6214_v34  ;;  %v954_v34 = vrot.slane %v3892_v22, 7 }
  0x98   : > { %2985 = vmatpush1.msra.mxu0 %v3581_v15  ;;  %2289 = vmatpush1.msra.mxu1 %v1473_v3  ;;  %v6208_v15 = vmov 0  ;;  %v6211_v3 = vrot.slane %v3909_v25, 1 }
  0x99   : > { %2986 = vmatprep.subr.mxu0 %v6185_v17  ;;  %3508 = vmatprep.mubr.msk.f32.mxu0 %vm6045_vm1, %v1649_v41  ;;  %v1753_v44 = vpop.permute.xlu0 %1752  ;;  %v6209_v15 = vsel %vm4419_vm12, 4294967295, %v6208_v15  ;;  %v4430_v12 = vpop.permute.xlu1 %1720  ;;  %v1826_v41 = vsel %vm6045_vm1, %v1570_v31, %v1751_v50  ;;  %v1471_v31 = vld [vmem:[%s5976_s1 + $0x48] sm:$0xff]  ;;  %v433_v46 = vand.u32 15, %v265_v37  ;;  %v6220_v37 = vrot.slane %v3874_v18, 7 }
  0x9a   : > { %6210 = vst [vmem:[#allocation23_spill] sm:$0xff] %v6209_v15  ;;  %v4427_v10 = vsel %vm6041_vm0, %v1163_v55, %v6211_v3  ;;  %3525 = vmatprep.mubr.msk.f32.mxu1 %vm6045_vm1, %v4398_v16  ;;  %2290 = vmatprep.subr.mxu1 %v6185_v17  ;;  %v6216_v55 = vrot.slane %v3877_v19, 7  ;;  %v314_v16 = vand.u32 15, %v248_v52  ;;  %v4464_v52 = vsel %vm6041_vm0, %v6218_v30, %v1147_v6 }
  0x9b   : > { %6212 = vst [vmem:[#allocation24_spill] sm:$0xff] %v4427_v10  ;;  %2987 = vmatpush1.msra.mxu0 %v3580_v9  ;;  %2291 = vmatpush1.msra.mxu1 %v1472_v56  ;;  %6219 = vst [vmem:[#allocation27_spill] sm:$0xff] %v4464_v52  ;;  %v1667_v9 = vsel %vm4419_vm12, %v4427_v10, 0.0  ;;  %v266_v30 = vadd.s32 184, %v4019_v49  ;;  %v249_v50 = vadd.s32 48, %v4019_v49  ;;  %v1165_v10 = vrot.slane %v3924_v28, 1 }
  0x9c   : > { %v4446_v3 = vsel %vm6042_vm2, %v952_v7, %v6216_v55  ;;  %2761 = vrot.lane.b32.xlu1 %v3839_v11, %s3743_s28  ;;  %1367 = vrot.lane.b32.xlu0 %v4090_v0, %s3743_s28  ;;  %v3579_v7 = vld [vmem:[%s5976_s1 + $0x1d0] sm:$0xff]  ;;  %vm4484_vm14 = vcmp.lt.s32.totalorder %v314_v16, 15  ;;  %vm4503_vm15 = vcmp.ge.s32.totalorder %v433_v46, 1 }
  0x9d   : > { %6217 = vst [vmem:[#allocation26_spill] sm:$0xff] %v4446_v3  ;;  %2039 = vmatmul.mubr.f32.gmra.mxu0 %v1809_v23  ;;  %2124 = vmatmul.mubr.f32.gmra.mxu1 %v1826_v41  ;;  %v1554_v56 = vsel %vm4438_vm13, %v4446_v3, 0.0  ;;  %v4476_v23 = vsel %vm6042_vm2, %v6220_v37, %v970_v59  ;;  %v1755_v41 = vpop.permute.xlu0 %1754  ;;  %v4478_v55 = vpop.permute.xlu1 %1722  ;;  %v6223_v38 = vsel %vm4484_vm14, 4294967295, %v6222_v38  ;;  %v6225_v37 = vrot.slane %v3912_v26, 1 }
  0x9e   : > { %6221 = vst [vmem:[#allocation28_spill] sm:$0xff] %v4476_v23  ;;  %2292 = vmatprep.subr.mxu1 %v6185_v17  ;;  %2988 = vmatprep.subr.mxu0 %v6185_v17  ;;  %6224 = vst [vmem:[#allocation29_spill] sm:$0xff] %v6223_v38  ;;  %v1810_v16 = vsel %vm6045_vm1, %v1554_v56, %v4383_v20  ;;  %v3578_v20 = vld [vmem:[%s5976_s1 + $0x1c8] sm:$0xff] }
  0x9f   : > { %2293 = vmatpush1.msra.mxu1 %v1471_v31  ;;  %2989 = vmatpush1.msra.mxu0 %v3579_v7  ;;  %v4492_v15 = vsel %vm6041_vm0, %v1147_v6, %v6225_v37  ;;  %v1827_v31 = vsel %vm6045_vm1, %v4476_v23, %v1753_v44  ;;  %v6227_v7 = vmov 0  ;;  %v6230_v6 = vrot.slane %v3909_v25, 7  ;;  %v1470_v44 = vld [vmem:[%s5976_s1 + $0x40] sm:$0xff] }
  0xa0   : > { %6226 = vst [vmem:[#allocation30_spill] sm:$0xff] %v4492_v15  ;;  %3509 = vmatprep.mubr.msk.f32.mxu0 %vm6045_vm1, %v4464_v52  ;;  %3526 = vmatprep.mubr.msk.f32.mxu1 %vm6045_vm1, %v1667_v9  ;;  %v6228_v7 = vsel %vm4503_vm15, 4294967295, %v6227_v7  ;;  %v1651_v37 = vsel %vm4484_vm14, %v4492_v15, 0.0  ;;  %v321_v23 = vand.u32 15, %v249_v50  ;;  %v6232_v9 = vrot.slane %v3909_v25, 1 }
  0xa1   : > { %6229 = vst [vmem:[#allocation31_spill] sm:$0xff] %v6228_v7  ;;  %v4511_v22 = vsel %vm6042_vm2, %v970_v59, %v6230_v6  ;;  %2990 = vmatprep.subr.mxu0 %v6185_v17  ;;  %2294 = vmatprep.subr.mxu1 %v6185_v17  ;;  %v4521_v46 = vpop.permute.xlu0 %1756  ;;  %v4525_v59 = vpop.permute.xlu1 %1724  ;;  %v440_v6 = vand.u32 15, %v266_v30  ;;  %v6234_v52 = vrot.slane %v3877_v19, 7  ;;  %v250_v50 = vadd.s32 56, %v4019_v49  ;;  %v3577_v30 = vld [vmem:[%s5976_s1 + $0x1c0] sm:$0xff]  ;;  %v1469_v19 = vld [vmem:[%s5976_s1 + $0x38] sm:$0xff] }
  0xa2   : > { %6231 = vst [vmem:[#allocation32_spill] sm:$0xff] %v4511_v22  ;;  %2763 = vrot.lane.b32.xlu1 %v3854_v14, %s3743_s28  ;;  %1369 = vrot.lane.b32.xlu0 %v3806_v4, %s3743_s28  ;;  %v4538_v56 = vsel %vm6041_vm0, %v6232_v9, %v1165_v10  ;;  %v1572_v38 = vsel %vm4503_vm15, %v4511_v22, 0.0  ;;  %v972_v7 = vrot.slane %v3924_v28, 7  ;;  %vm6248_vm15 = vcmp.lt.s32.totalorder %v4019_v49, 1 }
  0xa3   : > { %2044 = vmatmul.mubr.f32.gmra.mxu0 %v1810_v16  ;;  %2129 = vmatmul.mubr.f32.gmra.mxu1 %v1827_v31  ;;  %6233 = vst [vmem:[#allocation33_spill] sm:$0xff] %v4538_v56  ;;  %v4544_v3 = vsel %vm6042_vm2, %v6234_v52, %v954_v34  ;;  %v267_v16 = vadd.s32 192, %v4019_v49  ;;  %v1149_v52 = vrot.slane %v3927_v29, 1  ;;  %v6235_v31 = vrot.slane %v3944_v32, 1 }
  0xa4   : > { %2991 = vmatpush1.msra.mxu0 %v3578_v20  ;;  %2295 = vmatpush1.msra.mxu1 %v1470_v44  ;;  %v6237_v44 = vrot.slane %v3912_v26, 7 }
  0xa5   : > { %2992 = vmatprep.subr.mxu0 %v6185_v17  ;;  %3510 = vmatprep.mubr.msk.f32.mxu0 %vm6045_vm1, %v1651_v37  ;;  %v4564_v20 = vsel %vm6041_vm0, %v1165_v10, %v6235_v31  ;;  %v4573_v22 = vpop.permute.xlu0 %1758  ;;  %v4575_v15 = vpop.permute.xlu1 %1726  ;;  %v1811_v10 = vsel %vm6045_vm1, %v4544_v3, %v4430_v12  ;;  %v1828_v37 = vsel %vm6045_vm1, %v1572_v38, %v1755_v41  ;;  %vm4584_vm0 = vcmp.lt.s32.totalorder %v440_v6, 15  ;;  %v1468_v38 = vld [vmem:[%s5976_s1 + $0x30] sm:$0xff]  ;;  %v3576_v12 = vld [vmem:[%s5976_s1 + $0x1b8] sm:$0xff] }
  0xa6   : > { %6236 = vst [vmem:[#allocation34_spill] sm:$0xff] %v4564_v20  ;;  %v4570_v9 = vsel %vm6042_vm2, %v954_v34, %v6237_v44  ;;  %3527 = vmatprep.mubr.msk.f32.mxu1 %vm6045_vm1, %v4538_v56  ;;  %2296 = vmatprep.subr.mxu1 %v6185_v17  ;;  %v6238_v34 = vmov 0  ;;  %vm4588_vm2 = vcmp.ge.s32.totalorder %v321_v23, 1  ;;  %v6241_v31 = vmov 0 }
  0xa7   : > { %v6239_v34 = vsel %vm4584_vm0, 4294967295, %v6238_v34  ;;  %v6242_v31 = vsel %vm4588_vm2, 4294967295, %v6241_v31  ;;  %2993 = vmatpush1.msra.mxu0 %v3577_v30  ;;  %2297 = vmatpush1.msra.mxu1 %v1469_v19  ;;  %v328_v44 = vand.u32 15, %v250_v50  ;;  %v447_v23 = vand.u32 15, %v267_v16 }
  0xa8   : > { %6240 = vst [vmem:[#allocation35_spill] sm:$0xff] %v6239_v34  ;;  %6243 = vst [vmem:[#allocation36_spill] sm:$0xff] %v6242_v31  ;;  %2765 = vrot.lane.b32.xlu1 %v3874_v18, %s3743_s28  ;;  %1371 = vrot.lane.b32.xlu0 %v3809_v5, %s3743_s28  ;;  %v6244_v6 = vrot.slane %v3912_v26, 1  ;;  %vm6245_vm1 = vcmp.lt.s32.totalorder %v4019_v49, 7  ;;  %v1669_v5 = vsel %vm4584_vm0, %v4564_v20, 0.0  ;;  %v1556_v30 = vsel %vm4588_vm2, %v4570_v9, 0.0 }
  0xa9   : > { %2049 = vmatmul.mubr.f32.gmra.mxu0 %v1811_v10  ;;  %2134 = vmatmul.mubr.f32.gmra.mxu1 %v1828_v37  ;;  %v6247_v19 = vrot.slane %v3909_v25, 7  ;;  %v4622_v10 = vpop.permute.xlu0 %1760  ;;  %v4624_v37 = vpop.permute.xlu1 %1728  ;;  %v251_v41 = vadd.s32 64, %v4019_v49  ;;  %v6250_v56 = vmov 0  ;;  %v1167_v20 = vrot.slane %v3959_v35, 1 }
  0xaa   : > { %v4608_v50 = vsel %vm6245_vm1, %v6244_v6, %v1149_v52  ;;  %2298 = vmatprep.subr.mxu1 %v6185_v17  ;;  %2994 = vmatprep.subr.mxu0 %v6185_v17  ;;  %v268_v6 = vadd.s32 200, %v4019_v49  ;;  %vm4630_vm1 = vcmp.lt.s32.totalorder %v328_v44, 15  ;;  %v956_v31 = vrot.slane %v3927_v29, 7 }
  0xab   : > { %6246 = vst [vmem:[#allocation37_spill] sm:$0xff] %v4608_v50  ;;  %v4620_v16 = vsel %vm6248_vm15, %v6247_v19, %v972_v7  ;;  %2299 = vmatpush1.msra.mxu1 %v1468_v38  ;;  %2995 = vmatpush1.msra.mxu0 %v3576_v12  ;;  %v6251_v56 = vsel %vm4630_vm1, 4294967295, %v6250_v56  ;;  %v6253_v19 = vrot.slane %v3947_v33, 1  ;;  %vm6254_vm15 = vcmp.lt.s32.totalorder %v4019_v49, 7 }
  0xac   : > { %6249 = vst [vmem:[#allocation38_spill] sm:$0xff] %v4620_v16  ;;  %6252 = vst [vmem:[#allocation39_spill] sm:$0xff] %v6251_v56  ;;  %vm6255_vm0 = vcmask 523264   ;;  %vm4650_vm7 = vcmp.ge.s32.totalorder %v447_v23, 1  ;;  %v6259_v12 = vmov 0  ;;  %2996 = vmatprep.subr.mxu0 %v6185_v17  ;;  %2300 = vmatprep.subr.mxu1 %v6185_v17 }
  0xad   : > { %v4638_v34 = vsel %vm6254_vm15, %v1149_v52, %v6253_v19  ;;  %3511 = vmatprep.mubr.msk.f32.mxu0 %vm6255_vm0, %v4608_v50  ;;  %vm6256_vm12 = vmmov %vm6255_vm0  ;;  %v6260_v12 = vsel %vm4650_vm7, 4294967295, %v6259_v12  ;;  %v6262_v52 = vrot.slane %v3944_v32, 7  ;;  %vm6263_vm15 = vcmp.lt.s32.totalorder %v4019_v49, 1  ;;  %2767 = vrot.lane.b32.xlu1 %v3889_v21, %s3743_s28 }
  0xae   : > { %3528 = vmatprep.mubr.msk.f32.mxu1 %vm6256_vm12, %v1669_v5  ;;  %vm6257_vm11 = vmmov %vm6255_vm0  ;;  %6261 = vst [vmem:[#allocation40_spill] sm:$0xff] %v6260_v12  ;;  %1373 = vrot.lane.b32.xlu0 %v3839_v11, %s3743_s28  ;;  %v1653_v19 = vsel %vm4630_vm1, %v4638_v34, 0.0  ;;  %v6265_v5 = vrot.slane %v3944_v32, 1  ;;  %v6268_v50 = vrot.slane %v3912_v26, 7  ;;  %v1466_v26 = vld [vmem:[%s5976_s1 + $0x20] sm:$0xff]  ;;  %v974_v12 = vrot.slane %v3959_v35, 7 }
  0xaf   : > { %v1812_v44 = vsel %vm6257_vm11, %v1556_v30, %v4478_v55  ;;  %vm6258_vm8 = vmmov %vm6255_vm0  ;;  %v4658_v29 = vsel %vm6263_vm15, %v972_v7, %v6262_v52  ;;  %v3575_v55 = vld [vmem:[%s5976_s1 + $0x1b0] sm:$0xff]  ;;  %v4670_v30 = vpop.permute.xlu0 %1762  ;;  %v4672_v7 = vpop.permute.xlu1 %1730  ;;  %v454_v52 = vand.u32 15, %v268_v6  ;;  %vm6266_vm0 = vcmp.lt.s32.totalorder %v4019_v49, 7  ;;  %v3574_v6 = vld [vmem:[%s5976_s1 + $0x1a8] sm:$0xff] }
  0xb0   : > { %v1829_v38 = vsel %vm6258_vm8, %v4620_v16, %v4521_v46  ;;  %6264 = vst [vmem:[#allocation41_spill] sm:$0xff] %v4658_v29  ;;  %v1467_v46 = vld [vmem:[%s5976_s1 + $0x28] sm:$0xff]  ;;  %v335_v16 = vand.u32 15, %v251_v41  ;;  %2054 = vmatmul.mubr.f32.gmra.mxu0 %v1812_v44  ;;  %v4685_v23 = vsel %vm6266_vm0, %v6265_v5, %v1167_v20  ;;  %vm6269_vm8 = vmmov %vm6263_vm15  ;;  %v1574_v11 = vsel %vm4650_vm7, %v4658_v29, 0.0 }
  0xb1   : > { %2139 = vmatmul.mubr.f32.gmra.mxu1 %v1829_v38  ;;  %6267 = vst [vmem:[#allocation42_spill] sm:$0xff] %v4685_v23  ;;  %v4691_v21 = vsel %vm6269_vm8, %v6268_v50, %v956_v31  ;;  %v252_v41 = vadd.s32 72, %v4019_v49  ;;  %2997 = vmatpush1.msra.mxu0 %v3575_v55  ;;  %v1151_v44 = vrot.slane %v3962_v36, 1  ;;  %v269_v50 = vadd.s32 208, %v4019_v49  ;;  %vm6271_vm12 = vmmov %vm6266_vm0 }
  0xb2   : > { %2301 = vmatpush1.msra.mxu1 %v1467_v46  ;;  %2998 = vmatprep.subr.mxu0 %v6185_v17  ;;  %v6270_v38 = vrot.slane %v3979_v39, 1  ;;  %v6273_v46 = vrot.slane %v3947_v33, 7  ;;  %vm6274_vm15 = vmmov %vm6269_vm8 }
  0xb3   : > { %3512 = vmatprep.mubr.msk.f32.mxu0 %vm6257_vm11, %v1653_v19  ;;  %v4720_v29 = vpop.permute.xlu0 %1764  ;;  %v4722_v56 = vpop.permute.xlu1 %1732  ;;  %vm6275_vm0 = vmmov %vm6257_vm11  ;;  %2302 = vmatprep.subr.mxu1 %v6185_v17 }
  0xb4   : > { %v4711_v55 = vsel %vm6271_vm12, %v1167_v20, %v6270_v38  ;;  %v4717_v5 = vsel %vm6274_vm15, %v956_v31, %v6273_v46  ;;  %3529 = vmatprep.mubr.msk.f32.mxu1 %vm6275_vm0, %v4685_v23  ;;  %vm6276_vm8 = vmmov %vm6275_vm0  ;;  %vm4732_vm12 = vcmp.lt.s32.totalorder %v454_v52, 15  ;;  %v6278_v31 = vmov 0  ;;  %2999 = vmatpush1.msra.mxu0 %v3574_v6 }
  0xb5   : > { %6272 = vst [vmem:[#allocation43_spill] sm:$0xff] %v4711_v55  ;;  %v1813_v20 = vsel %vm6276_vm8, %v4691_v21, %v4525_v59  ;;  %vm6277_vm11 = vmmov %vm6275_vm0  ;;  %v6279_v31 = vsel %vm4732_vm12, 4294967295, %v6278_v31  ;;  %vm4736_vm15 = vcmp.ge.s32.totalorder %v335_v16, 1  ;;  %2303 = vmatpush1.msra.mxu1 %v1466_v26  ;;  %v342_v38 = vand.u32 15, %v252_v41  ;;  %2769 = vrot.lane.b32.xlu1 %v3909_v25, %s3743_s28  ;;  %v3573_v59 = vld [vmem:[%s5976_s1 + $0x1a0] sm:$0xff] }
  0xb6   : > { %v1830_v19 = vsel %vm6277_vm11, %v1574_v11, %v4573_v22  ;;  %6280 = vst [vmem:[#allocation44_spill] sm:$0xff] %v6279_v31  ;;  %v6086_v46 = vrot.slane %v3982_v40, 1  ;;  %1375 = vrot.lane.b32.xlu0 %v3854_v14, %s3743_s28  ;;  %v1465_v22 = vld [vmem:[%s5976_s1 + $0x18] sm:$0xff]  ;;  %v6283_v16 = vrot.slane %v3947_v33, 1  ;;  %vm6284_vm0 = vcmp.lt.s32.totalorder %v4019_v49, 7  ;;  %2059 = vmatmul.mubr.f32.gmra.mxu0 %v1813_v20 }
  0xb7   : > { %v461_v11 = vand.u32 15, %v269_v50  ;;  %2144 = vmatmul.mubr.f32.gmra.mxu1 %v1830_v19  ;;  %v1671_v14 = vsel %vm4732_vm12, %v4711_v55, 0.0  ;;  %v1558_v41 = vsel %vm4736_vm15, %v4717_v5, 0.0  ;;  %v6285_v6 = vrot.slane %v3944_v32, 7  ;;  %v4773_v20 = vpop.permute.xlu1 %1734  ;;  %2304 = vmatprep.subr.mxu1 %v6185_v17 }
  0xb8   : > { %v4755_v52 = vsel %vm6284_vm0, %v6283_v16, %v1151_v44  ;;  %vm6286_vm8 = vcmp.lt.s32.totalorder %v4019_v49, 1  ;;  %v270_v50 = vadd.s32 216, %v4019_v49  ;;  %v4771_v16 = vpop.permute.xlu0 %1766  ;;  %3000 = vmatprep.subr.mxu0 %v6185_v17  ;;  %v253_v19 = vadd.s32 80, %v4019_v49  ;;  %2305 = vmatpush1.msra.mxu1 %v1465_v22 }
  0xb9   : > { %v4768_v26 = vsel %vm6286_vm8, %v6285_v6, %v974_v12  ;;  %3001 = vmatpush1.msra.mxu0 %v3573_v59  ;;  %vm4778_vm11 = vcmp.lt.s32.totalorder %v342_v38, 15  ;;  %v6288_v25 = vmov 0  ;;  %v4786_v6 = vsel %vm6284_vm0, %v1151_v44, %v6086_v46  ;;  %2306 = vmatprep.subr.mxu1 %v6185_v17 }
  0xba   : > { %6287 = vst [vmem:[#allocation45_spill] sm:$0xff] %v4768_v26  ;;  %v6289_v25 = vsel %vm4778_vm11, 4294967295, %v6288_v25  ;;  %v1169_v31 = vrot.slane %v3994_v42, 1  ;;  %v958_v55 = vrot.slane %v3962_v36, 7  ;;  %vm6291_vm8 = vcmask 523264   ;;  %3002 = vmatprep.subr.mxu0 %v6185_v17  ;;  %2771 = vrot.lane.b32.xlu1 %v3924_v28, %s3743_s28 }
  0xbb   : > { %6290 = vst [vmem:[#allocation46_spill] sm:$0xff] %v6289_v25  ;;  %3513 = vmatprep.mubr.msk.f32.mxu0 %vm6291_vm8, %v4755_v52  ;;  %vm6292_vm12 = vmmov %vm6291_vm8  ;;  %vm4798_vm3 = vcmp.ge.s32.totalorder %v461_v11, 1  ;;  %v6295_v59 = vmov 0  ;;  %v6298_v44 = vrot.slane %v3979_v39, 7  ;;  %vm6299_vm0 = vcmp.lt.s32.totalorder %v4019_v49, 1  ;;  %v4819_v46 = vpop.permute.xlu1 %1736  ;;  %1377 = vrot.lane.b32.xlu0 %v3874_v18, %s3743_s28 }
  0xbc   : > { %3530 = vmatprep.mubr.msk.f32.mxu1 %vm6292_vm12, %v1671_v14  ;;  %vm6293_vm7 = vmmov %vm6291_vm8  ;;  %v6296_v59 = vsel %vm4798_vm3, 4294967295, %v6295_v59  ;;  %v468_v11 = vand.u32 15, %v270_v50  ;;  %v6301_v50 = vrot.slane %v3979_v39, 1  ;;  %v6304_v28 = vrot.slane %v3947_v33, 7  ;;  %v1463_v33 = vld [vmem:[%s5976_s1 + $0x8] sm:$0xff] }
  0xbd   : > { %v1814_v38 = vsel %vm6293_vm7, %v1558_v41, %v4575_v15  ;;  %vm6294_vm4 = vmmov %vm6293_vm7  ;;  %6297 = vst [vmem:[#allocation47_spill] sm:$0xff] %v6296_v59  ;;  %v4806_v36 = vsel %vm6299_vm0, %v974_v12, %v6298_v44  ;;  %v3572_v15 = vld [vmem:[%s5976_s1 + $0x198] sm:$0xff]  ;;  %v4817_v41 = vpop.permute.xlu0 %1768  ;;  %v1655_v12 = vsel %vm4778_vm11, %v4786_v6, 0.0  ;;  %v349_v44 = vand.u32 15, %v253_v19 }
  0xbe   : > { %v1831_v22 = vsel %vm6294_vm4, %v4768_v26, %v4622_v10  ;;  %6300 = vst [vmem:[#allocation48_spill] sm:$0xff] %v4806_v36  ;;  %v1464_v10 = vld [vmem:[%s5976_s1 + $0x10] sm:$0xff]  ;;  %2064 = vmatmul.mubr.f32.gmra.mxu0 %v1814_v38  ;;  %vm6302_vm4 = vcmp.lt.s32.totalorder %v4019_v49, 7  ;;  %vm6305_vm7 = vmmov %vm6299_vm0  ;;  %v1576_v19 = vsel %vm4798_vm3, %v4806_v36, 0.0  ;;  %v254_v26 = vadd.s32 88, %v4019_v49  ;;  %2773 = vrot.lane.b32.xlu1 %v3944_v32, %s3743_s28 }
  0xbf   : > { %2149 = vmatmul.mubr.f32.gmra.mxu1 %v1831_v22  ;;  %v4833_v14 = vsel %vm6302_vm4, %v6301_v50, %v1169_v31  ;;  %v4839_v18 = vsel %vm6305_vm7, %v6304_v28, %v958_v55  ;;  %3003 = vmatpush1.msra.mxu0 %v3572_v15  ;;  %v3571_v38 = vld [vmem:[%s5976_s1 + $0x190] sm:$0xff]  ;;  %v1153_v22 = vrot.slane %v3997_v43, 1  ;;  %v271_v50 = vadd.s32 224, %v4019_v49  ;;  %vm6306_vm12 = vmmov %vm6291_vm8  ;;  %v4868_v23 = vpop.permute.xlu1 %1738 }
  0xc0   : > { %6303 = vst [vmem:[#allocation49_spill] sm:$0xff] %v4833_v14  ;;  %2307 = vmatpush1.msra.mxu1 %v1464_v10  ;;  %3004 = vmatprep.subr.mxu0 %v6185_v17  ;;  %vm4855_vm8 = vcmp.lt.s32.totalorder %v468_v11, 15  ;;  %v6307_v28 = vmov 0  ;;  %v6310_v15 = vrot.slane %v4014_v47, 1  ;;  %vm6311_vm0 = vmmov %vm6302_vm4  ;;  %v976_v59 = vrot.slane %v3994_v42, 7 }
  0xc1   : > { %3514 = vmatprep.mubr.msk.f32.mxu0 %vm6306_vm12, %v1655_v12  ;;  %v6308_v28 = vsel %vm4855_vm8, 4294967295, %v6307_v28  ;;  %v4866_v36 = vpop.permute.xlu0 %1770  ;;  %vm6313_vm4 = vmmov %vm6306_vm12  ;;  %2308 = vmatprep.subr.mxu1 %v6185_v17  ;;  %v6319_v42 = vrot.slane %v3982_v40, 7  ;;  %vm6320_vm3 = vcmp.lt.s32.totalorder %v4019_v49, 1  ;;  %v6109_v25 = vrot.slane %v4017_v48, 1 }
  0xc2   : > { %6309 = vst [vmem:[#allocation50_spill] sm:$0xff] %v6308_v28  ;;  %v4863_v10 = vsel %vm6311_vm0, %v1169_v31, %v6310_v15  ;;  %3531 = vmatprep.mubr.msk.f32.mxu1 %vm6313_vm4, %v4833_v14  ;;  %vm6314_vm7 = vmmov %vm6313_vm4  ;;  %vm4878_vm0 = vcmp.ge.s32.totalorder %v349_v44, 1  ;;  %v6316_v31 = vmov 0  ;;  %3005 = vmatpush1.msra.mxu0 %v3571_v38  ;;  %v356_v14 = vand.u32 15, %v254_v26 }
  0xc3   : > { %6312 = vst [vmem:[#allocation51_spill] sm:$0xff] %v4863_v10  ;;  %v1815_v11 = vsel %vm6314_vm7, %v4839_v18, %v4624_v37  ;;  %vm6315_vm12 = vmmov %vm6313_vm4  ;;  %v6317_v31 = vsel %vm4878_vm0, 4294967295, %v6316_v31  ;;  %v4886_v15 = vsel %vm6320_vm3, %v958_v55, %v6319_v42  ;;  %2309 = vmatpush1.msra.mxu1 %v1463_v33  ;;  %v3704_v37 = vld [vmem:[%s3801_s25 + $0xa8] sm:$0xff]  ;;  %v6321_v44 = vrot.slane %v3982_v40, 1  ;;  %3006 = vmatprep.subr.mxu0 %v6185_v17 }
  0xc4   : > { %v1832_v12 = vsel %vm6315_vm12, %v1576_v19, %v4670_v30  ;;  %6318 = vst [vmem:[#allocation52_spill] sm:$0xff] %v6317_v31  ;;  %1379 = vrot.lane.b32.xlu0 %v3704_v37, %s3743_s28  ;;  %v1462_v30 = vld [vmem:[%s5976_s1] sm:$0xff]  ;;  %v3570_v55 = vld [vmem:[%s5976_s1 + $0x188] sm:$0xff]  ;;  %vm6322_vm3 = vcmp.lt.s32.totalorder %v4019_v49, 7  ;;  %v475_v19 = vand.u32 15, %v271_v50  ;;  %2069 = vmatmul.mubr.f32.gmra.mxu0 %v1815_v11  ;;  %v1673_v38 = vsel %vm4855_vm8, %v4863_v10, 0.0  ;;  %v4921_v11 = vpop.permute.xlu1 %1740 }
  0xc5   : > { %v4903_v26 = vsel %vm6322_vm3, %v6321_v44, %v1153_v22  ;;  %2154 = vmatmul.mubr.f32.gmra.mxu1 %v1832_v12  ;;  %v1560_v33 = vsel %vm4878_vm0, %v4886_v15, 0.0  ;;  %v6324_v42 = vrot.slane %v3979_v39, 7  ;;  %vm6325_vm4 = vcmp.lt.s32.totalorder %v4019_v49, 1  ;;  %v4919_v44 = vpop.permute.xlu0 %1772  ;;  %2310 = vmatprep.subr.mxu1 %v6185_v17  ;;  %vm6330_vm12 = vmmov %vm6322_vm3 }
  0xc6   : > { %6323 = vst [vmem:[#allocation53_spill] sm:$0xff] %v4903_v26  ;;  %v272_v50 = vadd.s32 232, %v4019_v49  ;;  %v255_v12 = vadd.s32 96, %v4019_v49  ;;  %2311 = vmatpush1.msra.mxu1 %v1462_v30  ;;  %3007 = vmatpush1.msra.mxu0 %v3570_v55  ;;  %vm4926_vm7 = vcmp.lt.s32.totalorder %v356_v14, 15  ;;  %v6327_v39 = vmov 0 }
  0xc7   : > { %v4916_v37 = vsel %vm6325_vm4, %v6324_v42, %v976_v59  ;;  %v6328_v39 = vsel %vm4926_vm7, 4294967295, %v6327_v39  ;;  %v4934_v42 = vsel %vm6330_vm12, %v1153_v22, %v6109_v25  ;;  %v4937_v32 = vrot.slane %v4034_v53, 1  ;;  %3008 = vmatprep.subr.mxu0 %v6185_v17  ;;  %2328 = vmatprep.subr.mxu1 %v6185_v17 }
  0xc8   : > { %6326 = vst [vmem:[#allocation54_spill] sm:$0xff] %v4916_v37  ;;  %6329 = vst [vmem:[#allocation55_spill] sm:$0xff] %v6328_v39  ;;  %v960_v28 = vrot.slane %v3997_v43, 7  ;;  %vm6333_vm3 = vcmask 523264   ;;  %vm4948_vm12 = vcmp.ge.s32.totalorder %v475_v19, 1  ;;  %v6337_v30 = vmov 0 }
  0xc9   : > { %6331 = vst [vmem:[#allocation56_spill] sm:$0xff] %v4934_v42  ;;  %6332 = vst [vmem:[#allocation57_spill] sm:$0xff] %v4937_v32  ;;  %3515 = vmatprep.mubr.msk.f32.mxu0 %vm6333_vm3, %v4903_v26  ;;  %v6338_v30 = vsel %vm4948_vm12, 4294967295, %v6337_v30  ;;  %v6340_v55 = vrot.slane %v4014_v47, 7  ;;  %vm6341_vm11 = vcmp.lt.s32.totalorder %v4019_v49, 1  ;;  %v482_v19 = vand.u32 15, %v272_v50 }
  0xca   : > { %vm6334_vm4 = vmmov %vm6333_vm3  ;;  %6339 = vst [vmem:[#allocation58_spill] sm:$0xff] %v6338_v30  ;;  %v1657_v25 = vsel %vm4926_vm7, %v4934_v42, 0.0  ;;  %v6343_v50 = vrot.slane %v4014_v47, 1  ;;  %v6346_v26 = vrot.slane %v3982_v40, 7  ;;  %v1484_v40 = vld [vmem:[%s5976_s1 + $0xb0] sm:$0xff]  ;;  %v6349_v10 = vmov 0 }
  0xcb   : > { %3532 = vmatprep.mubr.msk.f32.mxu1 %vm6334_vm4, %v1673_v38  ;;  %vm6335_vm8 = vmmov %vm6333_vm3  ;;  %v4956_v43 = vsel %vm6341_vm11, %v976_v59, %v6340_v55  ;;  %v4967_v38 = vpop.permute.xlu0 %1333  ;;  %v4972_v59 = vld [vmem:[%s3801_s25 + $0xc8] sm:$0xff]  ;;  %v3706_v55 = vld [vmem:[%s3801_s25 + $0xb0] sm:$0xff]  ;;  %vm6344_vm11 = vcmp.lt.s32.totalorder %v4019_v49, 7  ;;  %v5088_v39 = vrot.slane %v4087_v63, 1 }
  0xcc   : > { %v1816_v14 = vsel %vm6335_vm8, %v1560_v33, %v4672_v7  ;;  %vm6336_vm0 = vmmov %vm6333_vm3  ;;  %6342 = vst [vmem:[#allocation59_spill] sm:$0xff] %v4956_v43  ;;  %v1485_v7 = vld [vmem:[%s5976_s1 + $0xb8] sm:$0xff]  ;;  %v4969_v33 = vpop.permute.xlu1 %2729  ;;  %2775 = vrot.lane.b32.xlu1 %v4972_v59, %s3743_s28  ;;  %1381 = vrot.lane.b32.xlu0 %v3706_v55, %s3743_s28  ;;  %v4987_v31 = vsel %vm6344_vm11, %v6343_v50, %v4937_v32  ;;  %vm6347_vm8 = vcmp.lt.s32.totalorder %v4019_v49, 1  ;;  %v1155_v50 = vrot.slane %v4037_v54, 1  ;;  %v6472_v35 = vld [vmem:[#allocation52_spill] sm:$0xff] }
  0xcd   : > { %v1833_v22 = vsel %vm6336_vm0, %v4916_v37, %v4720_v29  ;;  %v3569_v29 = vld [vmem:[%s5976_s1 + $0x180] sm:$0xff]  ;;  %v363_v37 = vand.u32 15, %v255_v12  ;;  %2074 = vmatmul.mubr.f32.gmra.mxu0 %v1816_v14  ;;  %6345 = vst [vmem:[#allocation60_spill] sm:$0xff] %v4987_v31  ;;  %v4993_v55 = vsel %vm6347_vm8, %v6346_v26, %v960_v28  ;;  %v1578_v12 = vsel %vm4948_vm12, %v4956_v43, 0.0  ;;  %2329 = vmatpush2.msra.mxu1 %v1485_v7  ;;  %vm6353_vm4 = vmmov %vm6344_vm11 }
  0xce   : > { %2159 = vmatmul.mubr.f32.gmra.mxu1 %v1833_v22  ;;  %6348 = vst [vmem:[#allocation61_spill] sm:$0xff] %v4993_v55  ;;  %v256_v14 = vadd.s32 104, %v4019_v49  ;;  %3009 = vmatpush1.msra.mxu0 %v3569_v29  ;;  %v3592_v22 = vld [vmem:[%s5976_s1 + $0x238] sm:$0xff]  ;;  %v273_v26 = vadd.s32 240, %v4019_v49  ;;  %vm5009_vm3 = vcmp.lt.s32.totalorder %v482_v19, 15  ;;  %v6352_v29 = vrot.slane %v4066_v60, 1  ;;  %vm6355_vm11 = vmmov %vm6336_vm0 }
  0xcf   : > { %3026 = vmatprep.subr.mxu0 %v6185_v17  ;;  %3516 = vmatprep.mubr.msk.f32.mxu0 %vm6336_vm0, %v1657_v25  ;;  %v6350_v10 = vsel %vm5009_vm3, 4294967295, %v6349_v10  ;;  %v5021_v54 = vrot.slane %v4034_v53, 7  ;;  %v5023_v30 = vpop.permute.xlu0 %1335  ;;  %vm6356_vm8 = vmmov %vm6336_vm0  ;;  %v1834_v19 = vsel %vm6336_vm0, %v1578_v12, %v4771_v16  ;;  %v6357_v53 = vmov 0  ;;  %v3708_v16 = vld [vmem:[%s3801_s25 + $0xb8] sm:$0xff]  ;;  %6369 = vst [vmem:[#allocation68_spill] sm:$0xff] %v5088_v39 }
  0xd0   : > { %6351 = vst [vmem:[#allocation62_spill] sm:$0xff] %v6350_v10  ;;  %v5018_v7 = vsel %vm6353_vm4, %v4937_v32, %v6352_v29  ;;  %v5025_v43 = vpop.permute.xlu1 %2731  ;;  %3533 = vmatprep.mubr.msk.f32.mxu1 %vm6355_vm11, %v4987_v31  ;;  %2330 = vmatprep.subr.mxu1 %v6185_v17  ;;  %v1817_v25 = vsel %vm6356_vm8, %v4993_v55, %v4722_v56  ;;  %vm5035_vm4 = vcmp.ge.s32.totalorder %v363_v37, 1  ;;  %v6360_v29 = vrot.slane %v4017_v48, 7  ;;  %v5048_v55 = vld [vmem:[%s3801_s25 + $0xd0] sm:$0xff] }
  0xd1   : > { %6354 = vst [vmem:[#allocation63_spill] sm:$0xff] %v5018_v7  ;;  %v6358_v53 = vsel %vm5035_vm4, 4294967295, %v6357_v53  ;;  %vm6361_vm12 = vcmp.lt.s32.totalorder %v4019_v49, 1  ;;  %3027 = vmatpush2.msra.mxu0 %v3592_v22  ;;  %2331 = vmatpush2.msra.mxu1 %v1484_v40  ;;  %v370_v31 = vand.u32 15, %v256_v14  ;;  %v3591_v37 = vld [vmem:[%s5976_s1 + $0x230] sm:$0xff]  ;;  %v6363_v12 = vrot.slane %v4017_v48, 1 }
  0xd2   : > { %6359 = vst [vmem:[#allocation64_spill] sm:$0xff] %v6358_v53  ;;  %v5043_v32 = vsel %vm6361_vm12, %v960_v28, %v6360_v29  ;;  %2777 = vrot.lane.b32.xlu1 %v5048_v55, %s3743_s28  ;;  %1383 = vrot.lane.b32.xlu0 %v3708_v16, %s3743_s28  ;;  %v1483_v28 = vld [vmem:[%s5976_s1 + $0xa8] sm:$0xff]  ;;  %vm6364_vm12 = vcmp.lt.s32.totalorder %v4019_v49, 7  ;;  %v489_v22 = vand.u32 15, %v273_v26  ;;  %v1675_v40 = vsel %vm5009_vm3, %v5018_v7, 0.0 }
  0xd3   : > { %6362 = vst [vmem:[#allocation65_spill] sm:$0xff] %v5043_v32  ;;  %v5064_v14 = vsel %vm6364_vm12, %v6363_v12, %v1155_v50  ;;  %2079 = vmatmul.mubr.f32.gmra.mxu0 %v1817_v25  ;;  %2164 = vmatmul.mubr.f32.gmra.mxu1 %v1834_v19  ;;  %v1562_v29 = vsel %vm5035_vm4, %v5043_v32, 0.0  ;;  %v6366_v16 = vrot.slane %v4014_v47, 7  ;;  %vm6367_vm11 = vcmp.lt.s32.totalorder %v4019_v49, 1  ;;  %v5080_v25 = vpop.permute.xlu0 %1337  ;;  %vm6374_vm0 = vmmov %vm6364_vm12  ;;  %v3709_v7 = vld [vmem:[%s3801_s25 + $0x68] sm:$0xff] }
  0xd4   : > { %6365 = vst [vmem:[#allocation66_spill] sm:$0xff] %v5064_v14  ;;  %v274_v26 = vadd.s32 248, %v4019_v49  ;;  %v5082_v19 = vpop.permute.xlu1 %2733  ;;  %2332 = vmatprep.subr.mxu1 %v6185_v17  ;;  %3028 = vmatprep.subr.mxu0 %v6185_v17  ;;  %v257_v12 = vadd.s32 112, %v4019_v49  ;;  %vm5090_vm8 = vcmp.lt.s32.totalorder %v370_v31, 15  ;;  %v6370_v47 = vmov 0 }
  0xd5   : > { %v5077_v56 = vsel %vm6367_vm11, %v6366_v16, %v5021_v54  ;;  %2333 = vmatpush2.msra.mxu1 %v1483_v28  ;;  %3029 = vmatpush2.msra.mxu0 %v3591_v37  ;;  %v6371_v47 = vsel %vm5090_vm8, 4294967295, %v6370_v47  ;;  %v6373_v16 = vrot.slane %v4069_v61, 1  ;;  %v962_v53 = vrot.slane %v3709_v7, 7 }
  0xd6   : > { %6368 = vst [vmem:[#allocation67_spill] sm:$0xff] %v5077_v56  ;;  %6372 = vst [vmem:[#allocation69_spill] sm:$0xff] %v6371_v47  ;;  %vm6376_vm12 = vcmask 523264   ;;  %vm5109_vm7 = vcmp.ge.s32.totalorder %v489_v22, 1  ;;  %v6383_v7 = vrot.slane %v4066_v60, 7  ;;  %3030 = vmatprep.subr.mxu0 %v6185_v17  ;;  %2334 = vmatprep.subr.mxu1 %v6185_v17  ;;  %v496_v37 = vand.u32 15, %v274_v26 }
  0xd7   : > { %v5098_v10 = vsel %vm6374_vm0, %v1155_v50, %v6373_v16  ;;  %3517 = vmatprep.mubr.msk.f32.mxu0 %vm6376_vm12, %v5064_v14  ;;  %vm6377_vm11 = vmmov %vm6376_vm12  ;;  %v6380_v50 = vmov 0  ;;  %vm6384_vm0 = vcmp.lt.s32.totalorder %v4019_v49, 1  ;;  %v5128_v22 = vpop.permute.xlu0 %1339  ;;  %v3711_v16 = vld [vmem:[%s3801_s25 + $0xc0] sm:$0xff]  ;;  %v5143_v14 = vld [vmem:[%s3801_s25 + $0x70] sm:$0xff]  ;;  %v6386_v32 = vrot.slane %v4066_v60, 1 }
  0xd8   : > { %6375 = vst [vmem:[#allocation70_spill] sm:$0xff] %v5098_v10  ;;  %3534 = vmatprep.mubr.msk.f32.mxu1 %vm6377_vm11, %v1675_v40  ;;  %vm6378_vm3 = vmmov %vm6377_vm11  ;;  %v6381_v50 = vsel %vm5109_vm7, 4294967295, %v6380_v50  ;;  %v5118_v28 = vsel %vm6384_vm0, %v5021_v54, %v6383_v7  ;;  %v5130_v40 = vpop.permute.xlu1 %2735  ;;  %1385 = vrot.lane.b32.xlu0 %v3711_v16, %s3743_s28  ;;  %v1659_v7 = vsel %vm5090_vm8, %v5098_v10, 0.0  ;;  %v6389_v16 = vrot.slane %v4017_v48, 7  ;;  %v5206_v10 = vld [vmem:[%s3801_s25 + $0xe0] sm:$0xff] }
  0xd9   : > { %v1818_v63 = vsel %vm6378_vm3, %v1562_v29, %v4773_v20  ;;  %vm6379_vm4 = vmmov %vm6378_vm3  ;;  %6382 = vst [vmem:[#allocation71_spill] sm:$0xff] %v6381_v50  ;;  %v3590_v20 = vld [vmem:[%s5976_s1 + $0x228] sm:$0xff]  ;;  %v5133_v29 = vld [vmem:[%s3801_s25 + $0xd8] sm:$0xff]  ;;  %vm6387_vm3 = vcmp.lt.s32.totalorder %v4019_v49, 7  ;;  %v258_v48 = vadd.s32 120, %v4019_v49 }
  0xda   : > { %v1835_v31 = vsel %vm6379_vm4, %v5077_v56, %v4817_v41  ;;  %6385 = vst [vmem:[#allocation72_spill] sm:$0xff] %v5118_v28  ;;  %v1482_v41 = vld [vmem:[%s5976_s1 + $0xa0] sm:$0xff]  ;;  %2779 = vrot.lane.b32.xlu1 %v5133_v29, %s3743_s28  ;;  %v377_v56 = vand.u32 15, %v257_v12  ;;  %2084 = vmatmul.mubr.f32.gmra.mxu0 %v1818_v63  ;;  %v5151_v42 = vsel %vm6387_vm3, %v6386_v32, %v5088_v39  ;;  %vm6390_vm4 = vmmov %vm6384_vm0  ;;  %v1580_v12 = vsel %vm5109_vm7, %v5118_v28, 0.0  ;;  %v1481_v32 = vld [vmem:[%s5976_s1 + $0x98] sm:$0xff] }
  0xdb   : > { %2169 = vmatmul.mubr.f32.gmra.mxu1 %v1835_v31  ;;  %6388 = vst [vmem:[#allocation73_spill] sm:$0xff] %v5151_v42  ;;  %v5157_v47 = vsel %vm6390_vm4, %v6389_v16, %v962_v53  ;;  %3031 = vmatpush2.msra.mxu0 %v3590_v20  ;;  %v3589_v63 = vld [vmem:[%s5976_s1 + $0x220] sm:$0xff]  ;;  %vm6391_vm12 = vmmov %vm6377_vm11  ;;  %v3713_v31 = vld [vmem:[%s3801_s25 + $0x78] sm:$0xff]  ;;  %vm5172_vm11 = vcmp.lt.s32.totalorder %v496_v37, 15  ;;  %v6392_v20 = vmov 0  ;;  %v5180_v26 = vpop.permute.xlu0 %1341 }
  0xdc   : > { %2335 = vmatpush2.msra.mxu1 %v1482_v41  ;;  %3032 = vmatprep.subr.mxu0 %v6185_v17  ;;  %v1157_v16 = vrot.slane %v3713_v31, 1  ;;  %v6393_v20 = vsel %vm5172_vm11, 4294967295, %v6392_v20  ;;  %vm6394_vm0 = vmmov %vm6387_vm3  ;;  %v5182_v50 = vpop.permute.xlu1 %2737  ;;  %vm5192_vm7 = vcmp.ge.s32.totalorder %v377_v56, 1  ;;  %v6398_v31 = vmov 0 }
  0xdd   : > { %3518 = vmatprep.mubr.msk.f32.mxu0 %vm6391_vm12, %v1659_v7  ;;  %v1645_v41 = vsel %vm6394_vm0, %v5088_v39, %v4055_v57  ;;  %vm6395_vm3 = vmmov %vm6391_vm12  ;;  %2336 = vmatprep.subr.mxu1 %v6185_v17  ;;  %v6399_v31 = vsel %vm5192_vm7, 4294967295, %v6398_v31  ;;  %v6400_v39 = vrot.slane %v5143_v14, 7  ;;  %vm6401_vm0 = vcmp.lt.s32.totalorder %v4019_v49, 1 }
  0xde   : > { %3535 = vmatprep.mubr.msk.f32.mxu1 %vm6395_vm3, %v5151_v42  ;;  %vm6396_vm4 = vmmov %vm6395_vm3  ;;  %3033 = vmatpush2.msra.mxu0 %v3589_v63  ;;  %v5203_v42 = vrot.slane %v6185_v17, 7  ;;  %v6404_v63 = vrot.slane %v4066_v60, 7 }
  0xdf   : > { %v1819_v37 = vsel %vm6396_vm4, %v5157_v47, %v4819_v46  ;;  %vm6397_vm12 = vmmov %vm6395_vm3  ;;  %v5200_v28 = vsel %vm6401_vm0, %v962_v53, %v6400_v39  ;;  %2337 = vmatpush2.msra.mxu1 %v1481_v32  ;;  %2781 = vrot.lane.b32.xlu1 %v5206_v10, %s3743_s28  ;;  %v1480_v46 = vld [vmem:[%s5976_s1 + $0x90] sm:$0xff]  ;;  %v384_v39 = vand.u32 15, %v258_v48  ;;  %v6402_v53 = vrot.slane %v4069_v61, 1  ;;  %v5236_v48 = vpop.permute.xlu0 %1343 }
  0xe0   : > { %v1836_v7 = vsel %vm6397_vm12, %v1580_v12, %v4866_v36  ;;  %1387 = vrot.lane.b32.xlu0 %v4972_v59, %s3743_s28  ;;  %v3588_v36 = vld [vmem:[%s5976_s1 + $0x218] sm:$0xff]  ;;  %2089 = vmatmul.mubr.f32.gmra.mxu0 %v1819_v37  ;;  %vm6403_vm3 = vcmp.lt.s32.totalorder %v4019_v49, 7  ;;  %v1677_v59 = vsel %vm5172_vm11, %v1645_v41, 0.0  ;;  %v1564_v12 = vsel %vm5192_vm7, %v5200_v28, 0.0  ;;  %vm6405_vm4 = vmmov %vm6401_vm0  ;;  %v5238_v61 = vpop.permute.xlu1 %2739 }
  0xe1   : > { %2174 = vmatmul.mubr.f32.gmra.mxu1 %v1836_v7  ;;  %v5222_v56 = vsel %vm6403_vm3, %v6402_v53, %v1157_v16  ;;  %v5234_v32 = vsel %vm6405_vm4, %v6404_v63, %v4161_v27  ;;  %2338 = vmatprep.subr.mxu1 %v6185_v17  ;;  %vm6406_vm12 = vmmov %vm6401_vm0  ;;  %vm6407_vm0 = vcmask 523264   ;;  %vm5254_vm7 = vcmp.lt.s32.totalorder %v384_v39, 15 }
  0xe2   : > { %3034 = vmatprep.subr.mxu0 %v6185_v17  ;;  %2339 = vmatpush2.msra.mxu1 %v1480_v46  ;;  %v1011_v60 = vsel %vm6406_vm12, %v5021_v54, %v5203_v42  ;;  %vm6408_vm3 = vmmov %vm6407_vm0  ;;  %v6413_v46 = vrot.slane %v3806_v4, 1  ;;  %vm6414_vm12 = vcmp.lt.s32.totalorder %v4019_v49, 7  ;;  %v3715_v4 = vld [vmem:[%s3801_s25 + $0xe8] sm:$0xff]  ;;  %v6415_v63 = vrot.slane %v4090_v0, 7 }
  0xe3   : > { %3035 = vmatpush2.msra.mxu0 %v3588_v36  ;;  %3519 = vmatprep.mubr.msk.f32.mxu0 %vm6407_vm0, %v5222_v56  ;;  %vm6409_vm4 = vmmov %vm6407_vm0  ;;  %v5272_v36 = vpop.permute.xlu0 %1345  ;;  %v1076_v53 = vsel %vm4194_vm5, %v1011_v60, 0.0  ;;  %v3586_v60 = vld [vmem:[%s5976_s1 + $0x208] sm:$0xff] }
  0xe4   : > { %3536 = vmatprep.mubr.msk.f32.mxu1 %vm6408_vm3, %v1677_v59  ;;  %v1820_v41 = vsel %vm6409_vm4, %v1564_v12, %v4868_v23  ;;  %vm6410_vm11 = vmmov %vm6407_vm0  ;;  %v5262_v54 = vsel %vm6414_vm12, %v1157_v16, %v6413_v46  ;;  %3036 = vmatprep.subr.mxu0 %v6185_v17  ;;  %v3587_v23 = vld [vmem:[%s5976_s1 + $0x210] sm:$0xff]  ;;  %v5274_v39 = vpop.permute.xlu1 %2741  ;;  %v5281_v16 = vrot.slane %v6185_v17, 1  ;;  %v1478_v12 = vld [vmem:[%s5976_s1 + $0x80] sm:$0xff] }
  0xe5   : > { %v1837_v37 = vsel %vm6410_vm11, %v5234_v32, %v4919_v44  ;;  %2340 = vmatprep.subr.mxu1 %v6185_v17  ;;  %v1479_v44 = vld [vmem:[%s5976_s1 + $0x88] sm:$0xff]  ;;  %2783 = vrot.lane.b32.xlu1 %v3715_v4, %s3743_s28  ;;  %v1661_v59 = vsel %vm5254_vm7, %v5262_v54, 0.0  ;;  %vm6417_vm11 = vcmp.lt.s32.totalorder %v4019_v49, 1  ;;  %vm6419_vm3 = vmmov %vm6414_vm12 }
  0xe6   : > { %1389 = vrot.lane.b32.xlu0 %v5048_v55, %s3743_s28  ;;  %2094 = vmatmul.mubr.f32.gmra.mxu0 %v1820_v41  ;;  %v6416_v55 = vrot.slane %v5143_v14, 7  ;;  %vm6418_vm0 = vmmov %vm6417_vm11  ;;  %v1202_v0 = vsel %vm6419_vm3, %v5281_v16, %v4055_v57  ;;  %vm6423_vm3 = vcmp.lt.s32.totalorder %v4019_v49, 1 }
  0xe7   : > { %2179 = vmatmul.mubr.f32.gmra.mxu1 %v1837_v37  ;;  %3037 = vmatpush2.msra.mxu0 %v3587_v23  ;;  %v2568_v41 = vsel %vm6418_vm0, %v5203_v42, %v4258_v2  ;;  %v5312_v14 = vpop.permute.xlu0 %1347  ;;  %v1430_v23 = vsel %vm6409_vm4, %v1076_v53, %v4967_v38  ;;  %vm6420_vm12 = vmmov %vm6409_vm4  ;;  %v1009_v45 = vsel %vm6423_vm3, %v5203_v42, %v4158_v24  ;;  %v2666_v24 = vsel %vm4225_vm6, %v4355_v51, 0.0 }
  0xe8   : > { %v5297_v46 = vsel %vm6417_vm11, %v6416_v55, %v6415_v63  ;;  %2341 = vmatpush2.msra.mxu1 %v1479_v44  ;;  %3038 = vmatprep.subr.mxu0 %v6185_v17  ;;  %v5314_v37 = vpop.permute.xlu1 %2743  ;;  %vm6421_vm11 = vmmov %vm6409_vm4  ;;  %v2569_v57 = vsel %vm4194_vm5, %v2568_v41, 0.0  ;;  %v1270_v44 = vsel %vm4225_vm6, %v1202_v0, 0.0  ;;  %v3716_v63 = vld [vmem:[%s3801_s25 + $0xf0] sm:$0xff]  ;;  %v3717_v55 = vld [vmem:[%s3801_s25 + $0xf8] sm:$0xff] }
  0xe9   : > { %2342 = vmatprep.subr.mxu1 %v6185_v17  ;;  %3520 = vmatprep.mubr.msk.f32.mxu0 %vm6420_vm12, %v1661_v59  ;;  %v1821_v2 = vsel %vm6421_vm11, %v5297_v46, %v4921_v11  ;;  %vm6422_vm0 = vmmov %vm6409_vm4  ;;  %v3585_v11 = vld [vmem:[%s5976_s1 + $0x200] sm:$0xff]  ;;  %v6431_v41 = vld [vmem:[#allocation10_spill] sm:$0xff] }
  0xea   : > { %2343 = vmatpush2.msra.mxu1 %v1478_v12  ;;  %3537 = vmatprep.mubr.msk.f32.mxu1 %vm6422_vm0, %v5281_v16  ;;  %vm6424_vm5 = vmmov %vm6422_vm0  ;;  %v1078_v12 = vsel %vm4310_vm9, %v1009_v45, 0.0  ;;  %v1272_v0 = vsel %vm4347_vm10, %v6431_v41, 0.0  ;;  %v6488_v41 = vld [vmem:[#allocation64_spill] sm:$0xff] }
  0xeb   : > { %3039 = vmatpush2.msra.mxu0 %v3586_v60  ;;  %2785 = vrot.lane.b32.xlu1 %v3716_v63, %s3743_s28  ;;  %v5339_v38 = vpop.permute.xlu0 %1349  ;;  %vm6425_vm4 = vmmov %vm6422_vm0  ;;  %v6440_v63 = vld [vmem:[#allocation30_spill] sm:$0xff] }
  0xec   : > { %1391 = vrot.lane.b32.xlu0 %v5133_v29, %s3743_s28  ;;  %2099 = vmatmul.mubr.f32.gmra.mxu0 %v1821_v2  ;;  %v5341_v53 = vpop.permute.xlu1 %2745  ;;  %v2825_v29 = vsel %vm6424_vm5, %v2569_v57, %v4969_v33  ;;  %vm6426_vm12 = vmmov %vm6422_vm0  ;;  %v6437_v57 = vld [vmem:[#allocation14_spill] sm:$0xff] }
  0xed   : > { %2345 = vmatmul.mubr.f32.vlgmr.msra.gmra.mxu1 %v1430_v23  ;;  %3040 = vmatprep.subr.mxu0 %v6185_v17  ;;  %v1431_v59 = vsel %vm6426_vm12, %v5203_v42, %v5023_v30  ;;  %vm6427_vm11 = vmmov %vm6422_vm0  ;;  %v6433_v23 = vld [vmem:[#allocation26_spill] sm:$0xff] }
  0xee   : > { %3538 = vmatprep.mubr.msk.f32.mxu1 %vm6425_vm4, %v1270_v44  ;;  %3041 = vmatpush2.msra.mxu0 %v3585_v11  ;;  %vm6428_vm3 = vmmov %vm6422_vm0  ;;  %v2571_v2 = vsel %vm4310_vm9, %v6433_v23, 0.0  ;;  %v6441_v11 = vld [vmem:[#allocation16_spill] sm:$0xff] }
  0xef   : > { %3593 = vmatprep.mubr.msk.f32.mxu0 %vm6427_vm11, %v4328_v58  ;;  %2787 = vrot.lane.b32.xlu1 %v3717_v55, %s3743_s28  ;;  %v5361_v30 = vpop.permute.xlu0 %1351  ;;  %vm6429_vm6 = vmmov %vm6422_vm0  ;;  %v2573_v55 = vsel %vm4438_vm13, %v4570_v9, 0.0 }
  0xf0   : > { %1393 = vrot.lane.b32.xlu0 %v5206_v10, %s3743_s28  ;;  %3043 = vmatmul.mubr.f32.vlgmr.msra.gmra.mxu0 %v2825_v29  ;;  %v5363_v33 = vpop.permute.xlu1 %2747  ;;  %v1432_v1 = vsel %vm6429_vm6, %v1078_v12, %v5080_v25  ;;  %vm6430_vm5 = vmmov %vm6422_vm0  ;;  %v1080_v29 = vsel %vm4438_vm13, %v6441_v11, 0.0  ;;  %v1274_v12 = vsel %vm4484_vm14, %v4355_v51, 0.0  ;;  %v1082_v10 = vsel %vm4588_vm2, %v6433_v23, 0.0 }
  0xf1   : > { %2350 = vmatmul.mubr.f32.gmra.mxu1 %v1431_v59  ;;  %3594 = vmatprep.mubr.msk.f32.mxu0 %vm6428_vm3, %v2666_v24  ;;  %v2826_v60 = vsel %vm6430_vm5, %v4403_v8, %v5025_v43  ;;  %vm6434_vm4 = vmmov %vm6422_vm0  ;;  %v6435_v43 = vld [vmem:[#allocation27_spill] sm:$0xff]  ;;  %v1276_v23 = vsel %vm4630_vm1, %v6440_v63, 0.0  ;;  %v2577_v11 = vsel %vm4736_vm15, %v4886_v15, 0.0 }
  0xf2   : > { %3539 = vmatprep.mubr.msk.f32.mxu1 %vm6422_vm0, %v4080_v62  ;;  %vm6436_vm12 = vmmov %vm6422_vm0 }
  0xf3   : > { %2789 = vrot.lane.b32.xlu1 %v6185_v17, %s3743_s28  ;;  %v5382_v62 = vpop.permute.xlu0 %1353  ;;  %vm6438_vm11 = vmmov %vm6422_vm0 }
  0xf4   : > { %1395 = vrot.lane.b32.xlu0 %v3715_v4, %s3743_s28  ;;  %3048 = vmatmul.mubr.f32.gmra.mxu0 %v2826_v60  ;;  %v5384_v25 = vpop.permute.xlu1 %2749  ;;  %v1433_v13 = vsel %vm6438_vm11, %v6437_v57, %v5128_v22  ;;  %vm6439_vm9 = vmmov %vm6422_vm0  ;;  %v2668_v4 = vsel %vm4347_vm10, %v6440_v63, 0.0  ;;  %v2670_v60 = vsel %vm4484_vm14, %v4638_v34, 0.0 }
  0xf5   : > { %2355 = vmatmul.mubr.f32.gmra.mxu1 %v1432_v1  ;;  %3595 = vmatprep.mubr.msk.f32.mxu0 %vm6436_vm12, %v6435_v43  ;;  %v2827_v44 = vsel %vm6439_vm9, %v2571_v2, %v5082_v19  ;;  %vm6443_vm3 = vmmov %vm6422_vm0  ;;  %v6448_v1 = vld [vmem:[#allocation37_spill] sm:$0xff]  ;;  %v2575_v2 = vsel %vm4588_vm2, %v4717_v5, 0.0 }
  0xf6   : > { %3540 = vmatprep.mubr.msk.f32.mxu1 %vm6434_vm4, %v1272_v0  ;;  %vm6444_vm10 = vmmov %vm6422_vm0 }
  0xf7   : > { %2791 = vrot.lane.b32.xlu1 %v6185_v17, %s3743_s28  ;;  %v5402_v59 = vpop.permute.xlu0 %1355  ;;  %v1434_v19 = vsel %vm6444_vm10, %v1080_v29, %v5180_v26  ;;  %vm6445_vm6 = vmmov %vm6422_vm0  ;;  %v6471_v29 = vld [vmem:[#allocation56_spill] sm:$0xff] }
  0xf8   : > { %3053 = vmatmul.mubr.f32.gmra.mxu0 %v2827_v44  ;;  %v5404_v24 = vpop.permute.xlu1 %2751  ;;  %v2828_v22 = vsel %vm6445_vm6, %v4544_v3, %v5130_v40  ;;  %vm6447_vm5 = vmmov %vm6422_vm0  ;;  %v1084_v44 = vsel %vm4736_vm15, %v4570_v9, 0.0  ;;  %v6465_v9 = vld [vmem:[#allocation46_spill] sm:$0xff]  ;;  %vm6473_vm15 = vnez %v6472_v35 }
  0xf9   : > { %2360 = vmatmul.mubr.f32.gmra.mxu1 %v1433_v13  ;;  %3596 = vmatprep.mubr.msk.f32.mxu0 %vm6443_vm3, %v2668_v4  ;;  %vm6449_vm4 = vmmov %vm6422_vm0  ;;  %v2672_v13 = vsel %vm4630_vm1, %v4786_v6, 0.0  ;;  %vm6466_vm1 = vnez %v6465_v9  ;;  %v6508_v9 = vld [vmem:[#allocation7_spill] sm:$0xff] }
  0xfa   : > { %3541 = vmatprep.mubr.msk.f32.mxu1 %vm6422_vm0, %v4328_v58  ;;  %vm6450_vm12 = vmmov %vm6422_vm0  ;;  %v1278_v4 = vsel %vm6466_vm1, %v4638_v34, 0.0  ;;  %v2674_v34 = vsel %vm6466_vm1, %v6471_v29, 0.0 }
  0xfb   : > { %v5420_v58 = vpop.permute.xlu0 %1357  ;;  %v1435_v40 = vsel %vm6450_vm12, %v4403_v8, %v5236_v48  ;;  %vm6451_vm11 = vmmov %vm6422_vm0  ;;  %v1436_v8 = vsel %vm6422_vm0, %v1082_v10, %v5272_v36 }
  0xfc   : > { %3058 = vmatmul.mubr.f32.gmra.mxu0 %v2828_v22  ;;  %v2829_v51 = vsel %vm6451_vm11, %v2573_v55, %v5182_v50  ;;  %v5430_v26 = vpop.permute.xlu1 %2753  ;;  %vm6453_vm13 = vmmov %vm6422_vm0  ;;  %v6481_v55 = vld [vmem:[#allocation65_spill] sm:$0xff] }
  0xfd   : > { %2365 = vmatmul.mubr.f32.gmra.mxu1 %v1434_v19  ;;  %3597 = vmatprep.mubr.msk.f32.mxu0 %vm6449_vm4, %v6448_v1  ;;  %vm6454_vm9 = vmmov %vm6422_vm0  ;;  %v1086_v19 = vsel %vm6473_vm15, %v4717_v5, 0.0 }
  0xfe   : > { %3542 = vmatprep.mubr.msk.f32.mxu1 %vm6447_vm5, %v1274_v12  ;;  %vm6455_vm3 = vmmov %vm6422_vm0  ;;  %v6479_v12 = vld [vmem:[#allocation55_spill] sm:$0xff] }
  0xff   : > { %v5438_v0 = vpop.permute.xlu0 %1359  ;;  %v2830_v50 = vsel %vm6455_vm3, %v4691_v21, %v5238_v61  ;;  %vm6457_vm14 = vmmov %vm6422_vm0 }
 0x100   : > { %3063 = vmatmul.mubr.f32.gmra.mxu0 %v2829_v51  ;;  %v5454_v57 = vpop.permute.xlu1 %2755  ;;  %vm6458_vm10 = vmmov %vm6422_vm0  ;;  %v6487_v51 = vld [vmem:[#allocation70_spill] sm:$0xff] }
 0x101   : > { %2370 = vmatmul.mubr.f32.gmra.mxu1 %v1435_v40  ;;  %3598 = vmatprep.mubr.msk.f32.mxu0 %vm6454_vm9, %v2670_v60  ;;  %vm6459_vm6 = vmmov %vm6422_vm0 }
 0x102   : > { %3543 = vmatprep.mubr.msk.f32.mxu1 %vm6453_vm13, %v6435_v43  ;;  %v1437_v61 = vsel %vm6459_vm6, %v4544_v3, %v5312_v14  ;;  %vm6460_vm5 = vmmov %vm6422_vm0 }
 0x103   : > { %v5456_v43 = vpop.permute.xlu0 %1361  ;;  %v2831_v36 = vsel %vm6460_vm5, %v2575_v2, %v5274_v39  ;;  %vm6461_vm2 = vmmov %vm6422_vm0 }
 0x104   : > { %3068 = vmatmul.mubr.f32.gmra.mxu0 %v2830_v50  ;;  %vm6462_vm4 = vmmov %vm6422_vm0  ;;  %v5480_v14 = vpop.permute.xlu1 %2757 }
 0x105   : > { %2375 = vmatmul.mubr.f32.gmra.mxu1 %v1436_v8  ;;  %3599 = vmatprep.mubr.msk.f32.mxu0 %vm6458_vm10, %v4755_v52  ;;  %vm6463_vm12 = vmmov %vm6422_vm0  ;;  %v1282_v8 = vsel %vm5090_vm8, %v6471_v29, 0.0 }
 0x106   : > { %3544 = vmatprep.mubr.msk.f32.mxu1 %vm6457_vm14, %v1276_v23  ;;  %v1438_v3 = vsel %vm6463_vm12, %v1084_v44, %v5339_v38  ;;  %vm6464_vm11 = vmmov %vm6422_vm0  ;;  %v6468_v38 = vld [vmem:[#allocation53_spill] sm:$0xff]  ;;  %v2678_v23 = vsel %vm5090_vm8, %v5262_v54, 0.0 }
 0x107   : > { %v2832_v39 = vsel %vm6464_vm11, %v4839_v18, %v5314_v37  ;;  %v5482_v63 = vpop.permute.xlu0 %1363  ;;  %vm6467_vm13 = vmmov %vm6422_vm0  ;;  %v1439_v37 = vsel %vm6422_vm0, %v4691_v21, %v5361_v30  ;;  %v6503_v44 = vld [vmem:[#allocation5_spill] sm:$0xff] }
 0x108   : > { %3073 = vmatmul.mubr.f32.gmra.mxu0 %v2831_v36  ;;  %vm6469_vm9 = vmmov %vm6422_vm0  ;;  %v5504_v22 = vpop.permute.xlu1 %2759 }
 0x109   : > { %2380 = vmatmul.mubr.f32.gmra.mxu1 %v1437_v61  ;;  %3600 = vmatprep.mubr.msk.f32.mxu0 %vm6462_vm4, %v2672_v13  ;;  %vm6470_vm3 = vmmov %vm6422_vm0  ;;  %v1284_v13 = vsel %vm5254_vm7, %v6487_v51, 0.0 }
 0x10a   : > { %3545 = vmatprep.mubr.msk.f32.mxu1 %vm6461_vm2, %v6448_v1  ;;  %v2833_v45 = vsel %vm6470_vm3, %v2577_v11, %v5341_v53  ;;  %vm6474_vm14 = vmmov %vm6422_vm0  ;;  %v6477_v53 = vld [vmem:[#allocation61_spill] sm:$0xff]  ;;  %vm6480_vm2 = vnez %v6479_v12  ;;  %v2579_v1 = vsel %vm6473_vm15, %v6481_v55, 0.0 }
 0x10b   : > { %v1366_v17 = vpop.permute.xlu0 %1365  ;;  %vm6475_vm10 = vmmov %vm6422_vm0  ;;  %v1280_v5 = vsel %vm6480_vm2, %v4786_v6, 0.0  ;;  %v2676_v60 = vsel %vm6480_vm2, %v6487_v51, 0.0  ;;  %vm6498_vm2 = vnez %v6399_v31  ;;  %v6509_v31 = vld [vmem:[#allocation4_spill] sm:$0xff] }
 0x10c   : > { %3078 = vmatmul.mubr.f32.gmra.mxu0 %v2832_v39  ;;  %vm6476_vm6 = vmmov %vm6422_vm0  ;;  %v1090_v2 = vsel %vm6498_vm2, %v6481_v55, 0.0  ;;  %v6505_v39 = vld [vmem:[#allocation3_spill] sm:$0xff] }
 0x10d   : > { %2385 = vmatmul.mubr.f32.gmra.mxu1 %v1438_v3  ;;  %3601 = vmatprep.mubr.msk.f32.mxu0 %vm6469_vm9, %v6468_v38  ;;  %v1440_v21 = vsel %vm6476_vm6, %v1086_v19, %v5382_v62  ;;  %vm6478_vm5 = vmmov %vm6422_vm0  ;;  %v2583_v3 = vsel %vm6498_vm2, %v6503_v44, 0.0 }
 0x10e   : > { %3546 = vmatprep.mubr.msk.f32.mxu1 %vm6467_vm13, %v1278_v4  ;;  %v2834_v30 = vsel %vm6478_vm5, %v6477_v53, %v5363_v33  ;;  %vm6482_vm4 = vmmov %vm6422_vm0  ;;  %v2762_v40 = vpop.permute.xlu1 %2761  ;;  %vm6489_vm13 = vnez %v6488_v41  ;;  %v2680_v4 = vsel %vm5254_vm7, %v6508_v9, 0.0 }
 0x10f   : > { %vm6484_vm12 = vmmov %vm6422_vm0  ;;  %v1368_v6 = vpop.permute.xlu0 %1367  ;;  %v1088_v10 = vsel %vm6489_vm13, %v4886_v15, 0.0  ;;  %v2581_v15 = vsel %vm6489_vm13, %v5200_v28, 0.0 }
 0x110   : > { %3083 = vmatmul.mubr.f32.gmra.mxu0 %v2833_v45  ;;  %vm6485_vm11 = vmmov %vm6422_vm0 }
 0x111   : > { %2390 = vmatmul.mubr.f32.gmra.mxu1 %v1439_v37  ;;  %3602 = vmatprep.mubr.msk.f32.mxu0 %vm6475_vm10, %v2674_v34  ;;  %v1441_v62 = vsel %vm6485_vm11, %v4839_v18, %v5402_v59  ;;  %vm6486_vm1 = vmmov %vm6422_vm0  ;;  %v6546_v59 = vld [vmem:[#allocation28_spill] sm:$0xff] }
 0x112   : > { %3547 = vmatprep.mubr.msk.f32.mxu1 %vm6474_vm14, %v4755_v52  ;;  %v6483_v52 = vld [vmem:[#allocation66_spill] sm:$0xff]  ;;  %v2835_v33 = vsel %vm6486_vm1, %v2579_v1, %v5384_v25  ;;  %vm6490_vm9 = vmmov %vm6422_vm0  ;;  %v6534_v1 = vld [vmem:[#allocation21_spill] sm:$0xff] }
 0x113   : > { %vm6491_vm3 = vmmov %vm6422_vm0 }
 0x114   : > { %3088 = vmatmul.mubr.f32.gmra.mxu0 %v2834_v30  ;;  %v1442_v18 = vsel %vm6491_vm3, %v1088_v10, %v5420_v58  ;;  %vm6492_vm15 = vmmov %vm6422_vm0  ;;  %v2764_v50 = vpop.permute.xlu1 %2763  ;;  %v1370_v48 = vpop.permute.xlu0 %1369  ;;  %vm6510_vm3 = vnez %v6509_v31  ;;  %v6530_v30 = vld [vmem:[#allocation18_spill] sm:$0xff]  ;;  %v6541_v10 = vld [vmem:[#allocation20_spill] sm:$0xff] }
 0x115   : > { %2395 = vmatmul.mubr.f32.gmra.mxu1 %v1440_v21  ;;  %3603 = vmatprep.mubr.msk.f32.mxu0 %vm6484_vm12, %v6483_v52  ;;  %v2836_v25 = vsel %vm6492_vm15, %v5157_v47, %v5404_v24  ;;  %vm6494_vm14 = vmmov %vm6422_vm0  ;;  %v1092_v11 = vsel %vm6510_vm3, %v5200_v28, 0.0  ;;  %v6518_v28 = vld [vmem:[#allocation12_spill] sm:$0xff]  ;;  %v6525_v21 = vld [vmem:[#allocation11_spill] sm:$0xff] }
 0x116   : > { %3548 = vmatprep.mubr.msk.f32.mxu1 %vm6482_vm4, %v1280_v5  ;;  %vm6495_vm10 = vmmov %vm6422_vm0  ;;  %v2585_v29 = vsel %vm6510_vm3, %v6518_v28, 0.0  ;;  %v6532_v5 = vld [vmem:[#allocation17_spill] sm:$0xff] }
 0x117   : > { %vm6496_vm6 = vmmov %vm6422_vm0 }
 0x118   : > { %3093 = vmatmul.mubr.f32.gmra.mxu0 %v2835_v33  ;;  %v1443_v24 = vsel %vm6496_vm6, %v6477_v53, %v5438_v0  ;;  %vm6497_vm5 = vmmov %vm6422_vm0 }
 0x119   : > { %2400 = vmatmul.mubr.f32.gmra.mxu1 %v1441_v62  ;;  %3604 = vmatprep.mubr.msk.f32.mxu0 %vm6422_vm0, %v2676_v60  ;;  %v2837_v58 = vsel %vm6497_vm5, %v2581_v15, %v5430_v26  ;;  %vm6499_vm4 = vmmov %vm6422_vm0  ;;  %v6540_v60 = vld [vmem:[#allocation24_spill] sm:$0xff] }
 0x11a   : > { %3549 = vmatprep.mubr.msk.f32.mxu1 %vm6490_vm9, %v6468_v38  ;;  %vm6500_vm12 = vmmov %vm6422_vm0  ;;  %v2766_v61 = vpop.permute.xlu1 %2765  ;;  %v1372_v36 = vpop.permute.xlu0 %1371 }
 0x11b   : > { %vm6501_vm11 = vmmov %vm6422_vm0 }
 0x11c   : > { %3098 = vmatmul.mubr.f32.gmra.mxu0 %v2836_v25  ;;  %v1444_v0 = vsel %vm6501_vm11, %v1090_v2, %v5456_v43  ;;  %vm6502_vm1 = vmmov %vm6422_vm0  ;;  %v2839_v43 = vsel %vm6422_vm0, %v2583_v3, %v5480_v14  ;;  %v6514_v14 = vld [vmem:[#allocation9_spill] sm:$0xff]  ;;  %vm6526_vm11 = vnez %v6525_v21 }
 0x11d   : > { %2405 = vmatmul.mubr.f32.gmra.mxu1 %v1442_v18  ;;  %3605 = vmatprep.mubr.msk.f32.mxu0 %vm6495_vm10, %v5222_v56  ;;  %v2838_v26 = vsel %vm6502_vm1, %v5297_v46, %v5454_v57  ;;  %vm6504_vm8 = vmmov %vm6422_vm0  ;;  %v1094_v53 = vsel %vm6526_vm11, %v6503_v44, 0.0  ;;  %v6552_v2 = vld [vmem:[#allocation33_spill] sm:$0xff] }
 0x11e   : > { %3550 = vmatprep.mubr.msk.f32.mxu1 %vm6494_vm14, %v1282_v8  ;;  %vm6506_vm13 = vmmov %vm6422_vm0 }
 0x11f   : > { %vm6507_vm9 = vmmov %vm6422_vm0  ;;  %v2768_v38 = vpop.permute.xlu1 %2767 }
 0x120   : > { %3103 = vmatmul.mubr.f32.gmra.mxu0 %v2837_v58  ;;  %v1445_v57 = vsel %vm6507_vm9, %v5157_v47, %v5482_v63  ;;  %v1374_v37 = vpop.permute.xlu0 %1373  ;;  %vm6511_vm15 = vmmov %vm6422_vm0  ;;  %v6516_v63 = vld [vmem:[#allocation6_spill] sm:$0xff]  ;;  %v6550_v58 = vld [vmem:[#allocation32_spill] sm:$0xff] }
 0x121   : > { %2410 = vmatmul.mubr.f32.gmra.mxu1 %v1443_v24  ;;  %3606 = vmatprep.mubr.msk.f32.mxu0 %vm6500_vm12, %v2678_v23  ;;  %vm6512_vm14 = vmmov %vm6422_vm0  ;;  %vm6517_vm7 = vnez %v6516_v63 }
 0x122   : > { %3551 = vmatprep.mubr.msk.f32.mxu1 %vm6499_vm4, %v6483_v52  ;;  %vm6513_vm10 = vmmov %vm6422_vm0  ;;  %v1286_v45 = vsel %vm6517_vm7, %v5262_v54, 0.0  ;;  %v2587_v52 = vsel %vm6526_vm11, %v6534_v1, 0.0 }
 0x123   : > { %v1446_v47 = vsel %vm6513_vm10, %v1092_v11, %v1366_v17  ;;  %vm6515_vm6 = vmmov %vm6422_vm0  ;;  %v6524_v17 = vld [vmem:[#allocation15_spill] sm:$0xff]  ;;  %v6565_v11 = vld [vmem:[#allocation41_spill] sm:$0xff] }
 0x124   : > { %3108 = vmatmul.mubr.f32.gmra.mxu0 %v2838_v26  ;;  %v2840_v7 = vsel %vm6515_vm6, %v6514_v14, %v5504_v22  ;;  %vm6519_vm5 = vmmov %vm6422_vm0  ;;  %v2682_v54 = vsel %vm6517_vm7, %v6524_v17, 0.0  ;;  %vm6542_vm6 = vnez %v6541_v10 }
 0x125   : > { %2415 = vmatmul.mubr.f32.gmra.mxu1 %v1444_v0  ;;  %3607 = vmatprep.mubr.msk.f32.mxu0 %vm6506_vm13, %v6505_v39  ;;  %vm6521_vm2 = vmmov %vm6422_vm0  ;;  %v1096_v18 = vsel %vm6542_vm6, %v6518_v28, 0.0  ;;  %v2589_v23 = vsel %vm6542_vm6, %v6550_v58, 0.0 }
 0x126   : > { %3552 = vmatprep.mubr.msk.f32.mxu1 %vm6504_vm8, %v1284_v13  ;;  %vm6522_vm4 = vmmov %vm6422_vm0  ;;  %v6556_v13 = vld [vmem:[#allocation31_spill] sm:$0xff] }
 0x127   : > { %v1447_v34 = vsel %vm6522_vm4, %v5297_v46, %v1368_v6  ;;  %vm6523_vm12 = vmmov %vm6422_vm0  ;;  %v2770_v19 = vpop.permute.xlu1 %2769 }
 0x128   : > { %3113 = vmatmul.mubr.f32.gmra.mxu0 %v2839_v43  ;;  %v2841_v35 = vsel %vm6523_vm12, %v2585_v29, %v2762_v40  ;;  %v1376_v22 = vpop.permute.xlu0 %1375  ;;  %vm6527_vm1 = vmmov %vm6422_vm0  ;;  %v6536_v40 = vld [vmem:[#allocation22_spill] sm:$0xff]  ;;  %v6572_v29 = vld [vmem:[#allocation40_spill] sm:$0xff] }
 0x129   : > { %2420 = vmatmul.mubr.f32.gmra.mxu1 %v1445_v57  ;;  %3608 = vmatprep.mubr.msk.f32.mxu0 %vm6512_vm14, %v2680_v4  ;;  %vm6528_vm8 = vmmov %vm6422_vm0  ;;  %v6561_v43 = vld [vmem:[#allocation38_spill] sm:$0xff]  ;;  %v6563_v4 = vld [vmem:[#allocation35_spill] sm:$0xff] }
 0x12a   : > { %3553 = vmatprep.mubr.msk.f32.mxu1 %vm6511_vm15, %v5222_v56  ;;  %v6520_v56 = vld [vmem:[#allocation13_spill] sm:$0xff]  ;;  %vm6529_vm13 = vmmov %vm6422_vm0 }
 0x12b   : > { %v1448_v46 = vsel %vm6529_vm13, %v1094_v53, %v1370_v48  ;;  %vm6531_vm9 = vmmov %vm6422_vm0  ;;  %vm6533_vm0 = vnez %v6532_v5  ;;  %v6548_v48 = vld [vmem:[#allocation23_spill] sm:$0xff] }
 0x12c   : > { %3118 = vmatmul.mubr.f32.gmra.mxu0 %v2840_v7  ;;  %v2842_v12 = vsel %vm6531_vm9, %v6530_v30, %v2764_v50  ;;  %v1288_v55 = vsel %vm6533_vm0, %v6508_v9, 0.0  ;;  %v2772_v62 = vpop.permute.xlu1 %2771  ;;  %vm6535_vm3 = vmmov %vm6527_vm1  ;;  %v2684_v41 = vsel %vm6533_vm0, %v6540_v60, 0.0  ;;  %vm6549_vm12 = vnez %v6548_v48 }
 0x12d   : > { %2425 = vmatmul.mubr.f32.gmra.mxu1 %v1446_v47  ;;  %3609 = vmatprep.mubr.msk.f32.mxu0 %vm6521_vm2, %v6520_v56  ;;  %v1378_v33 = vpop.permute.xlu0 %1377  ;;  %vm6537_vm15 = vmmov %vm6527_vm1  ;;  %v1290_v24 = vsel %vm6549_vm12, %v6524_v17, 0.0  ;;  %vm6557_vm9 = vnez %v6556_v13 }
 0x12e   : > { %3554 = vmatprep.mubr.msk.f32.mxu1 %vm6519_vm5, %v1286_v45  ;;  %vm6538_vm14 = vmmov %vm6527_vm1  ;;  %v1098_v44 = vsel %vm6557_vm9, %v6534_v1, 0.0  ;;  %v6571_v45 = vld [vmem:[#allocation43_spill] sm:$0xff] }
 0x12f   : > { %v1449_v6 = vsel %vm6538_vm14, %v6514_v14, %v1372_v36  ;;  %vm6539_vm10 = vmmov %vm6527_vm1 }
 0x130   : > { %3123 = vmatmul.mubr.f32.gmra.mxu0 %v2841_v35  ;;  %v2843_v51 = vsel %vm6539_vm10, %v2587_v52, %v2766_v61  ;;  %vm6543_vm7 = vmmov %vm6527_vm1  ;;  %v2774_v15 = vpop.permute.xlu1 %2773  ;;  %v6555_v61 = vld [vmem:[#allocation34_spill] sm:$0xff]  ;;  %vm6564_vm10 = vnez %v6563_v4  ;;  %v6577_v35 = vld [vmem:[#allocation45_spill] sm:$0xff] }
 0x131   : > { %2430 = vmatmul.mubr.f32.gmra.mxu1 %v1447_v34  ;;  %3610 = vmatprep.mubr.msk.f32.mxu0 %vm6528_vm8, %v2682_v54  ;;  %vm6544_vm5 = vmmov %vm6527_vm1  ;;  %v2686_v36 = vsel %vm6549_vm12, %v6555_v61, 0.0  ;;  %v1292_v31 = vsel %vm6564_vm10, %v6540_v60, 0.0  ;;  %v2688_v28 = vsel %vm6564_vm10, %v6571_v45, 0.0  ;;  %v6581_v54 = vld [vmem:[#allocation48_spill] sm:$0xff]  ;;  %v6587_v52 = vld [vmem:[#allocation47_spill] sm:$0xff] }
 0x132   : > { %3555 = vmatprep.mubr.msk.f32.mxu1 %vm6527_vm1, %v6505_v39  ;;  %vm6545_vm2 = vmmov %vm6527_vm1  ;;  %v6609_v4 = vld [vmem:[#allocation62_spill] sm:$0xff] }
 0x133   : > { %v1450_v25 = vsel %vm6545_vm2, %v1096_v18, %v1374_v37  ;;  %vm6547_vm4 = vmmov %vm6527_vm1  ;;  %v6567_v37 = vld [vmem:[#allocation42_spill] sm:$0xff] }
 0x134   : > { %3128 = vmatmul.mubr.f32.gmra.mxu0 %v2842_v12  ;;  %v2844_v8 = vsel %vm6547_vm4, %v6546_v59, %v2768_v38  ;;  %vm6551_vm11 = vmmov %vm6527_vm1  ;;  %v2591_v38 = vsel %vm6557_vm9, %v6565_v11, 0.0  ;;  %vm6573_vm4 = vnez %v6572_v29  ;;  %v6594_v18 = vld [vmem:[#allocation50_spill] sm:$0xff] }
 0x135   : > { %2435 = vmatmul.mubr.f32.gmra.mxu1 %v1448_v46  ;;  %3611 = vmatprep.mubr.msk.f32.mxu0 %vm6537_vm15, %v6536_v40  ;;  %vm6553_vm8 = vmmov %vm6527_vm1  ;;  %v2593_v21 = vsel %vm6573_vm4, %v6581_v54, 0.0 }
 0x136   : > { %3556 = vmatprep.mubr.msk.f32.mxu1 %vm6535_vm3, %v1288_v55  ;;  %v1380_v50 = vpop.permute.xlu0 %1379  ;;  %v1451_v0 = vsel %vm6553_vm8, %v6530_v30, %v1376_v22  ;;  %vm6554_vm13 = vmmov %vm6527_vm1  ;;  %v6579_v22 = vld [vmem:[#allocation44_spill] sm:$0xff]  ;;  %v6583_v30 = vld [vmem:[#allocation49_spill] sm:$0xff] }
 0x137   : > { %v2845_v26 = vsel %vm6554_vm13, %v2589_v23, %v2770_v19  ;;  %vm6558_vm0 = vmmov %vm6527_vm1  ;;  %vm6580_vm13 = vnez %v6579_v22  ;;  %v6586_v55 = vld [vmem:[#allocation51_spill] sm:$0xff] }
 0x138   : > { %3133 = vmatmul.mubr.f32.gmra.mxu0 %v2843_v51  ;;  %vm6559_vm3 = vmmov %vm6558_vm0  ;;  %v1294_v17 = vsel %vm6580_vm13, %v6555_v61, 0.0  ;;  %v2690_v1 = vsel %vm6580_vm13, %v6586_v55, 0.0  ;;  %v6592_v51 = vld [vmem:[#allocation54_spill] sm:$0xff]  ;;  %v6619_v22 = vld [vmem:[#allocation71_spill] sm:$0xff] }
 0x139   : > { %2440 = vmatmul.mubr.f32.gmra.mxu1 %v1449_v6  ;;  %3612 = vmatprep.mubr.msk.f32.mxu0 %vm6544_vm5, %v2684_v41  ;;  %vm6560_vm15 = vmmov %vm6558_vm0  ;;  %v6603_v61 = vld [vmem:[#allocation58_spill] sm:$0xff] }
 0x13a   : > { %3557 = vmatprep.mubr.msk.f32.mxu1 %vm6543_vm7, %v6520_v56  ;;  %v1452_v57 = vsel %vm6560_vm15, %v1098_v44, %v1378_v33  ;;  %vm6562_vm14 = vmmov %vm6558_vm0  ;;  %v1100_v56 = vsel %vm6573_vm4, %v6550_v58, 0.0 }
 0x13b   : > { %v2846_v9 = vsel %vm6562_vm14, %v6561_v43, %v2772_v62  ;;  %vm6566_vm6 = vmmov %vm6558_vm0  ;;  %vm6588_vm14 = vnez %v6587_v52 }
 0x13c   : > { %3138 = vmatmul.mubr.f32.gmra.mxu0 %v2844_v8  ;;  %vm6568_vm7 = vmmov %vm6558_vm0  ;;  %v1102_v62 = vsel %vm6588_vm14, %v6565_v11, 0.0 }
 0x13d   : > { %2445 = vmatmul.mubr.f32.gmra.mxu1 %v1450_v25  ;;  %3613 = vmatprep.mubr.msk.f32.mxu0 %vm6527_vm1, %v6552_v2  ;;  %vm6569_vm5 = vmmov %vm6558_vm0 }
 0x13e   : > { %3558 = vmatprep.mubr.msk.f32.mxu1 %vm6551_vm11, %v1290_v24  ;;  %v2776_v3 = vpop.permute.xlu1 %2775  ;;  %v1382_v39 = vpop.permute.xlu0 %1381  ;;  %v1453_v47 = vsel %vm6569_vm5, %v6546_v59, %v1380_v50  ;;  %vm6570_vm2 = vmmov %vm6558_vm0  ;;  %v6596_v59 = vld [vmem:[#allocation59_spill] sm:$0xff]  ;;  %v6598_v24 = vld [vmem:[#allocation60_spill] sm:$0xff] }
 0x13f   : > { %v2847_v14 = vsel %vm6570_vm2, %v2591_v38, %v2774_v15  ;;  %vm6574_vm12 = vmmov %vm6558_vm0  ;;  %vm6595_vm2 = vnez %v6594_v18  ;;  %v2595_v8 = vsel %vm6588_vm14, %v6596_v59, 0.0  ;;  %vm6613_vm14 = vcmp.lt.s32.totalorder %v4019_v49, 7 }
 0x140   : > { %3143 = vmatmul.mubr.f32.gmra.mxu0 %v2845_v26  ;;  %vm6575_vm11 = vmmov %vm6558_vm0  ;;  %v1296_v25 = vsel %vm6595_vm2, %v6571_v45, 0.0 }
 0x141   : > { %2450 = vmatmul.mubr.f32.gmra.mxu1 %v1451_v0  ;;  %3614 = vmatprep.mubr.msk.f32.mxu0 %vm6559_vm3, %v2686_v36  ;;  %vm6576_vm1 = vmmov %vm6558_vm0  ;;  %v6602_v0 = vld [vmem:[#allocation63_spill] sm:$0xff] }
 0x142   : > { %3559 = vmatprep.mubr.msk.f32.mxu1 %vm6558_vm0, %v6536_v40  ;;  %v1454_v34 = vsel %vm6576_vm1, %v1100_v56, %v1382_v39  ;;  %vm6578_vm8 = vmmov %vm6558_vm0  ;;  %v2692_v26 = vsel %vm6595_vm2, %v6602_v0, 0.0  ;;  %vm6620_vm2 = vnez %v6619_v22 }
 0x143   : > { %v2848_v19 = vsel %vm6578_vm8, %v6577_v35, %v2776_v3  ;;  %vm6582_vm9 = vmmov %vm6558_vm0  ;;  %vm6604_vm8 = vnez %v6603_v61 }
 0x144   : > { %3148 = vmatmul.mubr.f32.gmra.mxu0 %v2846_v9  ;;  %v2778_v7 = vpop.permute.xlu1 %2777  ;;  %v1384_v63 = vpop.permute.xlu0 %1383  ;;  %vm6584_vm3 = vmmov %vm6558_vm0  ;;  %v1104_v36 = vsel %vm6604_vm8, %v6581_v54, 0.0  ;;  %v6621_v54 = vld [vmem:[#allocation57_spill] sm:$0xff] }
 0x145   : > { %2455 = vmatmul.mubr.f32.gmra.mxu1 %v1452_v57  ;;  %3615 = vmatprep.mubr.msk.f32.mxu0 %vm6568_vm7, %v6567_v37  ;;  %v1455_v12 = vsel %vm6584_vm3, %v6561_v43, %v1384_v63  ;;  %vm6585_vm15 = vmmov %vm6558_vm0  ;;  %v6607_v43 = vld [vmem:[#allocation67_spill] sm:$0xff] }
 0x146   : > { %3560 = vmatprep.mubr.msk.f32.mxu1 %vm6566_vm6, %v1292_v31  ;;  %v2849_v5 = vsel %vm6585_vm15, %v2593_v21, %v2778_v7  ;;  %vm6589_vm10 = vmmov %vm6558_vm0  ;;  %vm6610_vm15 = vnez %v6609_v4 }
 0x147   : > { %v5711_v33 = vpop.f32.mrf.mxu1  ;;  %vm6590_vm6 = vmmov %vm6558_vm0  ;;  %v1298_v31 = vsel %vm6610_vm15, %v6586_v55, 0.0 }
 0x148   : > { %3153 = vmatmul.mubr.f32.gmra.mxu0 %v2847_v14  ;;  %vm6591_vm7 = vmmov %vm6558_vm0  ;;  %v6612_v14 = vld [vmem:[#allocation68_spill] sm:$0xff] }
 0x149   : > { %2460 = vmatmul.mubr.f32.gmra.mxu1 %v1453_v47  ;;  %3616 = vmatprep.mubr.msk.f32.mxu0 %vm6575_vm11, %v2688_v28  ;;  %v2107_v40 = vpop.f32.mrf.mxu1  ;;  %vm6593_vm5 = vmmov %vm6558_vm0  ;;  %v2634_v7 = vsel %vm6613_vm14, %v6612_v14, %v5281_v16  ;;  %v6615_v28 = vld [vmem:[#allocation73_spill] sm:$0xff] }
 0x14a   : > { %3561 = vmatprep.mubr.msk.f32.mxu1 %vm6574_vm12, %v6552_v2  ;;  %v1386_v46 = vpop.permute.xlu0 %1385  ;;  %vm6597_vm4 = vmmov %vm6558_vm0 }
 0x14b   : > { %v1456_v6 = vsel %vm6591_vm7, %v1102_v62, %v1386_v46  ;;  %v5725_v15 = vpop.f32.mrf.mxu1  ;;  %vm6599_vm12 = vmmov %vm6558_vm0  ;;  %v6629_v62 = vld [vmem:[#allocation8_spill] sm:$0xff] }
 0x14c   : > { %v2780_v53 = vpop.permute.xlu1 %2779  ;;  %3158 = vmatmul.mubr.f32.gmra.mxu0 %v2848_v19  ;;  %v5727_v50 = vpop.f32.mrf.mxu0  ;;  %vm6600_vm11 = vmmov %vm6558_vm0 }
 0x14d   : > { %2465 = vmatmul.mubr.f32.gmra.mxu1 %v1454_v34  ;;  %3617 = vmatprep.mubr.msk.f32.mxu0 %vm6558_vm0, %v6583_v30  ;;  %v2850_v60 = vsel %vm6593_vm5, %v6592_v51, %v2780_v53  ;;  %v2112_v48 = vpop.f32.mrf.mxu1  ;;  %vm6601_vm1 = vmmov %vm6558_vm0  ;;  %v2694_v34 = vsel %vm6610_vm15, %v2634_v7, 0.0 }
 0x14e   : > { %3562 = vmatprep.mubr.msk.f32.mxu1 %vm6582_vm9, %v1294_v17  ;;  %v2027_v2 = vpop.f32.mrf.mxu0  ;;  %vm6605_vm13 = vmmov %vm6558_vm0  ;;  %v1106_v17 = vsel %vm6620_vm2, %v6596_v59, 0.0 }
 0x14f   : > { %vm6606_vm9 = vmmov %vm6558_vm0 }
 0x150   : > { %3163 = vmatmul.mubr.f32.gmra.mxu0 %v2849_v5  ;;  %vm6608_vm3 = vmmov %vm6558_vm0 }
 0x151   : > { %2470 = vmatmul.mubr.f32.gmra.mxu1 %v1455_v12  ;;  %3618 = vmatprep.mubr.msk.f32.mxu0 %vm6590_vm6, %v2690_v1  ;;  %v2782_v41 = vpop.permute.xlu1 %2781  ;;  %v5741_v3 = vpop.f32.mrf.mxu0  ;;  %vm6616_vm6 = vmmov %vm6558_vm0 }
 0x152   : > { %3563 = vmatprep.mubr.msk.f32.mxu1 %vm6589_vm10, %v6567_v37  ;;  %v1388_v10 = vpop.permute.xlu0 %1387  ;;  %v2851_v23 = vsel %vm6601_vm1, %v2595_v8, %v2782_v41  ;;  %v5743_v39 = vpop.f32.mrf.mxu1  ;;  %v6611_v37 = vld [vmem:[#allocation72_spill] sm:$0xff]  ;;  %vm6614_vm10 = vmmov %vm6558_vm0 }
 0x153   : > { %v1457_v58 = vsel %vm6600_vm11, %v6577_v35, %v1388_v10  ;;  %v2032_v11 = vpop.f32.mrf.mxu0  ;;  %v2597_v47 = vsel %vm6604_vm8, %v6611_v37, 0.0  ;;  %vm6617_vm7 = vmmov %vm6558_vm0 }
 0x154   : > { %3168 = vmatmul.mubr.f32.gmra.mxu0 %v2850_v60  ;;  %v2117_v38 = vpop.f32.mrf.mxu1  ;;  %vm6618_vm5 = vmmov %vm6558_vm0 }
 0x155   : > { %2475 = vmatmul.mubr.f32.gmra.mxu1 %v1456_v6  ;;  %3619 = vmatprep.mubr.msk.f32.mxu0 %vm6599_vm12, %v6598_v24  ;;  %vm6623_vm12 = vcmp.lt.s32.totalorder %v4019_v49, 1  ;;  %vm6624_vm11 = vmmov %vm6558_vm0 }
 0x156   : > { %3564 = vmatprep.mubr.msk.f32.mxu1 %vm6597_vm4, %v1296_v25  ;;  %vm6622_vm4 = vmmov %vm6613_vm14  ;;  %v2538_v53 = vsel %vm6623_vm12, %v4161_v27, %v5203_v42 }
 0x157   : > { %v2784_v13 = vpop.permute.xlu1 %2783  ;;  %v5769_v35 = vpop.f32.mrf.mxu0  ;;  %v1204_v21 = vsel %vm6622_vm4, %v6621_v54, %v5281_v16  ;;  %vm6625_vm1 = vmmov %vm6558_vm0  ;;  %v2599_v27 = vsel %vm6620_vm2, %v2538_v53, 0.0 }
 0x158   : > { %v1390_v44 = vpop.permute.xlu0 %1389  ;;  %3173 = vmatmul.mubr.f32.gmra.mxu0 %v2851_v23  ;;  %v2852_v9 = vsel %vm6608_vm3, %v6607_v43, %v2784_v13  ;;  %v5771_v19 = vpop.f32.mrf.mxu1  ;;  %vm6626_vm8 = vmmov %vm6558_vm0 }
 0x159   : > { %2480 = vmatmul.mubr.f32.gmra.mxu1 %v1457_v58  ;;  %3620 = vmatprep.mubr.msk.f32.mxu0 %vm6606_vm9, %v2692_v26  ;;  %v1458_v57 = vsel %vm6558_vm0, %v1104_v36, %v1390_v44  ;;  %v2037_v46 = vpop.f32.mrf.mxu0  ;;  %vm6628_vm9 = vnez %v6393_v20  ;;  %vm6631_vm3 = vmmov %vm6625_vm1 }
 0x15a   : > { %3565 = vmatprep.mubr.msk.f32.mxu1 %vm6605_vm13, %v6583_v30  ;;  %v2122_v30 = vpop.f32.mrf.mxu1  ;;  %vm6627_vm13 = vmmov %vm6558_vm0  ;;  %v1300_v52 = vsel %vm6628_vm9, %v1204_v21, 0.0 }
 0x15b   : > { %vm6630_vm0 = vmmov %vm6622_vm4 }
 0x15c   : > { %3178 = vmatmul.mubr.f32.gmra.mxu0 %v2852_v9  ;;  %v2664_v40 = vsel %vm6630_vm0, %v5281_v16, %v6629_v62  ;;  %vm6632_vm15 = vmmov %vm6625_vm1 }
 0x15d   : > { %2485 = vmatmul.mubr.f32.gmra.mxu1 %v1458_v57  ;;  %v2786_v63 = vpop.permute.xlu1 %2785  ;;  %3621 = vmatprep.mubr.msk.f32.mxu0 %vm6616_vm6, %v6615_v28  ;;  %v5798_v6 = vpop.f32.mrf.mxu0  ;;  %vm6633_vm14 = vmmov %vm6625_vm1  ;;  %v2696_v49 = vsel %vm6628_vm9, %v2664_v40, 0.0 }
 0x15e   : > { %v1392_v45 = vpop.permute.xlu0 %1391  ;;  %3566 = vmatprep.mubr.msk.f32.mxu1 %vm6614_vm10, %v1298_v31  ;;  %v2853_v56 = vsel %vm6618_vm5, %v2597_v47, %v2786_v63  ;;  %vm6634_vm10 = vmmov %vm6625_vm1 }
 0x15f   : > { %v1459_v29 = vsel %vm6617_vm7, %v6592_v51, %v1392_v45  ;;  %v5800_v51 = vpop.f32.mrf.mxu1  ;;  %v2042_v18 = vpop.f32.mrf.mxu0  ;;  %vm6635_vm6 = vmmov %vm6625_vm1 }
 0x160   : > { %3183 = vmatmul.mubr.f32.gmra.mxu0 %v2853_v56  ;;  %vm6636_vm7 = vmmov %vm6625_vm1 }
 0x161   : > { %2490 = vmatmul.mubr.f32.gmra.mxu1 %v1459_v29  ;;  %v2788_v12 = vpop.permute.xlu1 %2787  ;;  %3622 = vmatprep.mubr.msk.f32.mxu0 %vm6625_vm1, %v2694_v34  ;;  %v2127_v25 = vpop.f32.mrf.mxu1  ;;  %vm6637_vm5 = vmmov %vm6625_vm1 }
 0x162   : > { %v1394_v5 = vpop.permute.xlu0 %1393  ;;  %3567 = vmatprep.mubr.msk.f32.mxu1 %vm6624_vm11, %v6598_v24  ;;  %v2854_v1 = vsel %vm6627_vm13, %v5234_v32, %v2788_v12  ;;  %vm6638_vm2 = vmmov %vm6625_vm1 }
 0x163   : > { %v1460_v55 = vsel %vm6626_vm8, %v1106_v17, %v1394_v5  ;;  %v5813_v48 = vpop.f32.mrf.mxu0  ;;  %vm6639_vm4 = vmmov %vm6625_vm1 }
 0x164   : > { %3188 = vmatmul.mubr.f32.gmra.mxu0 %v2854_v1  ;;  %vm6640_vm12 = vmmov %vm6625_vm1 }
 0x165   : > { %2495 = vmatmul.mubr.f32.gmra.mxu1 %v1460_v55  ;;  %v2790_v60 = vpop.permute.xlu1 %2789  ;;  %3623 = vmatprep.mubr.msk.f32.mxu0 %vm6632_vm15, %v5281_v16  ;;  %v5815_v16 = vpop.f32.mrf.mxu1  ;;  %vm6641_vm11 = vmmov %vm6625_vm1 }
 0x166   : > { %v1396_v41 = vpop.permute.xlu0 %1395  ;;  %3568 = vmatprep.mubr.msk.f32.mxu1 %vm6631_vm3, %v1300_v52  ;;  %v2855_v10 = vsel %vm6634_vm10, %v2599_v27, %v2790_v60  ;;  %v2047_v24 = vpop.f32.mrf.mxu0  ;;  %vm6642_vm8 = vmmov %vm6625_vm1 }
 0x167   : > { %v1461_v32 = vsel %vm6633_vm14, %v6607_v43, %v1396_v41  ;;  %v2132_v58 = vpop.f32.mrf.mxu1  ;;  %vm6643_vm13 = vmmov %vm6625_vm1 }
 0x168   : > { %3193 = vmatmul.mubr.f32.gmra.mxu0 %v2855_v10  ;;  %v5863_v58 = vld [vmem:[%s5977_s2] ss:$0 sm:$0xff]  ;;  %vm6644_vm9 = vmmov %vm6625_vm1 }
 0x169   : > { %2500 = vmatmul.mubr.f32.gmra.mxu1 %v1461_v32  ;;  %v2792_v59 = vpop.permute.xlu1 %2791  ;;  %3624 = vmatprep.mubr.msk.f32.mxu0 %vm6635_vm6, %v2696_v49  ;;  %v5817_v23 = vpop.f32.mrf.mxu0  ;;  %vm6645_vm0 = vmmov %vm6625_vm1 }
 0x16a   : > { %v2856_v8 = vsel %vm6636_vm7, %v5203_v42, %v2792_v59  ;;  %v5819_v20 = vpop.f32.mrf.mxu1  ;;  %vm6646_vm3 = vmmov %vm6645_vm0 }
 0x16b   : > { %v2052_v2 = vpop.f32.mrf.mxu0  ;;  %vm6647_vm15 = vmmov %vm6645_vm0 }
 0x16c   : > { %3198 = vmatmul.mubr.f32.gmra.mxu0 %v2856_v8  ;;  %v2137_v0 = vpop.f32.mrf.mxu1  ;;  %vm6648_vm14 = vmmov %vm6645_vm0 }
 0x16d   : > { %vm6649_vm10 = vmmov %vm6645_vm0 }
 0x16e   : > { %vm6650_vm6 = vmmov %vm6645_vm0 }
 0x16f   : > { %vm6651_vm7 = vmmov %vm6645_vm0 }
 0x170   : > { %v5821_v26 = vpop.f32.mrf.mxu0 }
 0x171   : > { %v5823_v61 = vpop.f32.mrf.mxu1 }
 0x172   : > { %v2057_v36 = vpop.f32.mrf.mxu0 }
 0x173   : > { %v2142_v13 = vpop.f32.mrf.mxu1 }
 0x176   : > { %v5825_v42 = vpop.f32.mrf.mxu0 }
 0x177   : > { %v5827_v44 = vpop.f32.mrf.mxu1 }
 0x178   : > { %v2062_v57 = vpop.f32.mrf.mxu0 }
 0x179   : > { %v2147_v43 = vpop.f32.mrf.mxu1 }
 0x17e   : > { %v5829_v9 = vpop.f32.mrf.mxu0 }
 0x17f   : > { %v5831_v4 = vpop.f32.mrf.mxu1 }
 0x180   : > { %v2067_v31 = vpop.f32.mrf.mxu0 }
 0x181   : > { %v2152_v11 = vpop.f32.mrf.mxu1 }
 0x184   : > { %v5833_v38 = vpop.f32.mrf.mxu0 }
 0x185   : > { %v5835_v37 = vpop.f32.mrf.mxu1 }
 0x186   : > { %v2072_v47 = vpop.f32.mrf.mxu0 }
 0x187   : > { %v2157_v14 = vpop.f32.mrf.mxu1 }
 0x18d   : > { %v5837_v7 = vpop.f32.mrf.mxu0 }
 0x18e   : > { %v5839_v63 = vpop.f32.mrf.mxu1 }
 0x18f   : > { %v2077_v45 = vpop.f32.mrf.mxu0 }
 0x190   : > { %v2162_v28 = vpop.f32.mrf.mxu1 }
 0x193   : > { %v5841_v29 = vpop.f32.mrf.mxu0  ;;  %v5843_v56 = vpop.f32.mrf.mxu1 }
 0x195   : > { %v2082_v34 = vpop.f32.mrf.mxu0  ;;  %v2167_v22 = vpop.f32.mrf.mxu1 }
 0x19a   : > { %v5845_v17 = vpop.f32.mrf.mxu0 }
 0x19b   : > { %v5847_v54 = vpop.f32.mrf.mxu1 }
 0x19c   : > { %v2087_v21 = vpop.f32.mrf.mxu0 }
 0x19d   : > { %v2172_v53 = vpop.f32.mrf.mxu1 }
 0x1a0   : > { %v5849_v46 = vpop.f32.mrf.mxu0 }
 0x1a1   : > { %v5851_v30 = vpop.f32.mrf.mxu1 }
 0x1a2   : > { %v2092_v12 = vpop.f32.mrf.mxu0 }
 0x1a3   : > { %v2177_v5 = vpop.f32.mrf.mxu1 }
 0x1a6   : > { %v5853_v55 = vpop.f32.mrf.mxu0 }
 0x1a7   : > { %v5855_v1 = vpop.f32.mrf.mxu1 }
 0x1a8   : > { %v2097_v52 = vpop.f32.mrf.mxu0 }
 0x1a9   : > { %v2182_v27 = vpop.f32.mrf.mxu1 }
 0x1ac   : > { %v5857_v62 = vpop.f32.mrf.mxu0 }
 0x1ad   : > { %v2346_v40 = vpop.f32.mrf.mxu1 }
 0x1ae   : > { %v2102_v60 = vpop.f32.mrf.mxu0  ;;  %v2347_v25 = vadd.f32 %v2346_v40, %v5727_v50 }
 0x1af   : > { %v2348_v41 = vpop.f32.mrf.mxu1 }
 0x1b0   : > { %v3044_v10 = vpop.f32.mrf.mxu0 }
 0x1b1   : > { %v2351_v32 = vpop.f32.mrf.mxu1  ;;  %v3203_v24 = vadd.f32 %v3044_v10, %v2347_v25 }
 0x1b2   : > { %v3046_v18 = vpop.f32.mrf.mxu0  ;;  %v2352_v36 = vadd.f32 %v2351_v32, %v5741_v3 }
 0x1b3   : > { %v2353_v49 = vpop.f32.mrf.mxu1  ;;  %v3242_v31 = vadd.f32 %v5863_v58, %v3203_v24 }
 0x1b4   : > { %v3049_v8 = vpop.f32.mrf.mxu0 }
 0x1b5   : > { %v2356_v59 = vpop.f32.mrf.mxu1  ;;  %v3204_v11 = vadd.f32 %v3049_v8, %v2352_v36  ;;  %v3274_v21 = vmax.f32 %v3242_v31, 0.0 }
 0x1b6   : > { %v3051_v0 = vpop.f32.mrf.mxu0  ;;  %v2357_v13 = vadd.f32 %v2356_v59, %v5769_v35 }
 0x1b7   : > { %v2358_v2 = vpop.f32.mrf.mxu1  ;;  %v3243_v53 = vadd.f32 %v5863_v58, %v3204_v11 }
 0x1b8   : > { %v3054_v43 = vpop.f32.mrf.mxu0 }
 0x1b9   : > { %v2361_v57 = vpop.f32.mrf.mxu1  ;;  %v3205_v50 = vadd.f32 %v3054_v43, %v2357_v13  ;;  %v3275_v41 = vmax.f32 %v3243_v53, 0.0 }
 0x1ba   : > { %v3056_v14 = vpop.f32.mrf.mxu0  ;;  %v2362_v45 = vadd.f32 %v2361_v57, %v5798_v6 }
 0x1bb   : > { %v2363_v47 = vpop.f32.mrf.mxu1  ;;  %v3244_v28 = vadd.f32 %v5863_v58, %v3205_v50 }
 0x1bc   : > { %v3059_v22 = vpop.f32.mrf.mxu0 }
 0x1bd   : > { %v2366_v34 = vpop.f32.mrf.mxu1  ;;  %v3276_v3 = vmax.f32 %v3244_v28, 0.0  ;;  %v3206_v12 = vadd.f32 %v3059_v22, %v2362_v45 }
 0x1be   : > { %v3061_v5 = vpop.f32.mrf.mxu0  ;;  %v2367_v32 = vadd.f32 %v2366_v34, %v5813_v48 }
 0x1bf   : > { %v2368_v35 = vpop.f32.mrf.mxu1  ;;  %v3306_v52 = vmax.f32 %v3274_v21, %v3276_v3  ;;  %v3245_v27 = vadd.f32 %v5863_v58, %v3206_v12 }
 0x1c0   : > { %v3064_v60 = vpop.f32.mrf.mxu0 }
 0x1c1   : > { %v2371_v40 = vpop.f32.mrf.mxu1  ;;  %3322 = vst.msk [vmem:[#allocation2] sm:$0xff] %vm6637_vm5, %v3306_v52  ;;  %v3277_v6 = vmax.f32 %v3245_v27, 0.0  ;;  %v3207_v25 = vadd.f32 %v3064_v60, %v2367_v32  ;;  %vm6652_vm5 = vmmov %vm6645_vm0 }
 0x1c2   : > { %v3066_v49 = vpop.f32.mrf.mxu0  ;;  %v2372_v0 = vadd.f32 %v2371_v40, %v5817_v23 }
 0x1c3   : > { %v2373_v10 = vpop.f32.mrf.mxu1  ;;  %v3307_v18 = vmax.f32 %v3275_v41, %v3277_v6  ;;  %v3246_v13 = vadd.f32 %v5863_v58, %v3207_v25 }
 0x1c4   : > { %v3069_v8 = vpop.f32.mrf.mxu0 }
 0x1c5   : > { %v2376_v59 = vpop.f32.mrf.mxu1  ;;  %3323 = vst.msk [vmem:[#allocation2 + $0x8] sm:$0xff] %vm6638_vm2, %v3307_v18  ;;  %v3208_v48 = vadd.f32 %v3069_v8, %v2372_v0  ;;  %v3278_v45 = vmax.f32 %v3246_v13, 0.0  ;;  %vm6653_vm2 = vmmov %vm6645_vm0 }
 0x1c6   : > { %v3071_v2 = vpop.f32.mrf.mxu0  ;;  %v2377_v36 = vadd.f32 %v2376_v59, %v5821_v26 }
 0x1c7   : > { %v2378_v24 = vpop.f32.mrf.mxu1  ;;  %v3247_v21 = vadd.f32 %v5863_v58, %v3208_v48 }
 0x1c8   : > { %v3074_v43 = vpop.f32.mrf.mxu0 }
 0x1c9   : > { %v2381_v57 = vpop.f32.mrf.mxu1  ;;  %v3209_v31 = vadd.f32 %v3074_v43, %v2377_v36  ;;  %v3279_v40 = vmax.f32 %v3247_v21, 0.0 }
 0x1ca   : > { %v3076_v50 = vpop.f32.mrf.mxu0  ;;  %v2382_v47 = vadd.f32 %v2381_v57, %v5825_v42 }
 0x1cb   : > { %v2383_v11 = vpop.f32.mrf.mxu1  ;;  %v3248_v14 = vadd.f32 %v5863_v58, %v3209_v31 }
 0x1cc   : > { %v3338_v23 = vld [vmem:[#allocation2] ss:$2 sm:$0xff]  ;;  %v3354_v26 = vld [vmem:[#allocation2 + $0x1] ss:$2 sm:$0xff]  ;;  %v3079_v34 = vpop.f32.mrf.mxu0 }
 0x1cd   : > { %v2386_v28 = vpop.f32.mrf.mxu1  ;;  %v3369_v22 = vmax.f32 %v3338_v23, %v3354_v26  ;;  %v3280_v53 = vmax.f32 %v3248_v14, 0.0  ;;  %v3210_v3 = vadd.f32 %v3079_v34, %v2382_v47 }
 0x1ce   : > { %v3081_v42 = vpop.f32.mrf.mxu0  ;;  %v2387_v41 = vadd.f32 %v2386_v28, %v5829_v9 }
 0x1cf   : > { %v2388_v12 = vpop.f32.mrf.mxu1  ;;  %3377 = vst.msk [vmem:[%s5884_s19] sm:$0xff] %vm6639_vm4, %v3369_v22  ;;  %v3308_v35 = vmax.f32 %v3278_v45, %v3280_v53  ;;  %v3249_v5 = vadd.f32 %v5863_v58, %v3210_v3  ;;  %vm6654_vm4 = vmmov %vm6645_vm0 }
 0x1d0   : > { %v3084_v27 = vpop.f32.mrf.mxu0 }
 0x1d1   : > { %v2391_v52 = vpop.f32.mrf.mxu1  ;;  %3324 = vst.msk [vmem:[#allocation2 + $0x10] sm:$0xff] %vm6640_vm12, %v3308_v35  ;;  %v3281_v60 = vmax.f32 %v3249_v5, 0.0  ;;  %v3211_v49 = vadd.f32 %v3084_v27, %v2387_v41  ;;  %vm6655_vm12 = vmmov %vm6645_vm0 }
 0x1d2   : > { %v3086_v32 = vpop.f32.mrf.mxu0  ;;  %v2392_v24 = vadd.f32 %v2391_v52, %v5833_v38 }
 0x1d3   : > { %v2393_v6 = vpop.f32.mrf.mxu1  ;;  %v3309_v10 = vmax.f32 %v3279_v40, %v3281_v60  ;;  %v3250_v0 = vadd.f32 %v5863_v58, %v3211_v49 }
 0x1d4   : > { %v3089_v25 = vpop.f32.mrf.mxu0 }
 0x1d5   : > { %v2396_v18 = vpop.f32.mrf.mxu1  ;;  %3325 = vst.msk [vmem:[#allocation2 + $0x18] sm:$0xff] %vm6641_vm11, %v3309_v10  ;;  %v3212_v57 = vadd.f32 %v3089_v25, %v2392_v24  ;;  %v3282_v14 = vmax.f32 %v3250_v0, 0.0  ;;  %vm6656_vm11 = vmmov %vm6645_vm0 }
 0x1d6   : > { %v3091_v8 = vpop.f32.mrf.mxu0  ;;  %v2397_v2 = vadd.f32 %v2396_v18, %v5837_v7 }
 0x1d7   : > { %v2398_v59 = vpop.f32.mrf.mxu1  ;;  %v3251_v7 = vadd.f32 %v5863_v58, %v3212_v57 }
 0x1d8   : > { %v3094_v13 = vpop.f32.mrf.mxu0 }
 0x1d9   : > { %v2401_v36 = vpop.f32.mrf.mxu1  ;;  %v3213_v9 = vadd.f32 %v3094_v13, %v2397_v2  ;;  %v3283_v12 = vmax.f32 %v3251_v7, 0.0 }
 0x1da   : > { %v3096_v48 = vpop.f32.mrf.mxu0  ;;  %v2402_v31 = vadd.f32 %v2401_v36, %v5841_v29 }
 0x1db   : > { %v2403_v43 = vpop.f32.mrf.mxu1  ;;  %v3252_v11 = vadd.f32 %v5863_v58, %v3213_v9 }
 0x1dc   : > { %v3340_v50 = vld [vmem:[#allocation2 + $0x10] ss:$2 sm:$0xff]  ;;  %v3356_v47 = vld [vmem:[#allocation2 + $0x11] ss:$2 sm:$0xff]  ;;  %v3099_v38 = vpop.f32.mrf.mxu0 }
 0x1dd   : > { %v2406_v23 = vpop.f32.mrf.mxu1  ;;  %v3370_v26 = vmax.f32 %v3340_v50, %v3356_v47  ;;  %v3284_v45 = vmax.f32 %v3252_v11, 0.0  ;;  %v3214_v28 = vadd.f32 %v3099_v38, %v2402_v31 }
 0x1de   : > { %v3101_v22 = vpop.f32.mrf.mxu0  ;;  %v2407_v35 = vadd.f32 %v2406_v23, %v5845_v17 }
 0x1df   : > { %v2408_v34 = vpop.f32.mrf.mxu1  ;;  %3378 = vst.msk [vmem:[%s5884_s19 + $0x8] sm:$0xff] %vm6625_vm1, %v3370_v26  ;;  %v3310_v21 = vmax.f32 %v3282_v14, %v3284_v45  ;;  %v3253_v53 = vadd.f32 %v5863_v58, %v3214_v28  ;;  %vm6657_vm1 = vmmov %vm6645_vm0 }
 0x1e0   : > { %v3104_v3 = vpop.f32.mrf.mxu0 }
 0x1e1   : > { %v2411_v29 = vpop.f32.mrf.mxu1  ;;  %3326 = vst.msk [vmem:[#allocation2 + $0x20] sm:$0xff] %vm6642_vm8, %v3310_v21  ;;  %v3285_v42 = vmax.f32 %v3253_v53, 0.0  ;;  %v3215_v40 = vadd.f32 %v3104_v3, %v2407_v35  ;;  %vm6658_vm8 = vmmov %vm6645_vm0 }
 0x1e2   : > { %v3106_v52 = vpop.f32.mrf.mxu0  ;;  %v2412_v10 = vadd.f32 %v2411_v29, %v5849_v46 }
 0x1e3   : > { %v2413_v5 = vpop.f32.mrf.mxu1  ;;  %v3311_v27 = vmax.f32 %v3283_v12, %v3285_v42  ;;  %v3254_v18 = vadd.f32 %v5863_v58, %v3215_v40 }
 0x1e4   : > { %v3109_v41 = vpop.f32.mrf.mxu0 }
 0x1e5   : > { %v2416_v60 = vpop.f32.mrf.mxu1  ;;  %3327 = vst.msk [vmem:[#allocation2 + $0x28] sm:$0xff] %vm6643_vm13, %v3311_v27  ;;  %v3216_v8 = vadd.f32 %v3109_v41, %v2412_v10  ;;  %v3286_v9 = vmax.f32 %v3254_v18, 0.0  ;;  %vm6659_vm13 = vmmov %vm6645_vm0 }
 0x1e6   : > { %v3111_v32 = vpop.f32.mrf.mxu0  ;;  %v2417_v49 = vadd.f32 %v2416_v60, %v5853_v55 }
 0x1e7   : > { %v2418_v6 = vpop.f32.mrf.mxu1  ;;  %v3255_v55 = vadd.f32 %v5863_v58, %v3216_v8 }
 0x1e8   : > { %v3114_v59 = vpop.f32.mrf.mxu0 }
 0x1e9   : > { %v2421_v25 = vpop.f32.mrf.mxu1  ;;  %v3217_v17 = vadd.f32 %v3114_v59, %v2417_v49  ;;  %v3287_v26 = vmax.f32 %v3255_v55, 0.0 }
 0x1ea   : > { %v3116_v2 = vpop.f32.mrf.mxu0  ;;  %v2422_v0 = vadd.f32 %v2421_v25, %v5857_v62 }
 0x1eb   : > { %v2423_v24 = vpop.f32.mrf.mxu1  ;;  %v3256_v36 = vadd.f32 %v5863_v58, %v3217_v17 }
 0x1ec   : > { %v3342_v13 = vld [vmem:[#allocation2 + $0x20] ss:$2 sm:$0xff]  ;;  %v3358_v57 = vld [vmem:[#allocation2 + $0x21] ss:$2 sm:$0xff]  ;;  %v3119_v46 = vpop.f32.mrf.mxu0 }
 0x1ed   : > { %v2426_v43 = vpop.f32.mrf.mxu1  ;;  %v3371_v48 = vmax.f32 %v3342_v13, %v3358_v57  ;;  %v3288_v31 = vmax.f32 %v3256_v36, 0.0  ;;  %v3218_v11 = vadd.f32 %v3119_v46, %v2422_v0 }
 0x1ee   : > { %v3121_v47 = vpop.f32.mrf.mxu0  ;;  %v2427_v45 = vadd.f32 %v2426_v43, %v5711_v33 }
 0x1ef   : > { %v2428_v50 = vpop.f32.mrf.mxu1  ;;  %3379 = vst.msk [vmem:[%s5884_s19 + $0x10] sm:$0xff] %vm6644_vm9, %v3371_v48  ;;  %v3312_v14 = vmax.f32 %v3286_v9, %v3288_v31  ;;  %v3257_v23 = vadd.f32 %v5863_v58, %v3218_v11 }
 0x1f0   : > { %v3124_v38 = vpop.f32.mrf.mxu0 }
 0x1f1   : > { %v2431_v62 = vpop.f32.mrf.mxu1  ;;  %3328 = vst.msk [vmem:[#allocation2 + $0x30] sm:$0xff] %vm6645_vm0, %v3312_v14  ;;  %v3289_v7 = vmax.f32 %v3257_v23, 0.0  ;;  %v3219_v21 = vadd.f32 %v3124_v38, %v2427_v45 }
 0x1f2   : > { %v3126_v34 = vpop.f32.mrf.mxu0  ;;  %v2432_v42 = vadd.f32 %v2431_v62, %v5725_v15 }
 0x1f3   : > { %v2433_v28 = vpop.f32.mrf.mxu1  ;;  %v3313_v22 = vmax.f32 %v3287_v26, %v3289_v7  ;;  %v3258_v5 = vadd.f32 %v5863_v58, %v3219_v21 }
 0x1f4   : > { %v3129_v29 = vpop.f32.mrf.mxu0 }
 0x1f5   : > { %v2436_v53 = vpop.f32.mrf.mxu1  ;;  %3329 = vst.msk [vmem:[#allocation2 + $0x38] sm:$0xff] %vm6646_vm3, %v3313_v22  ;;  %v3220_v40 = vadd.f32 %v3129_v29, %v2432_v42  ;;  %v3290_v18 = vmax.f32 %v3258_v5, 0.0 }
 0x1f6   : > { %v3131_v12 = vpop.f32.mrf.mxu0  ;;  %v2437_v35 = vadd.f32 %v2436_v53, %v5743_v39 }
 0x1f7   : > { %v2438_v3 = vpop.f32.mrf.mxu1  ;;  %v3259_v39 = vadd.f32 %v5863_v58, %v3220_v40 }
 0x1f8   : > { %v3134_v27 = vpop.f32.mrf.mxu0 }
 0x1f9   : > { %v2441_v52 = vpop.f32.mrf.mxu1  ;;  %v3221_v33 = vadd.f32 %v3134_v27, %v2437_v35  ;;  %v3291_v57 = vmax.f32 %v3259_v39, 0.0 }
 0x1fa   : > { %v3136_v41 = vpop.f32.mrf.mxu0  ;;  %v2442_v6 = vadd.f32 %v2441_v52, %v5771_v19 }
 0x1fb   : > { %v2443_v60 = vpop.f32.mrf.mxu1  ;;  %v3260_v32 = vadd.f32 %v5863_v58, %v3221_v33 }
 0x1fc   : > { %v3344_v10 = vld [vmem:[#allocation2 + $0x30] ss:$2 sm:$0xff]  ;;  %v3360_v49 = vld [vmem:[#allocation2 + $0x31] ss:$2 sm:$0xff]  ;;  %v3139_v15 = vpop.f32.mrf.mxu0 }
 0x1fd   : > { %v2446_v25 = vpop.f32.mrf.mxu1  ;;  %v3372_v59 = vmax.f32 %v3344_v10, %v3360_v49  ;;  %v3292_v8 = vmax.f32 %v3260_v32, 0.0  ;;  %v3222_v17 = vadd.f32 %v3139_v15, %v2442_v6 }
 0x1fe   : > { %v3141_v2 = vpop.f32.mrf.mxu0  ;;  %v2447_v43 = vadd.f32 %v2446_v25, %v5800_v51 }
 0x1ff   : > { %v2448_v24 = vpop.f32.mrf.mxu1  ;;  %3380 = vst.msk [vmem:[%s5884_s19 + $0x18] sm:$0xff] %vm6647_vm15, %v3372_v59  ;;  %v3314_v0 = vmax.f32 %v3290_v18, %v3292_v8  ;;  %v3261_v36 = vadd.f32 %v5863_v58, %v3222_v17 }
 0x200   : > { %v3144_v13 = vpop.f32.mrf.mxu0 }
 0x201   : > { %v2451_v19 = vpop.f32.mrf.mxu1  ;;  %3330 = vst.msk [vmem:[#allocation2 + $0x40] sm:$0xff] %vm6648_vm14, %v3314_v0  ;;  %v3293_v9 = vmax.f32 %v3261_v36, 0.0  ;;  %v3223_v31 = vadd.f32 %v3144_v13, %v2447_v43 }
 0x202   : > { %v3146_v48 = vpop.f32.mrf.mxu0  ;;  %v2452_v23 = vadd.f32 %v2451_v19, %v5815_v16 }
 0x203   : > { %v2453_v46 = vpop.f32.mrf.mxu1  ;;  %v3315_v55 = vmax.f32 %v3291_v57, %v3293_v9  ;;  %v3262_v38 = vadd.f32 %v5863_v58, %v3223_v31 }
 0x204   : > { %v3149_v50 = vpop.f32.mrf.mxu0 }
 0x205   : > { %v2456_v11 = vpop.f32.mrf.mxu1  ;;  %3331 = vst.msk [vmem:[#allocation2 + $0x48] sm:$0xff] %vm6649_vm10, %v3315_v55  ;;  %v3224_v45 = vadd.f32 %v3149_v50, %v2452_v23  ;;  %v3294_v3 = vmax.f32 %v3262_v38, 0.0 }
 0x206   : > { %v3151_v14 = vpop.f32.mrf.mxu0  ;;  %v2457_v62 = vadd.f32 %v2456_v11, %v5819_v20 }
 0x207   : > { %v2458_v47 = vpop.f32.mrf.mxu1  ;;  %v3263_v20 = vadd.f32 %v5863_v58, %v3224_v45 }
 0x208   : > { %v3154_v7 = vpop.f32.mrf.mxu0 }
 0x209   : > { %v2461_v26 = vpop.f32.mrf.mxu1  ;;  %v3225_v51 = vadd.f32 %v3154_v7, %v2457_v62  ;;  %v3295_v41 = vmax.f32 %v3263_v20, 0.0 }
 0x20a   : > { %v3156_v34 = vpop.f32.mrf.mxu0  ;;  %v2462_v22 = vadd.f32 %v2461_v26, %v5823_v61 }
 0x20b   : > { %v2463_v28 = vpop.f32.mrf.mxu1  ;;  %v3264_v21 = vadd.f32 %v5863_v58, %v3225_v51 }
 0x20c   : > { %v3346_v53 = vld [vmem:[#allocation2 + $0x40] ss:$2 sm:$0xff]  ;;  %v3362_v29 = vld [vmem:[#allocation2 + $0x41] ss:$2 sm:$0xff]  ;;  %v3159_v16 = vpop.f32.mrf.mxu0 }
 0x20d   : > { %v2466_v12 = vpop.f32.mrf.mxu1  ;;  %v3373_v42 = vmax.f32 %v3346_v53, %v3362_v29  ;;  %v3296_v35 = vmax.f32 %v3264_v21, 0.0  ;;  %v3226_v5 = vadd.f32 %v3159_v16, %v2462_v22 }
 0x20e   : > { %v3161_v27 = vpop.f32.mrf.mxu0  ;;  %v2467_v32 = vadd.f32 %v2466_v12, %v5827_v44 }
 0x20f   : > { %v2468_v52 = vpop.f32.mrf.mxu1  ;;  %3381 = vst.msk [vmem:[%s5884_s19 + $0x20] sm:$0xff] %vm6650_vm6, %v3373_v42  ;;  %v3316_v40 = vmax.f32 %v3294_v3, %v3296_v35  ;;  %v3265_v33 = vadd.f32 %v5863_v58, %v3226_v5 }
 0x210   : > { %v3164_v60 = vpop.f32.mrf.mxu0 }
 0x211   : > { %v2471_v61 = vpop.f32.mrf.mxu1  ;;  %3332 = vst.msk [vmem:[#allocation2 + $0x50] sm:$0xff] %vm6651_vm7, %v3316_v40  ;;  %v3297_v6 = vmax.f32 %v3265_v33, 0.0  ;;  %v3227_v25 = vadd.f32 %v3164_v60, %v2467_v32 }
 0x212   : > { %v3166_v49 = vpop.f32.mrf.mxu0  ;;  %v2472_v17 = vadd.f32 %v2471_v61, %v5831_v4 }
 0x213   : > { %v2473_v10 = vpop.f32.mrf.mxu1  ;;  %v3317_v18 = vmax.f32 %v3295_v41, %v3297_v6  ;;  %v3266_v2 = vadd.f32 %v5863_v58, %v3227_v25 }
 0x214   : > { %v3169_v59 = vpop.f32.mrf.mxu0 }
 0x215   : > { %v2476_v15 = vpop.f32.mrf.mxu1  ;;  %3333 = vst.msk [vmem:[#allocation2 + $0x58] sm:$0xff] %vm6652_vm5, %v3317_v18  ;;  %v3228_v19 = vadd.f32 %v3169_v59, %v2472_v17  ;;  %v3298_v55 = vmax.f32 %v3266_v2, 0.0 }
 0x216   : > { %v3171_v8 = vpop.f32.mrf.mxu0  ;;  %v2477_v24 = vadd.f32 %v2476_v15, %v5835_v37 }
 0x217   : > { %v2478_v39 = vpop.f32.mrf.mxu1  ;;  %v3267_v37 = vadd.f32 %v5863_v58, %v3228_v19 }
 0x218   : > { %v3174_v36 = vpop.f32.mrf.mxu0 }
 0x219   : > { %v2481_v0 = vpop.f32.mrf.mxu1  ;;  %v3229_v44 = vadd.f32 %v3174_v36, %v2477_v24  ;;  %v3299_v7 = vmax.f32 %v3267_v37, 0.0 }
 0x21a   : > { %v3176_v57 = vpop.f32.mrf.mxu0  ;;  %v2482_v9 = vadd.f32 %v2481_v0, %v5839_v63 }
 0x21b   : > { %v2483_v13 = vpop.f32.mrf.mxu1  ;;  %v3268_v43 = vadd.f32 %v5863_v58, %v3229_v44 }
 0x21c   : > { %v3348_v46 = vld [vmem:[#allocation2 + $0x50] ss:$2 sm:$0xff]  ;;  %v3364_v48 = vld [vmem:[#allocation2 + $0x51] ss:$2 sm:$0xff]  ;;  %v3179_v4 = vpop.f32.mrf.mxu0 }
 0x21d   : > { %v2486_v31 = vpop.f32.mrf.mxu1  ;;  %v3374_v11 = vmax.f32 %v3348_v46, %v3364_v48  ;;  %v3300_v50 = vmax.f32 %v3268_v43, 0.0  ;;  %v3230_v47 = vadd.f32 %v3179_v4, %v2482_v9 }
 0x21e   : > { %v3181_v23 = vpop.f32.mrf.mxu0  ;;  %v2487_v51 = vadd.f32 %v2486_v31, %v5843_v56 }
 0x21f   : > { %v2488_v14 = vpop.f32.mrf.mxu1  ;;  %3382 = vst.msk [vmem:[%s5884_s19 + $0x28] sm:$0xff] %vm6653_vm2, %v3374_v11  ;;  %v3318_v62 = vmax.f32 %v3298_v55, %v3300_v50  ;;  %v3269_v38 = vadd.f32 %v5863_v58, %v3230_v47 }
 0x220   : > { %v3184_v26 = vpop.f32.mrf.mxu0 }
 0x221   : > { %v2491_v63 = vpop.f32.mrf.mxu1  ;;  %3334 = vst.msk [vmem:[#allocation2 + $0x60] sm:$0xff] %vm6654_vm4, %v3318_v62  ;;  %v3301_v45 = vmax.f32 %v3269_v38, 0.0  ;;  %v3231_v21 = vadd.f32 %v3184_v26, %v2487_v51 }
 0x222   : > { %v3186_v34 = vpop.f32.mrf.mxu0  ;;  %v2492_v16 = vadd.f32 %v2491_v63, %v5847_v54 }
 0x223   : > { %v2493_v28 = vpop.f32.mrf.mxu1  ;;  %v3319_v22 = vmax.f32 %v3299_v7, %v3301_v45  ;;  %v3270_v20 = vadd.f32 %v5863_v58, %v3231_v21 }
 0x224   : > { %v3189_v29 = vpop.f32.mrf.mxu0 }
 0x225   : > { %v2496_v53 = vpop.f32.mrf.mxu1  ;;  %3335 = vst.msk [vmem:[#allocation2 + $0x68] sm:$0xff] %vm6655_vm12, %v3319_v22  ;;  %v3232_v56 = vadd.f32 %v3189_v29, %v2492_v16  ;;  %v3302_v6 = vmax.f32 %v3270_v20, 0.0 }
 0x226   : > { %v3191_v12 = vpop.f32.mrf.mxu0  ;;  %v2497_v42 = vadd.f32 %v2496_v53, %v5851_v30 }
 0x227   : > { %v2498_v3 = vpop.f32.mrf.mxu1  ;;  %v3271_v30 = vadd.f32 %v5863_v58, %v3232_v56 }
 0x228   : > { %v3194_v5 = vpop.f32.mrf.mxu0 }
 0x229   : > { %v2501_v35 = vpop.f32.mrf.mxu1  ;;  %v3233_v52 = vadd.f32 %v3194_v5, %v2497_v42  ;;  %v3303_v59 = vmax.f32 %v3271_v30, 0.0 }
 0x22a   : > { %v3196_v40 = vpop.f32.mrf.mxu0  ;;  %v2502_v33 = vadd.f32 %v2501_v35, %v5855_v1 }
 0x22b   : > { %v2503_v27 = vpop.f32.mrf.mxu1  ;;  %v3272_v61 = vadd.f32 %v5863_v58, %v3233_v52 }
 0x22c   : > { %v3350_v60 = vld [vmem:[#allocation2 + $0x60] ss:$2 sm:$0xff]  ;;  %v3366_v41 = vld [vmem:[#allocation2 + $0x61] ss:$2 sm:$0xff]  ;;  %v3199_v32 = vpop.f32.mrf.mxu0 }
 0x22d   : > { %v3375_v54 = vmax.f32 %v3350_v60, %v3366_v41  ;;  %v3304_v10 = vmax.f32 %v3272_v61, 0.0  ;;  %v3234_v49 = vadd.f32 %v3199_v32, %v2502_v33 }
 0x22e   : > { %v3201_v18 = vpop.f32.mrf.mxu0 }
 0x22f   : > { %3383 = vst.msk [vmem:[%s5884_s19 + $0x30] sm:$0xff] %vm6656_vm11, %v3375_v54  ;;  %v3320_v25 = vmax.f32 %v3302_v6, %v3304_v10  ;;  %v3273_v15 = vadd.f32 %v5863_v58, %v3234_v49 }
 0x231   : > { %3336 = vst.msk [vmem:[#allocation2 + $0x70] sm:$0xff] %vm6657_vm1, %v3320_v25  ;;  %v3305_v1 = vmax.f32 %v3273_v15, 0.0 }
 0x233   : > { %v3321_v39 = vmax.f32 %v3303_v59, %v3305_v1 }
 0x235   : > { %3337 = vst.msk [vmem:[#allocation2 + $0x78] sm:$0xff] %vm6658_vm8, %v3321_v39 }
 0x23c   : > { %v3352_v8 = vld [vmem:[#allocation2 + $0x70] ss:$2 sm:$0xff]  ;;  %v3368_v17 = vld [vmem:[#allocation2 + $0x71] ss:$2 sm:$0xff] }
 0x23d   : > { %v3376_v24 = vmax.f32 %v3352_v8, %v3368_v17 }
 0x23f   : > { %3384 = vst.msk [vmem:[%s5884_s19 + $0x38] sm:$0xff] %vm6659_vm13, %v3376_v24 }
 0x240 PF: > { %s13_s14 = sadd.s32 1, %s3740_s14   ;;  %s6660_s12 = smov %s3736_s13 }
 0x241   : > { %p10_p5 = scmp.ge.s32.totalorder %s13_s14, 4   ;;  %s6661_s13 = smov %s6663_s15 }
 0x243   :  { %12 = sbr.rel (!%p10_p5) target bundleno = 2 (0x2), region = 79 }

// kernel: fe_forward.8
= control target key start
LH: loop header
LB: loop body
LE: loop exit
PB: predicated region body
PF: predicated region fallthrough
CT: control target
= control target key end

     0   :  { %s2112_s12 = smov 0   ;;  %s2114_s13 = smov 0   ;;  %s3071_s0 = inlined_call_operand.vmem [shape: f32[2,64,128], index: 0, kind: input, shape index: {}]   ;;  %s3072_s1 = inlined_call_operand.vmem [shape: f32[3,384,128], index: 1, kind: input, shape index: {}]   ;;  %s3073_s2 = inlined_call_operand.vmem [shape: f32[1,128], index: 2, kind: input, shape index: {}]   ;;  %s3074_s3 = inlined_call_operand.vmem [shape: f32[2,16,128], index: 3, kind: output, shape index: {}]  }
   0x1   :  { %s2116_s14 = smov 0  }
   0x2 LB: > { %s25_s15 = sadd.s32 1, %s2085_s13  ;;  %p1516_p0 = scmp.ge.s32.totalorder %s2089_s14, 1  ;;  %s2089_s14 = sphi %s2116_s14, %s13_s14   ;;  %s2085_s13 = sphi %s2114_s13, %s3119_s13   ;;  %s2081_s12 = sphi %s2112_s12, %s3118_s12  }
   0x3   : > { %p27_p1 = scmp.ge.s32.totalorder %s25_s15, 2  ;;  %p158_p2 = scmp.lt.s32.totalorder %s2089_s14, 3 }
   0x5   : > { %s3121_s15 = smov (%p27_p1, %s25_s15), 0  ;;  %p159_p3 = pnand %p1516_p0, %p158_p2 }
   0x6   : > { %p191_p4 = scmp.lt.s32.totalorder (!%p159_p3), %s2081_s12, 1 }
   0x7   : > { %162 = sbr.rel (%p159_p3) target bundleno = 381 (0x17d), region = 32 }
   0xc   : > { %v1552_v0 = vld [vmem:[%s3072_s1 + $0x278] sm:$0xff]  ;;  %v1551_v2 = vld [vmem:[%s3072_s1 + $0x270] sm:$0xff]  ;;  %v1550_v5 = vld [vmem:[%s3072_s1 + $0x268] sm:$0xff]  ;;  %s3123_s12 = smov (!%p191_p4, %s2081_s12), 1  ;;  %v218_v22 = vlaneseq  ;;  %v2091_v38 = vmov 0.0  }
   0xd   : > { %v1536_v1 = vld [vmem:[%s3072_s1 + $0x1f8] sm:$0xff]  ;;  %1670 = vmatprep.subr.mxu0 %v1552_v0  ;;  %v1535_v4 = vld [vmem:[%s3072_s1 + $0x1f0] sm:$0xff]  ;;  %v1534_v7 = vld [vmem:[%s3072_s1 + $0x1e8] sm:$0xff]  ;;  %s1668_s8 = sshll.u32 %s3123_s12, 6  ;;  %v2255_v39 = vrot.slane %v2091_v38, 7  ;;  %v2268_v43 = vrot.slane %v2091_v38, 1 }
   0xe   : > { %v1568_v3 = vld [vmem:[%s3072_s1 + $0x2f8] sm:$0xff]  ;;  %1671 = vmatpush3.msra.mxu0 %v1536_v1  ;;  %v1567_v6 = vld [vmem:[%s3072_s1 + $0x2f0] sm:$0xff]  ;;  %v1566_v8 = vld [vmem:[%s3072_s1 + $0x2e8] sm:$0xff]  ;;  %s2217_s23 = scalar_lea.vmem %s3071_s0, %s1668_s8  ;;  %v2228_v29 = vshrl.u32 %v218_v22, 7  ;;  %s1669_s10 = sshll.u32 %s3123_s12, 4 }
   0xf   : > { %1910 = vmatprep.subr.mxu1 %v1568_v3  ;;  %1672 = vmatprep.subr.mxu0 %v1551_v2  ;;  %v1549_v9 = vld [vmem:[%s3072_s1 + $0x260] sm:$0xff]  ;;  %v1548_v12 = vld [vmem:[%s3072_s1 + $0x258] sm:$0xff]  ;;  %v1547_v15 = vld [vmem:[%s3072_s1 + $0x250] sm:$0xff]  ;;  %s208_s17 = scalar_lea.vmem %s3074_s3, %s1669_s10 }
  0x10   : > { %1911 = vmatpush3.msra.mxu1 %v1568_v3  ;;  %1673 = vmatpush3.msra.mxu0 %v1535_v4  ;;  %v1533_v10 = vld [vmem:[%s3072_s1 + $0x1e0] sm:$0xff]  ;;  %v1532_v13 = vld [vmem:[%s3072_s1 + $0x1d8] sm:$0xff]  ;;  %v1531_v16 = vld [vmem:[%s3072_s1 + $0x1d0] sm:$0xff]  ;;  %vm3075_vm0 = vcmp.lt.s32.totalorder %v2228_v29, 1  ;;  %vm3076_vm1 = vcmp.lt.s32.totalorder %v2228_v29, 7  ;;  %v220_v58 = vadd.s32 8, %v2228_v29 }
  0x11   : > { %1912 = vmatprep.subr.mxu1 %v1567_v6  ;;  %1674 = vmatprep.subr.mxu0 %v1550_v5  ;;  %v1565_v11 = vld [vmem:[%s3072_s1 + $0x2e0] sm:$0xff]  ;;  %v1564_v14 = vld [vmem:[%s3072_s1 + $0x2d8] sm:$0xff]  ;;  %v1563_v17 = vld [vmem:[%s3072_s1 + $0x2d0] sm:$0xff]  ;;  %v231_v61 = vand.u32 7, %v2228_v29 }
  0x12   : > { %1913 = vmatpush3.msra.mxu1 %v1567_v6  ;;  %1675 = vmatpush3.msra.mxu0 %v1534_v7  ;;  %v1546_v18 = vld [vmem:[%s3072_s1 + $0x248] sm:$0xff]  ;;  %v1545_v21 = vld [vmem:[%s3072_s1 + $0x240] sm:$0xff]  ;;  %v1544_v25 = vld [vmem:[%s3072_s1 + $0x238] sm:$0xff]  ;;  %v238_v4 = vand.u32 7, %v220_v58 }
  0x13   : > { %1914 = vmatprep.subr.mxu1 %v1566_v8  ;;  %1676 = vmatprep.subr.mxu0 %v1549_v9  ;;  %v1530_v19 = vld [vmem:[%s3072_s1 + $0x1c8] sm:$0xff]  ;;  %v1529_v23 = vld [vmem:[%s3072_s1 + $0x1c0] sm:$0xff]  ;;  %v1528_v26 = vld [vmem:[%s3072_s1 + $0x1b8] sm:$0xff]  ;;  %vm2352_vm2 = vcmp.ge.s32.totalorder %v231_v61, 1  ;;  %vm2367_vm3 = vcmp.lt.s32.totalorder %v231_v61, 7 }
  0x14   : > { %1915 = vmatpush3.msra.mxu1 %v1566_v8  ;;  %1677 = vmatpush3.msra.mxu0 %v1533_v10  ;;  %v1562_v20 = vld [vmem:[%s3072_s1 + $0x2c8] sm:$0xff]  ;;  %v1561_v24 = vld [vmem:[%s3072_s1 + $0x2c0] sm:$0xff]  ;;  %v1560_v27 = vld [vmem:[%s3072_s1 + $0x2b8] sm:$0xff]  ;;  %vm2382_vm4 = vcmp.lt.s32.totalorder %v238_v4, 7  ;;  %vm2410_vm5 = vcmp.ge.s32.totalorder %v238_v4, 1 }
  0x15   : > { %1916 = vmatprep.subr.mxu1 %v1565_v11  ;;  %1678 = vmatprep.subr.mxu0 %v1548_v12  ;;  %v1543_v28 = vld [vmem:[%s3072_s1 + $0x230] sm:$0xff]  ;;  %v2237_v32 = vld [vmem:[%s2217_s23 + $0x8] sm:$0xff]  ;;  %v2243_v34 = vld [vmem:[%s2217_s23 + $0x38] sm:$0xff] }
  0x16   : > { %1917 = vmatpush3.msra.mxu1 %v1565_v11  ;;  %1679 = vmatpush3.msra.mxu0 %v1532_v13  ;;  %v1527_v30 = vld [vmem:[%s3072_s1 + $0x1b0] sm:$0xff]  ;;  %v1542_v33 = vld [vmem:[%s3072_s1 + $0x228] sm:$0xff]  ;;  %v2252_v37 = vrot.slane %v2237_v32, 7  ;;  %v1541_v40 = vld [vmem:[%s3072_s1 + $0x220] sm:$0xff]  ;;  %v2262_v41 = vrot.slane %v2237_v32, 1  ;;  %v2265_v42 = vrot.slane %v2243_v34, 1 }
  0x17   : > { %1918 = vmatprep.subr.mxu1 %v1564_v14  ;;  %1680 = vmatprep.subr.mxu0 %v1547_v15  ;;  %v1559_v31 = vld [vmem:[%s3072_s1 + $0x2b0] sm:$0xff]  ;;  %v1526_v35 = vld [vmem:[%s3072_s1 + $0x1a8] sm:$0xff]  ;;  %v1525_v44 = vld [vmem:[%s3072_s1 + $0x1a0] sm:$0xff]  ;;  %v2277_v46 = vrot.slane %v2243_v34, 7 }
  0x18   : > { %1919 = vmatpush3.msra.mxu1 %v1564_v14  ;;  %1681 = vmatpush3.msra.mxu0 %v1531_v16  ;;  %v1558_v36 = vld [vmem:[%s3072_s1 + $0x2a8] sm:$0xff]  ;;  %v1557_v45 = vld [vmem:[%s3072_s1 + $0x2a0] sm:$0xff]  ;;  %v2284_v47 = vsel %vm3075_vm0, %v2255_v39, %v2252_v37  ;;  %v1540_v48 = vld [vmem:[%s3072_s1 + $0x218] sm:$0xff]  ;;  %v2293_v49 = vsel %vm3076_vm1, %v2265_v42, %v2268_v43  ;;  %v2299_v50 = vsel %vm3076_vm1, %v2268_v43, %v2262_v41  ;;  %v221_v16 = vadd.s32 16, %v2228_v29 }
  0x19   : > { %1920 = vmatprep.subr.mxu1 %v1563_v17  ;;  %1682 = vmatprep.subr.mxu0 %v1546_v18  ;;  %v1524_v51 = vld [vmem:[%s3072_s1 + $0x198] sm:$0xff]  ;;  %v2308_v53 = vld [vmem:[%s2217_s23] sm:$0xff]  ;;  %v2314_v54 = vsel %vm3075_vm0, %v2277_v46, %v2255_v39  ;;  %v1539_v55 = vld [vmem:[%s3072_s1 + $0x210] sm:$0xff] }
  0x1a   : > { %1921 = vmatpush3.msra.mxu1 %v1563_v17  ;;  %1683 = vmatpush3.msra.mxu0 %v1530_v19  ;;  %v1556_v52 = vld [vmem:[%s3072_s1 + $0x298] sm:$0xff]  ;;  %v1523_v56 = vld [vmem:[%s3072_s1 + $0x190] sm:$0xff]  ;;  %v1538_v59 = vld [vmem:[%s3072_s1 + $0x208] sm:$0xff]  ;;  %v2330_v60 = vrot.slane %v2308_v53, 7  ;;  %v2346_v2 = vrot.slane %v2308_v53, 1 }
  0x1b   : > { %1922 = vmatprep.subr.mxu1 %v1562_v20  ;;  %1684 = vmatprep.subr.mxu0 %v1545_v21  ;;  %v1555_v57 = vld [vmem:[%s3072_s1 + $0x290] sm:$0xff]  ;;  %v1522_v63 = vld [vmem:[%s3072_s1 + $0x188] sm:$0xff]  ;;  %v1537_v1 = vld [vmem:[%s3072_s1 + $0x200] sm:$0xff] }
  0x1c   : > { %1923 = vmatpush3.msra.mxu1 %v1562_v20  ;;  %1685 = vmatpush3.msra.mxu0 %v1529_v23  ;;  %v2334_v62 = vld [vmem:[%s2217_s23 + $0x10] sm:$0xff]  ;;  %v1554_v0 = vld [vmem:[%s3072_s1 + $0x288] sm:$0xff]  ;;  %v1521_v3 = vld [vmem:[%s3072_s1 + $0x180] sm:$0xff]  ;;  %v548_v7 = vsel %vm3075_vm0, %v2277_v46, %v2330_v60  ;;  %v2375_v11 = vsel %vm3076_vm1, %v2346_v2, %v2262_v41  ;;  %v2418_v21 = vsel %vm3075_vm0, %v2330_v60, %v2252_v37  ;;  %v222_v23 = vadd.s32 24, %v2228_v29 }
  0x1d   : > { %1924 = vmatprep.subr.mxu1 %v1561_v24  ;;  %1686 = vmatprep.subr.mxu0 %v1544_v25  ;;  %v447_v5 = vrot.slane %v2334_v62, 1  ;;  %v1553_v8 = vld [vmem:[%s3072_s1 + $0x280] sm:$0xff]  ;;  %v516_v9 = vld [vmem:[%s3072_s1 + $0xf8] sm:$0xff]  ;;  %v515_v15 = vld [vmem:[%s3072_s1 + $0xf0] sm:$0xff] }
  0x1e   : > { %1925 = vmatpush3.msra.mxu1 %v1561_v24  ;;  %1687 = vmatpush3.msra.mxu0 %v1528_v26  ;;  %v500_v12 = vld [vmem:[%s3072_s1 + $0x78] sm:$0xff]  ;;  %v499_v18 = vld [vmem:[%s3072_s1 + $0x70] sm:$0xff]  ;;  %v514_v22 = vld [vmem:[%s3072_s1 + $0xe8] sm:$0xff]  ;;  %v245_v26 = vand.u32 7, %v221_v16 }
  0x1f   : > { %1926 = vmatprep.subr.mxu1 %v1560_v27  ;;  %1688 = vmatprep.subr.mxu0 %v1543_v28  ;;  %v2389_v14 = vsel %vm3076_vm1, %v2262_v41, %v447_v5  ;;  %v532_v17 = vld [vmem:[%s3072_s1 + $0x178] sm:$0xff]  ;;  %v531_v24 = vld [vmem:[%s3072_s1 + $0x170] sm:$0xff]  ;;  %v498_v25 = vld [vmem:[%s3072_s1 + $0x68] sm:$0xff] }
  0x20   : > { %1927 = vmatpush3.msra.mxu1 %v1560_v27  ;;  %1689 = vmatpush3.msra.mxu0 %v1527_v30  ;;  %v2405_v19 = vld [vmem:[%s2217_s23 + $0x18] sm:$0xff]  ;;  %v398_v27 = vrot.slane %v2334_v62, 7  ;;  %v2433_v28 = vld [vmem:[%s2217_s23 + $0x20] sm:$0xff]  ;;  %vm2449_vm6 = vcmp.ge.s32.totalorder %v245_v26, 1  ;;  %vm2465_vm7 = vcmp.lt.s32.totalorder %v245_v26, 7  ;;  %v511_v58 = vld [vmem:[%s3072_s1 + $0xd0] sm:$0xff] }
  0x21   : > { %1928 = vmatprep.subr.mxu1 %v1559_v31  ;;  %1690 = vmatprep.subr.mxu0 %v1542_v33  ;;  %v513_v30 = vld [vmem:[%s3072_s1 + $0xe0] sm:$0xff]  ;;  %v530_v33 = vld [vmem:[%s3072_s1 + $0x168] sm:$0xff]  ;;  %v528_v61 = vld [vmem:[%s3072_s1 + $0x158] sm:$0xff] }
  0x22   : > { %1929 = vmatpush3.msra.mxu1 %v1559_v31  ;;  %1691 = vmatpush3.msra.mxu0 %v1526_v35  ;;  %v448_v31 = vrot.slane %v2405_v19, 1  ;;  %v497_v35 = vld [vmem:[%s3072_s1 + $0x60] sm:$0xff]  ;;  %v510_v4 = vld [vmem:[%s3072_s1 + $0xc8] sm:$0xff] }
  0x23   : > { %1930 = vmatprep.subr.mxu1 %v1558_v36  ;;  %1692 = vmatprep.subr.mxu0 %v1541_v40  ;;  %v449_v40 = vrot.slane %v2433_v28, 1  ;;  %v509_v16 = vld [vmem:[%s3072_s1 + $0xc0] sm:$0xff] }
  0x24   : > { %1931 = vmatpush3.msra.mxu1 %v1558_v36  ;;  %1693 = vmatpush3.msra.mxu0 %v1525_v44  ;;  %v252_v36 = vand.u32 7, %v222_v23  ;;  %v2456_v44 = vsel %vm3075_vm0, %v2252_v37, %v398_v27  ;;  %v496_v37 = vld [vmem:[%s3072_s1 + $0x58] sm:$0xff] }
  0x25   : > { %1932 = vmatprep.subr.mxu1 %v1557_v45  ;;  %1694 = vmatprep.subr.mxu0 %v1540_v48  ;;  %v529_v48 = vld [vmem:[%s3072_s1 + $0x160] sm:$0xff] }
  0x26   : > { %1933 = vmatpush3.msra.mxu1 %v1557_v45  ;;  %1695 = vmatpush3.msra.mxu0 %v1524_v51  ;;  %v512_v45 = vld [vmem:[%s3072_s1 + $0xd8] sm:$0xff]  ;;  %vm2480_vm8 = vcmp.lt.s32.totalorder %v252_v36, 7  ;;  %vm2509_vm9 = vcmp.ge.s32.totalorder %v252_v36, 1 }
  0x27   : > { %1934 = vmatprep.subr.mxu1 %v1556_v52  ;;  %1696 = vmatprep.subr.mxu0 %v1539_v55  ;;  %v399_v55 = vrot.slane %v2405_v19, 7 }
  0x28   : > { %1935 = vmatpush3.msra.mxu1 %v1556_v52  ;;  %1697 = vmatpush3.msra.mxu0 %v1523_v56  ;;  %v2471_v52 = vsel %vm3076_vm1, %v447_v5, %v448_v31  ;;  %v224_v5 = vadd.s32 40, %v2228_v29 }
  0x29   : > { %1936 = vmatprep.subr.mxu1 %v1555_v57  ;;  %1698 = vmatprep.subr.mxu0 %v1538_v59  ;;  %v223_v59 = vadd.s32 32, %v2228_v29 }
  0x2a   : > { %1937 = vmatpush3.msra.mxu1 %v1555_v57  ;;  %1699 = vmatpush3.msra.mxu0 %v1522_v63  ;;  %v2488_v57 = vsel %vm3076_vm1, %v448_v31, %v449_v40  ;;  %v495_v63 = vld [vmem:[%s3072_s1 + $0x50] sm:$0xff]  ;;  %v266_v23 = vand.u32 7, %v224_v5 }
  0x2b   : > { %1938 = vmatprep.subr.mxu1 %v1554_v0  ;;  %1700 = vmatprep.subr.mxu0 %v1537_v1  ;;  %v523_v5 = vld [vmem:[%s3072_s1 + $0x130] sm:$0xff] }
  0x2c   : > { %694 = vmatprep.mubr.f32.mxu0 %v2308_v53  ;;  %1701 = vmatpush3.msra.mxu0 %v1521_v3  ;;  %v2515_v3 = vsel %vm3075_vm0, %v398_v27, %v399_v55  ;;  %v508_v27 = vld [vmem:[%s3072_s1 + $0xb8] sm:$0xff]  ;;  %vm2580_vm12 = vcmp.lt.s32.totalorder %v266_v23, 7  ;;  %vm2605_vm13 = vcmp.ge.s32.totalorder %v266_v23, 1 }
  0x2d   : > { %1939 = vmatpush3.msra.mxu1 %v1554_v0  ;;  %1569 = vmatmul.mubr.msk.f32.vlgmr.msra.gmra.mxu0 %vm2352_vm2, %v548_v7  ;;  %v2504_v0 = vld [vmem:[%s2217_s23 + $0x28] sm:$0xff]  ;;  %v527_v7 = vld [vmem:[%s3072_s1 + $0x150] sm:$0xff] }
  0x2e   : > { %1940 = vmatprep.subr.mxu1 %v1553_v8  ;;  %1750 = vmatprep.subr.mxu0 %v516_v9  ;;  %v259_v9 = vand.u32 7, %v223_v59  ;;  %v401_v36 = vrot.slane %v2504_v0, 7 }
  0x2f   : > { %1941 = vmatpush3.msra.mxu1 %v1553_v8  ;;  %1942 = vmatprep.mubr.msk.f32.mxu1 %vm2367_vm3, %v2375_v11  ;;  %v494_v8 = vld [vmem:[%s3072_s1 + $0x48] sm:$0xff] }
  0x30   : > { %1751 = vmatpush3.msra.mxu0 %v500_v12  ;;  %1943 = vmatmul.mubr.msk.f32.vlgmr.msra.gmra.mxu1 %vm2382_vm4, %v2389_v14  ;;  %v400_v12 = vrot.slane %v2433_v28, 7  ;;  %vm2548_vm10 = vcmp.ge.s32.totalorder %v259_v9, 1  ;;  %vm2563_vm11 = vcmp.lt.s32.totalorder %v259_v9, 7 }
  0x31   : > { %1752 = vmatprep.subr.mxu0 %v515_v15  ;;  %1954 = vmatprep.subr.mxu1 %v532_v17  ;;  %v2530_v15 = vld [vmem:[%s2217_s23 + $0x30] sm:$0xff] }
  0x32   : > { %699 = vmatprep.mubr.f32.mxu0 %v2237_v32  ;;  %1753 = vmatpush3.msra.mxu0 %v499_v18  ;;  %v526_v18 = vld [vmem:[%s3072_s1 + $0x148] sm:$0xff]  ;;  %v2554_v26 = vsel %vm3075_vm0, %v399_v55, %v400_v12  ;;  %v524_v55 = vld [vmem:[%s3072_s1 + $0x138] sm:$0xff]  ;;  %v402_v9 = vrot.slane %v2530_v15, 7 }
  0x33   : > { %1955 = vmatpush3.msra.mxu1 %v532_v17  ;;  %1570 = vmatmul.mubr.msk.f32.gmra.mxu0 %vm2410_vm5, %v2418_v21  ;;  %v450_v17 = vrot.slane %v2504_v0, 1 }
  0x34   : > { %1754 = vmatprep.subr.mxu0 %v514_v22  ;;  %1956 = vmatprep.subr.mxu1 %v531_v24  ;;  %v493_v22 = vld [vmem:[%s3072_s1 + $0x40] sm:$0xff]  ;;  %v2643_v23 = vsel %vm3075_vm0, %v401_v36, %v402_v9 }
  0x35   : > { %1755 = vmatpush3.msra.mxu0 %v498_v25  ;;  %1957 = vmatpush3.msra.mxu1 %v531_v24  ;;  %v2546_v24 = vrot.slane %v2530_v15, 1 }
  0x36   : > { %1756 = vmatprep.subr.mxu0 %v513_v30  ;;  %1958 = vmatprep.subr.mxu1 %v530_v33  ;;  %v525_v30 = vld [vmem:[%s3072_s1 + $0x140] sm:$0xff] }
  0x37   : > { %704 = vmatprep.mubr.f32.mxu0 %v2334_v62  ;;  %1757 = vmatpush3.msra.mxu0 %v497_v35  ;;  %v492_v35 = vld [vmem:[%s3072_s1 + $0x38] sm:$0xff] }
  0x38   : > { %1959 = vmatpush3.msra.mxu1 %v530_v33  ;;  %1571 = vmatmul.mubr.msk.f32.gmra.mxu0 %vm2449_vm6, %v2456_v44  ;;  %v2571_v33 = vsel %vm3076_vm1, %v449_v40, %v450_v17  ;;  %v2587_v40 = vsel %vm3076_vm1, %v450_v17, %v2546_v24  ;;  %v489_v17 = vld [vmem:[%s3072_s1 + $0x20] sm:$0xff] }
  0x39   : > { %1758 = vmatprep.subr.mxu0 %v512_v45  ;;  %1960 = vmatprep.subr.mxu1 %v529_v48 }
  0x3a   : > { %1945 = vmatprep.mubr.msk.f32.mxu1 %vm2465_vm7, %v2471_v52  ;;  %1759 = vmatpush3.msra.mxu0 %v496_v37  ;;  %v225_v37 = vadd.s32 48, %v2228_v29 }
  0x3b   : > { %1961 = vmatpush3.msra.mxu1 %v529_v48  ;;  %1760 = vmatprep.subr.mxu0 %v511_v58  ;;  %v507_v48 = vld [vmem:[%s3072_s1 + $0xb0] sm:$0xff] }
  0x3c   : > { %1946 = vmatmul.mubr.msk.f32.gmra.mxu1 %vm2480_vm8, %v2488_v57  ;;  %1962 = vmatprep.subr.mxu1 %v528_v61  ;;  %v491_v58 = vld [vmem:[%s3072_s1 + $0x30] sm:$0xff] }
  0x3d   : > { %709 = vmatprep.mubr.f32.mxu0 %v2405_v19  ;;  %1761 = vmatpush3.msra.mxu0 %v495_v63  ;;  %v506_v63 = vld [vmem:[%s3072_s1 + $0xa8] sm:$0xff] }
  0x3e   : > { %1963 = vmatpush3.msra.mxu1 %v528_v61  ;;  %1572 = vmatmul.mubr.msk.f32.gmra.mxu0 %vm2509_vm9, %v2515_v3  ;;  %v2611_v61 = vsel %vm3075_vm0, %v400_v12, %v401_v36  ;;  %v505_v12 = vld [vmem:[%s3072_s1 + $0xa0] sm:$0xff]  ;;  %v2660_v36 = vsel %vm3076_vm1, %v2546_v24, %v2265_v42 }
  0x3f   : > { %1762 = vmatprep.subr.mxu0 %v510_v4  ;;  %1964 = vmatprep.subr.mxu1 %v527_v7  ;;  %v226_v4 = vadd.s32 56, %v2228_v29 }
  0x40   : > { %1763 = vmatpush3.msra.mxu0 %v494_v8  ;;  %1965 = vmatpush3.msra.mxu1 %v527_v7  ;;  %v490_v7 = vld [vmem:[%s3072_s1 + $0x28] sm:$0xff]  ;;  %v273_v8 = vand.u32 7, %v225_v37 }
  0x41   : > { %1764 = vmatprep.subr.mxu0 %v509_v16  ;;  %1966 = vmatprep.subr.mxu1 %v526_v18  ;;  %v522_v16 = vld [vmem:[%s3072_s1 + $0x128] sm:$0xff] }
  0x42   : > { %714 = vmatprep.mubr.f32.mxu0 %v2433_v28  ;;  %1765 = vmatpush3.msra.mxu0 %v493_v22  ;;  %vm2637_vm14 = vcmp.ge.s32.totalorder %v273_v8, 1  ;;  %v3104_v22 = vmov 0  ;;  %vm2652_vm15 = vcmp.lt.s32.totalorder %v273_v8, 7  ;;  %v519_v8 = vld [vmem:[%s3072_s1 + $0x110] sm:$0xff] }
  0x43   : > { %1967 = vmatpush3.msra.mxu1 %v526_v18  ;;  %1573 = vmatmul.mubr.msk.f32.gmra.mxu0 %vm2548_vm10, %v2554_v26  ;;  %v280_v18 = vand.u32 7, %v226_v4  ;;  %v3105_v22 = vsel %vm2637_vm14, 4294967295, %v3104_v22  ;;  %v487_v4 = vld [vmem:[%s3072_s1 + $0x10] sm:$0xff] }
  0x44   : > { %1766 = vmatprep.subr.mxu0 %v508_v27  ;;  %1968 = vmatprep.subr.mxu1 %v525_v30  ;;  %v504_v27 = vld [vmem:[%s3072_s1 + $0x98] sm:$0xff] }
  0x45   : > { %1948 = vmatprep.mubr.msk.f32.mxu1 %vm2563_vm11, %v2571_v33  ;;  %1767 = vmatpush3.msra.mxu0 %v492_v35  ;;  %v3106_v35 = vmov 0  ;;  %vm2668_vm0 = vcmp.lt.s32.totalorder %v280_v18, 7 }
  0x46   : > { %1969 = vmatpush3.msra.mxu1 %v525_v30  ;;  %1768 = vmatprep.subr.mxu0 %v507_v48  ;;  %v521_v30 = vld [vmem:[%s3072_s1 + $0x120] sm:$0xff]  ;;  %v3107_v35 = vsel %vm2652_vm15, 4294967295, %v3106_v35  ;;  %v488_v48 = vld [vmem:[%s3072_s1 + $0x18] sm:$0xff] }
  0x47   : > { %1949 = vmatmul.mubr.msk.f32.gmra.mxu1 %vm2580_vm12, %v2587_v40  ;;  %1970 = vmatprep.subr.mxu1 %v524_v55 }
  0x48   : > { %719 = vmatprep.mubr.f32.mxu0 %v2504_v0  ;;  %1769 = vmatpush3.msra.mxu0 %v491_v58  ;;  %v503_v58 = vld [vmem:[%s3072_s1 + $0x90] sm:$0xff] }
  0x49   : > { %1971 = vmatpush3.msra.mxu1 %v524_v55  ;;  %1574 = vmatmul.mubr.msk.f32.gmra.mxu0 %vm2605_vm13, %v2611_v61  ;;  %v572_v55 = vsel %vm3076_vm1, %v2265_v42, %v2346_v2  ;;  %vm2690_vm1 = vcmp.ge.s32.totalorder %v280_v18, 1 }
  0x4a   : > { %1770 = vmatprep.subr.mxu0 %v506_v63  ;;  %1972 = vmatprep.subr.mxu1 %v523_v5  ;;  %v520_v63 = vld [vmem:[%s3072_s1 + $0x118] sm:$0xff] }
  0x4b   : > { %1771 = vmatpush3.msra.mxu0 %v490_v7  ;;  %1973 = vmatpush3.msra.mxu1 %v523_v5  ;;  %v502_v7 = vld [vmem:[%s3072_s1 + $0x88] sm:$0xff] }
  0x4c   : > { %1772 = vmatprep.subr.mxu0 %v505_v12  ;;  %1974 = vmatprep.subr.mxu1 %v522_v16  ;;  %v486_v12 = vld [vmem:[%s3072_s1 + $0x8] sm:$0xff] }
  0x4d   : > { %724 = vmatprep.mubr.f32.mxu0 %v2530_v15  ;;  %1773 = vmatpush3.msra.mxu0 %v489_v17  ;;  %v485_v17 = vld [vmem:[%s3072_s1] sm:$0xff] }
  0x4e   : > { %1975 = vmatpush3.msra.mxu1 %v522_v16  ;;  %1575 = vmatmul.mubr.msk.f32.gmra.mxu0 %vm2637_vm14, %v2643_v23  ;;  %v518_v16 = vld [vmem:[%s3072_s1 + $0x108] sm:$0xff] }
  0x4f   : > { %1774 = vmatprep.subr.mxu0 %v504_v27  ;;  %1976 = vmatprep.subr.mxu1 %v521_v30  ;;  %v517_v27 = vld [vmem:[%s3072_s1 + $0x100] sm:$0xff] }
  0x50   : > { %1951 = vmatprep.mubr.msk.f32.mxu1 %vm2652_vm15, %v2660_v36  ;;  %1775 = vmatpush3.msra.mxu0 %v488_v48  ;;  %vm3112_vm15 = vcmp.lt.s32.totalorder %v2228_v29, 1  ;;  %v1616_v48 = vld [vmem:[%s3072_s1 + $0x378] sm:$0xff] }
  0x51   : > { %1977 = vmatpush3.msra.mxu1 %v521_v30  ;;  %1776 = vmatprep.subr.mxu0 %v503_v58  ;;  %v2697_v5 = vsel %vm3112_vm15, %v402_v9, %v2277_v46  ;;  %v501_v46 = vld [vmem:[%s3072_s1 + $0x80] sm:$0xff]  ;;  %v411_v18 = vsel %vm3112_vm15, %v402_v9, %v2255_v39  ;;  %v1632_v30 = vld [vmem:[%s3072_s1 + $0x3f8] sm:$0xff]  ;;  %vm3113_vm15 = vcmp.lt.s32.totalorder %v2228_v29, 7 }
  0x52   : > { %1952 = vmatmul.mubr.msk.f32.gmra.mxu1 %vm2668_vm0, %v572_v55  ;;  %1978 = vmatprep.subr.mxu1 %v520_v63  ;;  %v459_v9 = vsel %vm3113_vm15, %v2268_v43, %v2346_v2  ;;  %v1631_v55 = vld [vmem:[%s3072_s1 + $0x3f0] sm:$0xff]  ;;  %v1648_v58 = vld [vmem:[%s3072_s1 + $0x478] sm:$0xff]  ;;  %vm3114_vm15 = vcmp.lt.s32.totalorder %v2228_v29, 1 }
  0x53   : > { %729 = vmatprep.mubr.f32.mxu0 %v2243_v34  ;;  %1777 = vmatpush3.msra.mxu0 %v487_v4  ;;  %v1615_v2 = vld [vmem:[%s3072_s1 + $0x370] sm:$0xff]  ;;  %v1630_v4 = vld [vmem:[%s3072_s1 + $0x3e8] sm:$0xff] }
  0x54   : > { %1979 = vmatpush3.msra.mxu1 %v520_v63  ;;  %1576 = vmatmul.mubr.msk.f32.gmra.mxu0 %vm2690_vm1, %v2697_v5  ;;  %v410_v63 = vsel %vm3114_vm15, %v2255_v39, %v2330_v60  ;;  %v1629_v39 = vld [vmem:[%s3072_s1 + $0x3e0] sm:$0xff]  ;;  %vm3115_vm15 = vcmp.lt.s32.totalorder %v2228_v29, 7 }
  0x55   : > { %1778 = vmatprep.subr.mxu0 %v502_v7  ;;  %1980 = vmatprep.subr.mxu1 %v519_v8  ;;  %v1647_v7 = vld [vmem:[%s3072_s1 + $0x470] sm:$0xff]  ;;  %v1613_v60 = vld [vmem:[%s3072_s1 + $0x360] sm:$0xff] }
  0x56   : > { %1779 = vmatpush3.msra.mxu0 %v486_v12  ;;  %1981 = vmatpush3.msra.mxu1 %v519_v8  ;;  %v1614_v8 = vld [vmem:[%s3072_s1 + $0x368] sm:$0xff]  ;;  %v1645_v12 = vld [vmem:[%s3072_s1 + $0x460] sm:$0xff] }
  0x57   : > { %1780 = vmatprep.subr.mxu0 %v501_v46  ;;  %1982 = vmatprep.subr.mxu1 %v518_v16  ;;  %v1612_v46 = vld [vmem:[%s3072_s1 + $0x358] sm:$0xff]  ;;  %v1617_v29 = vld [vmem:[%s3072_s1 + $0x380] sm:$0xff] }
  0x58   : > { %1781 = vmatpush3.msra.mxu0 %v485_v17  ;;  %904 = vmatprep.mubr.f32.mxu0 %v2091_v38  ;;  %v1644_v17 = vld [vmem:[%s3072_s1 + $0x458] sm:$0xff] }
  0x59   : > { %1983 = vmatpush3.msra.mxu1 %v518_v16  ;;  %1585 = vmatmul.mubr.msk.f32.vlgmr.msra.gmra.mxu0 %vm2352_vm2, %v411_v18  ;;  %v1627_v16 = vld [vmem:[%s3072_s1 + $0x3d0] sm:$0xff] }
  0x5a   : > { %1984 = vmatprep.subr.mxu1 %v517_v27  ;;  %1830 = vmatprep.subr.mxu0 %v1632_v30  ;;  %v1611_v18 = vld [vmem:[%s3072_s1 + $0x350] sm:$0xff]  ;;  %v1610_v30 = vld [vmem:[%s3072_s1 + $0x348] sm:$0xff] }
  0x5b   : > { %1985 = vmatpush3.msra.mxu1 %v517_v27  ;;  %1831 = vmatpush3.msra.mxu0 %v1616_v48  ;;  %v1643_v27 = vld [vmem:[%s3072_s1 + $0x450] sm:$0xff]  ;;  %v1625_v48 = vld [vmem:[%s3072_s1 + $0x3c0] sm:$0xff] }
  0x5c   : > { %1986 = vmatprep.mubr.msk.f32.mxu1 %vm2367_vm3, %v459_v9  ;;  %1832 = vmatprep.subr.mxu0 %v1631_v55  ;;  %v1642_v9 = vld [vmem:[%s3072_s1 + $0x448] sm:$0xff]  ;;  %v1609_v55 = vld [vmem:[%s3072_s1 + $0x340] sm:$0xff] }
  0x5d   : > { %1998 = vmatprep.subr.mxu1 %v1648_v58  ;;  %909 = vmatprep.mubr.f32.mxu0 %v2308_v53  ;;  %v1646_v53 = vld [vmem:[%s3072_s1 + $0x468] sm:$0xff] }
  0x5e   : > { %1987 = vmatmul.mubr.msk.f32.vlgmr.msra.gmra.mxu1 %vm2382_vm4, %v2375_v11  ;;  %1833 = vmatpush3.msra.mxu0 %v1615_v2  ;;  %v1628_v11 = vld [vmem:[%s3072_s1 + $0x3d8] sm:$0xff]  ;;  %v1641_v2 = vld [vmem:[%s3072_s1 + $0x440] sm:$0xff] }
  0x5f   : > { %1999 = vmatpush3.msra.mxu1 %v1648_v58  ;;  %1586 = vmatmul.mubr.msk.f32.gmra.mxu0 %vm2410_vm5, %v410_v63  ;;  %v1624_v58 = vld [vmem:[%s3072_s1 + $0x3b8] sm:$0xff] }
  0x60   : > { %1834 = vmatprep.subr.mxu0 %v1630_v4  ;;  %2000 = vmatprep.subr.mxu1 %v1647_v7  ;;  %v1608_v63 = vld [vmem:[%s3072_s1 + $0x338] sm:$0xff]  ;;  %v1623_v4 = vld [vmem:[%s3072_s1 + $0x3b0] sm:$0xff] }
  0x61   : > { %1835 = vmatpush3.msra.mxu0 %v1614_v8  ;;  %2001 = vmatpush3.msra.mxu1 %v1647_v7  ;;  %v1640_v7 = vld [vmem:[%s3072_s1 + $0x438] sm:$0xff]  ;;  %v1607_v8 = vld [vmem:[%s3072_s1 + $0x330] sm:$0xff] }
  0x62   : > { %1836 = vmatprep.subr.mxu0 %v1629_v39  ;;  %2002 = vmatprep.subr.mxu1 %v1646_v53  ;;  %v1622_v39 = vld [vmem:[%s3072_s1 + $0x3a8] sm:$0xff] }
  0x63   : > { %914 = vmatprep.mubr.f32.mxu0 %v2237_v32  ;;  %1837 = vmatpush3.msra.mxu0 %v1613_v60  ;;  %v1606_v60 = vld [vmem:[%s3072_s1 + $0x328] sm:$0xff] }
  0x64   : > { %2003 = vmatpush3.msra.mxu1 %v1646_v53  ;;  %1587 = vmatmul.mubr.msk.f32.gmra.mxu0 %vm2449_vm6, %v2418_v21  ;;  %v1626_v21 = vld [vmem:[%s3072_s1 + $0x3c8] sm:$0xff]  ;;  %v1639_v53 = vld [vmem:[%s3072_s1 + $0x430] sm:$0xff] }
  0x65   : > { %1838 = vmatprep.subr.mxu0 %v1628_v11  ;;  %2004 = vmatprep.subr.mxu1 %v1645_v12  ;;  %v1621_v11 = vld [vmem:[%s3072_s1 + $0x3a0] sm:$0xff] }
  0x66   : > { %1839 = vmatpush3.msra.mxu0 %v1612_v46  ;;  %2005 = vmatpush3.msra.mxu1 %v1645_v12  ;;  %v1638_v12 = vld [vmem:[%s3072_s1 + $0x428] sm:$0xff]  ;;  %v1605_v46 = vld [vmem:[%s3072_s1 + $0x320] sm:$0xff] }
  0x67   : > { %1840 = vmatprep.subr.mxu0 %v1627_v16  ;;  %2006 = vmatprep.subr.mxu1 %v1644_v17  ;;  %v1620_v16 = vld [vmem:[%s3072_s1 + $0x398] sm:$0xff] }
  0x68   : > { %919 = vmatprep.mubr.f32.mxu0 %v2334_v62  ;;  %1989 = vmatprep.mubr.msk.f32.mxu1 %vm2465_vm7, %v2389_v14 }
  0x69   : > { %1841 = vmatpush3.msra.mxu0 %v1611_v18  ;;  %2007 = vmatpush3.msra.mxu1 %v1644_v17  ;;  %v1637_v17 = vld [vmem:[%s3072_s1 + $0x420] sm:$0xff]  ;;  %v1604_v18 = vld [vmem:[%s3072_s1 + $0x318] sm:$0xff] }
  0x6a   : > { %1588 = vmatmul.mubr.msk.f32.gmra.mxu0 %vm2509_vm9, %v2456_v44  ;;  %1990 = vmatmul.mubr.msk.f32.gmra.mxu1 %vm2480_vm8, %v2471_v52 }
  0x6b   : > { %1842 = vmatprep.subr.mxu0 %v1626_v21  ;;  %2008 = vmatprep.subr.mxu1 %v1643_v27  ;;  %v1619_v21 = vld [vmem:[%s3072_s1 + $0x390] sm:$0xff] }
  0x6c   : > { %1843 = vmatpush3.msra.mxu0 %v1610_v30  ;;  %2009 = vmatpush3.msra.mxu1 %v1643_v27  ;;  %v1636_v27 = vld [vmem:[%s3072_s1 + $0x418] sm:$0xff]  ;;  %v1603_v30 = vld [vmem:[%s3072_s1 + $0x310] sm:$0xff] }
  0x6d   : > { %1844 = vmatprep.subr.mxu0 %v1625_v48  ;;  %2010 = vmatprep.subr.mxu1 %v1642_v9  ;;  %v460_v48 = vsel %vm3115_vm15, %v2546_v24, %v2268_v43  ;;  %v1634_v43 = vld [vmem:[%s3072_s1 + $0x408] sm:$0xff]  ;;  %v1601_v24 = vld [vmem:[%s3072_s1 + $0x300] sm:$0xff] }
  0x6e   : > { %924 = vmatprep.mubr.f32.mxu0 %v2405_v19  ;;  %1845 = vmatpush3.msra.mxu0 %v1609_v55  ;;  %v1635_v55 = vld [vmem:[%s3072_s1 + $0x410] sm:$0xff] }
  0x6f   : > { %2011 = vmatpush3.msra.mxu1 %v1642_v9  ;;  %1589 = vmatmul.mubr.msk.f32.gmra.mxu0 %vm2548_vm10, %v2515_v3  ;;  %v1618_v9 = vld [vmem:[%s3072_s1 + $0x388] sm:$0xff] }
  0x70   : > { %1846 = vmatprep.subr.mxu0 %v1624_v58  ;;  %2012 = vmatprep.subr.mxu1 %v1641_v2  ;;  %v1602_v58 = vld [vmem:[%s3072_s1 + $0x308] sm:$0xff] }
  0x71   : > { %1847 = vmatpush3.msra.mxu0 %v1608_v63  ;;  %2013 = vmatpush3.msra.mxu1 %v1641_v2  ;;  %v1633_v2 = vld [vmem:[%s3072_s1 + $0x400] sm:$0xff] }
  0x72   : > { %1848 = vmatprep.subr.mxu0 %v1623_v4  ;;  %2014 = vmatprep.subr.mxu1 %v1640_v7 }
  0x73   : > { %929 = vmatprep.mubr.f32.mxu0 %v2433_v28  ;;  %1992 = vmatprep.mubr.msk.f32.mxu1 %vm2563_vm11, %v2488_v57 }
  0x74   : > { %1849 = vmatpush3.msra.mxu0 %v1607_v8  ;;  %2015 = vmatpush3.msra.mxu1 %v1640_v7 }
  0x75   : > { %1590 = vmatmul.mubr.msk.f32.gmra.mxu0 %vm2605_vm13, %v2554_v26  ;;  %1993 = vmatmul.mubr.msk.f32.gmra.mxu1 %vm2580_vm12, %v2571_v33 }
  0x76   : > { %1850 = vmatprep.subr.mxu0 %v1622_v39  ;;  %2016 = vmatprep.subr.mxu1 %v1639_v53 }
  0x77   : > { %1851 = vmatpush3.msra.mxu0 %v1606_v60  ;;  %2017 = vmatpush3.msra.mxu1 %v1639_v53 }
  0x78   : > { %1852 = vmatprep.subr.mxu0 %v1621_v11  ;;  %2018 = vmatprep.subr.mxu1 %v1638_v12 }
  0x79   : > { %934 = vmatprep.mubr.f32.mxu0 %v2504_v0  ;;  %1853 = vmatpush3.msra.mxu0 %v1605_v46 }
  0x7a   : > { %2019 = vmatpush3.msra.mxu1 %v1638_v12  ;;  %1591 = vmatmul.mubr.msk.f32.gmra.mxu0 %vm2637_vm14, %v2611_v61  ;;  %vm3116_vm14 = vnez %v3107_v35 }
  0x7b   : > { %1854 = vmatprep.subr.mxu0 %v1620_v16  ;;  %2020 = vmatprep.subr.mxu1 %v1637_v17 }
  0x7c   : > { %1855 = vmatpush3.msra.mxu0 %v1604_v18  ;;  %2021 = vmatpush3.msra.mxu1 %v1637_v17 }
  0x7d   : > { %1856 = vmatprep.subr.mxu0 %v1619_v21  ;;  %2022 = vmatprep.subr.mxu1 %v1636_v27 }
  0x7e   : > { %939 = vmatprep.mubr.f32.mxu0 %v2530_v15  ;;  %1995 = vmatprep.mubr.msk.f32.mxu1 %vm3116_vm14, %v2587_v40 }
  0x7f   : > { %1857 = vmatpush3.msra.mxu0 %v1603_v30  ;;  %2023 = vmatpush3.msra.mxu1 %v1636_v27 }
  0x80   : > { %1592 = vmatmul.mubr.msk.f32.gmra.mxu0 %vm2690_vm1, %v2643_v23  ;;  %1996 = vmatmul.mubr.msk.f32.gmra.mxu1 %vm2668_vm0, %v460_v48 }
  0x81   : > { %1858 = vmatprep.subr.mxu0 %v1618_v9  ;;  %2024 = vmatprep.subr.mxu1 %v1635_v55 }
  0x82   : > { %1859 = vmatpush3.msra.mxu0 %v1602_v58  ;;  %2025 = vmatpush3.msra.mxu1 %v1635_v55 }
  0x83   : > { %1860 = vmatprep.subr.mxu0 %v1617_v29  ;;  %2026 = vmatprep.subr.mxu1 %v1634_v43 }
  0x84   : > { %1861 = vmatpush3.msra.mxu0 %v1601_v24  ;;  %1211 = vmatprep.mubr.f32.mxu0 %v2237_v32 }
  0x85   : > { %2027 = vmatpush3.msra.mxu1 %v1634_v43  ;;  %1649 = vmatmul.mubr.msk.f32.vlgmr.msra.gmra.mxu0 %vm2352_vm2, %v2284_v47  ;;  %vm3117_vm2 = vnez %v3105_v22 }
  0x86   : > { %2028 = vmatprep.subr.mxu1 %v1633_v2  ;;  %2030 = vmatprep.mubr.msk.f32.mxu1 %vm2367_vm3, %v2389_v14 }
  0x87   : > { %2029 = vmatpush3.msra.mxu1 %v1633_v2  ;;  %1216 = vmatprep.mubr.f32.mxu0 %v2334_v62 }
  0x88   : > { %2031 = vmatmul.mubr.msk.f32.vlgmr.msra.gmra.mxu1 %vm2382_vm4, %v2471_v52 }
  0x89   : > { %2033 = vmatprep.mubr.msk.f32.mxu1 %vm2465_vm7, %v2488_v57  ;;  %1650 = vmatmul.mubr.msk.f32.gmra.mxu0 %vm2410_vm5, %v2456_v44 }
  0x8a   : > { %1221 = vmatprep.mubr.f32.mxu0 %v2405_v19 }
  0x8c   : > { %2034 = vmatmul.mubr.msk.f32.gmra.mxu1 %vm2480_vm8, %v2571_v33 }
  0x8d   : > { %2036 = vmatprep.mubr.msk.f32.mxu1 %vm2563_vm11, %v2587_v40  ;;  %1651 = vmatmul.mubr.msk.f32.gmra.mxu0 %vm2449_vm6, %v2515_v3 }
  0x8e   : > { %1226 = vmatprep.mubr.f32.mxu0 %v2433_v28 }
  0x90   : > { %2037 = vmatmul.mubr.msk.f32.gmra.mxu1 %vm2580_vm12, %v2660_v36 }
  0x91   : > { %2039 = vmatprep.mubr.msk.f32.mxu1 %vm3116_vm14, %v2293_v49  ;;  %1652 = vmatmul.mubr.msk.f32.gmra.mxu0 %vm2509_vm9, %v2554_v26 }
  0x92   : > { %1231 = vmatprep.mubr.f32.mxu0 %v2504_v0 }
  0x94   : > { %2040 = vmatmul.mubr.msk.f32.gmra.mxu1 %vm2668_vm0, %v2299_v50 }
  0x95   : > { %1653 = vmatmul.mubr.msk.f32.gmra.mxu0 %vm2548_vm10, %v2611_v61 }
  0x96   : > { %1236 = vmatprep.mubr.f32.mxu0 %v2530_v15 }
  0x99   : > { %1654 = vmatmul.mubr.msk.f32.gmra.mxu0 %vm2605_vm13, %v2643_v23 }
  0x9a   : > { %1241 = vmatprep.mubr.f32.mxu0 %v2243_v34 }
  0x9d   : > { %1655 = vmatmul.mubr.msk.f32.gmra.mxu0 %vm3117_vm2, %v2697_v5 }
  0x9e   : > { %1246 = vmatprep.mubr.f32.mxu0 %v2091_v38 }
  0xa1   : > { %1656 = vmatmul.mubr.msk.f32.gmra.mxu0 %vm2690_vm1, %v2314_v54 }
  0xed   : > { %v1702_v32 = vpop.f32.mrf.mxu0 }
  0xef   : > { %v1703_v47 = vpop.f32.mrf.mxu0 }
  0xf0   : > { %v1704_v49 = vadd.f32 %v1703_v47, %v1702_v32  ;;  %v1944_v57 = vpop.f32.mrf.mxu1 }
  0xf2   : > { %v801_v1 = vpop.f32.mrf.mxu1 }
  0xf3   : > { %v1705_v50 = vpop.f32.mrf.mxu0  ;;  %v802_v18 = vadd.f32 %v1704_v49, %v801_v1 }
  0xf5   : > { %v1706_v62 = vpop.f32.mrf.mxu0 }
  0xf6   : > { %v1707_v21 = vadd.f32 %v1706_v62, %v1705_v50 }
  0xf8   : > { %v1708_v6 = vpop.f32.mrf.mxu0  ;;  %v807_v29 = vadd.f32 %v1944_v57, %v1707_v21 }
  0xfa   : > { %v1709_v10 = vpop.f32.mrf.mxu0 }
  0xfb   : > { %v1710_v13 = vadd.f32 %v1709_v10, %v1708_v6 }
  0xfc   : > { %v1947_v15 = vpop.f32.mrf.mxu1 }
  0xfe   : > { %v2991_v14 = vpop.f32.mrf.mxu0  ;;  %v811_v26 = vpop.f32.mrf.mxu1 }
 0x100   : > { %v1712_v34 = vpop.f32.mrf.mxu0 }
 0x101   : > { %v1713_v49 = vadd.f32 %v1712_v34, %v2991_v14 }
 0x103   : > { %v1714_v19 = vpop.f32.mrf.mxu0 }
 0x105   : > { %v1715_v20 = vpop.f32.mrf.mxu0 }
 0x106   : > { %v2993_v28 = vadd.f32 %v1715_v20, %v1714_v19  ;;  %v812_v19 = vadd.f32 %v1710_v13, %v811_v26 }
 0x107   : > { %v3005_v33 = vpop.f32.mrf.mxu1 }
 0x109   : > { %v2995_v38 = vpop.f32.mrf.mxu0  ;;  %v821_v59 = vpop.f32.mrf.mxu1 }
 0x10b   : > { %v2997_v41 = vpop.f32.mrf.mxu0 }
 0x10e   : > { %v1720_v54 = vpop.f32.mrf.mxu0 }
 0x110   : > { %v1721_v44 = vpop.f32.mrf.mxu0 }
 0x111   : > { %v2999_v51 = vadd.f32 %v1721_v44, %v1720_v54 }
 0x112   : > { %v3007_v61 = vpop.f32.mrf.mxu1 }
 0x114   : > { %v3001_v52 = vpop.f32.mrf.mxu0  ;;  %v3009_v35 = vpop.f32.mrf.mxu1 }
 0x116   : > { %v3003_v56 = vpop.f32.mrf.mxu0 }
 0x119   : > { %v1782_v0 = vpop.f32.mrf.mxu0 }
 0x11b   : > { %v1783_v3 = vpop.f32.mrf.mxu0 }
 0x11c   : > { %v1784_v17 = vadd.f32 %v1783_v3, %v1782_v0  ;;  %v3031_v0 = vld [vmem:[%s3073_s2] ss:$0 sm:$0xff] }
 0x11e   : > { %v1988_v36 = vpop.f32.mrf.mxu1  ;;  %v907_v9 = vadd.f32 %v1784_v17, %v802_v18 }
 0x11f   : > { %v1785_v25 = vpop.f32.mrf.mxu0 }
 0x120   : > { %v1011_v5 = vpop.f32.mrf.mxu1 }
 0x121   : > { %v1786_v31 = vpop.f32.mrf.mxu0  ;;  %v1012_v6 = vadd.f32 %v1011_v5, %v907_v9 }
 0x122   : > { %v1787_v48 = vadd.f32 %v1786_v31, %v1785_v25 }
 0x124   : > { %v1788_v45 = vpop.f32.mrf.mxu0  ;;  %v912_v47 = vadd.f32 %v1787_v48, %v807_v29  ;;  %v822_v48 = vadd.f32 %v2993_v28, %v821_v59 }
 0x126   : > { %v1789_v40 = vpop.f32.mrf.mxu0  ;;  %v1017_v1 = vadd.f32 %v1988_v36, %v912_v47 }
 0x127   : > { %v1790_v24 = vadd.f32 %v1789_v40, %v1788_v45  ;;  %v817_v40 = vadd.f32 %v1947_v15, %v1713_v49 }
 0x129   : > { %v917_v44 = vadd.f32 %v1790_v24, %v812_v19  ;;  %v1725_v19 = vadd.f32 %v3003_v56, %v3001_v52 }
 0x12a   : > { %v1791_v22 = vpop.f32.mrf.mxu0  ;;  %v1991_v4 = vpop.f32.mrf.mxu1 }
 0x12c   : > { %v1792_v23 = vpop.f32.mrf.mxu0  ;;  %v1021_v8 = vpop.f32.mrf.mxu1 }
 0x12d   : > { %v1793_v3 = vadd.f32 %v1792_v23, %v1791_v22  ;;  %v1022_v14 = vadd.f32 %v1021_v8, %v917_v44  ;;  %v1719_v22 = vadd.f32 %v2997_v41, %v2995_v38 }
 0x12f   : > { %v1794_v37 = vpop.f32.mrf.mxu0  ;;  %v922_v17 = vadd.f32 %v1793_v3, %v817_v40 }
 0x131   : > { %v1795_v42 = vpop.f32.mrf.mxu0  ;;  %v1027_v8 = vadd.f32 %v1991_v4, %v922_v17 }
 0x132   : > { %v1796_v18 = vadd.f32 %v1795_v42, %v1794_v37  ;;  %v827_v42 = vadd.f32 %v3005_v33, %v1719_v22  ;;  %v832_v33 = vadd.f32 %v2999_v51, %v3009_v35  ;;  %v837_v35 = vadd.f32 %v3007_v61, %v1725_v19 }
 0x134   : > { %v927_v24 = vadd.f32 %v1796_v18, %v822_v48 }
 0x135   : > { %v1797_v63 = vpop.f32.mrf.mxu0  ;;  %v3013_v53 = vpop.f32.mrf.mxu1 }
 0x137   : > { %v1798_v7 = vpop.f32.mrf.mxu0  ;;  %v3017_v11 = vpop.f32.mrf.mxu1 }
 0x138   : > { %v1799_v29 = vadd.f32 %v1798_v7, %v1797_v63 }
 0x13a   : > { %v3011_v39 = vpop.f32.mrf.mxu0  ;;  %v932_v59 = vadd.f32 %v1799_v29, %v827_v42 }
 0x13c   : > { %v3015_v60 = vpop.f32.mrf.mxu0 }
 0x13d   : > { %v1802_v63 = vadd.f32 %v3015_v60, %v3011_v39 }
 0x13f   : > { %v937_v60 = vadd.f32 %v1802_v63, %v832_v33 }
 0x140   : > { %v3019_v12 = vpop.f32.mrf.mxu0  ;;  %v3021_v46 = vpop.f32.mrf.mxu1 }
 0x142   : > { %v3023_v16 = vpop.f32.mrf.mxu0  ;;  %v3025_v27 = vpop.f32.mrf.mxu1 }
 0x143   : > { %v1805_v39 = vadd.f32 %v3023_v16, %v3019_v12 }
 0x145   : > { %v1862_v30 = vpop.f32.mrf.mxu0  ;;  %v942_v40 = vadd.f32 %v1805_v39, %v837_v35 }
 0x147   : > { %v1863_v55 = vpop.f32.mrf.mxu0  ;;  %v1047_v18 = vadd.f32 %v3021_v46, %v942_v40 }
 0x148   : > { %v2032_v58 = vpop.f32.mrf.mxu1  ;;  %v1864_v43 = vadd.f32 %v1863_v55, %v1862_v30 }
 0x149   : > { %v1865_v2 = vpop.f32.mrf.mxu0 }
 0x14a   : > { %v1318_v32 = vpop.f32.mrf.mxu1 }
 0x14b   : > { %v1319_v10 = vadd.f32 %v1864_v43, %v1318_v32  ;;  %v1866_v20 = vpop.f32.mrf.mxu0 }
 0x14c   : > { %v2035_v54 = vpop.f32.mrf.mxu1  ;;  %v1867_v62 = vadd.f32 %v1866_v20, %v1865_v2 }
 0x14d   : > { %v1357_v50 = vadd.f32 %v1319_v10, %v1012_v6  ;;  %v1868_v57 = vpop.f32.mrf.mxu0  ;;  %v1032_v10 = vadd.f32 %v3017_v11, %v927_v24  ;;  %v1037_v11 = vadd.f32 %v3013_v53, %v932_v59  ;;  %v1042_v53 = vadd.f32 %v3025_v27, %v937_v60 }
 0x14e   : > { %v1324_v25 = vadd.f32 %v2032_v58, %v1867_v62  ;;  %v1328_v45 = vpop.f32.mrf.mxu1 }
 0x14f   : > { %v1869_v31 = vpop.f32.mrf.mxu0  ;;  %v1372_v13 = vadd.f32 %v3031_v0, %v1357_v50 }
 0x150   : > { %v1358_v26 = vadd.f32 %v1324_v25, %v1017_v1  ;;  %v1870_v5 = vadd.f32 %v1869_v31, %v1868_v57  ;;  %v2038_v36 = vpop.f32.mrf.mxu1 }
 0x151   : > { %v1871_v34 = vpop.f32.mrf.mxu0  ;;  %v1380_v9 = vmax.f32 %v1372_v13, 0.0 }
 0x152   : > { %v1373_v21 = vadd.f32 %v3031_v0, %v1358_v26  ;;  %v1329_v30 = vadd.f32 %v1870_v5, %v1328_v45  ;;  %v1338_v47 = vpop.f32.mrf.mxu1 }
 0x153   : > { %v1872_v23 = vpop.f32.mrf.mxu0 }
 0x154   : > { %v1381_v15 = vmax.f32 %v1373_v21, 0.0  ;;  %v1359_v55 = vadd.f32 %v1329_v30, %v1022_v14  ;;  %v1873_v58 = vadd.f32 %v1872_v23, %v1871_v34 }
 0x155   : > { %v1874_v43 = vpop.f32.mrf.mxu0 }
 0x156   : > { %v1388_v2 = vmax.f32 %v1380_v9, %v1381_v15  ;;  %v1334_v37 = vadd.f32 %v2035_v54, %v1873_v58  ;;  %v1374_v28 = vadd.f32 %v3031_v0, %v1359_v55  ;;  %v2041_v54 = vpop.f32.mrf.mxu1 }
 0x157   : > { %v1875_v32 = vpop.f32.mrf.mxu0 }
 0x158   : > { %1392 = vst [vmem:[#allocation2] sm:$0xff] %v1388_v2  ;;  %v1360_v38 = vadd.f32 %v1334_v37, %v1027_v8  ;;  %v1876_v41 = vadd.f32 %v1875_v32, %v1874_v43  ;;  %v1382_v49 = vmax.f32 %v1374_v28, 0.0  ;;  %v1348_v51 = vpop.f32.mrf.mxu1 }
 0x159   : > { %v1877_v6 = vpop.f32.mrf.mxu0 }
 0x15a   : > { %v1375_v4 = vadd.f32 %v3031_v0, %v1360_v38  ;;  %v1339_v7 = vadd.f32 %v1876_v41, %v1338_v47 }
 0x15b   : > { %v1878_v20 = vpop.f32.mrf.mxu0 }
 0x15c   : > { %v1383_v50 = vmax.f32 %v1375_v4, 0.0  ;;  %v1361_v62 = vadd.f32 %v1339_v7, %v1032_v10  ;;  %v1879_v44 = vadd.f32 %v1878_v20, %v1877_v6 }
 0x15d   : > { %v1880_v57 = vpop.f32.mrf.mxu0 }
 0x15e   : > { %v1389_v1 = vmax.f32 %v1382_v49, %v1383_v50  ;;  %v1344_v3 = vadd.f32 %v2038_v36, %v1879_v44  ;;  %v1376_v52 = vadd.f32 %v3031_v0, %v1361_v62 }
 0x15f   : > { %v1881_v25 = vpop.f32.mrf.mxu0  ;;  %v1396_v17 = vld [vmem:[#allocation2] ss:$2 sm:$0xf]  ;;  %v1404_v61 = vld [vmem:[#allocation2 + $0x1] ss:$2 sm:$0xf] }
 0x160   : > { %1393 = vst [vmem:[#allocation2 + $0x8] sm:$0xff] %v1389_v1  ;;  %v1362_v56 = vadd.f32 %v1344_v3, %v1037_v11  ;;  %v1882_v31 = vadd.f32 %v1881_v25, %v1880_v57  ;;  %v1384_v26 = vmax.f32 %v1376_v52, 0.0  ;;  %v1411_v23 = vmax.f32 %v1396_v17, %v1404_v61 }
 0x161   : > { %v1883_v45 = vpop.f32.mrf.mxu0 }
 0x162   : > { %v1377_v13 = vadd.f32 %v3031_v0, %v1362_v56  ;;  %v1349_v12 = vadd.f32 %v1882_v31, %v1348_v51 }
 0x163   : > { %v1884_v16 = vpop.f32.mrf.mxu0 }
 0x164   : > { %v1385_v5 = vmax.f32 %v1377_v13, 0.0  ;;  %v1363_v14 = vadd.f32 %v1349_v12, %v1042_v53  ;;  %v1885_v34 = vadd.f32 %v1884_v16, %v1883_v45 }
 0x166   : > { %v1390_v21 = vmax.f32 %v1384_v26, %v1385_v5  ;;  %v1354_v30 = vadd.f32 %v2041_v54, %v1885_v34  ;;  %v1378_v27 = vadd.f32 %v3031_v0, %v1363_v14 }
 0x167   : > { %v1398_v48 = vld [vmem:[#allocation2 + $0x8] ss:$2 sm:$0xf]  ;;  %v1406_v22 = vld [vmem:[#allocation2 + $0x9] ss:$2 sm:$0xf] }
 0x168   : > { %v1412_v36 = vmax.f32 %v1398_v48, %v1406_v22  ;;  %1394 = vst [vmem:[#allocation2 + $0x10] sm:$0xff] %v1390_v21  ;;  %v1364_v9 = vadd.f32 %v1354_v30, %v1047_v18  ;;  %v1386_v58 = vmax.f32 %v1378_v27, 0.0 }
 0x16a   : > { %v1419_v15 = vcombine.low %v1411_v23, %v1412_v36  ;;  %v1379_v55 = vadd.f32 %v3031_v0, %v1364_v9 }
 0x16c   : > { %1423 = vst [vmem:[%s208_s17] sm:$0xff] %v1419_v15  ;;  %v1387_v46 = vmax.f32 %v1379_v55, 0.0 }
 0x16e   : > { %v1391_v29 = vmax.f32 %v1386_v58, %v1387_v46 }
 0x16f   : > { %v1400_v43 = vld [vmem:[#allocation2 + $0x10] ss:$2 sm:$0xf]  ;;  %v1408_v8 = vld [vmem:[#allocation2 + $0x11] ss:$2 sm:$0xf] }
 0x170   : > { %1395 = vst [vmem:[#allocation2 + $0x18] sm:$0xff] %v1391_v29  ;;  %v1413_v37 = vmax.f32 %v1400_v43, %v1408_v8 }
 0x177   : > { %v1402_v24 = vld [vmem:[#allocation2 + $0x18] ss:$2 sm:$0xf]  ;;  %v1410_v2 = vld [vmem:[#allocation2 + $0x19] ss:$2 sm:$0xf] }
 0x178   : > { %v1414_v42 = vmax.f32 %v1402_v24, %v1410_v2 }
 0x17a   : > { %v1420_v32 = vcombine.low %v1413_v37, %v1414_v42 }
 0x17c   : > { %1424 = vst [vmem:[%s208_s17 + $0x8] sm:$0xff] %v1420_v32 }
 0x17d PF: > { %s13_s14 = sadd.s32 1, %s2089_s14   ;;  %s3118_s12 = smov %s2085_s13 }
 0x17e   : > { %p10_p5 = scmp.ge.s32.totalorder %s13_s14, 4   ;;  %s3119_s13 = smov %s3121_s15 }
 0x180   :  { %12 = sbr.rel (!%p10_p5) target bundleno = 2 (0x2), region = 71 }

// kernel: fe_forward.9
= control target key start
LH: loop header
LB: loop body
LE: loop exit
PB: predicated region body
PF: predicated region fallthrough
CT: control target
= control target key end

     0   :  { %s1474_s12 = smov 0   ;;  %s1476_s13 = smov 0   ;;  %s2546_s0 = inlined_call_operand.vmem [shape: f32[2,16,128], index: 0, kind: input, shape index: {}]   ;;  %s2547_s1 = inlined_call_operand.vmem [shape: f32[3,384,256], index: 1, kind: input, shape index: {}]   ;;  %s2548_s2 = inlined_call_operand.vmem [shape: f32[1,256], index: 2, kind: input, shape index: {}]   ;;  %s2549_s3 = inlined_call_operand.vmem [shape: f32[2,16,256], index: 3, kind: output, shape index: {}]  }
   0x1   :  { %s1478_s14 = smov 0  }
   0x2 LB: > { %s25_s15 = sadd.s32 1, %s1447_s13  ;;  %p1189_p0 = scmp.ge.s32.totalorder %s1451_s14, 1  ;;  %s1451_s14 = sphi %s1478_s14, %s13_s14   ;;  %s1447_s13 = sphi %s1476_s13, %s2559_s13   ;;  %s1443_s12 = sphi %s1474_s12, %s2558_s12  }
   0x3   : > { %p27_p1 = scmp.ge.s32.totalorder %s25_s15, 2  ;;  %p158_p2 = scmp.lt.s32.totalorder %s1451_s14, 3 }
   0x5   : > { %s2561_s15 = smov (%p27_p1, %s25_s15), 0  ;;  %p159_p3 = pnand %p1189_p0, %p158_p2 }
   0x6   : > { %p192_p4 = scmp.lt.s32.totalorder (!%p159_p3), %s1443_s12, 1 }
   0x7   : > { %162 = sbr.rel (%p159_p3) target bundleno = 388 (0x184), region = 32 }
   0xc   : > { %v1225_v0 = vld [vmem:[%s2547_s1 + $0x3f8] sm:$0xff]  ;;  %v1224_v2 = vld [vmem:[%s2547_s1 + $0x3f0] sm:$0xff]  ;;  %v1223_v4 = vld [vmem:[%s2547_s1 + $0x3e8] sm:$0xff]  ;;  %s2563_s12 = smov (!%p192_p4, %s1443_s12), 1  ;;  %v214_v44 = vlaneseq }
   0xd   : > { %v1289_v1 = vld [vmem:[%s2547_s1 + $0x5f8] sm:$0xff]  ;;  %493 = vmatprep.subr.mxu0 %v1225_v0  ;;  %v1288_v3 = vld [vmem:[%s2547_s1 + $0x5f0] sm:$0xff]  ;;  %v1287_v5 = vld [vmem:[%s2547_s1 + $0x5e8] sm:$0xff]  ;;  %s1402_s8 = sshll.u32 %s2563_s12, 4  ;;  %s1403_s23 = sshll.u32 %s2563_s12, 5 }
   0xe   : > { %570 = vmatprep.subr.mxu1 %v1289_v1  ;;  %494 = vmatpush1.msra.mxu0 %v1224_v2  ;;  %v1222_v6 = vld [vmem:[%s2547_s1 + $0x3e0] sm:$0xff]  ;;  %v1221_v8 = vld [vmem:[%s2547_s1 + $0x3d8] sm:$0xff]  ;;  %v1220_v10 = vld [vmem:[%s2547_s1 + $0x3d0] sm:$0xff]  ;;  %s199_s27 = scalar_lea.vmem %s2546_s0, %s1402_s8  ;;  %v1660_v53 = vshrl.u32 %v214_v44, 7  ;;  %s210_s26 = scalar_lea.vmem %s2549_s3, %s1403_s23 }
   0xf   : > { %571 = vmatpush1.msra.mxu1 %v1288_v3  ;;  %v1286_v7 = vld [vmem:[%s2547_s1 + $0x5e0] sm:$0xff]  ;;  %495 = vmatprep.subr.mxu0 %v1223_v4  ;;  %v1285_v9 = vld [vmem:[%s2547_s1 + $0x5d8] sm:$0xff]  ;;  %v1284_v11 = vld [vmem:[%s2547_s1 + $0x5d0] sm:$0xff] }
  0x10   : > { %572 = vmatprep.subr.mxu1 %v1287_v5  ;;  %496 = vmatpush1.msra.mxu0 %v1222_v6  ;;  %v1219_v12 = vld [vmem:[%s2547_s1 + $0x3c8] sm:$0xff]  ;;  %v1218_v14 = vld [vmem:[%s2547_s1 + $0x3c0] sm:$0xff]  ;;  %v1217_v16 = vld [vmem:[%s2547_s1 + $0x3b8] sm:$0xff]  ;;  %v221_v0 = vand.u32 3, %v1660_v53  ;;  %v1692_v1 = vadd.s32 8, %v1660_v53  ;;  %vm279_vm0 = vcmp.lt.s32.totalorder %v1660_v53, 7 }
  0x11   : > { %573 = vmatpush1.msra.mxu1 %v1286_v7  ;;  %v1283_v13 = vld [vmem:[%s2547_s1 + $0x5c8] sm:$0xff]  ;;  %497 = vmatprep.subr.mxu0 %v1221_v8  ;;  %v1282_v15 = vld [vmem:[%s2547_s1 + $0x5c0] sm:$0xff]  ;;  %v1281_v17 = vld [vmem:[%s2547_s1 + $0x5b8] sm:$0xff]  ;;  %vm245_vm1 = vcmp.lt.s32.totalorder %v1660_v53, 4  ;;  %vm266_vm4 = vcmp.lt.s32.totalorder %v1660_v53, 1  ;;  %vm241_vm6 = vcmp.ge.s32.totalorder %v1660_v53, 4 }
  0x12   : > { %574 = vmatprep.subr.mxu1 %v1285_v9  ;;  %498 = vmatpush1.msra.mxu0 %v1220_v10  ;;  %v1216_v18 = vld [vmem:[%s2547_s1 + $0x3b0] sm:$0xff]  ;;  %v1215_v20 = vld [vmem:[%s2547_s1 + $0x3a8] sm:$0xff]  ;;  %v1214_v22 = vld [vmem:[%s2547_s1 + $0x3a0] sm:$0xff]  ;;  %vm255_vm2 = vcmp.lt.s32.totalorder %v1692_v1, 12  ;;  %vm1724_vm3 = vcmp.lt.s32.totalorder %v221_v0, 3  ;;  %vm1952_vm5 = vcmp.ge.s32.totalorder %v221_v0, 1 }
  0x13   : > { %575 = vmatpush1.msra.mxu1 %v1284_v11  ;;  %499 = vmatprep.subr.mxu0 %v1219_v12  ;;  %v1280_v19 = vld [vmem:[%s2547_s1 + $0x5b0] sm:$0xff]  ;;  %v1279_v21 = vld [vmem:[%s2547_s1 + $0x5a8] sm:$0xff]  ;;  %v1278_v23 = vld [vmem:[%s2547_s1 + $0x5a0] sm:$0xff] }
  0x14   : > { %576 = vmatprep.subr.mxu1 %v1283_v13  ;;  %500 = vmatpush1.msra.mxu0 %v1218_v14  ;;  %v1213_v24 = vld [vmem:[%s2547_s1 + $0x398] sm:$0xff]  ;;  %v1212_v26 = vld [vmem:[%s2547_s1 + $0x390] sm:$0xff]  ;;  %v1211_v28 = vld [vmem:[%s2547_s1 + $0x388] sm:$0xff] }
  0x15   : > { %577 = vmatpush1.msra.mxu1 %v1282_v15  ;;  %501 = vmatprep.subr.mxu0 %v1217_v16  ;;  %v1277_v25 = vld [vmem:[%s2547_s1 + $0x598] sm:$0xff]  ;;  %v1276_v27 = vld [vmem:[%s2547_s1 + $0x590] sm:$0xff]  ;;  %v1275_v29 = vld [vmem:[%s2547_s1 + $0x588] sm:$0xff] }
  0x16   : > { %578 = vmatprep.subr.mxu1 %v1281_v17  ;;  %502 = vmatpush1.msra.mxu0 %v1216_v18  ;;  %v1210_v30 = vld [vmem:[%s2547_s1 + $0x380] sm:$0xff]  ;;  %v1209_v32 = vld [vmem:[%s2547_s1 + $0x378] sm:$0xff]  ;;  %v1208_v34 = vld [vmem:[%s2547_s1 + $0x370] sm:$0xff]  ;;  %v1453_v17 = vmov 0.0  }
  0x17   : > { %579 = vmatpush1.msra.mxu1 %v1280_v19  ;;  %503 = vmatprep.subr.mxu0 %v1215_v20  ;;  %v1274_v31 = vld [vmem:[%s2547_s1 + $0x580] sm:$0xff]  ;;  %v1273_v33 = vld [vmem:[%s2547_s1 + $0x578] sm:$0xff]  ;;  %v1272_v35 = vld [vmem:[%s2547_s1 + $0x570] sm:$0xff] }
  0x18   : > { %580 = vmatprep.subr.mxu1 %v1279_v21  ;;  %504 = vmatpush1.msra.mxu0 %v1214_v22  ;;  %v1207_v36 = vld [vmem:[%s2547_s1 + $0x368] sm:$0xff]  ;;  %v1206_v38 = vld [vmem:[%s2547_s1 + $0x360] sm:$0xff]  ;;  %v1205_v40 = vld [vmem:[%s2547_s1 + $0x358] sm:$0xff] }
  0x19   : > { %581 = vmatpush1.msra.mxu1 %v1278_v23  ;;  %505 = vmatprep.subr.mxu0 %v1213_v24  ;;  %v1271_v37 = vld [vmem:[%s2547_s1 + $0x568] sm:$0xff]  ;;  %v1270_v39 = vld [vmem:[%s2547_s1 + $0x560] sm:$0xff]  ;;  %v1269_v41 = vld [vmem:[%s2547_s1 + $0x558] sm:$0xff] }
  0x1a   : > { %582 = vmatprep.subr.mxu1 %v1277_v25  ;;  %506 = vmatpush1.msra.mxu0 %v1212_v26  ;;  %v1204_v42 = vld [vmem:[%s2547_s1 + $0x350] sm:$0xff]  ;;  %v1203_v45 = vld [vmem:[%s2547_s1 + $0x348] sm:$0xff]  ;;  %v1202_v47 = vld [vmem:[%s2547_s1 + $0x340] sm:$0xff] }
  0x1b   : > { %583 = vmatpush1.msra.mxu1 %v1276_v27  ;;  %507 = vmatprep.subr.mxu0 %v1211_v28  ;;  %v1268_v43 = vld [vmem:[%s2547_s1 + $0x550] sm:$0xff]  ;;  %v1267_v46 = vld [vmem:[%s2547_s1 + $0x548] sm:$0xff]  ;;  %v1266_v48 = vld [vmem:[%s2547_s1 + $0x540] sm:$0xff] }
  0x1c   : > { %584 = vmatprep.subr.mxu1 %v1275_v29  ;;  %508 = vmatpush1.msra.mxu0 %v1210_v30  ;;  %v1201_v49 = vld [vmem:[%s2547_s1 + $0x338] sm:$0xff]  ;;  %v1200_v51 = vld [vmem:[%s2547_s1 + $0x330] sm:$0xff]  ;;  %v1199_v54 = vld [vmem:[%s2547_s1 + $0x328] sm:$0xff] }
  0x1d   : > { %585 = vmatpush1.msra.mxu1 %v1274_v31  ;;  %509 = vmatprep.subr.mxu0 %v1209_v32  ;;  %v1265_v50 = vld [vmem:[%s2547_s1 + $0x538] sm:$0xff]  ;;  %v1264_v52 = vld [vmem:[%s2547_s1 + $0x530] sm:$0xff]  ;;  %v1263_v55 = vld [vmem:[%s2547_s1 + $0x528] sm:$0xff] }
  0x1e   : > { %586 = vmatprep.subr.mxu1 %v1273_v33  ;;  %510 = vmatpush1.msra.mxu0 %v1208_v34  ;;  %v1198_v56 = vld [vmem:[%s2547_s1 + $0x320] sm:$0xff]  ;;  %v1676_v59 = vld [vmem:[%s199_s27 + $0x8] sm:$0xff]  ;;  %v1197_v60 = vld [vmem:[%s2547_s1 + $0x318] sm:$0xff] }
  0x1f   : > { %587 = vmatpush1.msra.mxu1 %v1272_v35  ;;  %511 = vmatprep.subr.mxu0 %v1207_v36  ;;  %v1262_v57 = vld [vmem:[%s2547_s1 + $0x520] sm:$0xff]  ;;  %v1261_v61 = vld [vmem:[%s2547_s1 + $0x518] sm:$0xff]  ;;  %v1196_v62 = vld [vmem:[%s2547_s1 + $0x310] sm:$0xff]  ;;  %v391_v5 = vrot.slane %v1676_v59, 1  ;;  %v244_v7 = vrot.slane %v1676_v59, 4 }
  0x20   : > { %588 = vmatprep.subr.mxu1 %v1271_v37  ;;  %512 = vmatpush1.msra.mxu0 %v1206_v38  ;;  %v1674_v58 = vld [vmem:[%s199_s27] sm:$0xff]  ;;  %v1260_v63 = vld [vmem:[%s2547_s1 + $0x510] sm:$0xff]  ;;  %v1195_v2 = vld [vmem:[%s2547_s1 + $0x308] sm:$0xff] }
  0x21   : > { %589 = vmatpush1.msra.mxu1 %v1270_v39  ;;  %513 = vmatprep.subr.mxu0 %v1205_v40  ;;  %v1259_v3 = vld [vmem:[%s2547_s1 + $0x508] sm:$0xff]  ;;  %v390_v4 = vrot.slane %v1674_v58, 1  ;;  %v243_v6 = vrot.slane %v1674_v58, 4  ;;  %v1194_v8 = vld [vmem:[%s2547_s1 + $0x300] sm:$0xff]  ;;  %v1257_v10 = vld [vmem:[%s2547_s1 + $0x4f8] sm:$0xff] }
  0x22   : > { %590 = vmatprep.subr.mxu1 %v1269_v41  ;;  %514 = vmatpush1.msra.mxu0 %v1204_v42  ;;  %v1258_v9 = vld [vmem:[%s2547_s1 + $0x500] sm:$0xff]  ;;  %v319_v11 = vld [vmem:[%s2547_s1 + $0xf8] sm:$0xff]  ;;  %v1256_v12 = vld [vmem:[%s2547_s1 + $0x4f0] sm:$0xff] }
  0x23   : > { %591 = vmatpush1.msra.mxu1 %v1268_v43  ;;  %515 = vmatprep.subr.mxu0 %v1203_v45  ;;  %v392_v14 = vsel %vm279_vm0, %v390_v4, %v391_v5  ;;  %v1255_v15 = vld [vmem:[%s2547_s1 + $0x4e8] sm:$0xff]  ;;  %v1739_v16 = vsel %vm245_vm1, %v244_v7, %v243_v6  ;;  %v318_v18 = vld [vmem:[%s2547_s1 + $0xf0] sm:$0xff]  ;;  %v1254_v19 = vld [vmem:[%s2547_s1 + $0x4e0] sm:$0xff]  ;;  %v1750_v20 = vsel %vm245_vm1, %v243_v6, %v244_v7 }
  0x24   : > { %592 = vmatprep.subr.mxu1 %v1267_v46  ;;  %516 = vmatpush1.msra.mxu0 %v1202_v47  ;;  %v1755_v21 = vsel %vm255_vm2, %v1739_v16, 0.0  ;;  %v317_v22 = vld [vmem:[%s2547_s1 + $0xe8] sm:$0xff]  ;;  %v1253_v23 = vld [vmem:[%s2547_s1 + $0x4d8] sm:$0xff]  ;;  %v316_v25 = vld [vmem:[%s2547_s1 + $0xe0] sm:$0xff]  ;;  %v1779_v29 = vrot.slane %v1750_v20, 7 }
  0x25   : > { %593 = vmatpush1.msra.mxu1 %v1266_v48  ;;  %517 = vmatprep.subr.mxu0 %v1201_v49  ;;  %v802_v24 = vrot.slane %v1755_v21, 7  ;;  %v1252_v26 = vld [vmem:[%s2547_s1 + $0x4d0] sm:$0xff]  ;;  %v315_v27 = vld [vmem:[%s2547_s1 + $0xd8] sm:$0xff]  ;;  %v1251_v28 = vld [vmem:[%s2547_s1 + $0x4c8] sm:$0xff] }
  0x26   : > { %594 = vmatprep.subr.mxu1 %v1265_v50  ;;  %518 = vmatpush1.msra.mxu0 %v1200_v51  ;;  %v314_v30 = vld [vmem:[%s2547_s1 + $0xd0] sm:$0xff]  ;;  %v1250_v31 = vld [vmem:[%s2547_s1 + $0x4c0] sm:$0xff]  ;;  %v313_v32 = vld [vmem:[%s2547_s1 + $0xc8] sm:$0xff] }
  0x27   : > { %595 = vmatpush1.msra.mxu1 %v1264_v52  ;;  %519 = vmatprep.subr.mxu0 %v1199_v54  ;;  %v1249_v33 = vld [vmem:[%s2547_s1 + $0x4b8] sm:$0xff]  ;;  %v1797_v34 = vsel %vm266_vm4, %v802_v24, %v1779_v29  ;;  %v312_v35 = vld [vmem:[%s2547_s1 + $0xc0] sm:$0xff]  ;;  %v1248_v36 = vld [vmem:[%s2547_s1 + $0x4b0] sm:$0xff]  ;;  %v1814_v39 = vsel %vm266_vm4, %v1779_v29, %v802_v24 }
  0x28   : > { %596 = vmatprep.subr.mxu1 %v1263_v55  ;;  %520 = vmatpush1.msra.mxu0 %v1198_v56  ;;  %v311_v37 = vld [vmem:[%s2547_s1 + $0xb8] sm:$0xff]  ;;  %v1247_v38 = vld [vmem:[%s2547_s1 + $0x4a8] sm:$0xff]  ;;  %v310_v40 = vld [vmem:[%s2547_s1 + $0xb0] sm:$0xff] }
  0x29   : > { %597 = vmatpush1.msra.mxu1 %v1262_v57  ;;  %521 = vmatprep.subr.mxu0 %v1197_v60  ;;  %v1246_v41 = vld [vmem:[%s2547_s1 + $0x4a0] sm:$0xff]  ;;  %v309_v42 = vld [vmem:[%s2547_s1 + $0xa8] sm:$0xff]  ;;  %v1245_v43 = vld [vmem:[%s2547_s1 + $0x498] sm:$0xff] }
  0x2a   : > { %598 = vmatprep.subr.mxu1 %v1261_v61  ;;  %522 = vmatpush1.msra.mxu0 %v1196_v62  ;;  %v308_v44 = vld [vmem:[%s2547_s1 + $0xa0] sm:$0xff]  ;;  %v1244_v45 = vld [vmem:[%s2547_s1 + $0x490] sm:$0xff]  ;;  %v307_v46 = vld [vmem:[%s2547_s1 + $0x98] sm:$0xff] }
  0x2b   : > { %599 = vmatpush1.msra.mxu1 %v1260_v63  ;;  %523 = vmatprep.subr.mxu0 %v1195_v2  ;;  %v1243_v47 = vld [vmem:[%s2547_s1 + $0x488] sm:$0xff]  ;;  %v306_v48 = vld [vmem:[%s2547_s1 + $0x90] sm:$0xff]  ;;  %v1242_v49 = vld [vmem:[%s2547_s1 + $0x480] sm:$0xff] }
  0x2c   : > { %600 = vmatprep.subr.mxu1 %v1259_v3  ;;  %524 = vmatpush1.msra.mxu0 %v1194_v8  ;;  %v305_v50 = vld [vmem:[%s2547_s1 + $0x88] sm:$0xff]  ;;  %v1241_v51 = vld [vmem:[%s2547_s1 + $0x478] sm:$0xff]  ;;  %v304_v52 = vld [vmem:[%s2547_s1 + $0x80] sm:$0xff] }
  0x2d   : > { %601 = vmatpush1.msra.mxu1 %v1258_v9  ;;  %525 = vmatprep.subr.mxu0 %v1257_v10  ;;  %v1240_v54 = vld [vmem:[%s2547_s1 + $0x470] sm:$0xff]  ;;  %v303_v55 = vld [vmem:[%s2547_s1 + $0x78] sm:$0xff]  ;;  %v1239_v56 = vld [vmem:[%s2547_s1 + $0x468] sm:$0xff] }
  0x2e   : > { %634 = vmatprep.mubr.f32.mxu1 %v1453_v17  ;;  %647 = vmatprep.subr.mxu1 %v319_v11  ;;  %v302_v57 = vld [vmem:[%s2547_s1 + $0x70] sm:$0xff]  ;;  %v1238_v60 = vld [vmem:[%s2547_s1 + $0x460] sm:$0xff]  ;;  %v301_v61 = vld [vmem:[%s2547_s1 + $0x68] sm:$0xff] }
  0x2f   : > { %526 = vmatpush2.msra.mxu0 %v1256_v12  ;;  %1292 = vmatmul.mubr.msk.f32.vlgmr.msra.gmra.mxu1 %vm1724_vm3, %v392_v14  ;;  %v1237_v62 = vld [vmem:[%s2547_s1 + $0x458] sm:$0xff]  ;;  %v300_v63 = vld [vmem:[%s2547_s1 + $0x60] sm:$0xff]  ;;  %v1236_v2 = vld [vmem:[%s2547_s1 + $0x450] sm:$0xff] }
  0x30   : > { %527 = vmatprep.subr.mxu0 %v1255_v15  ;;  %648 = vmatpush1.msra.mxu1 %v318_v18  ;;  %v299_v3 = vld [vmem:[%s2547_s1 + $0x58] sm:$0xff]  ;;  %v1235_v6 = vld [vmem:[%s2547_s1 + $0x448] sm:$0xff]  ;;  %v298_v7 = vld [vmem:[%s2547_s1 + $0x50] sm:$0xff] }
  0x31   : > { %528 = vmatpush2.msra.mxu0 %v1254_v19  ;;  %649 = vmatprep.subr.mxu1 %v317_v22  ;;  %v1234_v8 = vld [vmem:[%s2547_s1 + $0x440] sm:$0xff]  ;;  %v297_v9 = vld [vmem:[%s2547_s1 + $0x48] sm:$0xff]  ;;  %v1233_v10 = vld [vmem:[%s2547_s1 + $0x438] sm:$0xff] }
  0x32   : > { %529 = vmatprep.subr.mxu0 %v1253_v23  ;;  %650 = vmatpush1.msra.mxu1 %v316_v25  ;;  %v296_v11 = vld [vmem:[%s2547_s1 + $0x40] sm:$0xff]  ;;  %v1232_v12 = vld [vmem:[%s2547_s1 + $0x430] sm:$0xff]  ;;  %v295_v14 = vld [vmem:[%s2547_s1 + $0x38] sm:$0xff] }
  0x33   : > { %530 = vmatpush2.msra.mxu0 %v1252_v26  ;;  %651 = vmatprep.subr.mxu1 %v315_v27  ;;  %v1231_v15 = vld [vmem:[%s2547_s1 + $0x428] sm:$0xff]  ;;  %v294_v18 = vld [vmem:[%s2547_s1 + $0x30] sm:$0xff]  ;;  %v1230_v19 = vld [vmem:[%s2547_s1 + $0x420] sm:$0xff]  ;;  %v384_v26 = vrot.slane %v1674_v58, 7  ;;  %v385_v27 = vrot.slane %v1676_v59, 7 }
  0x34   : > { %531 = vmatprep.subr.mxu0 %v1251_v28  ;;  %652 = vmatpush1.msra.mxu1 %v314_v30  ;;  %v293_v22 = vld [vmem:[%s2547_s1 + $0x28] sm:$0xff]  ;;  %v1229_v23 = vld [vmem:[%s2547_s1 + $0x418] sm:$0xff]  ;;  %v292_v24 = vld [vmem:[%s2547_s1 + $0x20] sm:$0xff] }
  0x35   : > { %532 = vmatpush2.msra.mxu0 %v1250_v31  ;;  %653 = vmatprep.subr.mxu1 %v313_v32  ;;  %v1228_v25 = vld [vmem:[%s2547_s1 + $0x410] sm:$0xff]  ;;  %v291_v28 = vld [vmem:[%s2547_s1 + $0x18] sm:$0xff]  ;;  %v1227_v30 = vld [vmem:[%s2547_s1 + $0x408] sm:$0xff] }
  0x36   : > { %533 = vmatprep.subr.mxu0 %v1249_v33  ;;  %654 = vmatpush1.msra.mxu1 %v312_v35  ;;  %v290_v31 = vld [vmem:[%s2547_s1 + $0x10] sm:$0xff]  ;;  %v1226_v32 = vld [vmem:[%s2547_s1 + $0x400] sm:$0xff]  ;;  %v289_v33 = vld [vmem:[%s2547_s1 + $0x8] sm:$0xff] }
  0x37   : > { %534 = vmatpush2.msra.mxu0 %v1248_v36  ;;  %655 = vmatprep.subr.mxu1 %v311_v37  ;;  %v288_v35 = vld [vmem:[%s2547_s1] sm:$0xff]  ;;  %v387_v37 = vsel %vm266_vm4, %v385_v27, %v384_v26  ;;  %v383_v0 = vld [vmem:[%s2547_s1 + $0x2f8] sm:$0xff] }
  0x38   : > { %535 = vmatprep.subr.mxu0 %v1247_v38  ;;  %656 = vmatpush1.msra.mxu1 %v310_v40  ;;  %v351_v38 = vld [vmem:[%s2547_s1 + $0x1f8] sm:$0xff]  ;;  %v350_v40 = vld [vmem:[%s2547_s1 + $0x1f0] sm:$0xff]  ;;  %v1351_v13 = vld [vmem:[%s2547_s1 + $0x7a0] sm:$0xff] }
  0x39   : > { %536 = vmatpush2.msra.mxu0 %v1246_v41  ;;  %657 = vmatprep.subr.mxu1 %v309_v42  ;;  %v382_v41 = vld [vmem:[%s2547_s1 + $0x2f0] sm:$0xff]  ;;  %v349_v42 = vld [vmem:[%s2547_s1 + $0x1e8] sm:$0xff] }
  0x3a   : > { %537 = vmatprep.subr.mxu0 %v1245_v43  ;;  %658 = vmatpush1.msra.mxu1 %v308_v44  ;;  %v381_v43 = vld [vmem:[%s2547_s1 + $0x2e8] sm:$0xff]  ;;  %v348_v44 = vld [vmem:[%s2547_s1 + $0x1e0] sm:$0xff] }
  0x3b   : > { %538 = vmatpush2.msra.mxu0 %v1244_v45  ;;  %659 = vmatprep.subr.mxu1 %v307_v46  ;;  %v380_v45 = vld [vmem:[%s2547_s1 + $0x2e0] sm:$0xff]  ;;  %v347_v46 = vld [vmem:[%s2547_s1 + $0x1d8] sm:$0xff] }
  0x3c   : > { %539 = vmatprep.subr.mxu0 %v1243_v47  ;;  %660 = vmatpush1.msra.mxu1 %v306_v48  ;;  %v379_v47 = vld [vmem:[%s2547_s1 + $0x2d8] sm:$0xff]  ;;  %v346_v48 = vld [vmem:[%s2547_s1 + $0x1d0] sm:$0xff] }
  0x3d   : > { %540 = vmatpush2.msra.mxu0 %v1242_v49  ;;  %661 = vmatprep.subr.mxu1 %v305_v50  ;;  %v378_v49 = vld [vmem:[%s2547_s1 + $0x2d0] sm:$0xff]  ;;  %v345_v50 = vld [vmem:[%s2547_s1 + $0x1c8] sm:$0xff] }
  0x3e   : > { %541 = vmatprep.subr.mxu0 %v1241_v51  ;;  %662 = vmatpush1.msra.mxu1 %v304_v52  ;;  %v377_v51 = vld [vmem:[%s2547_s1 + $0x2c8] sm:$0xff]  ;;  %v344_v52 = vld [vmem:[%s2547_s1 + $0x1c0] sm:$0xff] }
  0x3f   : > { %542 = vmatpush2.msra.mxu0 %v1240_v54  ;;  %663 = vmatprep.subr.mxu1 %v303_v55  ;;  %v376_v54 = vld [vmem:[%s2547_s1 + $0x2c0] sm:$0xff]  ;;  %v343_v55 = vld [vmem:[%s2547_s1 + $0x1b8] sm:$0xff] }
  0x40   : > { %543 = vmatprep.subr.mxu0 %v1239_v56  ;;  %664 = vmatpush1.msra.mxu1 %v302_v57  ;;  %v375_v56 = vld [vmem:[%s2547_s1 + $0x2b8] sm:$0xff]  ;;  %v342_v57 = vld [vmem:[%s2547_s1 + $0x1b0] sm:$0xff] }
  0x41   : > { %544 = vmatpush2.msra.mxu0 %v1238_v60  ;;  %665 = vmatprep.subr.mxu1 %v301_v61  ;;  %v374_v60 = vld [vmem:[%s2547_s1 + $0x2b0] sm:$0xff]  ;;  %v341_v61 = vld [vmem:[%s2547_s1 + $0x1a8] sm:$0xff] }
  0x42   : > { %545 = vmatprep.subr.mxu0 %v1237_v62  ;;  %666 = vmatpush1.msra.mxu1 %v300_v63  ;;  %v373_v62 = vld [vmem:[%s2547_s1 + $0x2a8] sm:$0xff]  ;;  %v340_v63 = vld [vmem:[%s2547_s1 + $0x1a0] sm:$0xff] }
  0x43   : > { %546 = vmatpush2.msra.mxu0 %v1236_v2  ;;  %667 = vmatprep.subr.mxu1 %v299_v3  ;;  %v372_v2 = vld [vmem:[%s2547_s1 + $0x2a0] sm:$0xff]  ;;  %v339_v3 = vld [vmem:[%s2547_s1 + $0x198] sm:$0xff] }
  0x44   : > { %547 = vmatprep.subr.mxu0 %v1235_v6  ;;  %668 = vmatpush1.msra.mxu1 %v298_v7  ;;  %v371_v6 = vld [vmem:[%s2547_s1 + $0x298] sm:$0xff]  ;;  %v338_v7 = vld [vmem:[%s2547_s1 + $0x190] sm:$0xff] }
  0x45   : > { %548 = vmatpush2.msra.mxu0 %v1234_v8  ;;  %669 = vmatprep.subr.mxu1 %v297_v9  ;;  %v370_v8 = vld [vmem:[%s2547_s1 + $0x290] sm:$0xff]  ;;  %v337_v9 = vld [vmem:[%s2547_s1 + $0x188] sm:$0xff] }
  0x46   : > { %549 = vmatprep.subr.mxu0 %v1233_v10  ;;  %670 = vmatpush1.msra.mxu1 %v296_v11  ;;  %v369_v10 = vld [vmem:[%s2547_s1 + $0x288] sm:$0xff]  ;;  %v336_v11 = vld [vmem:[%s2547_s1 + $0x180] sm:$0xff] }
  0x47   : > { %550 = vmatpush2.msra.mxu0 %v1232_v12  ;;  %671 = vmatprep.subr.mxu1 %v295_v14  ;;  %v368_v12 = vld [vmem:[%s2547_s1 + $0x280] sm:$0xff]  ;;  %v335_v14 = vld [vmem:[%s2547_s1 + $0x178] sm:$0xff] }
  0x48   : > { %551 = vmatprep.subr.mxu0 %v1231_v15  ;;  %672 = vmatpush1.msra.mxu1 %v294_v18  ;;  %v367_v15 = vld [vmem:[%s2547_s1 + $0x278] sm:$0xff]  ;;  %v334_v18 = vld [vmem:[%s2547_s1 + $0x170] sm:$0xff] }
  0x49   : > { %552 = vmatpush2.msra.mxu0 %v1230_v19  ;;  %673 = vmatprep.subr.mxu1 %v293_v22  ;;  %v366_v19 = vld [vmem:[%s2547_s1 + $0x270] sm:$0xff]  ;;  %v333_v22 = vld [vmem:[%s2547_s1 + $0x168] sm:$0xff] }
  0x4a   : > { %553 = vmatprep.subr.mxu0 %v1229_v23  ;;  %674 = vmatpush1.msra.mxu1 %v292_v24  ;;  %v365_v23 = vld [vmem:[%s2547_s1 + $0x268] sm:$0xff]  ;;  %v332_v24 = vld [vmem:[%s2547_s1 + $0x160] sm:$0xff] }
  0x4b   : > { %554 = vmatpush2.msra.mxu0 %v1228_v25  ;;  %675 = vmatprep.subr.mxu1 %v291_v28  ;;  %v364_v25 = vld [vmem:[%s2547_s1 + $0x260] sm:$0xff]  ;;  %v331_v28 = vld [vmem:[%s2547_s1 + $0x158] sm:$0xff] }
  0x4c   : > { %555 = vmatprep.subr.mxu0 %v1227_v30  ;;  %676 = vmatpush1.msra.mxu1 %v290_v31  ;;  %v363_v30 = vld [vmem:[%s2547_s1 + $0x258] sm:$0xff]  ;;  %v330_v31 = vld [vmem:[%s2547_s1 + $0x150] sm:$0xff] }
  0x4d   : > { %556 = vmatpush2.msra.mxu0 %v1226_v32  ;;  %677 = vmatprep.subr.mxu1 %v289_v33  ;;  %v362_v32 = vld [vmem:[%s2547_s1 + $0x250] sm:$0xff]  ;;  %v329_v33 = vld [vmem:[%s2547_s1 + $0x148] sm:$0xff] }
  0x4e   : > { %557 = vmatprep.mubr.f32.mxu0 %v1674_v58  ;;  %678 = vmatpush1.msra.mxu1 %v288_v35  ;;  %v361_v35 = vld [vmem:[%s2547_s1 + $0x248] sm:$0xff]  ;;  %v356_v58 = vld [vmem:[%s2547_s1 + $0x220] sm:$0xff] }
  0x4f   : > { %1290 = vmatmul.mubr.msk.f32.vlgmr.msra.gmra.mxu0 %vm1952_vm5, %v387_v37  ;;  %679 = vmatprep.subr.mxu1 %v351_v38  ;;  %v328_v37 = vld [vmem:[%s2547_s1 + $0x140] sm:$0xff] }
  0x50   : > { %724 = vmatprep.subr.mxu0 %v383_v0  ;;  %680 = vmatpush2.msra.mxu1 %v350_v40  ;;  %v360_v38 = vld [vmem:[%s2547_s1 + $0x240] sm:$0xff]  ;;  %v228_v0 = vand.u32 3, %v1692_v1  ;;  %v327_v40 = vld [vmem:[%s2547_s1 + $0x138] sm:$0xff] }
  0x51   : > { %725 = vmatpush1.msra.mxu0 %v382_v41  ;;  %681 = vmatprep.subr.mxu1 %v349_v42  ;;  %v359_v41 = vld [vmem:[%s2547_s1 + $0x238] sm:$0xff]  ;;  %v326_v42 = vld [vmem:[%s2547_s1 + $0x130] sm:$0xff] }
  0x52   : > { %726 = vmatprep.subr.mxu0 %v381_v43  ;;  %682 = vmatpush2.msra.mxu1 %v348_v44  ;;  %v358_v43 = vld [vmem:[%s2547_s1 + $0x230] sm:$0xff]  ;;  %v325_v44 = vld [vmem:[%s2547_s1 + $0x128] sm:$0xff]  ;;  %vm2129_vm7 = vcmp.ge.s32.totalorder %v228_v0, 1  ;;  %vm2139_vm8 = vcmp.lt.s32.totalorder %v228_v0, 3 }
  0x53   : > { %727 = vmatpush1.msra.mxu0 %v380_v45  ;;  %683 = vmatprep.subr.mxu1 %v347_v46  ;;  %v357_v45 = vld [vmem:[%s2547_s1 + $0x228] sm:$0xff] }
  0x54   : > { %728 = vmatprep.subr.mxu0 %v379_v47  ;;  %684 = vmatpush2.msra.mxu1 %v346_v48  ;;  %v386_v47 = vsel %vm266_vm4, %v384_v26, %v385_v27  ;;  %v324_v26 = vld [vmem:[%s2547_s1 + $0x120] sm:$0xff]  ;;  %v354_v27 = vld [vmem:[%s2547_s1 + $0x210] sm:$0xff]  ;;  %v1384_v0 = vld [vmem:[%s2547_s1 + $0x8a8] sm:$0xff] }
  0x55   : > { %729 = vmatpush1.msra.mxu0 %v378_v49  ;;  %685 = vmatprep.subr.mxu1 %v345_v50  ;;  %v393_v49 = vsel %vm279_vm0, %v391_v5, %v390_v4  ;;  %v252_v50 = vsel %vm241_vm6, %v1739_v16, 0.0  ;;  %v323_v4 = vld [vmem:[%s2547_s1 + $0x118] sm:$0xff]  ;;  %v322_v5 = vld [vmem:[%s2547_s1 + $0x110] sm:$0xff] }
  0x56   : > { %730 = vmatprep.subr.mxu0 %v377_v51  ;;  %686 = vmatpush2.msra.mxu1 %v344_v52  ;;  %v264_v51 = vrot.slane %v252_v50, 7  ;;  %v277_v52 = vrot.slane %v252_v50, 1  ;;  %v1311_v50 = vld [vmem:[%s2547_s1 + $0x660] sm:$0xff]  ;;  %v1346_v48 = vld [vmem:[%s2547_s1 + $0x778] sm:$0xff] }
  0x57   : > { %731 = vmatpush1.msra.mxu0 %v376_v54  ;;  %687 = vmatprep.subr.mxu1 %v343_v55  ;;  %v2177_v54 = vrot.slane %v1750_v20, 1  ;;  %v321_v55 = vld [vmem:[%s2547_s1 + $0x108] sm:$0xff] }
  0x58   : > { %732 = vmatprep.subr.mxu0 %v375_v56  ;;  %688 = vmatpush2.msra.mxu1 %v342_v57  ;;  %v353_v56 = vld [vmem:[%s2547_s1 + $0x208] sm:$0xff]  ;;  %v320_v57 = vld [vmem:[%s2547_s1 + $0x100] sm:$0xff] }
  0x59   : > { %733 = vmatpush1.msra.mxu0 %v374_v60  ;;  %689 = vmatprep.subr.mxu1 %v341_v61  ;;  %v352_v60 = vld [vmem:[%s2547_s1 + $0x200] sm:$0xff]  ;;  %v268_v61 = vsel %vm266_vm4, %v1779_v29, %v264_v51 }
  0x5a   : > { %734 = vmatprep.subr.mxu0 %v373_v62  ;;  %690 = vmatpush2.msra.mxu1 %v340_v63  ;;  %v280_v62 = vsel %vm279_vm0, %v277_v52, %v2177_v54  ;;  %v1330_v63 = vld [vmem:[%s2547_s1 + $0x6f8] sm:$0xff] }
  0x5b   : > { %735 = vmatpush1.msra.mxu0 %v372_v2  ;;  %691 = vmatprep.subr.mxu1 %v339_v3  ;;  %v1329_v2 = vld [vmem:[%s2547_s1 + $0x6f0] sm:$0xff]  ;;  %v1328_v3 = vld [vmem:[%s2547_s1 + $0x6e8] sm:$0xff] }
  0x5c   : > { %736 = vmatprep.subr.mxu0 %v371_v6  ;;  %692 = vmatpush2.msra.mxu1 %v338_v7  ;;  %v1394_v6 = vld [vmem:[%s2547_s1 + $0x8f8] sm:$0xff]  ;;  %v1327_v7 = vld [vmem:[%s2547_s1 + $0x6e0] sm:$0xff] }
  0x5d   : > { %737 = vmatpush1.msra.mxu0 %v370_v8  ;;  %693 = vmatprep.subr.mxu1 %v337_v9  ;;  %v267_v8 = vsel %vm266_vm4, %v264_v51, %v1779_v29  ;;  %v1326_v9 = vld [vmem:[%s2547_s1 + $0x6d8] sm:$0xff]  ;;  %v1393_v29 = vld [vmem:[%s2547_s1 + $0x8f0] sm:$0xff]  ;;  %v1376_v51 = vld [vmem:[%s2547_s1 + $0x868] sm:$0xff] }
  0x5e   : > { %738 = vmatprep.subr.mxu0 %v369_v10  ;;  %694 = vmatpush2.msra.mxu1 %v336_v11  ;;  %v281_v10 = vsel %vm279_vm0, %v2177_v54, %v277_v52  ;;  %v1325_v11 = vld [vmem:[%s2547_s1 + $0x6d0] sm:$0xff]  ;;  %v1307_v52 = vld [vmem:[%s2547_s1 + $0x640] sm:$0xff] }
  0x5f   : > { %739 = vmatpush1.msra.mxu0 %v368_v12  ;;  %695 = vmatprep.subr.mxu1 %v335_v14  ;;  %v1324_v12 = vld [vmem:[%s2547_s1 + $0x6c8] sm:$0xff] }
  0x60   : > { %740 = vmatprep.subr.mxu0 %v367_v15  ;;  %696 = vmatpush2.msra.mxu1 %v334_v18  ;;  %v1392_v14 = vld [vmem:[%s2547_s1 + $0x8e8] sm:$0xff]  ;;  %v1323_v15 = vld [vmem:[%s2547_s1 + $0x6c0] sm:$0xff] }
  0x61   : > { %741 = vmatpush1.msra.mxu0 %v366_v19  ;;  %697 = vmatprep.subr.mxu1 %v333_v22  ;;  %v1391_v18 = vld [vmem:[%s2547_s1 + $0x8e0] sm:$0xff]  ;;  %v1322_v19 = vld [vmem:[%s2547_s1 + $0x6b8] sm:$0xff] }
  0x62   : > { %742 = vmatprep.subr.mxu0 %v365_v23  ;;  %698 = vmatpush2.msra.mxu1 %v332_v24  ;;  %v1390_v22 = vld [vmem:[%s2547_s1 + $0x8d8] sm:$0xff]  ;;  %v1321_v23 = vld [vmem:[%s2547_s1 + $0x6b0] sm:$0xff] }
  0x63   : > { %743 = vmatpush1.msra.mxu0 %v364_v25  ;;  %699 = vmatprep.subr.mxu1 %v331_v28  ;;  %v1389_v24 = vld [vmem:[%s2547_s1 + $0x8d0] sm:$0xff]  ;;  %v1320_v25 = vld [vmem:[%s2547_s1 + $0x6a8] sm:$0xff] }
  0x64   : > { %744 = vmatprep.subr.mxu0 %v363_v30  ;;  %700 = vmatpush2.msra.mxu1 %v330_v31  ;;  %v1388_v28 = vld [vmem:[%s2547_s1 + $0x8c8] sm:$0xff]  ;;  %v1319_v30 = vld [vmem:[%s2547_s1 + $0x6a0] sm:$0xff] }
  0x65   : > { %745 = vmatpush1.msra.mxu0 %v362_v32  ;;  %701 = vmatprep.subr.mxu1 %v329_v33  ;;  %v1387_v31 = vld [vmem:[%s2547_s1 + $0x8c0] sm:$0xff]  ;;  %v1318_v32 = vld [vmem:[%s2547_s1 + $0x698] sm:$0xff] }
  0x66   : > { %746 = vmatprep.subr.mxu0 %v361_v35  ;;  %702 = vmatpush2.msra.mxu1 %v328_v37  ;;  %v1386_v33 = vld [vmem:[%s2547_s1 + $0x8b8] sm:$0xff]  ;;  %v1317_v35 = vld [vmem:[%s2547_s1 + $0x690] sm:$0xff] }
  0x67   : > { %747 = vmatpush1.msra.mxu0 %v360_v38  ;;  %703 = vmatprep.subr.mxu1 %v327_v40  ;;  %v1385_v37 = vld [vmem:[%s2547_s1 + $0x8b0] sm:$0xff]  ;;  %v1316_v38 = vld [vmem:[%s2547_s1 + $0x688] sm:$0xff]  ;;  %v1315_v40 = vld [vmem:[%s2547_s1 + $0x680] sm:$0xff] }
  0x68   : > { %748 = vmatprep.subr.mxu0 %v359_v41  ;;  %704 = vmatpush2.msra.mxu1 %v326_v42  ;;  %v1383_v41 = vld [vmem:[%s2547_s1 + $0x8a0] sm:$0xff]  ;;  %v1314_v42 = vld [vmem:[%s2547_s1 + $0x678] sm:$0xff] }
  0x69   : > { %749 = vmatpush1.msra.mxu0 %v358_v43  ;;  %563 = vmatprep.mubr.f32.mxu0 %v1676_v59  ;;  %v355_v59 = vld [vmem:[%s2547_s1 + $0x218] sm:$0xff] }
  0x6a   : > { %640 = vmatprep.mubr.f32.mxu1 %v1453_v17  ;;  %705 = vmatprep.subr.mxu1 %v325_v44  ;;  %v1382_v43 = vld [vmem:[%s2547_s1 + $0x898] sm:$0xff]  ;;  %v1313_v44 = vld [vmem:[%s2547_s1 + $0x670] sm:$0xff] }
  0x6b   : > { %750 = vmatprep.subr.mxu0 %v357_v45  ;;  %1291 = vmatmul.mubr.msk.f32.gmra.mxu0 %vm2129_vm7, %v386_v47  ;;  %v1381_v45 = vld [vmem:[%s2547_s1 + $0x890] sm:$0xff]  ;;  %v1312_v47 = vld [vmem:[%s2547_s1 + $0x668] sm:$0xff] }
  0x6c   : > { %1293 = vmatmul.mubr.msk.f32.gmra.mxu1 %vm2139_vm8, %v393_v49  ;;  %751 = vmatpush1.msra.mxu0 %v356_v58  ;;  %v1380_v49 = vld [vmem:[%s2547_s1 + $0x888] sm:$0xff]  ;;  %v1310_v58 = vld [vmem:[%s2547_s1 + $0x658] sm:$0xff] }
  0x6d   : > { %706 = vmatpush2.msra.mxu1 %v324_v26  ;;  %752 = vmatprep.subr.mxu0 %v355_v59  ;;  %v1379_v26 = vld [vmem:[%s2547_s1 + $0x880] sm:$0xff]  ;;  %v1309_v59 = vld [vmem:[%s2547_s1 + $0x650] sm:$0xff] }
  0x6e   : > { %707 = vmatprep.subr.mxu1 %v323_v4  ;;  %753 = vmatpush1.msra.mxu0 %v354_v27  ;;  %v1378_v4 = vld [vmem:[%s2547_s1 + $0x878] sm:$0xff]  ;;  %v1308_v27 = vld [vmem:[%s2547_s1 + $0x648] sm:$0xff] }
  0x6f   : > { %708 = vmatpush2.msra.mxu1 %v322_v5  ;;  %754 = vmatprep.subr.mxu0 %v353_v56  ;;  %v1377_v5 = vld [vmem:[%s2547_s1 + $0x870] sm:$0xff]  ;;  %v1306_v56 = vld [vmem:[%s2547_s1 + $0x638] sm:$0xff] }
  0x70   : > { %709 = vmatprep.subr.mxu1 %v321_v55  ;;  %1294 = vmatprep.mubr.msk.f32.mxu1 %vm241_vm6, %v1739_v16  ;;  %v1375_v55 = vld [vmem:[%s2547_s1 + $0x860] sm:$0xff] }
  0x71   : > { %710 = vmatpush2.msra.mxu1 %v320_v57  ;;  %755 = vmatpush1.msra.mxu0 %v352_v60  ;;  %v1374_v57 = vld [vmem:[%s2547_s1 + $0x858] sm:$0xff]  ;;  %v1305_v60 = vld [vmem:[%s2547_s1 + $0x630] sm:$0xff] }
  0x72   : > { %788 = vmatprep.mubr.f32.mxu0 %v1453_v17  ;;  %1295 = vmatmul.mubr.msk.f32.vlgmr.msra.gmra.mxu1 %vm1952_vm5, %v268_v61  ;;  %v1373_v61 = vld [vmem:[%s2547_s1 + $0x850] sm:$0xff] }
  0x73   : > { %1297 = vmatmul.mubr.msk.f32.vlgmr.msra.gmra.mxu0 %vm1724_vm3, %v280_v62  ;;  %910 = vmatprep.subr.mxu0 %v1330_v63  ;;  %v1304_v62 = vld [vmem:[%s2547_s1 + $0x628] sm:$0xff] }
  0x74   : > { %717 = vmatprep.mubr.f32.mxu1 %v1750_v20  ;;  %911 = vmatpush1.msra.mxu0 %v1329_v2  ;;  %v1372_v63 = vld [vmem:[%s2547_s1 + $0x848] sm:$0xff]  ;;  %v1303_v2 = vld [vmem:[%s2547_s1 + $0x620] sm:$0xff] }
  0x75   : > { %794 = vmatprep.mubr.f32.mxu0 %v1453_v17  ;;  %912 = vmatprep.subr.mxu0 %v1328_v3  ;;  %v1371_v3 = vld [vmem:[%s2547_s1 + $0x840] sm:$0xff] }
  0x76   : > { %987 = vmatprep.subr.mxu1 %v1394_v6  ;;  %913 = vmatpush1.msra.mxu0 %v1327_v7  ;;  %v1302_v6 = vld [vmem:[%s2547_s1 + $0x618] sm:$0xff] }
  0x77   : > { %1296 = vmatmul.mubr.msk.f32.gmra.mxu1 %vm2129_vm7, %v267_v8  ;;  %914 = vmatprep.subr.mxu0 %v1326_v9  ;;  %v1370_v7 = vld [vmem:[%s2547_s1 + $0x838] sm:$0xff]  ;;  %v1301_v8 = vld [vmem:[%s2547_s1 + $0x610] sm:$0xff] }
  0x78   : > { %1298 = vmatmul.mubr.msk.f32.gmra.mxu0 %vm2139_vm8, %v281_v10  ;;  %988 = vmatpush1.msra.mxu1 %v1393_v29  ;;  %v1369_v9 = vld [vmem:[%s2547_s1 + $0x830] sm:$0xff]  ;;  %v1300_v10 = vld [vmem:[%s2547_s1 + $0x608] sm:$0xff]  ;;  %v1299_v29 = vld [vmem:[%s2547_s1 + $0x600] sm:$0xff] }
  0x79   : > { %915 = vmatpush1.msra.mxu0 %v1325_v11  ;;  %989 = vmatprep.subr.mxu1 %v1392_v14  ;;  %v1368_v11 = vld [vmem:[%s2547_s1 + $0x828] sm:$0xff]  ;;  %v1362_v14 = vld [vmem:[%s2547_s1 + $0x7f8] sm:$0xff] }
  0x7a   : > { %916 = vmatprep.subr.mxu0 %v1324_v12  ;;  %990 = vmatpush1.msra.mxu1 %v1391_v18  ;;  %v1367_v12 = vld [vmem:[%s2547_s1 + $0x820] sm:$0xff]  ;;  %v808_v18 = vrot.slane %v1755_v21, 1  ;;  %v1364_v21 = vld [vmem:[%s2547_s1 + $0x808] sm:$0xff] }
  0x7b   : > { %917 = vmatpush1.msra.mxu0 %v1323_v15  ;;  %991 = vmatprep.subr.mxu1 %v1390_v22  ;;  %v1366_v15 = vld [vmem:[%s2547_s1 + $0x818] sm:$0xff]  ;;  %v1365_v22 = vld [vmem:[%s2547_s1 + $0x810] sm:$0xff] }
  0x7c   : > { %918 = vmatprep.subr.mxu0 %v1322_v19  ;;  %992 = vmatpush1.msra.mxu1 %v1389_v24  ;;  %v1361_v19 = vld [vmem:[%s2547_s1 + $0x7f0] sm:$0xff]  ;;  %v1359_v24 = vld [vmem:[%s2547_s1 + $0x7e0] sm:$0xff] }
  0x7d   : > { %919 = vmatpush1.msra.mxu0 %v1321_v23  ;;  %993 = vmatprep.subr.mxu1 %v1388_v28  ;;  %v1360_v23 = vld [vmem:[%s2547_s1 + $0x7e8] sm:$0xff]  ;;  %v1358_v28 = vld [vmem:[%s2547_s1 + $0x7d8] sm:$0xff] }
  0x7e   : > { %920 = vmatprep.subr.mxu0 %v1320_v25  ;;  %994 = vmatpush1.msra.mxu1 %v1387_v31  ;;  %v1363_v25 = vld [vmem:[%s2547_s1 + $0x800] sm:$0xff]  ;;  %v809_v31 = vsel %vm279_vm0, %v2177_v54, %v808_v18 }
  0x7f   : > { %921 = vmatpush1.msra.mxu0 %v1319_v30  ;;  %995 = vmatprep.subr.mxu1 %v1386_v33  ;;  %v1357_v30 = vld [vmem:[%s2547_s1 + $0x7d0] sm:$0xff]  ;;  %v1355_v33 = vld [vmem:[%s2547_s1 + $0x7c0] sm:$0xff] }
  0x80   : > { %922 = vmatprep.subr.mxu0 %v1318_v32  ;;  %996 = vmatpush1.msra.mxu1 %v1385_v37  ;;  %v1356_v32 = vld [vmem:[%s2547_s1 + $0x7c8] sm:$0xff]  ;;  %v1353_v37 = vld [vmem:[%s2547_s1 + $0x7b0] sm:$0xff] }
  0x81   : > { %923 = vmatpush1.msra.mxu0 %v1317_v35  ;;  %997 = vmatprep.subr.mxu1 %v1384_v0  ;;  %v1354_v35 = vld [vmem:[%s2547_s1 + $0x7b8] sm:$0xff]  ;;  %v1352_v0 = vld [vmem:[%s2547_s1 + $0x7a8] sm:$0xff] }
  0x82   : > { %924 = vmatprep.subr.mxu0 %v1316_v38  ;;  %998 = vmatpush1.msra.mxu1 %v1383_v41  ;;  %v810_v38 = vsel %vm279_vm0, %v808_v18, %v2177_v54  ;;  %v1349_v54 = vld [vmem:[%s2547_s1 + $0x790] sm:$0xff] }
  0x83   : > { %925 = vmatpush1.msra.mxu0 %v1315_v40  ;;  %999 = vmatprep.subr.mxu1 %v1382_v43  ;;  %v1347_v40 = vld [vmem:[%s2547_s1 + $0x780] sm:$0xff]  ;;  %v1345_v41 = vld [vmem:[%s2547_s1 + $0x770] sm:$0xff] }
  0x84   : > { %926 = vmatprep.subr.mxu0 %v1314_v42  ;;  %1000 = vmatpush1.msra.mxu1 %v1381_v45  ;;  %v1344_v42 = vld [vmem:[%s2547_s1 + $0x768] sm:$0xff]  ;;  %v1343_v43 = vld [vmem:[%s2547_s1 + $0x760] sm:$0xff]  ;;  %v1341_v45 = vld [vmem:[%s2547_s1 + $0x750] sm:$0xff] }
  0x85   : > { %927 = vmatpush1.msra.mxu0 %v1313_v44  ;;  %1001 = vmatprep.subr.mxu1 %v1380_v49  ;;  %v1342_v44 = vld [vmem:[%s2547_s1 + $0x758] sm:$0xff]  ;;  %v1339_v49 = vld [vmem:[%s2547_s1 + $0x740] sm:$0xff] }
  0x86   : > { %928 = vmatprep.subr.mxu0 %v1312_v47  ;;  %1002 = vmatpush1.msra.mxu1 %v1379_v26  ;;  %v1340_v47 = vld [vmem:[%s2547_s1 + $0x748] sm:$0xff]  ;;  %v1337_v26 = vld [vmem:[%s2547_s1 + $0x730] sm:$0xff] }
  0x87   : > { %929 = vmatpush1.msra.mxu0 %v1311_v50  ;;  %1003 = vmatprep.subr.mxu1 %v1378_v4  ;;  %v1338_v50 = vld [vmem:[%s2547_s1 + $0x738] sm:$0xff]  ;;  %v1335_v4 = vld [vmem:[%s2547_s1 + $0x720] sm:$0xff] }
  0x88   : > { %930 = vmatprep.subr.mxu0 %v1310_v58  ;;  %1004 = vmatpush1.msra.mxu1 %v1377_v5  ;;  %v1336_v58 = vld [vmem:[%s2547_s1 + $0x728] sm:$0xff]  ;;  %v1333_v5 = vld [vmem:[%s2547_s1 + $0x710] sm:$0xff] }
  0x89   : > { %931 = vmatpush1.msra.mxu0 %v1309_v59  ;;  %1005 = vmatprep.subr.mxu1 %v1376_v51  ;;  %v1334_v59 = vld [vmem:[%s2547_s1 + $0x718] sm:$0xff]  ;;  %v1331_v51 = vld [vmem:[%s2547_s1 + $0x700] sm:$0xff] }
  0x8a   : > { %932 = vmatprep.subr.mxu0 %v1308_v27  ;;  %1006 = vmatpush1.msra.mxu1 %v1375_v55  ;;  %v1332_v27 = vld [vmem:[%s2547_s1 + $0x708] sm:$0xff] }
  0x8b   : > { %933 = vmatpush1.msra.mxu0 %v1307_v52  ;;  %1007 = vmatprep.subr.mxu1 %v1374_v57 }
  0x8c   : > { %934 = vmatprep.subr.mxu0 %v1306_v56  ;;  %1008 = vmatpush1.msra.mxu1 %v1373_v61 }
  0x8d   : > { %935 = vmatpush1.msra.mxu0 %v1305_v60  ;;  %1009 = vmatprep.subr.mxu1 %v1372_v63 }
  0x8e   : > { %936 = vmatprep.subr.mxu0 %v1304_v62  ;;  %1010 = vmatpush1.msra.mxu1 %v1371_v3 }
  0x8f   : > { %937 = vmatpush1.msra.mxu0 %v1303_v2  ;;  %1011 = vmatprep.subr.mxu1 %v1370_v7 }
  0x90   : > { %938 = vmatprep.subr.mxu0 %v1302_v6  ;;  %1012 = vmatpush1.msra.mxu1 %v1369_v9 }
  0x91   : > { %939 = vmatpush1.msra.mxu0 %v1301_v8  ;;  %1013 = vmatprep.subr.mxu1 %v1368_v11  ;;  %v1068_v11 = vld [vmem:[%s2548_s2] sm:$0x3] }
  0x92   : > { %940 = vmatprep.subr.mxu0 %v1300_v10  ;;  %1014 = vmatpush1.msra.mxu1 %v1367_v12 }
  0x93   : > { %941 = vmatpush1.msra.mxu0 %v1299_v29  ;;  %1015 = vmatprep.subr.mxu1 %v1366_v15  ;;  %v1076_v15 = vsub.s32 1, %v1660_v53 }
  0x94   : > { %942 = vmatprep.subr.mxu0 %v1362_v14  ;;  %1016 = vmatpush1.msra.mxu1 %v1365_v22 }
  0x95   : > { %943 = vmatpush2.msra.mxu0 %v1361_v19  ;;  %1017 = vmatprep.subr.mxu1 %v1364_v21 }
  0x96   : > { %944 = vmatprep.subr.mxu0 %v1360_v23  ;;  %1018 = vmatpush1.msra.mxu1 %v1363_v25 }
  0x97   : > { %945 = vmatpush2.msra.mxu0 %v1359_v24  ;;  %1051 = vmatprep.mubr.f32.mxu1 %v1453_v17 }
  0x98   : > { %946 = vmatprep.subr.mxu0 %v1358_v28  ;;  %1398 = vmatmul.mubr.msk.f32.vlgmr.msra.gmra.mxu1 %vm1724_vm3, %v809_v31 }
  0x99   : > { %947 = vmatpush2.msra.mxu0 %v1357_v30  ;;  %974 = vmatprep.mubr.f32.mxu0 %v1750_v20  ;;  %v1350_v20 = vld [vmem:[%s2547_s1 + $0x798] sm:$0xff] }
  0x9a   : > { %948 = vmatprep.subr.mxu0 %v1356_v32  ;;  %1057 = vmatprep.mubr.f32.mxu1 %v1453_v17  ;;  %v1348_v17 = vld [vmem:[%s2547_s1 + $0x788] sm:$0xff] }
  0x9b   : > { %949 = vmatpush2.msra.mxu0 %v1355_v33 }
  0x9c   : > { %950 = vmatprep.subr.mxu0 %v1354_v35  ;;  %1399 = vmatmul.mubr.msk.f32.gmra.mxu1 %vm2139_vm8, %v810_v38  ;;  %v1077_v35 = vrot.slane %v1068_v11, %v1076_v15 }
  0x9d   : > { %951 = vmatpush2.msra.mxu0 %v1353_v37 }
  0x9e   : > { %952 = vmatprep.subr.mxu0 %v1352_v0 }
  0x9f   : > { %953 = vmatpush2.msra.mxu0 %v1351_v13 }
  0xa0   : > { %954 = vmatprep.subr.mxu0 %v1350_v20 }
  0xa1   : > { %955 = vmatpush2.msra.mxu0 %v1349_v54 }
  0xa2   : > { %956 = vmatprep.subr.mxu0 %v1348_v17 }
  0xa3   : > { %957 = vmatpush2.msra.mxu0 %v1347_v40 }
  0xa4   : > { %958 = vmatprep.subr.mxu0 %v1346_v48 }
  0xa5   : > { %959 = vmatpush2.msra.mxu0 %v1345_v41 }
  0xa6   : > { %960 = vmatprep.subr.mxu0 %v1344_v42 }
  0xa7   : > { %961 = vmatpush2.msra.mxu0 %v1343_v43 }
  0xa8   : > { %962 = vmatprep.subr.mxu0 %v1342_v44 }
  0xa9   : > { %963 = vmatpush2.msra.mxu0 %v1341_v45 }
  0xaa   : > { %964 = vmatprep.subr.mxu0 %v1340_v47 }
  0xab   : > { %965 = vmatpush2.msra.mxu0 %v1339_v49 }
  0xac   : > { %966 = vmatprep.subr.mxu0 %v1338_v50 }
  0xad   : > { %967 = vmatpush2.msra.mxu0 %v1337_v26 }
  0xae   : > { %968 = vmatprep.subr.mxu0 %v1336_v58 }
  0xaf   : > { %969 = vmatpush2.msra.mxu0 %v1335_v4 }
  0xb0   : > { %970 = vmatprep.subr.mxu0 %v1334_v59 }
  0xb1   : > { %971 = vmatpush2.msra.mxu0 %v1333_v5 }
  0xb2   : > { %972 = vmatprep.subr.mxu0 %v1332_v27 }
  0xb3   : > { %973 = vmatpush2.msra.mxu0 %v1331_v51 }
  0xb4   : > { %1395 = vmatmul.mubr.msk.f32.vlgmr.msra.gmra.mxu0 %vm1952_vm5, %v1797_v34 }
  0xb5   : > { %1396 = vmatprep.mubr.msk.f32.mxu0 %vm255_vm2, %v1739_v16 }
  0xb8   : > { %1397 = vmatmul.mubr.msk.f32.gmra.mxu0 %vm2129_vm7, %v1814_v39  ;;  %v1072_v39 = vsub.s32 0, %v1660_v53 }
  0xba   : > { %v1073_v24 = vrot.slane %v1068_v11, %v1072_v39 }
  0xef   : > { %v636_v52 = vpop.f32.mrf.mxu1 }
  0xf1   : > { %v638_v55 = vpop.f32.mrf.mxu1 }
 0x10f   : > { %v559_v57 = vpop.f32.mrf.mxu0 }
 0x110   : > { %v637_v8 = vadd.f32 %v636_v52, %v559_v57 }
 0x111   : > { %v561_v61 = vpop.f32.mrf.mxu0 }
 0x112   : > { %v639_v9 = vadd.f32 %v638_v55, %v561_v61 }
 0x12b   : > { %v565_v62 = vpop.f32.mrf.mxu0 }
 0x12c   : > { %v642_v56 = vpop.f32.mrf.mxu1 }
 0x12d   : > { %v567_v2 = vpop.f32.mrf.mxu0  ;;  %v643_v12 = vadd.f32 %v642_v56, %v565_v62 }
 0x12e   : > { %v644_v60 = vpop.f32.mrf.mxu1 }
 0x12f   : > { %v645_v18 = vadd.f32 %v644_v60, %v567_v2 }
 0x132   : > { %v713_v63 = vpop.f32.mrf.mxu1 }
 0x133   : > { %v790_v36 = vpop.f32.mrf.mxu0  ;;  %v714_v46 = vadd.f32 %v713_v63, %v637_v8 }
 0x134   : > { %v715_v3 = vpop.f32.mrf.mxu1 }
 0x135   : > { %v792_v6 = vpop.f32.mrf.mxu0  ;;  %v716_v14 = vadd.f32 %v715_v3, %v639_v9  ;;  %v791_v22 = vadd.f32 %v790_v36, %v714_v46 }
 0x137   : > { %v719_v34 = vpop.f32.mrf.mxu1  ;;  %v793_v31 = vadd.f32 %v792_v6, %v716_v14 }
 0x138   : > { %v796_v1 = vpop.f32.mrf.mxu0  ;;  %v720_v23 = vadd.f32 %v719_v34, %v643_v12 }
 0x139   : > { %v721_v7 = vpop.f32.mrf.mxu1 }
 0x13a   : > { %v798_v10 = vpop.f32.mrf.mxu0  ;;  %v722_v25 = vadd.f32 %v721_v7, %v645_v18  ;;  %v797_v38 = vadd.f32 %v796_v1, %v720_v23 }
 0x13c   : > { %v799_v53 = vadd.f32 %v798_v10, %v722_v25 }
 0x158   : > { %v1053_v16 = vpop.f32.mrf.mxu1 }
 0x15a   : > { %v1055_v29 = vpop.f32.mrf.mxu1 }
 0x15c   : > { %v1059_v30 = vpop.f32.mrf.mxu1 }
 0x15e   : > { %v1061_v54 = vpop.f32.mrf.mxu1 }
 0x174   : > { %v976_v19 = vpop.f32.mrf.mxu0 }
 0x175   : > { %v1054_v21 = vadd.f32 %v1053_v16, %v976_v19 }
 0x176   : > { %v978_v28 = vpop.f32.mrf.mxu0 }
 0x177   : > { %v1064_v32 = vadd.f32 %v1054_v21, %v791_v22  ;;  %v1056_v33 = vadd.f32 %v1055_v29, %v978_v28 }
 0x178   : > { %v982_v37 = vpop.f32.mrf.mxu0 }
 0x179   : > { %v1080_v0 = vadd.f32 %v1073_v24, %v1064_v32  ;;  %v1065_v13 = vadd.f32 %v1056_v33, %v793_v31  ;;  %v1060_v20 = vadd.f32 %v1059_v30, %v982_v37 }
 0x17a   : > { %v984_v17 = vpop.f32.mrf.mxu0 }
 0x17b   : > { %v1084_v40 = vmax.f32 %v1080_v0, 0.0  ;;  %v1081_v48 = vadd.f32 %v1077_v35, %v1065_v13  ;;  %v1066_v41 = vadd.f32 %v1060_v20, %v797_v38  ;;  %v1062_v42 = vadd.f32 %v1061_v54, %v984_v17 }
 0x17d   : > { %1088 = vst [vmem:[%s210_s26] sm:$0xff] %v1084_v40  ;;  %v1085_v43 = vmax.f32 %v1081_v48, 0.0  ;;  %v1082_v44 = vadd.f32 %v1073_v24, %v1066_v41  ;;  %v1067_v45 = vadd.f32 %v1062_v42, %v799_v53 }
 0x17f   : > { %1089 = vst [vmem:[%s210_s26 + $0x8] sm:$0xff] %v1085_v43  ;;  %v1086_v47 = vmax.f32 %v1082_v44, 0.0  ;;  %v1083_v49 = vadd.f32 %v1077_v35, %v1067_v45 }
 0x181   : > { %1090 = vst [vmem:[%s210_s26 + $0x10] sm:$0xff] %v1086_v47  ;;  %v1087_v50 = vmax.f32 %v1083_v49, 0.0 }
 0x183   : > { %1091 = vst [vmem:[%s210_s26 + $0x18] sm:$0xff] %v1087_v50 }
 0x184 PF: > { %s13_s14 = sadd.s32 1, %s1451_s14   ;;  %s2558_s12 = smov %s1447_s13 }
 0x185   : > { %p10_p5 = scmp.ge.s32.totalorder %s13_s14, 4   ;;  %s2559_s13 = smov %s2561_s15 }
 0x187   :  { %12 = sbr.rel (!%p10_p5) target bundleno = 2 (0x2), region = 64 }

</bundles_post_ra>
